<compile_context>
chip_gen: v7x
topology: tpu7x:2x2x1
jax: 0.10.0
libtpu: 0.0.40
codegen_flags: <defaults>
</compile_context>

<pallas_src>
import functools

import jax
import jax.numpy as jnp
from jax.experimental import pallas as pl
from jax.experimental.pallas import tpu as pltpu

# ----------------------------- config (small) -----------------------------
N_CLS = 3           # number of classes (text prompts)
N_CTX = 2           # learnable context tokens
CTX_DIM = 32        # text transformer width
CONTEXT_LEN = 8     # tokenized prompt length
TEXT_HEADS = 4
TEXT_DEPTH = 2

IMG_SIZE = 16
PATCH = 8
IN_CH = 3
VIS_WIDTH = 32      # vision transformer width
VIS_HEADS = 4
VIS_DEPTH = 2

EMBED_DIM = 32      # shared CLIP embedding dim

_BLOCK_PARAM_ORDER = ("ln1_g", "ln1_b", "w_qkv", "b_qkv", "w_out", "b_out",
                      "ln2_g", "ln2_b", "w_fc", "b_fc", "w_proj", "b_proj")


# ============================ in-kernel helpers ============================

def _ln(x, g, b):
    """LayerNorm over last axis. x: (M, D) f32; g, b: (1, D) f32."""
    mu = jnp.mean(x, axis=-1, keepdims=True)
    xc = x - mu
    var = jnp.mean(xc * xc, axis=-1, keepdims=True)
    return xc * jax.lax.rsqrt(var + 1e-5) * g + b


def _resblock(x, qkv_buf, ln1g, ln1b, wqkv, bqkv, wout, bout,
              ln2g, ln2b, wfc, bfc, wproj, bproj,
              *, batch, seq, heads, scale, mask):
    """One CLIP ResidualAttentionBlock, operating on a 2-D (batch*seq, D) carry.

    qkv_buf: VMEM scratch (3, heads*batch, seq, Dh) used to move the per-head
    lane slices of the fused QKV into a leading batch axis (one batched
    score/softmax/context instead of a per-head loop).
    """
    BS, D = x.shape
    Dh = D // heads

    # ------------------------------ attention ------------------------------
    h = _ln(x, ln1g, ln1b)
    qkv = jnp.dot(h.astype(jnp.bfloat16), wqkv,
                  preferred_element_type=jnp.float32) + bqkv          # (BS, 3D)
    qkv3 = qkv.reshape(batch, seq, 3 * D)
    for hh in range(heads):  # static lane slices -> heads become a batch axis
        qkv_buf[0, hh * batch:(hh + 1) * batch] = qkv3[:, :, hh * Dh:(hh + 1) * Dh]
        qkv_buf[1, hh * batch:(hh + 1) * batch] = \
            qkv3[:, :, D + hh * Dh:D + (hh + 1) * Dh]
        qkv_buf[2, hh * batch:(hh + 1) * batch] = \
            qkv3[:, :, 2 * D + hh * Dh:2 * D + (hh + 1) * Dh]
    q = qkv_buf[0].astype(jnp.bfloat16)          # (heads*batch, seq, Dh)
    k = qkv_buf[1].astype(jnp.bfloat16)
    v = qkv_buf[2].astype(jnp.bfloat16)

    s = jnp.einsum('gqd,gkd->gqk', q, k,
                   preferred_element_type=jnp.float32) * scale        # (G, S, S)
    if mask is not None:
        s = s + mask                                                   # (S, S) bcast
    s = s - jnp.max(s, axis=-1, keepdims=True)
    p = jnp.exp(s)
    p = p * pl.reciprocal(jnp.sum(p, axis=-1, keepdims=True), approx=True)
    ctx = jnp.einsum('gqk,gkd->gqd', p.astype(jnp.bfloat16), v,
                     preferred_element_type=jnp.float32)               # (G, S, Dh)
    ctx = ctx.reshape(heads, BS, Dh)

    # merge heads by summing per-head slices of the output projection
    # (mathematically identical to concat-then-project; single bias add).
    attn = bout
    for hh in range(heads):
        attn = attn + jnp.dot(ctx[hh].astype(jnp.bfloat16),
                              wout[hh * Dh:(hh + 1) * Dh, :],
                              preferred_element_type=jnp.float32)
    x = x + attn

    # -------------------------------- MLP ----------------------------------
    h2 = _ln(x, ln2g, ln2b)
    m = jnp.dot(h2.astype(jnp.bfloat16), wfc,
                preferred_element_type=jnp.float32) + bfc
    m = m * jax.nn.sigmoid(1.702 * m)                                  # QuickGELU
    x = x + jnp.dot(m.astype(jnp.bfloat16), wproj,
                    preferred_element_type=jnp.float32) + bproj
    return x


# ======================= fused text encoder kernel =========================

def _text_encoder_kernel(x_ref, eot_ref,
                         ln1g, ln1b, wqkv, bqkv, wout, bout,
                         ln2g, ln2b, wfc, bfc, wproj, bproj,
                         lnfg, lnfb, tproj,
                         o_ref, qkv_buf, *, n_cls, seq, heads):
    D = x_ref.shape[1]
    L = wqkv.shape[0]
    Dh = D // heads
    scale = float(Dh) ** -0.5

    # causal mask built ONCE (layers are statically unrolled below)
    r = jax.lax.broadcasted_iota(jnp.int32, (seq, seq), 0)
    c = jax.lax.broadcasted_iota(jnp.int32, (seq, seq), 1)
    mask = jnp.where(c > r, -1e9, 0.0).astype(jnp.float32)

    x = x_ref[...]                                    # (n_cls*seq, D) f32 carry
    for layer in range(L):                            # static unroll, weights resident
        x = _resblock(x, qkv_buf,
                      ln1g[layer], ln1b[layer], wqkv[layer], bqkv[layer],
                      wout[layer], bout[layer],
                      ln2g[layer], ln2b[layer], wfc[layer], bfc[layer],
                      wproj[layer], bproj[layer],
                      batch=n_cls, seq=seq, heads=heads, scale=scale, mask=mask)

    # EOT gather (block-diagonal one-hot @ x, exact), ln_final, projection, L2 norm.
    xe = jnp.dot(eot_ref[...], x, preferred_element_type=jnp.float32)  # (n_cls, D)
    hf = _ln(xe, lnfg[...], lnfb[...])
    tf = jnp.dot(hf.astype(jnp.bfloat16), tproj[...],
                 preferred_element_type=jnp.float32)                   # (n_cls, E)
    tf = tf * jax.lax.rsqrt(jnp.sum(tf * tf, axis=-1, keepdims=True) + 1e-12)
    o_ref[...] = tf.astype(o_ref.dtype)


def text_encoder_forward(params, prompts):
    """prompts: (n_cls, S, D) -> L2-normalized text features (n_cls, E)."""
    tp = params["text"]
    n_cls, S, D = prompts.shape
    heads = TEXT_HEADS
    E = tp["text_projection"].shape[1]

    x0 = (prompts + tp["pos_emb"][None]).reshape(n_cls * S, D).astype(jnp.float32)
    eot = jnp.argmax(params["tokenized_prompts"], axis=-1)             # EOT position
    eot_mat = jax.nn.one_hot(jnp.arange(n_cls) * S + eot, n_cls * S,
                             dtype=jnp.float32)                        # (n_cls, n_cls*S)

    blocks = tp["blocks"]
    inputs = ([x0, eot_mat]
              + [blocks[name] for name in _BLOCK_PARAM_ORDER]
              + [tp["lnf_g"].reshape(1, D), tp["lnf_b"].reshape(1, D),
                 tp["text_projection"]])

    kern = functools.partial(_text_encoder_kernel, n_cls=n_cls, seq=S, heads=heads)
    return pl.pallas_call(
        kern,
        out_shape=jax.ShapeDtypeStruct((n_cls, E), jnp.float32),
        scratch_shapes=[pltpu.VMEM((3, heads * n_cls, S, D // heads), jnp.float32)],
    )(*inputs)


# ================ fused vision encoder + logits kernel =====================

def _vision_logits_kernel(patch_ref, convw, pos_ref, lnpreg, lnpreb,
                          ln1g, ln1b, wqkv, bqkv, wout, bout,
                          ln2g, ln2b, wfc, bfc, wproj, bproj,
                          lnpostg, lnpostb, proj, cls_ref, txt_ref, scale_ref,
                          o_ref, qkv_buf, *, n_imgs, n_tok, heads):
    W = convw.shape[1]
    L = wqkv.shape[0]
    Dh = W // heads
    scale = float(Dh) ** -0.5

    # Patch-embed stem: conv1 as an im2col matmul. The CLS row is a zero patch,
    # so class_embedding arrives via the pre-folded positional table (pos_ref).
    tok = jnp.dot(patch_ref[...].astype(jnp.bfloat16), convw[...],
                  preferred_element_type=jnp.float32)                  # (N*n_tok, W)
    x = _ln(tok + pos_ref[...], lnpreg[...], lnpreb[...])              # ln_pre

    for layer in range(L):                              # static unroll
        x = _resblock(x, qkv_buf,
                      ln1g[layer], ln1b[layer], wqkv[layer], bqkv[layer],
                      wout[layer], bout[layer],
                      ln2g[layer], ln2b[layer], wfc[layer], bfc[layer],
                      wproj[layer], bproj[layer],
                      batch=n_imgs, seq=n_tok, heads=heads, scale=scale, mask=None)

    # CLS select (exact 0/1 matmul), ln_post, projection, L2 norm, logits.
    x_cls = jnp.dot(cls_ref[...], x, preferred_element_type=jnp.float32)   # (N, W)
    img = jnp.dot(_ln(x_cls, lnpostg[...], lnpostb[...]).astype(jnp.bfloat16),
                  proj[...], preferred_element_type=jnp.float32)           # (N, E)
    img = img * jax.lax.rsqrt(jnp.sum(img * img, axis=-1, keepdims=True) + 1e-12)

    logits = jnp.dot(img, txt_ref[...].T, preferred_element_type=jnp.float32)
    o_ref[...] = (scale_ref[0, 0] * logits).astype(o_ref.dtype)


def vision_logits_forward(params, image, text_features):
    """image: (N, C, H, W), text_features: (n_cls, E) -> logits (N, n_cls)."""
    vp = params["vision"]
    N = image.shape[0]
    gh = gw = IMG_SIZE // PATCH
    n_tok = gh * gw + 1
    W = VIS_WIDTH
    n_cls = text_features.shape[0]

    # im2col of non-overlapping patches; prepend one zero row per image for CLS.
    patches = image.reshape(N, IN_CH, gh, PATCH, gw, PATCH)
    patches = patches.transpose(0, 2, 4, 1, 3, 5).reshape(
        N, gh * gw, IN_CH * PATCH * PATCH)
    patches = jnp.pad(patches, ((0, 0), (1, 0), (0, 0)))
    patches = patches.reshape(N * n_tok, IN_CH * PATCH * PATCH).astype(jnp.float32)

    # positional table with class_embedding folded into row 0, tiled per image.
    pos_cls = vp["pos_emb"].at[0].add(vp["class_emb"])
    pos_full = jnp.tile(pos_cls, (N, 1)).astype(jnp.float32)           # (N*n_tok, W)

    cls_mat = jax.nn.one_hot(jnp.arange(N) * n_tok, N * n_tok,
                             dtype=jnp.float32)                        # (N, N*n_tok)
    scale = jnp.exp(params["logit_scale"]).reshape(1, 1).astype(jnp.float32)

    blocks = vp["blocks"]
    inputs = ([patches, vp["conv_w"], pos_full,
               vp["ln_pre_g"].reshape(1, W), vp["ln_pre_b"].reshape(1, W)]
              + [blocks[name] for name in _BLOCK_PARAM_ORDER]
              + [vp["ln_post_g"].reshape(1, W), vp["ln_post_b"].reshape(1, W),
                 vp["proj"], cls_mat, text_features, scale])

    kern = functools.partial(_vision_logits_kernel,
                             n_imgs=N, n_tok=n_tok, heads=VIS_HEADS)
    return pl.pallas_call(
        kern,
        out_shape=jax.ShapeDtypeStruct((N, n_cls), jnp.float32),
        scratch_shapes=[pltpu.VMEM((3, VIS_HEADS * N, n_tok, W // VIS_HEADS),
                                   jnp.float32)],
    )(*inputs)


# ========================= model glue (plain JAX) =========================

def prompt_learner_forward(params):
    p = params["prompt"]
    ctx = jnp.broadcast_to(p["ctx"][None], (N_CLS, N_CTX, CTX_DIM))
    # construct_prompts: cat([prefix, ctx, suffix], dim=1)
    return jnp.concatenate([p["token_prefix"], ctx, p["token_suffix"]], axis=1)


@jax.jit
def custom_clip_forward(params, image):
    """CustomCLIP.forward eval path -> logits (N_images, N_CLS). Two kernels."""
    prompts = prompt_learner_forward(params)
    text_features = text_encoder_forward(params, prompts)
    return vision_logits_forward(params, image, text_features)


# ========================= deterministic parameters =======================

def _norm(key, shape, std=0.02):
    return (std * jax.random.normal(key, shape)).astype(jnp.float32)


def init_block(key, d):
    ks = jax.random.split(key, 4)
    return dict(
        ln1_g=jnp.ones((d,), jnp.float32), ln1_b=jnp.zeros((d,), jnp.float32),
        w_qkv=_norm(ks[0], (d, 3 * d)), b_qkv=jnp.zeros((3 * d,), jnp.float32),
        w_out=_norm(ks[1], (d, d)), b_out=jnp.zeros((d,), jnp.float32),
        ln2_g=jnp.ones((d,), jnp.float32), ln2_b=jnp.zeros((d,), jnp.float32),
        w_fc=_norm(ks[2], (d, 4 * d)), b_fc=jnp.zeros((4 * d,), jnp.float32),
        w_proj=_norm(ks[3], (4 * d, d)), b_proj=jnp.zeros((d,), jnp.float32),
    )


_BF16_WEIGHTS = ("w_qkv", "w_out", "w_fc", "w_proj")


def stack_blocks(blocks):
    """Stack per-layer params into (L, rows, cols); matmul weights stored bf16."""
    out = {}
    for name in _BLOCK_PARAM_ORDER:
        arrs = []
        for blk in blocks:
            a = blk[name]
            if a.ndim == 1:
                a = a.reshape(1, -1)
            arrs.append(a)
        stacked = jnp.stack(arrs, axis=0)
        if name in _BF16_WEIGHTS:
            stacked = stacked.astype(jnp.bfloat16)
        out[name] = stacked
    return out


def init_params(key):
    keys = jax.random.split(key, 16)
    n_suffix = CONTEXT_LEN - 1 - N_CTX

    prompt = dict(
        ctx=_norm(keys[0], (N_CTX, CTX_DIM)),
        token_prefix=_norm(keys[1], (N_CLS, 1, CTX_DIM)),
        token_suffix=_norm(keys[2], (N_CLS, n_suffix, CTX_DIM)),
    )

    # synthetic tokenized prompts: SOT=49406, EOT=49407 (argmax -> EOT position)
    tokenized = jnp.zeros((N_CLS, CONTEXT_LEN), jnp.int32)
    tokenized = tokenized.at[:, 0].set(49406)
    eot_pos = jnp.array([4, 5, 5], jnp.int32)
    tokenized = tokenized.at[jnp.arange(N_CLS), eot_pos].set(49407)

    text = dict(
        pos_emb=_norm(keys[3], (CONTEXT_LEN, CTX_DIM)),
        blocks=stack_blocks([init_block(keys[4 + i], CTX_DIM)
                             for i in range(TEXT_DEPTH)]),
        lnf_g=jnp.ones((CTX_DIM,), jnp.float32),
        lnf_b=jnp.zeros((CTX_DIM,), jnp.float32),
        text_projection=_norm(keys[6], (CTX_DIM, EMBED_DIM)).astype(jnp.bfloat16),
    )

    n_tok = (IMG_SIZE // PATCH) ** 2 + 1
    vision = dict(
        # torch conv1.weight is (width, C, P, P); stored here as (C*P*P, width)
        conv_w=_norm(keys[7], (IN_CH * PATCH * PATCH, VIS_WIDTH)).astype(jnp.bfloat16),
        class_emb=_norm(keys[8], (VIS_WIDTH,)),
        pos_emb=_norm(keys[9], (n_tok, VIS_WIDTH)),
        ln_pre_g=jnp.ones((VIS_WIDTH,), jnp.float32),
        ln_pre_b=jnp.zeros((VIS_WIDTH,), jnp.float32),
        blocks=stack_blocks([init_block(keys[10 + i], VIS_WIDTH)
                             for i in range(VIS_DEPTH)]),
        ln_post_g=jnp.ones((VIS_WIDTH,), jnp.float32),
        ln_post_b=jnp.zeros((VIS_WIDTH,), jnp.float32),
        proj=_norm(keys[12], (VIS_WIDTH, EMBED_DIM)).astype(jnp.bfloat16),
    )

    return dict(
        prompt=prompt,
        text=text,
        vision=vision,
        tokenized_prompts=tokenized,
        logit_scale=jnp.asarray(jnp.log(1.0 / 0.07), jnp.float32),  # CLIP init
    )


# ================================ main =====================================

if __name__ == "__main__":
    key = jax.random.PRNGKey(0)
    params = init_params(key)
    image = jax.random.normal(jax.random.fold_in(key, 999),
                              (2, IN_CH, IMG_SIZE, IMG_SIZE), jnp.float32)

    logits = custom_clip_forward(params, image)
    logits = jax.block_until_ready(logits)

    assert logits.shape == (2, N_CLS), logits.shape
    assert bool(jnp.all(jnp.isfinite(logits)))
    print("KERNEL_OK")
</pallas_src>

<mosaic_0001>
module attributes {stable_mosaic.version = 11 : i64} {
  func.func @_text_encoder_kernel(%arg0: memref<24x32xf32, #tpu.memory_space<vmem>>, %arg1: memref<3x24xf32, #tpu.memory_space<vmem>>, %arg2: memref<2x1x32xf32, #tpu.memory_space<vmem>>, %arg3: memref<2x1x32xf32, #tpu.memory_space<vmem>>, %arg4: memref<2x32x96xbf16, #tpu.memory_space<vmem>>, %arg5: memref<2x1x96xf32, #tpu.memory_space<vmem>>, %arg6: memref<2x32x32xbf16, #tpu.memory_space<vmem>>, %arg7: memref<2x1x32xf32, #tpu.memory_space<vmem>>, %arg8: memref<2x1x32xf32, #tpu.memory_space<vmem>>, %arg9: memref<2x1x32xf32, #tpu.memory_space<vmem>>, %arg10: memref<2x32x128xbf16, #tpu.memory_space<vmem>>, %arg11: memref<2x1x128xf32, #tpu.memory_space<vmem>>, %arg12: memref<2x128x32xbf16, #tpu.memory_space<vmem>>, %arg13: memref<2x1x32xf32, #tpu.memory_space<vmem>>, %arg14: memref<1x32xf32, #tpu.memory_space<vmem>>, %arg15: memref<1x32xf32, #tpu.memory_space<vmem>>, %arg16: memref<32x32xbf16, #tpu.memory_space<vmem>>, %arg17: memref<3x32xf32, #tpu.memory_space<vmem>>, %arg18: memref<3x12x8x8xf32, #tpu.memory_space<vmem>>) attributes {dimension_semantics = [], scalar_prefetch = 0 : i64, scratch_operands = 1 : i64, tpu.core_type = #tpu.core_type<tc>} {
    %0 = tpu.iota {dimensions = array<i32: 0>} : vector<8x8xi32>
    %1 = tpu.iota {dimensions = array<i32: 1>} : vector<8x8xi32>
    %2 = arith.cmpi sgt, %1, %0 : vector<8x8xi32>
    %cst = arith.constant -1.000000e+09 : f32
    %cst_0 = arith.constant 0.000000e+00 : f32
    %3 = vector.broadcast %cst : f32 to vector<8x8xf32>
    %4 = vector.broadcast %cst_0 : f32 to vector<8x8xf32>
    %5 = arith.select %2, %3, %4 : vector<8x8xi1>, vector<8x8xf32>
    %c0 = arith.constant 0 : index
    %c0_1 = arith.constant 0 : index
    %6 = vector.load %arg0[%c0, %c0_1] : memref<24x32xf32, #tpu.memory_space<vmem>>, vector<24x32xf32>
    %c0_2 = arith.constant 0 : index
    %c0_3 = arith.constant 0 : index
    %c0_4 = arith.constant 0 : index
    %7 = vector.load %arg2[%c0_2, %c0_3, %c0_4] : memref<2x1x32xf32, #tpu.memory_space<vmem>>, vector<1x1x32xf32>
    %8 = vector.shape_cast %7 : vector<1x1x32xf32> to vector<1x32xf32>
    %c0_5 = arith.constant 0 : index
    %c0_6 = arith.constant 0 : index
    %c0_7 = arith.constant 0 : index
    %9 = vector.load %arg3[%c0_5, %c0_6, %c0_7] : memref<2x1x32xf32, #tpu.memory_space<vmem>>, vector<1x1x32xf32>
    %10 = vector.shape_cast %9 : vector<1x1x32xf32> to vector<1x32xf32>
    %c0_8 = arith.constant 0 : index
    %c0_9 = arith.constant 0 : index
    %c0_10 = arith.constant 0 : index
    %11 = vector.load %arg4[%c0_8, %c0_9, %c0_10] : memref<2x32x96xbf16, #tpu.memory_space<vmem>>, vector<1x32x96xbf16>
    %12 = vector.shape_cast %11 : vector<1x32x96xbf16> to vector<32x96xbf16>
    %c0_11 = arith.constant 0 : index
    %c0_12 = arith.constant 0 : index
    %c0_13 = arith.constant 0 : index
    %13 = vector.load %arg5[%c0_11, %c0_12, %c0_13] : memref<2x1x96xf32, #tpu.memory_space<vmem>>, vector<1x1x96xf32>
    %14 = vector.shape_cast %13 : vector<1x1x96xf32> to vector<1x96xf32>
    %c0_14 = arith.constant 0 : index
    %c0_15 = arith.constant 0 : index
    %c0_16 = arith.constant 0 : index
    %15 = vector.load %arg6[%c0_14, %c0_15, %c0_16] : memref<2x32x32xbf16, #tpu.memory_space<vmem>>, vector<1x32x32xbf16>
    %16 = vector.shape_cast %15 : vector<1x32x32xbf16> to vector<32x32xbf16>
    %c0_17 = arith.constant 0 : index
    %c0_18 = arith.constant 0 : index
    %c0_19 = arith.constant 0 : index
    %17 = vector.load %arg7[%c0_17, %c0_18, %c0_19] : memref<2x1x32xf32, #tpu.memory_space<vmem>>, vector<1x1x32xf32>
    %18 = vector.shape_cast %17 : vector<1x1x32xf32> to vector<1x32xf32>
    %c0_20 = arith.constant 0 : index
    %c0_21 = arith.constant 0 : index
    %c0_22 = arith.constant 0 : index
    %19 = vector.load %arg8[%c0_20, %c0_21, %c0_22] : memref<2x1x32xf32, #tpu.memory_space<vmem>>, vector<1x1x32xf32>
    %20 = vector.shape_cast %19 : vector<1x1x32xf32> to vector<1x32xf32>
    %c0_23 = arith.constant 0 : index
    %c0_24 = arith.constant 0 : index
    %c0_25 = arith.constant 0 : index
    %21 = vector.load %arg9[%c0_23, %c0_24, %c0_25] : memref<2x1x32xf32, #tpu.memory_space<vmem>>, vector<1x1x32xf32>
    %22 = vector.shape_cast %21 : vector<1x1x32xf32> to vector<1x32xf32>
    %c0_26 = arith.constant 0 : index
    %c0_27 = arith.constant 0 : index
    %c0_28 = arith.constant 0 : index
    %23 = vector.load %arg10[%c0_26, %c0_27, %c0_28] : memref<2x32x128xbf16, #tpu.memory_space<vmem>>, vector<1x32x128xbf16>
    %24 = vector.shape_cast %23 : vector<1x32x128xbf16> to vector<32x128xbf16>
    %c0_29 = arith.constant 0 : index
    %c0_30 = arith.constant 0 : index
    %c0_31 = arith.constant 0 : index
    %25 = vector.load %arg11[%c0_29, %c0_30, %c0_31] : memref<2x1x128xf32, #tpu.memory_space<vmem>>, vector<1x1x128xf32>
    %26 = vector.shape_cast %25 : vector<1x1x128xf32> to vector<1x128xf32>
    %c0_32 = arith.constant 0 : index
    %c0_33 = arith.constant 0 : index
    %c0_34 = arith.constant 0 : index
    %27 = vector.load %arg12[%c0_32, %c0_33, %c0_34] : memref<2x128x32xbf16, #tpu.memory_space<vmem>>, vector<1x128x32xbf16>
    %28 = vector.shape_cast %27 : vector<1x128x32xbf16> to vector<128x32xbf16>
    %c0_35 = arith.constant 0 : index
    %c0_36 = arith.constant 0 : index
    %c0_37 = arith.constant 0 : index
    %29 = vector.load %arg13[%c0_35, %c0_36, %c0_37] : memref<2x1x32xf32, #tpu.memory_space<vmem>>, vector<1x1x32xf32>
    %30 = vector.shape_cast %29 : vector<1x1x32xf32> to vector<1x32xf32>
    %cst_38 = arith.constant dense<0.000000e+00> : vector<24xf32>
    %31 = vector.multi_reduction <add>, %6, %cst_38 [1] : vector<24x32xf32> to vector<24xf32>
    %32 = vector.shape_cast %31 : vector<24xf32> to vector<24x1xf32>
    %cst_39 = arith.constant 3.200000e+01 : f32
    %33 = vector.broadcast %cst_39 : f32 to vector<24x1xf32>
    %34 = arith.divf %32, %33 : vector<24x1xf32>
    %35 = vector.broadcast %34 : vector<24x1xf32> to vector<24x32xf32>
    %36 = arith.subf %6, %35 : vector<24x32xf32>
    %37 = arith.mulf %36, %36 : vector<24x32xf32>
    %cst_40 = arith.constant dense<0.000000e+00> : vector<24xf32>
    %38 = vector.multi_reduction <add>, %37, %cst_40 [1] : vector<24x32xf32> to vector<24xf32>
    %39 = vector.shape_cast %38 : vector<24xf32> to vector<24x1xf32>
    %cst_41 = arith.constant 3.200000e+01 : f32
    %40 = vector.broadcast %cst_41 : f32 to vector<24x1xf32>
    %41 = arith.divf %39, %40 : vector<24x1xf32>
    %cst_42 = arith.constant 9.99999974E-6 : f32
    %42 = vector.broadcast %cst_42 : f32 to vector<24x1xf32>
    %43 = arith.addf %41, %42 : vector<24x1xf32>
    %44 = math.rsqrt %43 : vector<24x1xf32>
    %45 = vector.broadcast %44 : vector<24x1xf32> to vector<24x32xf32>
    %46 = arith.mulf %36, %45 : vector<24x32xf32>
    %47 = vector.broadcast %8 : vector<1x32xf32> to vector<24x32xf32>
    %48 = arith.mulf %46, %47 : vector<24x32xf32>
    %49 = vector.broadcast %10 : vector<1x32xf32> to vector<24x32xf32>
    %50 = arith.addf %48, %49 : vector<24x32xf32>
    %51 = arith.truncf %50 : vector<24x32xf32> to vector<24x32xbf16>
    %cst_43 = arith.constant dense<0.000000e+00> : vector<24x96xf32>
    %52 = tpu.matmul %51, %12, %cst_43 {dimension_numbers = #tpu.dot_dimension_numbers<[1], [0], [0], [1], [0, 0, 1, 1], [], []>} : vector<24x32xbf16>, vector<32x96xbf16>, vector<24x96xf32> -> vector<24x96xf32>
    %53 = vector.broadcast %14 : vector<1x96xf32> to vector<24x96xf32>
    %54 = arith.addf %52, %53 : vector<24x96xf32>
    %55 = vector.shape_cast %54 : vector<24x96xf32> to vector<3x8x96xf32>
    %56 = vector.extract_strided_slice %55 {offsets = [0, 0, 0], sizes = [3, 8, 8], strides = [1, 1, 1]} : vector<3x8x96xf32> to vector<3x8x8xf32>
    %c0_44 = arith.constant 0 : index
    %c0_45 = arith.constant 0 : index
    %c0_46 = arith.constant 0 : index
    %c0_47 = arith.constant 0 : index
    %57 = vector.load %arg18[%c0_44, %c0_45, %c0_46, %c0_47] : memref<3x12x8x8xf32, #tpu.memory_space<vmem>>, vector<1x3x8x8xf32>
    %58 = vector.shape_cast %57 : vector<1x3x8x8xf32> to vector<3x8x8xf32>
    %59 = vector.shape_cast %56 : vector<3x8x8xf32> to vector<1x3x8x8xf32>
    tpu.vector_store %arg18[%c0_44, %c0_45, %c0_46, %c0_47], %59 {strides = array<i32>} : memref<3x12x8x8xf32, #tpu.memory_space<vmem>>, vector<1x3x8x8xf32>,
    %60 = vector.extract_strided_slice %55 {offsets = [0, 0, 32], sizes = [3, 8, 8], strides = [1, 1, 1]} : vector<3x8x96xf32> to vector<3x8x8xf32>
    %c1 = arith.constant 1 : index
    %c0_48 = arith.constant 0 : index
    %c0_49 = arith.constant 0 : index
    %c0_50 = arith.constant 0 : index
    %61 = vector.load %arg18[%c1, %c0_48, %c0_49, %c0_50] : memref<3x12x8x8xf32, #tpu.memory_space<vmem>>, vector<1x3x8x8xf32>
    %62 = vector.shape_cast %61 : vector<1x3x8x8xf32> to vector<3x8x8xf32>
    %63 = vector.shape_cast %60 : vector<3x8x8xf32> to vector<1x3x8x8xf32>
    tpu.vector_store %arg18[%c1, %c0_48, %c0_49, %c0_50], %63 {strides = array<i32>} : memref<3x12x8x8xf32, #tpu.memory_space<vmem>>, vector<1x3x8x8xf32>,
    %64 = vector.extract_strided_slice %55 {offsets = [0, 0, 64], sizes = [3, 8, 8], strides = [1, 1, 1]} : vector<3x8x96xf32> to vector<3x8x8xf32>
    %c2 = arith.constant 2 : index
    %c0_51 = arith.constant 0 : index
    %c0_52 = arith.constant 0 : index
    %c0_53 = arith.constant 0 : index
    %65 = vector.load %arg18[%c2, %c0_51, %c0_52, %c0_53] : memref<3x12x8x8xf32, #tpu.memory_space<vmem>>, vector<1x3x8x8xf32>
    %66 = vector.shape_cast %65 : vector<1x3x8x8xf32> to vector<3x8x8xf32>
    %67 = vector.shape_cast %64 : vector<3x8x8xf32> to vector<1x3x8x8xf32>
    tpu.vector_store %arg18[%c2, %c0_51, %c0_52, %c0_53], %67 {strides = array<i32>} : memref<3x12x8x8xf32, #tpu.memory_space<vmem>>, vector<1x3x8x8xf32>,
    %68 = vector.extract_strided_slice %55 {offsets = [0, 0, 8], sizes = [3, 8, 8], strides = [1, 1, 1]} : vector<3x8x96xf32> to vector<3x8x8xf32>
    %c0_54 = arith.constant 0 : index
    %c3 = arith.constant 3 : index
    %c0_55 = arith.constant 0 : index
    %c0_56 = arith.constant 0 : index
    %69 = vector.load %arg18[%c0_54, %c3, %c0_55, %c0_56] : memref<3x12x8x8xf32, #tpu.memory_space<vmem>>, vector<1x3x8x8xf32>
    %70 = vector.shape_cast %69 : vector<1x3x8x8xf32> to vector<3x8x8xf32>
    %71 = vector.shape_cast %68 : vector<3x8x8xf32> to vector<1x3x8x8xf32>
    tpu.vector_store %arg18[%c0_54, %c3, %c0_55, %c0_56], %71 {strides = array<i32>} : memref<3x12x8x8xf32, #tpu.memory_space<vmem>>, vector<1x3x8x8xf32>,
    %72 = vector.extract_strided_slice %55 {offsets = [0, 0, 40], sizes = [3, 8, 8], strides = [1, 1, 1]} : vector<3x8x96xf32> to vector<3x8x8xf32>
    %c1_57 = arith.constant 1 : index
    %c3_58 = arith.constant 3 : index
    %c0_59 = arith.constant 0 : index
    %c0_60 = arith.constant 0 : index
    %73 = vector.load %arg18[%c1_57, %c3_58, %c0_59, %c0_60] : memref<3x12x8x8xf32, #tpu.memory_space<vmem>>, vector<1x3x8x8xf32>
    %74 = vector.shape_cast %73 : vector<1x3x8x8xf32> to vector<3x8x8xf32>
    %75 = vector.shape_cast %72 : vector<3x8x8xf32> to vector<1x3x8x8xf32>
    tpu.vector_store %arg18[%c1_57, %c3_58, %c0_59, %c0_60], %75 {strides = array<i32>} : memref<3x12x8x8xf32, #tpu.memory_space<vmem>>, vector<1x3x8x8xf32>,
    %76 = vector.extract_strided_slice %55 {offsets = [0, 0, 72], sizes = [3, 8, 8], strides = [1, 1, 1]} : vector<3x8x96xf32> to vector<3x8x8xf32>
    %c2_61 = arith.constant 2 : index
    %c3_62 = arith.constant 3 : index
    %c0_63 = arith.constant 0 : index
    %c0_64 = arith.constant 0 : index
    %77 = vector.load %arg18[%c2_61, %c3_62, %c0_63, %c0_64] : memref<3x12x8x8xf32, #tpu.memory_space<vmem>>, vector<1x3x8x8xf32>
    %78 = vector.shape_cast %77 : vector<1x3x8x8xf32> to vector<3x8x8xf32>
    %79 = vector.shape_cast %76 : vector<3x8x8xf32> to vector<1x3x8x8xf32>
    tpu.vector_store %arg18[%c2_61, %c3_62, %c0_63, %c0_64], %79 {strides = array<i32>} : memref<3x12x8x8xf32, #tpu.memory_space<vmem>>, vector<1x3x8x8xf32>,
    %80 = vector.extract_strided_slice %55 {offsets = [0, 0, 16], sizes = [3, 8, 8], strides = [1, 1, 1]} : vector<3x8x96xf32> to vector<3x8x8xf32>
    %c0_65 = arith.constant 0 : index
    %c6 = arith.constant 6 : index
    %c0_66 = arith.constant 0 : index
    %c0_67 = arith.constant 0 : index
    %81 = vector.load %arg18[%c0_65, %c6, %c0_66, %c0_67] : memref<3x12x8x8xf32, #tpu.memory_space<vmem>>, vector<1x3x8x8xf32>
    %82 = vector.shape_cast %81 : vector<1x3x8x8xf32> to vector<3x8x8xf32>
    %83 = vector.shape_cast %80 : vector<3x8x8xf32> to vector<1x3x8x8xf32>
    tpu.vector_store %arg18[%c0_65, %c6, %c0_66, %c0_67], %83 {strides = array<i32>} : memref<3x12x8x8xf32, #tpu.memory_space<vmem>>, vector<1x3x8x8xf32>,
    %84 = vector.extract_strided_slice %55 {offsets = [0, 0, 48], sizes = [3, 8, 8], strides = [1, 1, 1]} : vector<3x8x96xf32> to vector<3x8x8xf32>
    %c1_68 = arith.constant 1 : index
    %c6_69 = arith.constant 6 : index
    %c0_70 = arith.constant 0 : index
    %c0_71 = arith.constant 0 : index
    %85 = vector.load %arg18[%c1_68, %c6_69, %c0_70, %c0_71] : memref<3x12x8x8xf32, #tpu.memory_space<vmem>>, vector<1x3x8x8xf32>
    %86 = vector.shape_cast %85 : vector<1x3x8x8xf32> to vector<3x8x8xf32>
    %87 = vector.shape_cast %84 : vector<3x8x8xf32> to vector<1x3x8x8xf32>
    tpu.vector_store %arg18[%c1_68, %c6_69, %c0_70, %c0_71], %87 {strides = array<i32>} : memref<3x12x8x8xf32, #tpu.memory_space<vmem>>, vector<1x3x8x8xf32>,
    %88 = vector.extract_strided_slice %55 {offsets = [0, 0, 80], sizes = [3, 8, 8], strides = [1, 1, 1]} : vector<3x8x96xf32> to vector<3x8x8xf32>
    %c2_72 = arith.constant 2 : index
    %c6_73 = arith.constant 6 : index
    %c0_74 = arith.constant 0 : index
    %c0_75 = arith.constant 0 : index
    %89 = vector.load %arg18[%c2_72, %c6_73, %c0_74, %c0_75] : memref<3x12x8x8xf32, #tpu.memory_space<vmem>>, vector<1x3x8x8xf32>
    %90 = vector.shape_cast %89 : vector<1x3x8x8xf32> to vector<3x8x8xf32>
    %91 = vector.shape_cast %88 : vector<3x8x8xf32> to vector<1x3x8x8xf32>
    tpu.vector_store %arg18[%c2_72, %c6_73, %c0_74, %c0_75], %91 {strides = array<i32>} : memref<3x12x8x8xf32, #tpu.memory_space<vmem>>, vector<1x3x8x8xf32>,
    %92 = vector.extract_strided_slice %55 {offsets = [0, 0, 24], sizes = [3, 8, 8], strides = [1, 1, 1]} : vector<3x8x96xf32> to vector<3x8x8xf32>
    %c0_76 = arith.constant 0 : index
    %c9 = arith.constant 9 : index
    %c0_77 = arith.constant 0 : index
    %c0_78 = arith.constant 0 : index
    %93 = vector.load %arg18[%c0_76, %c9, %c0_77, %c0_78] : memref<3x12x8x8xf32, #tpu.memory_space<vmem>>, vector<1x3x8x8xf32>
    %94 = vector.shape_cast %93 : vector<1x3x8x8xf32> to vector<3x8x8xf32>
    %95 = vector.shape_cast %92 : vector<3x8x8xf32> to vector<1x3x8x8xf32>
    tpu.vector_store %arg18[%c0_76, %c9, %c0_77, %c0_78], %95 {strides = array<i32>} : memref<3x12x8x8xf32, #tpu.memory_space<vmem>>, vector<1x3x8x8xf32>,
    %96 = vector.extract_strided_slice %55 {offsets = [0, 0, 56], sizes = [3, 8, 8], strides = [1, 1, 1]} : vector<3x8x96xf32> to vector<3x8x8xf32>
    %c1_79 = arith.constant 1 : index
    %c9_80 = arith.constant 9 : index
    %c0_81 = arith.constant 0 : index
    %c0_82 = arith.constant 0 : index
    %97 = vector.load %arg18[%c1_79, %c9_80, %c0_81, %c0_82] : memref<3x12x8x8xf32, #tpu.memory_space<vmem>>, vector<1x3x8x8xf32>
    %98 = vector.shape_cast %97 : vector<1x3x8x8xf32> to vector<3x8x8xf32>
    %99 = vector.shape_cast %96 : vector<3x8x8xf32> to vector<1x3x8x8xf32>
    tpu.vector_store %arg18[%c1_79, %c9_80, %c0_81, %c0_82], %99 {strides = array<i32>} : memref<3x12x8x8xf32, #tpu.memory_space<vmem>>, vector<1x3x8x8xf32>,
    %100 = vector.extract_strided_slice %55 {offsets = [0, 0, 88], sizes = [3, 8, 8], strides = [1, 1, 1]} : vector<3x8x96xf32> to vector<3x8x8xf32>
    %c2_83 = arith.constant 2 : index
    %c9_84 = arith.constant 9 : index
    %c0_85 = arith.constant 0 : index
    %c0_86 = arith.constant 0 : index
    %101 = vector.load %arg18[%c2_83, %c9_84, %c0_85, %c0_86] : memref<3x12x8x8xf32, #tpu.memory_space<vmem>>, vector<1x3x8x8xf32>
    %102 = vector.shape_cast %101 : vector<1x3x8x8xf32> to vector<3x8x8xf32>
    %103 = vector.shape_cast %100 : vector<3x8x8xf32> to vector<1x3x8x8xf32>
    tpu.vector_store %arg18[%c2_83, %c9_84, %c0_85, %c0_86], %103 {strides = array<i32>} : memref<3x12x8x8xf32, #tpu.memory_space<vmem>>, vector<1x3x8x8xf32>,
    %c0_87 = arith.constant 0 : index
    %c0_88 = arith.constant 0 : index
    %c0_89 = arith.constant 0 : index
    %c0_90 = arith.constant 0 : index
    %104 = vector.load %arg18[%c0_87, %c0_88, %c0_89, %c0_90] : memref<3x12x8x8xf32, #tpu.memory_space<vmem>>, vector<1x12x8x8xf32>
    %105 = vector.shape_cast %104 : vector<1x12x8x8xf32> to vector<12x8x8xf32>
    %106 = arith.truncf %105 : vector<12x8x8xf32> to vector<12x8x8xbf16>
    %c1_91 = arith.constant 1 : index
    %c0_92 = arith.constant 0 : index
    %c0_93 = arith.constant 0 : index
    %c0_94 = arith.constant 0 : index
    %107 = vector.load %arg18[%c1_91, %c0_92, %c0_93, %c0_94] : memref<3x12x8x8xf32, #tpu.memory_space<vmem>>, vector<1x12x8x8xf32>
    %108 = vector.shape_cast %107 : vector<1x12x8x8xf32> to vector<12x8x8xf32>
    %109 = arith.truncf %108 : vector<12x8x8xf32> to vector<12x8x8xbf16>
    %c2_95 = arith.constant 2 : index
    %c0_96 = arith.constant 0 : index
    %c0_97 = arith.constant 0 : index
    %c0_98 = arith.constant 0 : index
    %110 = vector.load %arg18[%c2_95, %c0_96, %c0_97, %c0_98] : memref<3x12x8x8xf32, #tpu.memory_space<vmem>>, vector<1x12x8x8xf32>
    %111 = vector.shape_cast %110 : vector<1x12x8x8xf32> to vector<12x8x8xf32>
    %112 = arith.truncf %111 : vector<12x8x8xf32> to vector<12x8x8xbf16>
    "tpu.trace_start"() <{level = 10 : i32, message = "gqd,gkd->gqk"}> : () -> ()
    %cst_99 = arith.constant dense<0.000000e+00> : vector<12x8x8xf32>
    %113 = tpu.matmul %106, %109, %cst_99 {dimension_numbers = #tpu.dot_dimension_numbers<[2], [2], [1], [1], [0, 0, 0, 1, 1, 1], [0], [0]>} : vector<12x8x8xbf16>, vector<12x8x8xbf16>, vector<12x8x8xf32> -> vector<12x8x8xf32>
    "tpu.trace_stop"() : () -> ()
    %cst_100 = arith.constant 0.353553385 : f32
    %114 = vector.broadcast %cst_100 : f32 to vector<12x8x8xf32>
    %115 = arith.mulf %113, %114 : vector<12x8x8xf32>
    %116 = vector.shape_cast %5 : vector<8x8xf32> to vector<1x8x8xf32>
    %117 = vector.broadcast %116 : vector<1x8x8xf32> to vector<12x8x8xf32>
    %118 = arith.addf %115, %117 : vector<12x8x8xf32>
    %cst_101 = arith.constant dense<0xFF800000> : vector<12x8xf32>
    %119 = vector.multi_reduction <maximumf>, %118, %cst_101 [2] : vector<12x8x8xf32> to vector<12x8xf32>
    %120 = vector.shape_cast %119 : vector<12x8xf32> to vector<12x8x1xf32>
    %121 = vector.broadcast %120 : vector<12x8x1xf32> to vector<12x8x8xf32>
    %122 = arith.subf %118, %121 : vector<12x8x8xf32>
    %123 = math.exp %122 : vector<12x8x8xf32>
    %cst_102 = arith.constant dense<0.000000e+00> : vector<12x8xf32>
    %124 = vector.multi_reduction <add>, %123, %cst_102 [2] : vector<12x8x8xf32> to vector<12x8xf32>
    %125 = vector.shape_cast %124 : vector<12x8xf32> to vector<12x8x1xf32>
    %126 = tpu.reciprocal %125 {approx = true} : vector<12x8x1xf32> -> vector<12x8x1xf32>
    %127 = vector.broadcast %126 : vector<12x8x1xf32> to vector<12x8x8xf32>
    %128 = arith.mulf %123, %127 : vector<12x8x8xf32>
    %129 = arith.truncf %128 : vector<12x8x8xf32> to vector<12x8x8xbf16>
    "tpu.trace_start"() <{level = 10 : i32, message = "gqk,gkd->gqd"}> : () -> ()
    %cst_103 = arith.constant dense<0.000000e+00> : vector<12x8x8xf32>
    %130 = tpu.matmul %129, %112, %cst_103 {dimension_numbers = #tpu.dot_dimension_numbers<[2], [1], [1], [2], [0, 0, 0, 1, 1, 2], [0], [0]>} : vector<12x8x8xbf16>, vector<12x8x8xbf16>, vector<12x8x8xf32> -> vector<12x8x8xf32>
    "tpu.trace_stop"() : () -> ()
    %131 = vector.shape_cast %130 : vector<12x8x8xf32> to vector<4x24x8xf32>
    %132 = vector.extract_strided_slice %131 {offsets = [0, 0, 0], sizes = [1, 24, 8], strides = [1, 1, 1]} : vector<4x24x8xf32> to vector<1x24x8xf32>
    %133 = vector.shape_cast %132 : vector<1x24x8xf32> to vector<24x8xf32>
    %134 = arith.truncf %133 : vector<24x8xf32> to vector<24x8xbf16>
    %135 = vector.extract_strided_slice %16 {offsets = [0, 0], sizes = [8, 32], strides = [1, 1]} : vector<32x32xbf16> to vector<8x32xbf16>
    %cst_104 = arith.constant dense<0.000000e+00> : vector<24x32xf32>
    %136 = tpu.matmul %134, %135, %cst_104 {dimension_numbers = #tpu.dot_dimension_numbers<[1], [0], [0], [1], [0, 0, 1, 1], [], []>} : vector<24x8xbf16>, vector<8x32xbf16>, vector<24x32xf32> -> vector<24x32xf32>
    %137 = vector.broadcast %18 : vector<1x32xf32> to vector<24x32xf32>
    %138 = arith.addf %137, %136 : vector<24x32xf32>
    %139 = vector.extract_strided_slice %131 {offsets = [1, 0, 0], sizes = [1, 24, 8], strides = [1, 1, 1]} : vector<4x24x8xf32> to vector<1x24x8xf32>
    %140 = vector.shape_cast %139 : vector<1x24x8xf32> to vector<24x8xf32>
    %141 = arith.truncf %140 : vector<24x8xf32> to vector<24x8xbf16>
    %142 = vector.extract_strided_slice %16 {offsets = [8, 0], sizes = [8, 32], strides = [1, 1]} : vector<32x32xbf16> to vector<8x32xbf16>
    %cst_105 = arith.constant dense<0.000000e+00> : vector<24x32xf32>
    %143 = tpu.matmul %141, %142, %cst_105 {dimension_numbers = #tpu.dot_dimension_numbers<[1], [0], [0], [1], [0, 0, 1, 1], [], []>} : vector<24x8xbf16>, vector<8x32xbf16>, vector<24x32xf32> -> vector<24x32xf32>
    %144 = arith.addf %138, %143 : vector<24x32xf32>
    %145 = vector.extract_strided_slice %131 {offsets = [2, 0, 0], sizes = [1, 24, 8], strides = [1, 1, 1]} : vector<4x24x8xf32> to vector<1x24x8xf32>
    %146 = vector.shape_cast %145 : vector<1x24x8xf32> to vector<24x8xf32>
    %147 = arith.truncf %146 : vector<24x8xf32> to vector<24x8xbf16>
    %148 = vector.extract_strided_slice %16 {offsets = [16, 0], sizes = [8, 32], strides = [1, 1]} : vector<32x32xbf16> to vector<8x32xbf16>
    %cst_106 = arith.constant dense<0.000000e+00> : vector<24x32xf32>
    %149 = tpu.matmul %147, %148, %cst_106 {dimension_numbers = #tpu.dot_dimension_numbers<[1], [0], [0], [1], [0, 0, 1, 1], [], []>} : vector<24x8xbf16>, vector<8x32xbf16>, vector<24x32xf32> -> vector<24x32xf32>
    %150 = arith.addf %144, %149 : vector<24x32xf32>
    %151 = vector.extract_strided_slice %131 {offsets = [3, 0, 0], sizes = [1, 24, 8], strides = [1, 1, 1]} : vector<4x24x8xf32> to vector<1x24x8xf32>
    %152 = vector.shape_cast %151 : vector<1x24x8xf32> to vector<24x8xf32>
    %153 = arith.truncf %152 : vector<24x8xf32> to vector<24x8xbf16>
    %154 = vector.extract_strided_slice %16 {offsets = [24, 0], sizes = [8, 32], strides = [1, 1]} : vector<32x32xbf16> to vector<8x32xbf16>
    %cst_107 = arith.constant dense<0.000000e+00> : vector<24x32xf32>
    %155 = tpu.matmul %153, %154, %cst_107 {dimension_numbers = #tpu.dot_dimension_numbers<[1], [0], [0], [1], [0, 0, 1, 1], [], []>} : vector<24x8xbf16>, vector<8x32xbf16>, vector<24x32xf32> -> vector<24x32xf32>
    %156 = arith.addf %150, %155 : vector<24x32xf32>
    %157 = arith.addf %6, %156 : vector<24x32xf32>
    %cst_108 = arith.constant dense<0.000000e+00> : vector<24xf32>
    %158 = vector.multi_reduction <add>, %157, %cst_108 [1] : vector<24x32xf32> to vector<24xf32>
    %159 = vector.shape_cast %158 : vector<24xf32> to vector<24x1xf32>
    %cst_109 = arith.constant 3.200000e+01 : f32
    %160 = vector.broadcast %cst_109 : f32 to vector<24x1xf32>
    %161 = arith.divf %159, %160 : vector<24x1xf32>
    %162 = vector.broadcast %161 : vector<24x1xf32> to vector<24x32xf32>
    %163 = arith.subf %157, %162 : vector<24x32xf32>
    %164 = arith.mulf %163, %163 : vector<24x32xf32>
    %cst_110 = arith.constant dense<0.000000e+00> : vector<24xf32>
    %165 = vector.multi_reduction <add>, %164, %cst_110 [1] : vector<24x32xf32> to vector<24xf32>
    %166 = vector.shape_cast %165 : vector<24xf32> to vector<24x1xf32>
    %cst_111 = arith.constant 3.200000e+01 : f32
    %167 = vector.broadcast %cst_111 : f32 to vector<24x1xf32>
    %168 = arith.divf %166, %167 : vector<24x1xf32>
    %cst_112 = arith.constant 9.99999974E-6 : f32
    %169 = vector.broadcast %cst_112 : f32 to vector<24x1xf32>
    %170 = arith.addf %168, %169 : vector<24x1xf32>
    %171 = math.rsqrt %170 : vector<24x1xf32>
    %172 = vector.broadcast %171 : vector<24x1xf32> to vector<24x32xf32>
    %173 = arith.mulf %163, %172 : vector<24x32xf32>
    %174 = vector.broadcast %20 : vector<1x32xf32> to vector<24x32xf32>
    %175 = arith.mulf %173, %174 : vector<24x32xf32>
    %176 = vector.broadcast %22 : vector<1x32xf32> to vector<24x32xf32>
    %177 = arith.addf %175, %176 : vector<24x32xf32>
    %178 = arith.truncf %177 : vector<24x32xf32> to vector<24x32xbf16>
    %cst_113 = arith.constant dense<0.000000e+00> : vector<24x128xf32>
    %179 = tpu.matmul %178, %24, %cst_113 {dimension_numbers = #tpu.dot_dimension_numbers<[1], [0], [0], [1], [0, 0, 1, 1], [], []>} : vector<24x32xbf16>, vector<32x128xbf16>, vector<24x128xf32> -> vector<24x128xf32>
    %180 = vector.broadcast %26 : vector<1x128xf32> to vector<24x128xf32>
    %181 = arith.addf %179, %180 : vector<24x128xf32>
    %cst_114 = arith.constant 1.702000e+00 : f32
    %182 = vector.broadcast %cst_114 : f32 to vector<24x128xf32>
    %183 = arith.mulf %182, %181 : vector<24x128xf32>
    %184 = arith.negf %183 : vector<24x128xf32>
    %185 = math.exp %184 : vector<24x128xf32>
    %cst_115 = arith.constant 1.000000e+00 : f32
    %186 = vector.broadcast %cst_115 : f32 to vector<24x128xf32>
    %187 = arith.addf %186, %185 : vector<24x128xf32>
    %188 = arith.divf %186, %187 : vector<24x128xf32>
    %189 = arith.mulf %181, %188 : vector<24x128xf32>
    %190 = arith.truncf %189 : vector<24x128xf32> to vector<24x128xbf16>
    %cst_116 = arith.constant dense<0.000000e+00> : vector<24x32xf32>
    %191 = tpu.matmul %190, %28, %cst_116 {dimension_numbers = #tpu.dot_dimension_numbers<[1], [0], [0], [1], [0, 0, 1, 1], [], []>} : vector<24x128xbf16>, vector<128x32xbf16>, vector<24x32xf32> -> vector<24x32xf32>
    %192 = arith.addf %157, %191 : vector<24x32xf32>
    %193 = vector.broadcast %30 : vector<1x32xf32> to vector<24x32xf32>
    %194 = arith.addf %192, %193 : vector<24x32xf32>
    %c1_117 = arith.constant 1 : index
    %c0_118 = arith.constant 0 : index
    %c0_119 = arith.constant 0 : index
    %195 = vector.load %arg2[%c1_117, %c0_118, %c0_119] : memref<2x1x32xf32, #tpu.memory_space<vmem>>, vector<1x1x32xf32>
    %196 = vector.shape_cast %195 : vector<1x1x32xf32> to vector<1x32xf32>
    %c1_120 = arith.constant 1 : index
    %c0_121 = arith.constant 0 : index
    %c0_122 = arith.constant 0 : index
    %197 = vector.load %arg3[%c1_120, %c0_121, %c0_122] : memref<2x1x32xf32, #tpu.memory_space<vmem>>, vector<1x1x32xf32>
    %198 = vector.shape_cast %197 : vector<1x1x32xf32> to vector<1x32xf32>
    %c1_123 = arith.constant 1 : index
    %c0_124 = arith.constant 0 : index
    %c0_125 = arith.constant 0 : index
    %199 = vector.load %arg4[%c1_123, %c0_124, %c0_125] : memref<2x32x96xbf16, #tpu.memory_space<vmem>>, vector<1x32x96xbf16>
    %200 = vector.shape_cast %199 : vector<1x32x96xbf16> to vector<32x96xbf16>
    %c1_126 = arith.constant 1 : index
    %c0_127 = arith.constant 0 : index
    %c0_128 = arith.constant 0 : index
    %201 = vector.load %arg5[%c1_126, %c0_127, %c0_128] : memref<2x1x96xf32, #tpu.memory_space<vmem>>, vector<1x1x96xf32>
    %202 = vector.shape_cast %201 : vector<1x1x96xf32> to vector<1x96xf32>
    %c1_129 = arith.constant 1 : index
    %c0_130 = arith.constant 0 : index
    %c0_131 = arith.constant 0 : index
    %203 = vector.load %arg6[%c1_129, %c0_130, %c0_131] : memref<2x32x32xbf16, #tpu.memory_space<vmem>>, vector<1x32x32xbf16>
    %204 = vector.shape_cast %203 : vector<1x32x32xbf16> to vector<32x32xbf16>
    %c1_132 = arith.constant 1 : index
    %c0_133 = arith.constant 0 : index
    %c0_134 = arith.constant 0 : index
    %205 = vector.load %arg7[%c1_132, %c0_133, %c0_134] : memref<2x1x32xf32, #tpu.memory_space<vmem>>, vector<1x1x32xf32>
    %206 = vector.shape_cast %205 : vector<1x1x32xf32> to vector<1x32xf32>
    %c1_135 = arith.constant 1 : index
    %c0_136 = arith.constant 0 : index
    %c0_137 = arith.constant 0 : index
    %207 = vector.load %arg8[%c1_135, %c0_136, %c0_137] : memref<2x1x32xf32, #tpu.memory_space<vmem>>, vector<1x1x32xf32>
    %208 = vector.shape_cast %207 : vector<1x1x32xf32> to vector<1x32xf32>
    %c1_138 = arith.constant 1 : index
    %c0_139 = arith.constant 0 : index
    %c0_140 = arith.constant 0 : index
    %209 = vector.load %arg9[%c1_138, %c0_139, %c0_140] : memref<2x1x32xf32, #tpu.memory_space<vmem>>, vector<1x1x32xf32>
    %210 = vector.shape_cast %209 : vector<1x1x32xf32> to vector<1x32xf32>
    %c1_141 = arith.constant 1 : index
    %c0_142 = arith.constant 0 : index
    %c0_143 = arith.constant 0 : index
    %211 = vector.load %arg10[%c1_141, %c0_142, %c0_143] : memref<2x32x128xbf16, #tpu.memory_space<vmem>>, vector<1x32x128xbf16>
    %212 = vector.shape_cast %211 : vector<1x32x128xbf16> to vector<32x128xbf16>
    %c1_144 = arith.constant 1 : index
    %c0_145 = arith.constant 0 : index
    %c0_146 = arith.constant 0 : index
    %213 = vector.load %arg11[%c1_144, %c0_145, %c0_146] : memref<2x1x128xf32, #tpu.memory_space<vmem>>, vector<1x1x128xf32>
    %214 = vector.shape_cast %213 : vector<1x1x128xf32> to vector<1x128xf32>
    %c1_147 = arith.constant 1 : index
    %c0_148 = arith.constant 0 : index
    %c0_149 = arith.constant 0 : index
    %215 = vector.load %arg12[%c1_147, %c0_148, %c0_149] : memref<2x128x32xbf16, #tpu.memory_space<vmem>>, vector<1x128x32xbf16>
    %216 = vector.shape_cast %215 : vector<1x128x32xbf16> to vector<128x32xbf16>
    %c1_150 = arith.constant 1 : index
    %c0_151 = arith.constant 0 : index
    %c0_152 = arith.constant 0 : index
    %217 = vector.load %arg13[%c1_150, %c0_151, %c0_152] : memref<2x1x32xf32, #tpu.memory_space<vmem>>, vector<1x1x32xf32>
    %218 = vector.shape_cast %217 : vector<1x1x32xf32> to vector<1x32xf32>
    %cst_153 = arith.constant dense<0.000000e+00> : vector<24xf32>
    %219 = vector.multi_reduction <add>, %194, %cst_153 [1] : vector<24x32xf32> to vector<24xf32>
    %220 = vector.shape_cast %219 : vector<24xf32> to vector<24x1xf32>
    %cst_154 = arith.constant 3.200000e+01 : f32
    %221 = vector.broadcast %cst_154 : f32 to vector<24x1xf32>
    %222 = arith.divf %220, %221 : vector<24x1xf32>
    %223 = vector.broadcast %222 : vector<24x1xf32> to vector<24x32xf32>
    %224 = arith.subf %194, %223 : vector<24x32xf32>
    %225 = arith.mulf %224, %224 : vector<24x32xf32>
    %cst_155 = arith.constant dense<0.000000e+00> : vector<24xf32>
    %226 = vector.multi_reduction <add>, %225, %cst_155 [1] : vector<24x32xf32> to vector<24xf32>
    %227 = vector.shape_cast %226 : vector<24xf32> to vector<24x1xf32>
    %cst_156 = arith.constant 3.200000e+01 : f32
    %228 = vector.broadcast %cst_156 : f32 to vector<24x1xf32>
    %229 = arith.divf %227, %228 : vector<24x1xf32>
    %cst_157 = arith.constant 9.99999974E-6 : f32
    %230 = vector.broadcast %cst_157 : f32 to vector<24x1xf32>
    %231 = arith.addf %229, %230 : vector<24x1xf32>
    %232 = math.rsqrt %231 : vector<24x1xf32>
    %233 = vector.broadcast %232 : vector<24x1xf32> to vector<24x32xf32>
    %234 = arith.mulf %224, %233 : vector<24x32xf32>
    %235 = vector.broadcast %196 : vector<1x32xf32> to vector<24x32xf32>
    %236 = arith.mulf %234, %235 : vector<24x32xf32>
    %237 = vector.broadcast %198 : vector<1x32xf32> to vector<24x32xf32>
    %238 = arith.addf %236, %237 : vector<24x32xf32>
    %239 = arith.truncf %238 : vector<24x32xf32> to vector<24x32xbf16>
    %cst_158 = arith.constant dense<0.000000e+00> : vector<24x96xf32>
    %240 = tpu.matmul %239, %200, %cst_158 {dimension_numbers = #tpu.dot_dimension_numbers<[1], [0], [0], [1], [0, 0, 1, 1], [], []>} : vector<24x32xbf16>, vector<32x96xbf16>, vector<24x96xf32> -> vector<24x96xf32>
    %241 = vector.broadcast %202 : vector<1x96xf32> to vector<24x96xf32>
    %242 = arith.addf %240, %241 : vector<24x96xf32>
    %243 = vector.shape_cast %242 : vector<24x96xf32> to vector<3x8x96xf32>
    %244 = vector.extract_strided_slice %243 {offsets = [0, 0, 0], sizes = [3, 8, 8], strides = [1, 1, 1]} : vector<3x8x96xf32> to vector<3x8x8xf32>
    %c0_159 = arith.constant 0 : index
    %c0_160 = arith.constant 0 : index
    %c0_161 = arith.constant 0 : index
    %c0_162 = arith.constant 0 : index
    %245 = vector.load %arg18[%c0_159, %c0_160, %c0_161, %c0_162] : memref<3x12x8x8xf32, #tpu.memory_space<vmem>>, vector<1x3x8x8xf32>
    %246 = vector.shape_cast %245 : vector<1x3x8x8xf32> to vector<3x8x8xf32>
    %247 = vector.shape_cast %244 : vector<3x8x8xf32> to vector<1x3x8x8xf32>
    tpu.vector_store %arg18[%c0_159, %c0_160, %c0_161, %c0_162], %247 {strides = array<i32>} : memref<3x12x8x8xf32, #tpu.memory_space<vmem>>, vector<1x3x8x8xf32>,
    %248 = vector.extract_strided_slice %243 {offsets = [0, 0, 32], sizes = [3, 8, 8], strides = [1, 1, 1]} : vector<3x8x96xf32> to vector<3x8x8xf32>
    %c1_163 = arith.constant 1 : index
    %c0_164 = arith.constant 0 : index
    %c0_165 = arith.constant 0 : index
    %c0_166 = arith.constant 0 : index
    %249 = vector.load %arg18[%c1_163, %c0_164, %c0_165, %c0_166] : memref<3x12x8x8xf32, #tpu.memory_space<vmem>>, vector<1x3x8x8xf32>
    %250 = vector.shape_cast %249 : vector<1x3x8x8xf32> to vector<3x8x8xf32>
    %251 = vector.shape_cast %248 : vector<3x8x8xf32> to vector<1x3x8x8xf32>
    tpu.vector_store %arg18[%c1_163, %c0_164, %c0_165, %c0_166], %251 {strides = array<i32>} : memref<3x12x8x8xf32, #tpu.memory_space<vmem>>, vector<1x3x8x8xf32>,
    %252 = vector.extract_strided_slice %243 {offsets = [0, 0, 64], sizes = [3, 8, 8], strides = [1, 1, 1]} : vector<3x8x96xf32> to vector<3x8x8xf32>
    %c2_167 = arith.constant 2 : index
    %c0_168 = arith.constant 0 : index
    %c0_169 = arith.constant 0 : index
    %c0_170 = arith.constant 0 : index
    %253 = vector.load %arg18[%c2_167, %c0_168, %c0_169, %c0_170] : memref<3x12x8x8xf32, #tpu.memory_space<vmem>>, vector<1x3x8x8xf32>
    %254 = vector.shape_cast %253 : vector<1x3x8x8xf32> to vector<3x8x8xf32>
    %255 = vector.shape_cast %252 : vector<3x8x8xf32> to vector<1x3x8x8xf32>
    tpu.vector_store %arg18[%c2_167, %c0_168, %c0_169, %c0_170], %255 {strides = array<i32>} : memref<3x12x8x8xf32, #tpu.memory_space<vmem>>, vector<1x3x8x8xf32>,
    %256 = vector.extract_strided_slice %243 {offsets = [0, 0, 8], sizes = [3, 8, 8], strides = [1, 1, 1]} : vector<3x8x96xf32> to vector<3x8x8xf32>
    %c0_171 = arith.constant 0 : index
    %c3_172 = arith.constant 3 : index
    %c0_173 = arith.constant 0 : index
    %c0_174 = arith.constant 0 : index
    %257 = vector.load %arg18[%c0_171, %c3_172, %c0_173, %c0_174] : memref<3x12x8x8xf32, #tpu.memory_space<vmem>>, vector<1x3x8x8xf32>
    %258 = vector.shape_cast %257 : vector<1x3x8x8xf32> to vector<3x8x8xf32>
    %259 = vector.shape_cast %256 : vector<3x8x8xf32> to vector<1x3x8x8xf32>
    tpu.vector_store %arg18[%c0_171, %c3_172, %c0_173, %c0_174], %259 {strides = array<i32>} : memref<3x12x8x8xf32, #tpu.memory_space<vmem>>, vector<1x3x8x8xf32>,
    %260 = vector.extract_strided_slice %243 {offsets = [0, 0, 40], sizes = [3, 8, 8], strides = [1, 1, 1]} : vector<3x8x96xf32> to vector<3x8x8xf32>
    %c1_175 = arith.constant 1 : index
    %c3_176 = arith.constant 3 : index
    %c0_177 = arith.constant 0 : index
    %c0_178 = arith.constant 0 : index
    %261 = vector.load %arg18[%c1_175, %c3_176, %c0_177, %c0_178] : memref<3x12x8x8xf32, #tpu.memory_space<vmem>>, vector<1x3x8x8xf32>
    %262 = vector.shape_cast %261 : vector<1x3x8x8xf32> to vector<3x8x8xf32>
    %263 = vector.shape_cast %260 : vector<3x8x8xf32> to vector<1x3x8x8xf32>
    tpu.vector_store %arg18[%c1_175, %c3_176, %c0_177, %c0_178], %263 {strides = array<i32>} : memref<3x12x8x8xf32, #tpu.memory_space<vmem>>, vector<1x3x8x8xf32>,
    %264 = vector.extract_strided_slice %243 {offsets = [0, 0, 72], sizes = [3, 8, 8], strides = [1, 1, 1]} : vector<3x8x96xf32> to vector<3x8x8xf32>
    %c2_179 = arith.constant 2 : index
    %c3_180 = arith.constant 3 : index
    %c0_181 = arith.constant 0 : index
    %c0_182 = arith.constant 0 : index
    %265 = vector.load %arg18[%c2_179, %c3_180, %c0_181, %c0_182] : memref<3x12x8x8xf32, #tpu.memory_space<vmem>>, vector<1x3x8x8xf32>
    %266 = vector.shape_cast %265 : vector<1x3x8x8xf32> to vector<3x8x8xf32>
    %267 = vector.shape_cast %264 : vector<3x8x8xf32> to vector<1x3x8x8xf32>
    tpu.vector_store %arg18[%c2_179, %c3_180, %c0_181, %c0_182], %267 {strides = array<i32>} : memref<3x12x8x8xf32, #tpu.memory_space<vmem>>, vector<1x3x8x8xf32>,
    %268 = vector.extract_strided_slice %243 {offsets = [0, 0, 16], sizes = [3, 8, 8], strides = [1, 1, 1]} : vector<3x8x96xf32> to vector<3x8x8xf32>
    %c0_183 = arith.constant 0 : index
    %c6_184 = arith.constant 6 : index
    %c0_185 = arith.constant 0 : index
    %c0_186 = arith.constant 0 : index
    %269 = vector.load %arg18[%c0_183, %c6_184, %c0_185, %c0_186] : memref<3x12x8x8xf32, #tpu.memory_space<vmem>>, vector<1x3x8x8xf32>
    %270 = vector.shape_cast %269 : vector<1x3x8x8xf32> to vector<3x8x8xf32>
    %271 = vector.shape_cast %268 : vector<3x8x8xf32> to vector<1x3x8x8xf32>
    tpu.vector_store %arg18[%c0_183, %c6_184, %c0_185, %c0_186], %271 {strides = array<i32>} : memref<3x12x8x8xf32, #tpu.memory_space<vmem>>, vector<1x3x8x8xf32>,
    %272 = vector.extract_strided_slice %243 {offsets = [0, 0, 48], sizes = [3, 8, 8], strides = [1, 1, 1]} : vector<3x8x96xf32> to vector<3x8x8xf32>
    %c1_187 = arith.constant 1 : index
    %c6_188 = arith.constant 6 : index
    %c0_189 = arith.constant 0 : index
    %c0_190 = arith.constant 0 : index
    %273 = vector.load %arg18[%c1_187, %c6_188, %c0_189, %c0_190] : memref<3x12x8x8xf32, #tpu.memory_space<vmem>>, vector<1x3x8x8xf32>
    %274 = vector.shape_cast %273 : vector<1x3x8x8xf32> to vector<3x8x8xf32>
    %275 = vector.shape_cast %272 : vector<3x8x8xf32> to vector<1x3x8x8xf32>
    tpu.vector_store %arg18[%c1_187, %c6_188, %c0_189, %c0_190], %275 {strides = array<i32>} : memref<3x12x8x8xf32, #tpu.memory_space<vmem>>, vector<1x3x8x8xf32>,
    %276 = vector.extract_strided_slice %243 {offsets = [0, 0, 80], sizes = [3, 8, 8], strides = [1, 1, 1]} : vector<3x8x96xf32> to vector<3x8x8xf32>
    %c2_191 = arith.constant 2 : index
    %c6_192 = arith.constant 6 : index
    %c0_193 = arith.constant 0 : index
    %c0_194 = arith.constant 0 : index
    %277 = vector.load %arg18[%c2_191, %c6_192, %c0_193, %c0_194] : memref<3x12x8x8xf32, #tpu.memory_space<vmem>>, vector<1x3x8x8xf32>
    %278 = vector.shape_cast %277 : vector<1x3x8x8xf32> to vector<3x8x8xf32>
    %279 = vector.shape_cast %276 : vector<3x8x8xf32> to vector<1x3x8x8xf32>
    tpu.vector_store %arg18[%c2_191, %c6_192, %c0_193, %c0_194], %279 {strides = array<i32>} : memref<3x12x8x8xf32, #tpu.memory_space<vmem>>, vector<1x3x8x8xf32>,
    %280 = vector.extract_strided_slice %243 {offsets = [0, 0, 24], sizes = [3, 8, 8], strides = [1, 1, 1]} : vector<3x8x96xf32> to vector<3x8x8xf32>
    %c0_195 = arith.constant 0 : index
    %c9_196 = arith.constant 9 : index
    %c0_197 = arith.constant 0 : index
    %c0_198 = arith.constant 0 : index
    %281 = vector.load %arg18[%c0_195, %c9_196, %c0_197, %c0_198] : memref<3x12x8x8xf32, #tpu.memory_space<vmem>>, vector<1x3x8x8xf32>
    %282 = vector.shape_cast %281 : vector<1x3x8x8xf32> to vector<3x8x8xf32>
    %283 = vector.shape_cast %280 : vector<3x8x8xf32> to vector<1x3x8x8xf32>
    tpu.vector_store %arg18[%c0_195, %c9_196, %c0_197, %c0_198], %283 {strides = array<i32>} : memref<3x12x8x8xf32, #tpu.memory_space<vmem>>, vector<1x3x8x8xf32>,
    %284 = vector.extract_strided_slice %243 {offsets = [0, 0, 56], sizes = [3, 8, 8], strides = [1, 1, 1]} : vector<3x8x96xf32> to vector<3x8x8xf32>
    %c1_199 = arith.constant 1 : index
    %c9_200 = arith.constant 9 : index
    %c0_201 = arith.constant 0 : index
    %c0_202 = arith.constant 0 : index
    %285 = vector.load %arg18[%c1_199, %c9_200, %c0_201, %c0_202] : memref<3x12x8x8xf32, #tpu.memory_space<vmem>>, vector<1x3x8x8xf32>
    %286 = vector.shape_cast %285 : vector<1x3x8x8xf32> to vector<3x8x8xf32>
    %287 = vector.shape_cast %284 : vector<3x8x8xf32> to vector<1x3x8x8xf32>
    tpu.vector_store %arg18[%c1_199, %c9_200, %c0_201, %c0_202], %287 {strides = array<i32>} : memref<3x12x8x8xf32, #tpu.memory_space<vmem>>, vector<1x3x8x8xf32>,
    %288 = vector.extract_strided_slice %243 {offsets = [0, 0, 88], sizes = [3, 8, 8], strides = [1, 1, 1]} : vector<3x8x96xf32> to vector<3x8x8xf32>
    %c2_203 = arith.constant 2 : index
    %c9_204 = arith.constant 9 : index
    %c0_205 = arith.constant 0 : index
    %c0_206 = arith.constant 0 : index
    %289 = vector.load %arg18[%c2_203, %c9_204, %c0_205, %c0_206] : memref<3x12x8x8xf32, #tpu.memory_space<vmem>>, vector<1x3x8x8xf32>
    %290 = vector.shape_cast %289 : vector<1x3x8x8xf32> to vector<3x8x8xf32>
    %291 = vector.shape_cast %288 : vector<3x8x8xf32> to vector<1x3x8x8xf32>
    tpu.vector_store %arg18[%c2_203, %c9_204, %c0_205, %c0_206], %291 {strides = array<i32>} : memref<3x12x8x8xf32, #tpu.memory_space<vmem>>, vector<1x3x8x8xf32>,
    %c0_207 = arith.constant 0 : index
    %c0_208 = arith.constant 0 : index
    %c0_209 = arith.constant 0 : index
    %c0_210 = arith.constant 0 : index
    %292 = vector.load %arg18[%c0_207, %c0_208, %c0_209, %c0_210] : memref<3x12x8x8xf32, #tpu.memory_space<vmem>>, vector<1x12x8x8xf32>
    %293 = vector.shape_cast %292 : vector<1x12x8x8xf32> to vector<12x8x8xf32>
    %294 = arith.truncf %293 : vector<12x8x8xf32> to vector<12x8x8xbf16>
    %c1_211 = arith.constant 1 : index
    %c0_212 = arith.constant 0 : index
    %c0_213 = arith.constant 0 : index
    %c0_214 = arith.constant 0 : index
    %295 = vector.load %arg18[%c1_211, %c0_212, %c0_213, %c0_214] : memref<3x12x8x8xf32, #tpu.memory_space<vmem>>, vector<1x12x8x8xf32>
    %296 = vector.shape_cast %295 : vector<1x12x8x8xf32> to vector<12x8x8xf32>
    %297 = arith.truncf %296 : vector<12x8x8xf32> to vector<12x8x8xbf16>
    %c2_215 = arith.constant 2 : index
    %c0_216 = arith.constant 0 : index
    %c0_217 = arith.constant 0 : index
    %c0_218 = arith.constant 0 : index
    %298 = vector.load %arg18[%c2_215, %c0_216, %c0_217, %c0_218] : memref<3x12x8x8xf32, #tpu.memory_space<vmem>>, vector<1x12x8x8xf32>
    %299 = vector.shape_cast %298 : vector<1x12x8x8xf32> to vector<12x8x8xf32>
    %300 = arith.truncf %299 : vector<12x8x8xf32> to vector<12x8x8xbf16>
    "tpu.trace_start"() <{level = 10 : i32, message = "gqd,gkd->gqk"}> : () -> ()
    %cst_219 = arith.constant dense<0.000000e+00> : vector<12x8x8xf32>
    %301 = tpu.matmul %294, %297, %cst_219 {dimension_numbers = #tpu.dot_dimension_numbers<[2], [2], [1], [1], [0, 0, 0, 1, 1, 1], [0], [0]>} : vector<12x8x8xbf16>, vector<12x8x8xbf16>, vector<12x8x8xf32> -> vector<12x8x8xf32>
    "tpu.trace_stop"() : () -> ()
    %cst_220 = arith.constant 0.353553385 : f32
    %302 = vector.broadcast %cst_220 : f32 to vector<12x8x8xf32>
    %303 = arith.mulf %301, %302 : vector<12x8x8xf32>
    %304 = vector.shape_cast %5 : vector<8x8xf32> to vector<1x8x8xf32>
    %305 = vector.broadcast %304 : vector<1x8x8xf32> to vector<12x8x8xf32>
    %306 = arith.addf %303, %305 : vector<12x8x8xf32>
    %cst_221 = arith.constant dense<0xFF800000> : vector<12x8xf32>
    %307 = vector.multi_reduction <maximumf>, %306, %cst_221 [2] : vector<12x8x8xf32> to vector<12x8xf32>
    %308 = vector.shape_cast %307 : vector<12x8xf32> to vector<12x8x1xf32>
    %309 = vector.broadcast %308 : vector<12x8x1xf32> to vector<12x8x8xf32>
    %310 = arith.subf %306, %309 : vector<12x8x8xf32>
    %311 = math.exp %310 : vector<12x8x8xf32>
    %cst_222 = arith.constant dense<0.000000e+00> : vector<12x8xf32>
    %312 = vector.multi_reduction <add>, %311, %cst_222 [2] : vector<12x8x8xf32> to vector<12x8xf32>
    %313 = vector.shape_cast %312 : vector<12x8xf32> to vector<12x8x1xf32>
    %314 = tpu.reciprocal %313 {approx = true} : vector<12x8x1xf32> -> vector<12x8x1xf32>
    %315 = vector.broadcast %314 : vector<12x8x1xf32> to vector<12x8x8xf32>
    %316 = arith.mulf %311, %315 : vector<12x8x8xf32>
    %317 = arith.truncf %316 : vector<12x8x8xf32> to vector<12x8x8xbf16>
    "tpu.trace_start"() <{level = 10 : i32, message = "gqk,gkd->gqd"}> : () -> ()
    %cst_223 = arith.constant dense<0.000000e+00> : vector<12x8x8xf32>
    %318 = tpu.matmul %317, %300, %cst_223 {dimension_numbers = #tpu.dot_dimension_numbers<[2], [1], [1], [2], [0, 0, 0, 1, 1, 2], [0], [0]>} : vector<12x8x8xbf16>, vector<12x8x8xbf16>, vector<12x8x8xf32> -> vector<12x8x8xf32>
    "tpu.trace_stop"() : () -> ()
    %319 = vector.shape_cast %318 : vector<12x8x8xf32> to vector<4x24x8xf32>
    %320 = vector.extract_strided_slice %319 {offsets = [0, 0, 0], sizes = [1, 24, 8], strides = [1, 1, 1]} : vector<4x24x8xf32> to vector<1x24x8xf32>
    %321 = vector.shape_cast %320 : vector<1x24x8xf32> to vector<24x8xf32>
    %322 = arith.truncf %321 : vector<24x8xf32> to vector<24x8xbf16>
    %323 = vector.extract_strided_slice %204 {offsets = [0, 0], sizes = [8, 32], strides = [1, 1]} : vector<32x32xbf16> to vector<8x32xbf16>
    %cst_224 = arith.constant dense<0.000000e+00> : vector<24x32xf32>
    %324 = tpu.matmul %322, %323, %cst_224 {dimension_numbers = #tpu.dot_dimension_numbers<[1], [0], [0], [1], [0, 0, 1, 1], [], []>} : vector<24x8xbf16>, vector<8x32xbf16>, vector<24x32xf32> -> vector<24x32xf32>
    %325 = vector.broadcast %206 : vector<1x32xf32> to vector<24x32xf32>
    %326 = arith.addf %325, %324 : vector<24x32xf32>
    %327 = vector.extract_strided_slice %319 {offsets = [1, 0, 0], sizes = [1, 24, 8], strides = [1, 1, 1]} : vector<4x24x8xf32> to vector<1x24x8xf32>
    %328 = vector.shape_cast %327 : vector<1x24x8xf32> to vector<24x8xf32>
    %329 = arith.truncf %328 : vector<24x8xf32> to vector<24x8xbf16>
    %330 = vector.extract_strided_slice %204 {offsets = [8, 0], sizes = [8, 32], strides = [1, 1]} : vector<32x32xbf16> to vector<8x32xbf16>
    %cst_225 = arith.constant dense<0.000000e+00> : vector<24x32xf32>
    %331 = tpu.matmul %329, %330, %cst_225 {dimension_numbers = #tpu.dot_dimension_numbers<[1], [0], [0], [1], [0, 0, 1, 1], [], []>} : vector<24x8xbf16>, vector<8x32xbf16>, vector<24x32xf32> -> vector<24x32xf32>
    %332 = arith.addf %326, %331 : vector<24x32xf32>
    %333 = vector.extract_strided_slice %319 {offsets = [2, 0, 0], sizes = [1, 24, 8], strides = [1, 1, 1]} : vector<4x24x8xf32> to vector<1x24x8xf32>
    %334 = vector.shape_cast %333 : vector<1x24x8xf32> to vector<24x8xf32>
    %335 = arith.truncf %334 : vector<24x8xf32> to vector<24x8xbf16>
    %336 = vector.extract_strided_slice %204 {offsets = [16, 0], sizes = [8, 32], strides = [1, 1]} : vector<32x32xbf16> to vector<8x32xbf16>
    %cst_226 = arith.constant dense<0.000000e+00> : vector<24x32xf32>
    %337 = tpu.matmul %335, %336, %cst_226 {dimension_numbers = #tpu.dot_dimension_numbers<[1], [0], [0], [1], [0, 0, 1, 1], [], []>} : vector<24x8xbf16>, vector<8x32xbf16>, vector<24x32xf32> -> vector<24x32xf32>
    %338 = arith.addf %332, %337 : vector<24x32xf32>
    %339 = vector.extract_strided_slice %319 {offsets = [3, 0, 0], sizes = [1, 24, 8], strides = [1, 1, 1]} : vector<4x24x8xf32> to vector<1x24x8xf32>
    %340 = vector.shape_cast %339 : vector<1x24x8xf32> to vector<24x8xf32>
    %341 = arith.truncf %340 : vector<24x8xf32> to vector<24x8xbf16>
    %342 = vector.extract_strided_slice %204 {offsets = [24, 0], sizes = [8, 32], strides = [1, 1]} : vector<32x32xbf16> to vector<8x32xbf16>
    %cst_227 = arith.constant dense<0.000000e+00> : vector<24x32xf32>
    %343 = tpu.matmul %341, %342, %cst_227 {dimension_numbers = #tpu.dot_dimension_numbers<[1], [0], [0], [1], [0, 0, 1, 1], [], []>} : vector<24x8xbf16>, vector<8x32xbf16>, vector<24x32xf32> -> vector<24x32xf32>
    %344 = arith.addf %338, %343 : vector<24x32xf32>
    %345 = arith.addf %194, %344 : vector<24x32xf32>
    %cst_228 = arith.constant dense<0.000000e+00> : vector<24xf32>
    %346 = vector.multi_reduction <add>, %345, %cst_228 [1] : vector<24x32xf32> to vector<24xf32>
    %347 = vector.shape_cast %346 : vector<24xf32> to vector<24x1xf32>
    %cst_229 = arith.constant 3.200000e+01 : f32
    %348 = vector.broadcast %cst_229 : f32 to vector<24x1xf32>
    %349 = arith.divf %347, %348 : vector<24x1xf32>
    %350 = vector.broadcast %349 : vector<24x1xf32> to vector<24x32xf32>
    %351 = arith.subf %345, %350 : vector<24x32xf32>
    %352 = arith.mulf %351, %351 : vector<24x32xf32>
    %cst_230 = arith.constant dense<0.000000e+00> : vector<24xf32>
    %353 = vector.multi_reduction <add>, %352, %cst_230 [1] : vector<24x32xf32> to vector<24xf32>
    %354 = vector.shape_cast %353 : vector<24xf32> to vector<24x1xf32>
    %cst_231 = arith.constant 3.200000e+01 : f32
    %355 = vector.broadcast %cst_231 : f32 to vector<24x1xf32>
    %356 = arith.divf %354, %355 : vector<24x1xf32>
    %cst_232 = arith.constant 9.99999974E-6 : f32
    %357 = vector.broadcast %cst_232 : f32 to vector<24x1xf32>
    %358 = arith.addf %356, %357 : vector<24x1xf32>
    %359 = math.rsqrt %358 : vector<24x1xf32>
    %360 = vector.broadcast %359 : vector<24x1xf32> to vector<24x32xf32>
    %361 = arith.mulf %351, %360 : vector<24x32xf32>
    %362 = vector.broadcast %208 : vector<1x32xf32> to vector<24x32xf32>
    %363 = arith.mulf %361, %362 : vector<24x32xf32>
    %364 = vector.broadcast %210 : vector<1x32xf32> to vector<24x32xf32>
    %365 = arith.addf %363, %364 : vector<24x32xf32>
    %366 = arith.truncf %365 : vector<24x32xf32> to vector<24x32xbf16>
    %cst_233 = arith.constant dense<0.000000e+00> : vector<24x128xf32>
    %367 = tpu.matmul %366, %212, %cst_233 {dimension_numbers = #tpu.dot_dimension_numbers<[1], [0], [0], [1], [0, 0, 1, 1], [], []>} : vector<24x32xbf16>, vector<32x128xbf16>, vector<24x128xf32> -> vector<24x128xf32>
    %368 = vector.broadcast %214 : vector<1x128xf32> to vector<24x128xf32>
    %369 = arith.addf %367, %368 : vector<24x128xf32>
    %cst_234 = arith.constant 1.702000e+00 : f32
    %370 = vector.broadcast %cst_234 : f32 to vector<24x128xf32>
    %371 = arith.mulf %370, %369 : vector<24x128xf32>
    %372 = arith.negf %371 : vector<24x128xf32>
    %373 = math.exp %372 : vector<24x128xf32>
    %cst_235 = arith.constant 1.000000e+00 : f32
    %374 = vector.broadcast %cst_235 : f32 to vector<24x128xf32>
    %375 = arith.addf %374, %373 : vector<24x128xf32>
    %376 = arith.divf %374, %375 : vector<24x128xf32>
    %377 = arith.mulf %369, %376 : vector<24x128xf32>
    %378 = arith.truncf %377 : vector<24x128xf32> to vector<24x128xbf16>
    %cst_236 = arith.constant dense<0.000000e+00> : vector<24x32xf32>
    %379 = tpu.matmul %378, %216, %cst_236 {dimension_numbers = #tpu.dot_dimension_numbers<[1], [0], [0], [1], [0, 0, 1, 1], [], []>} : vector<24x128xbf16>, vector<128x32xbf16>, vector<24x32xf32> -> vector<24x32xf32>
    %380 = arith.addf %345, %379 : vector<24x32xf32>
    %381 = vector.broadcast %218 : vector<1x32xf32> to vector<24x32xf32>
    %382 = arith.addf %380, %381 : vector<24x32xf32>
    %c0_237 = arith.constant 0 : index
    %c0_238 = arith.constant 0 : index
    %383 = vector.load %arg1[%c0_237, %c0_238] : memref<3x24xf32, #tpu.memory_space<vmem>>, vector<3x24xf32>
    %cst_239 = arith.constant dense<0.000000e+00> : vector<3x32xf32>
    %384 = tpu.matmul %383, %382, %cst_239 {dimension_numbers = #tpu.dot_dimension_numbers<[1], [0], [0], [1], [0, 0, 1, 1], [], []>} : vector<3x24xf32>, vector<24x32xf32>, vector<3x32xf32> -> vector<3x32xf32>
    %c0_240 = arith.constant 0 : index
    %c0_241 = arith.constant 0 : index
    %385 = vector.load %arg14[%c0_240, %c0_241] : memref<1x32xf32, #tpu.memory_space<vmem>>, vector<1x32xf32>
    %c0_242 = arith.constant 0 : index
    %c0_243 = arith.constant 0 : index
    %386 = vector.load %arg15[%c0_242, %c0_243] : memref<1x32xf32, #tpu.memory_space<vmem>>, vector<1x32xf32>
    %cst_244 = arith.constant dense<0.000000e+00> : vector<3xf32>
    %387 = vector.multi_reduction <add>, %384, %cst_244 [1] : vector<3x32xf32> to vector<3xf32>
    %388 = vector.shape_cast %387 : vector<3xf32> to vector<3x1xf32>
    %cst_245 = arith.constant 3.200000e+01 : f32
    %389 = vector.broadcast %cst_245 : f32 to vector<3x1xf32>
    %390 = arith.divf %388, %389 : vector<3x1xf32>
    %391 = vector.broadcast %390 : vector<3x1xf32> to vector<3x32xf32>
    %392 = arith.subf %384, %391 : vector<3x32xf32>
    %393 = arith.mulf %392, %392 : vector<3x32xf32>
    %cst_246 = arith.constant dense<0.000000e+00> : vector<3xf32>
    %394 = vector.multi_reduction <add>, %393, %cst_246 [1] : vector<3x32xf32> to vector<3xf32>
    %395 = vector.shape_cast %394 : vector<3xf32> to vector<3x1xf32>
    %cst_247 = arith.constant 3.200000e+01 : f32
    %396 = vector.broadcast %cst_247 : f32 to vector<3x1xf32>
    %397 = arith.divf %395, %396 : vector<3x1xf32>
    %cst_248 = arith.constant 9.99999974E-6 : f32
    %398 = vector.broadcast %cst_248 : f32 to vector<3x1xf32>
    %399 = arith.addf %397, %398 : vector<3x1xf32>
    %400 = math.rsqrt %399 : vector<3x1xf32>
    %401 = vector.broadcast %400 : vector<3x1xf32> to vector<3x32xf32>
    %402 = arith.mulf %392, %401 : vector<3x32xf32>
    %403 = vector.broadcast %385 : vector<1x32xf32> to vector<3x32xf32>
    %404 = arith.mulf %402, %403 : vector<3x32xf32>
    %405 = vector.broadcast %386 : vector<1x32xf32> to vector<3x32xf32>
    %406 = arith.addf %404, %405 : vector<3x32xf32>
    %407 = arith.truncf %406 : vector<3x32xf32> to vector<3x32xbf16>
    %c0_249 = arith.constant 0 : index
    %c0_250 = arith.constant 0 : index
    %408 = vector.load %arg16[%c0_249, %c0_250] : memref<32x32xbf16, #tpu.memory_space<vmem>>, vector<32x32xbf16>
    %cst_251 = arith.constant dense<0.000000e+00> : vector<3x32xf32>
    %409 = tpu.matmul %407, %408, %cst_251 {dimension_numbers = #tpu.dot_dimension_numbers<[1], [0], [0], [1], [0, 0, 1, 1], [], []>} : vector<3x32xbf16>, vector<32x32xbf16>, vector<3x32xf32> -> vector<3x32xf32>
    %410 = arith.mulf %409, %409 : vector<3x32xf32>
    %cst_252 = arith.constant dense<0.000000e+00> : vector<3xf32>
    %411 = vector.multi_reduction <add>, %410, %cst_252 [1] : vector<3x32xf32> to vector<3xf32>
    %412 = vector.shape_cast %411 : vector<3xf32> to vector<3x1xf32>
    %cst_253 = arith.constant 9.99999996E-13 : f32
    %413 = vector.broadcast %cst_253 : f32 to vector<3x1xf32>
    %414 = arith.addf %412, %413 : vector<3x1xf32>
    %415 = math.rsqrt %414 : vector<3x1xf32>
    %416 = vector.broadcast %415 : vector<3x1xf32> to vector<3x32xf32>
    %417 = arith.mulf %409, %416 : vector<3x32xf32>
    %c0_254 = arith.constant 0 : index
    %c0_255 = arith.constant 0 : index
    %418 = vector.load %arg17[%c0_254, %c0_255] : memref<3x32xf32, #tpu.memory_space<vmem>>, vector<3x32xf32>
    tpu.vector_store %arg17[%c0_254, %c0_255], %417 {strides = array<i32>} : memref<3x32xf32, #tpu.memory_space<vmem>>, vector<3x32xf32>,
    return
  }
}

module attributes {stable_mosaic.version = 11 : i64} {
  func.func @_vision_logits_kernel(%arg0: memref<10x192xf32, #tpu.memory_space<vmem>>, %arg1: memref<192x32xbf16, #tpu.memory_space<vmem>>, %arg2: memref<10x32xf32, #tpu.memory_space<vmem>>, %arg3: memref<1x32xf32, #tpu.memory_space<vmem>>, %arg4: memref<1x32xf32, #tpu.memory_space<vmem>>, %arg5: memref<2x1x32xf32, #tpu.memory_space<vmem>>, %arg6: memref<2x1x32xf32, #tpu.memory_space<vmem>>, %arg7: memref<2x32x96xbf16, #tpu.memory_space<vmem>>, %arg8: memref<2x1x96xf32, #tpu.memory_space<vmem>>, %arg9: memref<2x32x32xbf16, #tpu.memory_space<vmem>>, %arg10: memref<2x1x32xf32, #tpu.memory_space<vmem>>, %arg11: memref<2x1x32xf32, #tpu.memory_space<vmem>>, %arg12: memref<2x1x32xf32, #tpu.memory_space<vmem>>, %arg13: memref<2x32x128xbf16, #tpu.memory_space<vmem>>, %arg14: memref<2x1x128xf32, #tpu.memory_space<vmem>>, %arg15: memref<2x128x32xbf16, #tpu.memory_space<vmem>>, %arg16: memref<2x1x32xf32, #tpu.memory_space<vmem>>, %arg17: memref<1x32xf32, #tpu.memory_space<vmem>>, %arg18: memref<1x32xf32, #tpu.memory_space<vmem>>, %arg19: memref<32x32xbf16, #tpu.memory_space<vmem>>, %arg20: memref<2x10xf32, #tpu.memory_space<vmem>>, %arg21: memref<3x32xf32, #tpu.memory_space<vmem>>, %arg22: memref<1x1xf32, #tpu.memory_space<vmem>>, %arg23: memref<2x3xf32, #tpu.memory_space<vmem>>, %arg24: memref<3x8x5x8xf32, #tpu.memory_space<vmem>>) attributes {dimension_semantics = [], scalar_prefetch = 0 : i64, scratch_operands = 1 : i64, tpu.core_type = #tpu.core_type<tc>} {
    %c0 = arith.constant 0 : index
    %c0_0 = arith.constant 0 : index
    %0 = vector.load %arg0[%c0, %c0_0] : memref<10x192xf32, #tpu.memory_space<vmem>>, vector<10x192xf32>
    %1 = arith.truncf %0 : vector<10x192xf32> to vector<10x192xbf16>
    %c0_1 = arith.constant 0 : index
    %c0_2 = arith.constant 0 : index
    %2 = vector.load %arg1[%c0_1, %c0_2] : memref<192x32xbf16, #tpu.memory_space<vmem>>, vector<192x32xbf16>
    %cst = arith.constant dense<0.000000e+00> : vector<10x32xf32>
    %3 = tpu.matmul %1, %2, %cst {dimension_numbers = #tpu.dot_dimension_numbers<[1], [0], [0], [1], [0, 0, 1, 1], [], []>} : vector<10x192xbf16>, vector<192x32xbf16>, vector<10x32xf32> -> vector<10x32xf32>
    %c0_3 = arith.constant 0 : index
    %c0_4 = arith.constant 0 : index
    %4 = vector.load %arg2[%c0_3, %c0_4] : memref<10x32xf32, #tpu.memory_space<vmem>>, vector<10x32xf32>
    %5 = arith.addf %3, %4 : vector<10x32xf32>
    %c0_5 = arith.constant 0 : index
    %c0_6 = arith.constant 0 : index
    %6 = vector.load %arg3[%c0_5, %c0_6] : memref<1x32xf32, #tpu.memory_space<vmem>>, vector<1x32xf32>
    %c0_7 = arith.constant 0 : index
    %c0_8 = arith.constant 0 : index
    %7 = vector.load %arg4[%c0_7, %c0_8] : memref<1x32xf32, #tpu.memory_space<vmem>>, vector<1x32xf32>
    %cst_9 = arith.constant dense<0.000000e+00> : vector<10xf32>
    %8 = vector.multi_reduction <add>, %5, %cst_9 [1] : vector<10x32xf32> to vector<10xf32>
    %9 = vector.shape_cast %8 : vector<10xf32> to vector<10x1xf32>
    %cst_10 = arith.constant 3.200000e+01 : f32
    %10 = vector.broadcast %cst_10 : f32 to vector<10x1xf32>
    %11 = arith.divf %9, %10 : vector<10x1xf32>
    %12 = vector.broadcast %11 : vector<10x1xf32> to vector<10x32xf32>
    %13 = arith.subf %5, %12 : vector<10x32xf32>
    %14 = arith.mulf %13, %13 : vector<10x32xf32>
    %cst_11 = arith.constant dense<0.000000e+00> : vector<10xf32>
    %15 = vector.multi_reduction <add>, %14, %cst_11 [1] : vector<10x32xf32> to vector<10xf32>
    %16 = vector.shape_cast %15 : vector<10xf32> to vector<10x1xf32>
    %cst_12 = arith.constant 3.200000e+01 : f32
    %17 = vector.broadcast %cst_12 : f32 to vector<10x1xf32>
    %18 = arith.divf %16, %17 : vector<10x1xf32>
    %cst_13 = arith.constant 9.99999974E-6 : f32
    %19 = vector.broadcast %cst_13 : f32 to vector<10x1xf32>
    %20 = arith.addf %18, %19 : vector<10x1xf32>
    %21 = math.rsqrt %20 : vector<10x1xf32>
    %22 = vector.broadcast %21 : vector<10x1xf32> to vector<10x32xf32>
    %23 = arith.mulf %13, %22 : vector<10x32xf32>
    %24 = vector.broadcast %6 : vector<1x32xf32> to vector<10x32xf32>
    %25 = arith.mulf %23, %24 : vector<10x32xf32>
    %26 = vector.broadcast %7 : vector<1x32xf32> to vector<10x32xf32>
    %27 = arith.addf %25, %26 : vector<10x32xf32>
    %c0_14 = arith.constant 0 : index
    %c0_15 = arith.constant 0 : index
    %c0_16 = arith.constant 0 : index
    %28 = vector.load %arg5[%c0_14, %c0_15, %c0_16] : memref<2x1x32xf32, #tpu.memory_space<vmem>>, vector<1x1x32xf32>
    %29 = vector.shape_cast %28 : vector<1x1x32xf32> to vector<1x32xf32>
    %c0_17 = arith.constant 0 : index
    %c0_18 = arith.constant 0 : index
    %c0_19 = arith.constant 0 : index
    %30 = vector.load %arg6[%c0_17, %c0_18, %c0_19] : memref<2x1x32xf32, #tpu.memory_space<vmem>>, vector<1x1x32xf32>
    %31 = vector.shape_cast %30 : vector<1x1x32xf32> to vector<1x32xf32>
    %c0_20 = arith.constant 0 : index
    %c0_21 = arith.constant 0 : index
    %c0_22 = arith.constant 0 : index
    %32 = vector.load %arg7[%c0_20, %c0_21, %c0_22] : memref<2x32x96xbf16, #tpu.memory_space<vmem>>, vector<1x32x96xbf16>
    %33 = vector.shape_cast %32 : vector<1x32x96xbf16> to vector<32x96xbf16>
    %c0_23 = arith.constant 0 : index
    %c0_24 = arith.constant 0 : index
    %c0_25 = arith.constant 0 : index
    %34 = vector.load %arg8[%c0_23, %c0_24, %c0_25] : memref<2x1x96xf32, #tpu.memory_space<vmem>>, vector<1x1x96xf32>
    %35 = vector.shape_cast %34 : vector<1x1x96xf32> to vector<1x96xf32>
    %c0_26 = arith.constant 0 : index
    %c0_27 = arith.constant 0 : index
    %c0_28 = arith.constant 0 : index
    %36 = vector.load %arg9[%c0_26, %c0_27, %c0_28] : memref<2x32x32xbf16, #tpu.memory_space<vmem>>, vector<1x32x32xbf16>
    %37 = vector.shape_cast %36 : vector<1x32x32xbf16> to vector<32x32xbf16>
    %c0_29 = arith.constant 0 : index
    %c0_30 = arith.constant 0 : index
    %c0_31 = arith.constant 0 : index
    %38 = vector.load %arg10[%c0_29, %c0_30, %c0_31] : memref<2x1x32xf32, #tpu.memory_space<vmem>>, vector<1x1x32xf32>
    %39 = vector.shape_cast %38 : vector<1x1x32xf32> to vector<1x32xf32>
    %c0_32 = arith.constant 0 : index
    %c0_33 = arith.constant 0 : index
    %c0_34 = arith.constant 0 : index
    %40 = vector.load %arg11[%c0_32, %c0_33, %c0_34] : memref<2x1x32xf32, #tpu.memory_space<vmem>>, vector<1x1x32xf32>
    %41 = vector.shape_cast %40 : vector<1x1x32xf32> to vector<1x32xf32>
    %c0_35 = arith.constant 0 : index
    %c0_36 = arith.constant 0 : index
    %c0_37 = arith.constant 0 : index
    %42 = vector.load %arg12[%c0_35, %c0_36, %c0_37] : memref<2x1x32xf32, #tpu.memory_space<vmem>>, vector<1x1x32xf32>
    %43 = vector.shape_cast %42 : vector<1x1x32xf32> to vector<1x32xf32>
    %c0_38 = arith.constant 0 : index
    %c0_39 = arith.constant 0 : index
    %c0_40 = arith.constant 0 : index
    %44 = vector.load %arg13[%c0_38, %c0_39, %c0_40] : memref<2x32x128xbf16, #tpu.memory_space<vmem>>, vector<1x32x128xbf16>
    %45 = vector.shape_cast %44 : vector<1x32x128xbf16> to vector<32x128xbf16>
    %c0_41 = arith.constant 0 : index
    %c0_42 = arith.constant 0 : index
    %c0_43 = arith.constant 0 : index
    %46 = vector.load %arg14[%c0_41, %c0_42, %c0_43] : memref<2x1x128xf32, #tpu.memory_space<vmem>>, vector<1x1x128xf32>
    %47 = vector.shape_cast %46 : vector<1x1x128xf32> to vector<1x128xf32>
    %c0_44 = arith.constant 0 : index
    %c0_45 = arith.constant 0 : index
    %c0_46 = arith.constant 0 : index
    %48 = vector.load %arg15[%c0_44, %c0_45, %c0_46] : memref<2x128x32xbf16, #tpu.memory_space<vmem>>, vector<1x128x32xbf16>
    %49 = vector.shape_cast %48 : vector<1x128x32xbf16> to vector<128x32xbf16>
    %c0_47 = arith.constant 0 : index
    %c0_48 = arith.constant 0 : index
    %c0_49 = arith.constant 0 : index
    %50 = vector.load %arg16[%c0_47, %c0_48, %c0_49] : memref<2x1x32xf32, #tpu.memory_space<vmem>>, vector<1x1x32xf32>
    %51 = vector.shape_cast %50 : vector<1x1x32xf32> to vector<1x32xf32>
    %cst_50 = arith.constant dense<0.000000e+00> : vector<10xf32>
    %52 = vector.multi_reduction <add>, %27, %cst_50 [1] : vector<10x32xf32> to vector<10xf32>
    %53 = vector.shape_cast %52 : vector<10xf32> to vector<10x1xf32>
    %cst_51 = arith.constant 3.200000e+01 : f32
    %54 = vector.broadcast %cst_51 : f32 to vector<10x1xf32>
    %55 = arith.divf %53, %54 : vector<10x1xf32>
    %56 = vector.broadcast %55 : vector<10x1xf32> to vector<10x32xf32>
    %57 = arith.subf %27, %56 : vector<10x32xf32>
    %58 = arith.mulf %57, %57 : vector<10x32xf32>
    %cst_52 = arith.constant dense<0.000000e+00> : vector<10xf32>
    %59 = vector.multi_reduction <add>, %58, %cst_52 [1] : vector<10x32xf32> to vector<10xf32>
    %60 = vector.shape_cast %59 : vector<10xf32> to vector<10x1xf32>
    %cst_53 = arith.constant 3.200000e+01 : f32
    %61 = vector.broadcast %cst_53 : f32 to vector<10x1xf32>
    %62 = arith.divf %60, %61 : vector<10x1xf32>
    %cst_54 = arith.constant 9.99999974E-6 : f32
    %63 = vector.broadcast %cst_54 : f32 to vector<10x1xf32>
    %64 = arith.addf %62, %63 : vector<10x1xf32>
    %65 = math.rsqrt %64 : vector<10x1xf32>
    %66 = vector.broadcast %65 : vector<10x1xf32> to vector<10x32xf32>
    %67 = arith.mulf %57, %66 : vector<10x32xf32>
    %68 = vector.broadcast %29 : vector<1x32xf32> to vector<10x32xf32>
    %69 = arith.mulf %67, %68 : vector<10x32xf32>
    %70 = vector.broadcast %31 : vector<1x32xf32> to vector<10x32xf32>
    %71 = arith.addf %69, %70 : vector<10x32xf32>
    %72 = arith.truncf %71 : vector<10x32xf32> to vector<10x32xbf16>
    %cst_55 = arith.constant dense<0.000000e+00> : vector<10x96xf32>
    %73 = tpu.matmul %72, %33, %cst_55 {dimension_numbers = #tpu.dot_dimension_numbers<[1], [0], [0], [1], [0, 0, 1, 1], [], []>} : vector<10x32xbf16>, vector<32x96xbf16>, vector<10x96xf32> -> vector<10x96xf32>
    %74 = vector.broadcast %35 : vector<1x96xf32> to vector<10x96xf32>
    %75 = arith.addf %73, %74 : vector<10x96xf32>
    %76 = vector.shape_cast %75 : vector<10x96xf32> to vector<2x5x96xf32>
    %77 = vector.extract_strided_slice %76 {offsets = [0, 0, 0], sizes = [2, 5, 8], strides = [1, 1, 1]} : vector<2x5x96xf32> to vector<2x5x8xf32>
    %c0_56 = arith.constant 0 : index
    %c0_57 = arith.constant 0 : index
    %c0_58 = arith.constant 0 : index
    %c0_59 = arith.constant 0 : index
    %78 = vector.load %arg24[%c0_56, %c0_57, %c0_58, %c0_59] : memref<3x8x5x8xf32, #tpu.memory_space<vmem>>, vector<1x2x5x8xf32>
    %79 = vector.shape_cast %78 : vector<1x2x5x8xf32> to vector<2x5x8xf32>
    %80 = vector.shape_cast %77 : vector<2x5x8xf32> to vector<1x2x5x8xf32>
    tpu.vector_store %arg24[%c0_56, %c0_57, %c0_58, %c0_59], %80 {strides = array<i32>} : memref<3x8x5x8xf32, #tpu.memory_space<vmem>>, vector<1x2x5x8xf32>,
    %81 = vector.extract_strided_slice %76 {offsets = [0, 0, 32], sizes = [2, 5, 8], strides = [1, 1, 1]} : vector<2x5x96xf32> to vector<2x5x8xf32>
    %c1 = arith.constant 1 : index
    %c0_60 = arith.constant 0 : index
    %c0_61 = arith.constant 0 : index
    %c0_62 = arith.constant 0 : index
    %82 = vector.load %arg24[%c1, %c0_60, %c0_61, %c0_62] : memref<3x8x5x8xf32, #tpu.memory_space<vmem>>, vector<1x2x5x8xf32>
    %83 = vector.shape_cast %82 : vector<1x2x5x8xf32> to vector<2x5x8xf32>
    %84 = vector.shape_cast %81 : vector<2x5x8xf32> to vector<1x2x5x8xf32>
    tpu.vector_store %arg24[%c1, %c0_60, %c0_61, %c0_62], %84 {strides = array<i32>} : memref<3x8x5x8xf32, #tpu.memory_space<vmem>>, vector<1x2x5x8xf32>,
    %85 = vector.extract_strided_slice %76 {offsets = [0, 0, 64], sizes = [2, 5, 8], strides = [1, 1, 1]} : vector<2x5x96xf32> to vector<2x5x8xf32>
    %c2 = arith.constant 2 : index
    %c0_63 = arith.constant 0 : index
    %c0_64 = arith.constant 0 : index
    %c0_65 = arith.constant 0 : index
    %86 = vector.load %arg24[%c2, %c0_63, %c0_64, %c0_65] : memref<3x8x5x8xf32, #tpu.memory_space<vmem>>, vector<1x2x5x8xf32>
    %87 = vector.shape_cast %86 : vector<1x2x5x8xf32> to vector<2x5x8xf32>
    %88 = vector.shape_cast %85 : vector<2x5x8xf32> to vector<1x2x5x8xf32>
    tpu.vector_store %arg24[%c2, %c0_63, %c0_64, %c0_65], %88 {strides = array<i32>} : memref<3x8x5x8xf32, #tpu.memory_space<vmem>>, vector<1x2x5x8xf32>,
    %89 = vector.extract_strided_slice %76 {offsets = [0, 0, 8], sizes = [2, 5, 8], strides = [1, 1, 1]} : vector<2x5x96xf32> to vector<2x5x8xf32>
    %c0_66 = arith.constant 0 : index
    %c2_67 = arith.constant 2 : index
    %c0_68 = arith.constant 0 : index
    %c0_69 = arith.constant 0 : index
    %90 = vector.load %arg24[%c0_66, %c2_67, %c0_68, %c0_69] : memref<3x8x5x8xf32, #tpu.memory_space<vmem>>, vector<1x2x5x8xf32>
    %91 = vector.shape_cast %90 : vector<1x2x5x8xf32> to vector<2x5x8xf32>
    %92 = vector.shape_cast %89 : vector<2x5x8xf32> to vector<1x2x5x8xf32>
    tpu.vector_store %arg24[%c0_66, %c2_67, %c0_68, %c0_69], %92 {strides = array<i32>} : memref<3x8x5x8xf32, #tpu.memory_space<vmem>>, vector<1x2x5x8xf32>,
    %93 = vector.extract_strided_slice %76 {offsets = [0, 0, 40], sizes = [2, 5, 8], strides = [1, 1, 1]} : vector<2x5x96xf32> to vector<2x5x8xf32>
    %c1_70 = arith.constant 1 : index
    %c2_71 = arith.constant 2 : index
    %c0_72 = arith.constant 0 : index
    %c0_73 = arith.constant 0 : index
    %94 = vector.load %arg24[%c1_70, %c2_71, %c0_72, %c0_73] : memref<3x8x5x8xf32, #tpu.memory_space<vmem>>, vector<1x2x5x8xf32>
    %95 = vector.shape_cast %94 : vector<1x2x5x8xf32> to vector<2x5x8xf32>
    %96 = vector.shape_cast %93 : vector<2x5x8xf32> to vector<1x2x5x8xf32>
    tpu.vector_store %arg24[%c1_70, %c2_71, %c0_72, %c0_73], %96 {strides = array<i32>} : memref<3x8x5x8xf32, #tpu.memory_space<vmem>>, vector<1x2x5x8xf32>,
    %97 = vector.extract_strided_slice %76 {offsets = [0, 0, 72], sizes = [2, 5, 8], strides = [1, 1, 1]} : vector<2x5x96xf32> to vector<2x5x8xf32>
    %c2_74 = arith.constant 2 : index
    %c2_75 = arith.constant 2 : index
    %c0_76 = arith.constant 0 : index
    %c0_77 = arith.constant 0 : index
    %98 = vector.load %arg24[%c2_74, %c2_75, %c0_76, %c0_77] : memref<3x8x5x8xf32, #tpu.memory_space<vmem>>, vector<1x2x5x8xf32>
    %99 = vector.shape_cast %98 : vector<1x2x5x8xf32> to vector<2x5x8xf32>
    %100 = vector.shape_cast %97 : vector<2x5x8xf32> to vector<1x2x5x8xf32>
    tpu.vector_store %arg24[%c2_74, %c2_75, %c0_76, %c0_77], %100 {strides = array<i32>} : memref<3x8x5x8xf32, #tpu.memory_space<vmem>>, vector<1x2x5x8xf32>,
    %101 = vector.extract_strided_slice %76 {offsets = [0, 0, 16], sizes = [2, 5, 8], strides = [1, 1, 1]} : vector<2x5x96xf32> to vector<2x5x8xf32>
    %c0_78 = arith.constant 0 : index
    %c4 = arith.constant 4 : index
    %c0_79 = arith.constant 0 : index
    %c0_80 = arith.constant 0 : index
    %102 = vector.load %arg24[%c0_78, %c4, %c0_79, %c0_80] : memref<3x8x5x8xf32, #tpu.memory_space<vmem>>, vector<1x2x5x8xf32>
    %103 = vector.shape_cast %102 : vector<1x2x5x8xf32> to vector<2x5x8xf32>
    %104 = vector.shape_cast %101 : vector<2x5x8xf32> to vector<1x2x5x8xf32>
    tpu.vector_store %arg24[%c0_78, %c4, %c0_79, %c0_80], %104 {strides = array<i32>} : memref<3x8x5x8xf32, #tpu.memory_space<vmem>>, vector<1x2x5x8xf32>,
    %105 = vector.extract_strided_slice %76 {offsets = [0, 0, 48], sizes = [2, 5, 8], strides = [1, 1, 1]} : vector<2x5x96xf32> to vector<2x5x8xf32>
    %c1_81 = arith.constant 1 : index
    %c4_82 = arith.constant 4 : index
    %c0_83 = arith.constant 0 : index
    %c0_84 = arith.constant 0 : index
    %106 = vector.load %arg24[%c1_81, %c4_82, %c0_83, %c0_84] : memref<3x8x5x8xf32, #tpu.memory_space<vmem>>, vector<1x2x5x8xf32>
    %107 = vector.shape_cast %106 : vector<1x2x5x8xf32> to vector<2x5x8xf32>
    %108 = vector.shape_cast %105 : vector<2x5x8xf32> to vector<1x2x5x8xf32>
    tpu.vector_store %arg24[%c1_81, %c4_82, %c0_83, %c0_84], %108 {strides = array<i32>} : memref<3x8x5x8xf32, #tpu.memory_space<vmem>>, vector<1x2x5x8xf32>,
    %109 = vector.extract_strided_slice %76 {offsets = [0, 0, 80], sizes = [2, 5, 8], strides = [1, 1, 1]} : vector<2x5x96xf32> to vector<2x5x8xf32>
    %c2_85 = arith.constant 2 : index
    %c4_86 = arith.constant 4 : index
    %c0_87 = arith.constant 0 : index
    %c0_88 = arith.constant 0 : index
    %110 = vector.load %arg24[%c2_85, %c4_86, %c0_87, %c0_88] : memref<3x8x5x8xf32, #tpu.memory_space<vmem>>, vector<1x2x5x8xf32>
    %111 = vector.shape_cast %110 : vector<1x2x5x8xf32> to vector<2x5x8xf32>
    %112 = vector.shape_cast %109 : vector<2x5x8xf32> to vector<1x2x5x8xf32>
    tpu.vector_store %arg24[%c2_85, %c4_86, %c0_87, %c0_88], %112 {strides = array<i32>} : memref<3x8x5x8xf32, #tpu.memory_space<vmem>>, vector<1x2x5x8xf32>,
    %113 = vector.extract_strided_slice %76 {offsets = [0, 0, 24], sizes = [2, 5, 8], strides = [1, 1, 1]} : vector<2x5x96xf32> to vector<2x5x8xf32>
    %c0_89 = arith.constant 0 : index
    %c6 = arith.constant 6 : index
    %c0_90 = arith.constant 0 : index
    %c0_91 = arith.constant 0 : index
    %114 = vector.load %arg24[%c0_89, %c6, %c0_90, %c0_91] : memref<3x8x5x8xf32, #tpu.memory_space<vmem>>, vector<1x2x5x8xf32>
    %115 = vector.shape_cast %114 : vector<1x2x5x8xf32> to vector<2x5x8xf32>
    %116 = vector.shape_cast %113 : vector<2x5x8xf32> to vector<1x2x5x8xf32>
    tpu.vector_store %arg24[%c0_89, %c6, %c0_90, %c0_91], %116 {strides = array<i32>} : memref<3x8x5x8xf32, #tpu.memory_space<vmem>>, vector<1x2x5x8xf32>,
    %117 = vector.extract_strided_slice %76 {offsets = [0, 0, 56], sizes = [2, 5, 8], strides = [1, 1, 1]} : vector<2x5x96xf32> to vector<2x5x8xf32>
    %c1_92 = arith.constant 1 : index
    %c6_93 = arith.constant 6 : index
    %c0_94 = arith.constant 0 : index
    %c0_95 = arith.constant 0 : index
    %118 = vector.load %arg24[%c1_92, %c6_93, %c0_94, %c0_95] : memref<3x8x5x8xf32, #tpu.memory_space<vmem>>, vector<1x2x5x8xf32>
    %119 = vector.shape_cast %118 : vector<1x2x5x8xf32> to vector<2x5x8xf32>
    %120 = vector.shape_cast %117 : vector<2x5x8xf32> to vector<1x2x5x8xf32>
    tpu.vector_store %arg24[%c1_92, %c6_93, %c0_94, %c0_95], %120 {strides = array<i32>} : memref<3x8x5x8xf32, #tpu.memory_space<vmem>>, vector<1x2x5x8xf32>,
    %121 = vector.extract_strided_slice %76 {offsets = [0, 0, 88], sizes = [2, 5, 8], strides = [1, 1, 1]} : vector<2x5x96xf32> to vector<2x5x8xf32>
    %c2_96 = arith.constant 2 : index
    %c6_97 = arith.constant 6 : index
    %c0_98 = arith.constant 0 : index
    %c0_99 = arith.constant 0 : index
    %122 = vector.load %arg24[%c2_96, %c6_97, %c0_98, %c0_99] : memref<3x8x5x8xf32, #tpu.memory_space<vmem>>, vector<1x2x5x8xf32>
    %123 = vector.shape_cast %122 : vector<1x2x5x8xf32> to vector<2x5x8xf32>
    %124 = vector.shape_cast %121 : vector<2x5x8xf32> to vector<1x2x5x8xf32>
    tpu.vector_store %arg24[%c2_96, %c6_97, %c0_98, %c0_99], %124 {strides = array<i32>} : memref<3x8x5x8xf32, #tpu.memory_space<vmem>>, vector<1x2x5x8xf32>,
    %c0_100 = arith.constant 0 : index
    %c0_101 = arith.constant 0 : index
    %c0_102 = arith.constant 0 : index
    %c0_103 = arith.constant 0 : index
    %125 = vector.load %arg24[%c0_100, %c0_101, %c0_102, %c0_103] : memref<3x8x5x8xf32, #tpu.memory_space<vmem>>, vector<1x8x5x8xf32>
    %126 = vector.shape_cast %125 : vector<1x8x5x8xf32> to vector<8x5x8xf32>
    %127 = arith.truncf %126 : vector<8x5x8xf32> to vector<8x5x8xbf16>
    %c1_104 = arith.constant 1 : index
    %c0_105 = arith.constant 0 : index
    %c0_106 = arith.constant 0 : index
    %c0_107 = arith.constant 0 : index
    %128 = vector.load %arg24[%c1_104, %c0_105, %c0_106, %c0_107] : memref<3x8x5x8xf32, #tpu.memory_space<vmem>>, vector<1x8x5x8xf32>
    %129 = vector.shape_cast %128 : vector<1x8x5x8xf32> to vector<8x5x8xf32>
    %130 = arith.truncf %129 : vector<8x5x8xf32> to vector<8x5x8xbf16>
    %c2_108 = arith.constant 2 : index
    %c0_109 = arith.constant 0 : index
    %c0_110 = arith.constant 0 : index
    %c0_111 = arith.constant 0 : index
    %131 = vector.load %arg24[%c2_108, %c0_109, %c0_110, %c0_111] : memref<3x8x5x8xf32, #tpu.memory_space<vmem>>, vector<1x8x5x8xf32>
    %132 = vector.shape_cast %131 : vector<1x8x5x8xf32> to vector<8x5x8xf32>
    %133 = arith.truncf %132 : vector<8x5x8xf32> to vector<8x5x8xbf16>
    "tpu.trace_start"() <{level = 10 : i32, message = "gqd,gkd->gqk"}> : () -> ()
    %cst_112 = arith.constant dense<0.000000e+00> : vector<8x5x5xf32>
    %134 = tpu.matmul %127, %130, %cst_112 {dimension_numbers = #tpu.dot_dimension_numbers<[2], [2], [1], [1], [0, 0, 0, 1, 1, 1], [0], [0]>} : vector<8x5x8xbf16>, vector<8x5x8xbf16>, vector<8x5x5xf32> -> vector<8x5x5xf32>
    "tpu.trace_stop"() : () -> ()
    %cst_113 = arith.constant 0.353553385 : f32
    %135 = vector.broadcast %cst_113 : f32 to vector<8x5x5xf32>
    %136 = arith.mulf %134, %135 : vector<8x5x5xf32>
    %cst_114 = arith.constant dense<0xFF800000> : vector<8x5xf32>
    %137 = vector.multi_reduction <maximumf>, %136, %cst_114 [2] : vector<8x5x5xf32> to vector<8x5xf32>
    %138 = vector.shape_cast %137 : vector<8x5xf32> to vector<8x5x1xf32>
    %139 = vector.broadcast %138 : vector<8x5x1xf32> to vector<8x5x5xf32>
    %140 = arith.subf %136, %139 : vector<8x5x5xf32>
    %141 = math.exp %140 : vector<8x5x5xf32>
    %cst_115 = arith.constant dense<0.000000e+00> : vector<8x5xf32>
    %142 = vector.multi_reduction <add>, %141, %cst_115 [2] : vector<8x5x5xf32> to vector<8x5xf32>
    %143 = vector.shape_cast %142 : vector<8x5xf32> to vector<8x5x1xf32>
    %144 = tpu.reciprocal %143 {approx = true} : vector<8x5x1xf32> -> vector<8x5x1xf32>
    %145 = vector.broadcast %144 : vector<8x5x1xf32> to vector<8x5x5xf32>
    %146 = arith.mulf %141, %145 : vector<8x5x5xf32>
    %147 = arith.truncf %146 : vector<8x5x5xf32> to vector<8x5x5xbf16>
    "tpu.trace_start"() <{level = 10 : i32, message = "gqk,gkd->gqd"}> : () -> ()
    %cst_116 = arith.constant dense<0.000000e+00> : vector<8x5x8xf32>
    %148 = tpu.matmul %147, %133, %cst_116 {dimension_numbers = #tpu.dot_dimension_numbers<[2], [1], [1], [2], [0, 0, 0, 1, 1, 2], [0], [0]>} : vector<8x5x5xbf16>, vector<8x5x8xbf16>, vector<8x5x8xf32> -> vector<8x5x8xf32>
    "tpu.trace_stop"() : () -> ()
    %149 = vector.shape_cast %148 : vector<8x5x8xf32> to vector<4x10x8xf32>
    %150 = vector.extract_strided_slice %149 {offsets = [0, 0, 0], sizes = [1, 10, 8], strides = [1, 1, 1]} : vector<4x10x8xf32> to vector<1x10x8xf32>
    %151 = vector.shape_cast %150 : vector<1x10x8xf32> to vector<10x8xf32>
    %152 = arith.truncf %151 : vector<10x8xf32> to vector<10x8xbf16>
    %153 = vector.extract_strided_slice %37 {offsets = [0, 0], sizes = [8, 32], strides = [1, 1]} : vector<32x32xbf16> to vector<8x32xbf16>
    %cst_117 = arith.constant dense<0.000000e+00> : vector<10x32xf32>
    %154 = tpu.matmul %152, %153, %cst_117 {dimension_numbers = #tpu.dot_dimension_numbers<[1], [0], [0], [1], [0, 0, 1, 1], [], []>} : vector<10x8xbf16>, vector<8x32xbf16>, vector<10x32xf32> -> vector<10x32xf32>
    %155 = vector.broadcast %39 : vector<1x32xf32> to vector<10x32xf32>
    %156 = arith.addf %155, %154 : vector<10x32xf32>
    %157 = vector.extract_strided_slice %149 {offsets = [1, 0, 0], sizes = [1, 10, 8], strides = [1, 1, 1]} : vector<4x10x8xf32> to vector<1x10x8xf32>
    %158 = vector.shape_cast %157 : vector<1x10x8xf32> to vector<10x8xf32>
    %159 = arith.truncf %158 : vector<10x8xf32> to vector<10x8xbf16>
    %160 = vector.extract_strided_slice %37 {offsets = [8, 0], sizes = [8, 32], strides = [1, 1]} : vector<32x32xbf16> to vector<8x32xbf16>
    %cst_118 = arith.constant dense<0.000000e+00> : vector<10x32xf32>
    %161 = tpu.matmul %159, %160, %cst_118 {dimension_numbers = #tpu.dot_dimension_numbers<[1], [0], [0], [1], [0, 0, 1, 1], [], []>} : vector<10x8xbf16>, vector<8x32xbf16>, vector<10x32xf32> -> vector<10x32xf32>
    %162 = arith.addf %156, %161 : vector<10x32xf32>
    %163 = vector.extract_strided_slice %149 {offsets = [2, 0, 0], sizes = [1, 10, 8], strides = [1, 1, 1]} : vector<4x10x8xf32> to vector<1x10x8xf32>
    %164 = vector.shape_cast %163 : vector<1x10x8xf32> to vector<10x8xf32>
    %165 = arith.truncf %164 : vector<10x8xf32> to vector<10x8xbf16>
    %166 = vector.extract_strided_slice %37 {offsets = [16, 0], sizes = [8, 32], strides = [1, 1]} : vector<32x32xbf16> to vector<8x32xbf16>
    %cst_119 = arith.constant dense<0.000000e+00> : vector<10x32xf32>
    %167 = tpu.matmul %165, %166, %cst_119 {dimension_numbers = #tpu.dot_dimension_numbers<[1], [0], [0], [1], [0, 0, 1, 1], [], []>} : vector<10x8xbf16>, vector<8x32xbf16>, vector<10x32xf32> -> vector<10x32xf32>
    %168 = arith.addf %162, %167 : vector<10x32xf32>
    %169 = vector.extract_strided_slice %149 {offsets = [3, 0, 0], sizes = [1, 10, 8], strides = [1, 1, 1]} : vector<4x10x8xf32> to vector<1x10x8xf32>
    %170 = vector.shape_cast %169 : vector<1x10x8xf32> to vector<10x8xf32>
    %171 = arith.truncf %170 : vector<10x8xf32> to vector<10x8xbf16>
    %172 = vector.extract_strided_slice %37 {offsets = [24, 0], sizes = [8, 32], strides = [1, 1]} : vector<32x32xbf16> to vector<8x32xbf16>
    %cst_120 = arith.constant dense<0.000000e+00> : vector<10x32xf32>
    %173 = tpu.matmul %171, %172, %cst_120 {dimension_numbers = #tpu.dot_dimension_numbers<[1], [0], [0], [1], [0, 0, 1, 1], [], []>} : vector<10x8xbf16>, vector<8x32xbf16>, vector<10x32xf32> -> vector<10x32xf32>
    %174 = arith.addf %168, %173 : vector<10x32xf32>
    %175 = arith.addf %27, %174 : vector<10x32xf32>
    %cst_121 = arith.constant dense<0.000000e+00> : vector<10xf32>
    %176 = vector.multi_reduction <add>, %175, %cst_121 [1] : vector<10x32xf32> to vector<10xf32>
    %177 = vector.shape_cast %176 : vector<10xf32> to vector<10x1xf32>
    %cst_122 = arith.constant 3.200000e+01 : f32
    %178 = vector.broadcast %cst_122 : f32 to vector<10x1xf32>
    %179 = arith.divf %177, %178 : vector<10x1xf32>
    %180 = vector.broadcast %179 : vector<10x1xf32> to vector<10x32xf32>
    %181 = arith.subf %175, %180 : vector<10x32xf32>
    %182 = arith.mulf %181, %181 : vector<10x32xf32>
    %cst_123 = arith.constant dense<0.000000e+00> : vector<10xf32>
    %183 = vector.multi_reduction <add>, %182, %cst_123 [1] : vector<10x32xf32> to vector<10xf32>
    %184 = vector.shape_cast %183 : vector<10xf32> to vector<10x1xf32>
    %cst_124 = arith.constant 3.200000e+01 : f32
    %185 = vector.broadcast %cst_124 : f32 to vector<10x1xf32>
    %186 = arith.divf %184, %185 : vector<10x1xf32>
    %cst_125 = arith.constant 9.99999974E-6 : f32
    %187 = vector.broadcast %cst_125 : f32 to vector<10x1xf32>
    %188 = arith.addf %186, %187 : vector<10x1xf32>
    %189 = math.rsqrt %188 : vector<10x1xf32>
    %190 = vector.broadcast %189 : vector<10x1xf32> to vector<10x32xf32>
    %191 = arith.mulf %181, %190 : vector<10x32xf32>
    %192 = vector.broadcast %41 : vector<1x32xf32> to vector<10x32xf32>
    %193 = arith.mulf %191, %192 : vector<10x32xf32>
    %194 = vector.broadcast %43 : vector<1x32xf32> to vector<10x32xf32>
    %195 = arith.addf %193, %194 : vector<10x32xf32>
    %196 = arith.truncf %195 : vector<10x32xf32> to vector<10x32xbf16>
    %cst_126 = arith.constant dense<0.000000e+00> : vector<10x128xf32>
    %197 = tpu.matmul %196, %45, %cst_126 {dimension_numbers = #tpu.dot_dimension_numbers<[1], [0], [0], [1], [0, 0, 1, 1], [], []>} : vector<10x32xbf16>, vector<32x128xbf16>, vector<10x128xf32> -> vector<10x128xf32>
    %198 = vector.broadcast %47 : vector<1x128xf32> to vector<10x128xf32>
    %199 = arith.addf %197, %198 : vector<10x128xf32>
    %cst_127 = arith.constant 1.702000e+00 : f32
    %200 = vector.broadcast %cst_127 : f32 to vector<10x128xf32>
    %201 = arith.mulf %200, %199 : vector<10x128xf32>
    %202 = arith.negf %201 : vector<10x128xf32>
    %203 = math.exp %202 : vector<10x128xf32>
    %cst_128 = arith.constant 1.000000e+00 : f32
    %204 = vector.broadcast %cst_128 : f32 to vector<10x128xf32>
    %205 = arith.addf %204, %203 : vector<10x128xf32>
    %206 = arith.divf %204, %205 : vector<10x128xf32>
    %207 = arith.mulf %199, %206 : vector<10x128xf32>
    %208 = arith.truncf %207 : vector<10x128xf32> to vector<10x128xbf16>
    %cst_129 = arith.constant dense<0.000000e+00> : vector<10x32xf32>
    %209 = tpu.matmul %208, %49, %cst_129 {dimension_numbers = #tpu.dot_dimension_numbers<[1], [0], [0], [1], [0, 0, 1, 1], [], []>} : vector<10x128xbf16>, vector<128x32xbf16>, vector<10x32xf32> -> vector<10x32xf32>
    %210 = arith.addf %175, %209 : vector<10x32xf32>
    %211 = vector.broadcast %51 : vector<1x32xf32> to vector<10x32xf32>
    %212 = arith.addf %210, %211 : vector<10x32xf32>
    %c1_130 = arith.constant 1 : index
    %c0_131 = arith.constant 0 : index
    %c0_132 = arith.constant 0 : index
    %213 = vector.load %arg5[%c1_130, %c0_131, %c0_132] : memref<2x1x32xf32, #tpu.memory_space<vmem>>, vector<1x1x32xf32>
    %214 = vector.shape_cast %213 : vector<1x1x32xf32> to vector<1x32xf32>
    %c1_133 = arith.constant 1 : index
    %c0_134 = arith.constant 0 : index
    %c0_135 = arith.constant 0 : index
    %215 = vector.load %arg6[%c1_133, %c0_134, %c0_135] : memref<2x1x32xf32, #tpu.memory_space<vmem>>, vector<1x1x32xf32>
    %216 = vector.shape_cast %215 : vector<1x1x32xf32> to vector<1x32xf32>
    %c1_136 = arith.constant 1 : index
    %c0_137 = arith.constant 0 : index
    %c0_138 = arith.constant 0 : index
    %217 = vector.load %arg7[%c1_136, %c0_137, %c0_138] : memref<2x32x96xbf16, #tpu.memory_space<vmem>>, vector<1x32x96xbf16>
    %218 = vector.shape_cast %217 : vector<1x32x96xbf16> to vector<32x96xbf16>
    %c1_139 = arith.constant 1 : index
    %c0_140 = arith.constant 0 : index
    %c0_141 = arith.constant 0 : index
    %219 = vector.load %arg8[%c1_139, %c0_140, %c0_141] : memref<2x1x96xf32, #tpu.memory_space<vmem>>, vector<1x1x96xf32>
    %220 = vector.shape_cast %219 : vector<1x1x96xf32> to vector<1x96xf32>
    %c1_142 = arith.constant 1 : index
    %c0_143 = arith.constant 0 : index
    %c0_144 = arith.constant 0 : index
    %221 = vector.load %arg9[%c1_142, %c0_143, %c0_144] : memref<2x32x32xbf16, #tpu.memory_space<vmem>>, vector<1x32x32xbf16>
    %222 = vector.shape_cast %221 : vector<1x32x32xbf16> to vector<32x32xbf16>
    %c1_145 = arith.constant 1 : index
    %c0_146 = arith.constant 0 : index
    %c0_147 = arith.constant 0 : index
    %223 = vector.load %arg10[%c1_145, %c0_146, %c0_147] : memref<2x1x32xf32, #tpu.memory_space<vmem>>, vector<1x1x32xf32>
    %224 = vector.shape_cast %223 : vector<1x1x32xf32> to vector<1x32xf32>
    %c1_148 = arith.constant 1 : index
    %c0_149 = arith.constant 0 : index
    %c0_150 = arith.constant 0 : index
    %225 = vector.load %arg11[%c1_148, %c0_149, %c0_150] : memref<2x1x32xf32, #tpu.memory_space<vmem>>, vector<1x1x32xf32>
    %226 = vector.shape_cast %225 : vector<1x1x32xf32> to vector<1x32xf32>
    %c1_151 = arith.constant 1 : index
    %c0_152 = arith.constant 0 : index
    %c0_153 = arith.constant 0 : index
    %227 = vector.load %arg12[%c1_151, %c0_152, %c0_153] : memref<2x1x32xf32, #tpu.memory_space<vmem>>, vector<1x1x32xf32>
    %228 = vector.shape_cast %227 : vector<1x1x32xf32> to vector<1x32xf32>
    %c1_154 = arith.constant 1 : index
    %c0_155 = arith.constant 0 : index
    %c0_156 = arith.constant 0 : index
    %229 = vector.load %arg13[%c1_154, %c0_155, %c0_156] : memref<2x32x128xbf16, #tpu.memory_space<vmem>>, vector<1x32x128xbf16>
    %230 = vector.shape_cast %229 : vector<1x32x128xbf16> to vector<32x128xbf16>
    %c1_157 = arith.constant 1 : index
    %c0_158 = arith.constant 0 : index
    %c0_159 = arith.constant 0 : index
    %231 = vector.load %arg14[%c1_157, %c0_158, %c0_159] : memref<2x1x128xf32, #tpu.memory_space<vmem>>, vector<1x1x128xf32>
    %232 = vector.shape_cast %231 : vector<1x1x128xf32> to vector<1x128xf32>
    %c1_160 = arith.constant 1 : index
    %c0_161 = arith.constant 0 : index
    %c0_162 = arith.constant 0 : index
    %233 = vector.load %arg15[%c1_160, %c0_161, %c0_162] : memref<2x128x32xbf16, #tpu.memory_space<vmem>>, vector<1x128x32xbf16>
    %234 = vector.shape_cast %233 : vector<1x128x32xbf16> to vector<128x32xbf16>
    %c1_163 = arith.constant 1 : index
    %c0_164 = arith.constant 0 : index
    %c0_165 = arith.constant 0 : index
    %235 = vector.load %arg16[%c1_163, %c0_164, %c0_165] : memref<2x1x32xf32, #tpu.memory_space<vmem>>, vector<1x1x32xf32>
    %236 = vector.shape_cast %235 : vector<1x1x32xf32> to vector<1x32xf32>
    %cst_166 = arith.constant dense<0.000000e+00> : vector<10xf32>
    %237 = vector.multi_reduction <add>, %212, %cst_166 [1] : vector<10x32xf32> to vector<10xf32>
    %238 = vector.shape_cast %237 : vector<10xf32> to vector<10x1xf32>
    %cst_167 = arith.constant 3.200000e+01 : f32
    %239 = vector.broadcast %cst_167 : f32 to vector<10x1xf32>
    %240 = arith.divf %238, %239 : vector<10x1xf32>
    %241 = vector.broadcast %240 : vector<10x1xf32> to vector<10x32xf32>
    %242 = arith.subf %212, %241 : vector<10x32xf32>
    %243 = arith.mulf %242, %242 : vector<10x32xf32>
    %cst_168 = arith.constant dense<0.000000e+00> : vector<10xf32>
    %244 = vector.multi_reduction <add>, %243, %cst_168 [1] : vector<10x32xf32> to vector<10xf32>
    %245 = vector.shape_cast %244 : vector<10xf32> to vector<10x1xf32>
    %cst_169 = arith.constant 3.200000e+01 : f32
    %246 = vector.broadcast %cst_169 : f32 to vector<10x1xf32>
    %247 = arith.divf %245, %246 : vector<10x1xf32>
    %cst_170 = arith.constant 9.99999974E-6 : f32
    %248 = vector.broadcast %cst_170 : f32 to vector<10x1xf32>
    %249 = arith.addf %247, %248 : vector<10x1xf32>
    %250 = math.rsqrt %249 : vector<10x1xf32>
    %251 = vector.broadcast %250 : vector<10x1xf32> to vector<10x32xf32>
    %252 = arith.mulf %242, %251 : vector<10x32xf32>
    %253 = vector.broadcast %214 : vector<1x32xf32> to vector<10x32xf32>
    %254 = arith.mulf %252, %253 : vector<10x32xf32>
    %255 = vector.broadcast %216 : vector<1x32xf32> to vector<10x32xf32>
    %256 = arith.addf %254, %255 : vector<10x32xf32>
    %257 = arith.truncf %256 : vector<10x32xf32> to vector<10x32xbf16>
    %cst_171 = arith.constant dense<0.000000e+00> : vector<10x96xf32>
    %258 = tpu.matmul %257, %218, %cst_171 {dimension_numbers = #tpu.dot_dimension_numbers<[1], [0], [0], [1], [0, 0, 1, 1], [], []>} : vector<10x32xbf16>, vector<32x96xbf16>, vector<10x96xf32> -> vector<10x96xf32>
    %259 = vector.broadcast %220 : vector<1x96xf32> to vector<10x96xf32>
    %260 = arith.addf %258, %259 : vector<10x96xf32>
    %261 = vector.shape_cast %260 : vector<10x96xf32> to vector<2x5x96xf32>
    %262 = vector.extract_strided_slice %261 {offsets = [0, 0, 0], sizes = [2, 5, 8], strides = [1, 1, 1]} : vector<2x5x96xf32> to vector<2x5x8xf32>
    %c0_172 = arith.constant 0 : index
    %c0_173 = arith.constant 0 : index
    %c0_174 = arith.constant 0 : index
    %c0_175 = arith.constant 0 : index
    %263 = vector.load %arg24[%c0_172, %c0_173, %c0_174, %c0_175] : memref<3x8x5x8xf32, #tpu.memory_space<vmem>>, vector<1x2x5x8xf32>
    %264 = vector.shape_cast %263 : vector<1x2x5x8xf32> to vector<2x5x8xf32>
    %265 = vector.shape_cast %262 : vector<2x5x8xf32> to vector<1x2x5x8xf32>
    tpu.vector_store %arg24[%c0_172, %c0_173, %c0_174, %c0_175], %265 {strides = array<i32>} : memref<3x8x5x8xf32, #tpu.memory_space<vmem>>, vector<1x2x5x8xf32>,
    %266 = vector.extract_strided_slice %261 {offsets = [0, 0, 32], sizes = [2, 5, 8], strides = [1, 1, 1]} : vector<2x5x96xf32> to vector<2x5x8xf32>
    %c1_176 = arith.constant 1 : index
    %c0_177 = arith.constant 0 : index
    %c0_178 = arith.constant 0 : index
    %c0_179 = arith.constant 0 : index
    %267 = vector.load %arg24[%c1_176, %c0_177, %c0_178, %c0_179] : memref<3x8x5x8xf32, #tpu.memory_space<vmem>>, vector<1x2x5x8xf32>
    %268 = vector.shape_cast %267 : vector<1x2x5x8xf32> to vector<2x5x8xf32>
    %269 = vector.shape_cast %266 : vector<2x5x8xf32> to vector<1x2x5x8xf32>
    tpu.vector_store %arg24[%c1_176, %c0_177, %c0_178, %c0_179], %269 {strides = array<i32>} : memref<3x8x5x8xf32, #tpu.memory_space<vmem>>, vector<1x2x5x8xf32>,
    %270 = vector.extract_strided_slice %261 {offsets = [0, 0, 64], sizes = [2, 5, 8], strides = [1, 1, 1]} : vector<2x5x96xf32> to vector<2x5x8xf32>
    %c2_180 = arith.constant 2 : index
    %c0_181 = arith.constant 0 : index
    %c0_182 = arith.constant 0 : index
    %c0_183 = arith.constant 0 : index
    %271 = vector.load %arg24[%c2_180, %c0_181, %c0_182, %c0_183] : memref<3x8x5x8xf32, #tpu.memory_space<vmem>>, vector<1x2x5x8xf32>
    %272 = vector.shape_cast %271 : vector<1x2x5x8xf32> to vector<2x5x8xf32>
    %273 = vector.shape_cast %270 : vector<2x5x8xf32> to vector<1x2x5x8xf32>
    tpu.vector_store %arg24[%c2_180, %c0_181, %c0_182, %c0_183], %273 {strides = array<i32>} : memref<3x8x5x8xf32, #tpu.memory_space<vmem>>, vector<1x2x5x8xf32>,
    %274 = vector.extract_strided_slice %261 {offsets = [0, 0, 8], sizes = [2, 5, 8], strides = [1, 1, 1]} : vector<2x5x96xf32> to vector<2x5x8xf32>
    %c0_184 = arith.constant 0 : index
    %c2_185 = arith.constant 2 : index
    %c0_186 = arith.constant 0 : index
    %c0_187 = arith.constant 0 : index
    %275 = vector.load %arg24[%c0_184, %c2_185, %c0_186, %c0_187] : memref<3x8x5x8xf32, #tpu.memory_space<vmem>>, vector<1x2x5x8xf32>
    %276 = vector.shape_cast %275 : vector<1x2x5x8xf32> to vector<2x5x8xf32>
    %277 = vector.shape_cast %274 : vector<2x5x8xf32> to vector<1x2x5x8xf32>
    tpu.vector_store %arg24[%c0_184, %c2_185, %c0_186, %c0_187], %277 {strides = array<i32>} : memref<3x8x5x8xf32, #tpu.memory_space<vmem>>, vector<1x2x5x8xf32>,
    %278 = vector.extract_strided_slice %261 {offsets = [0, 0, 40], sizes = [2, 5, 8], strides = [1, 1, 1]} : vector<2x5x96xf32> to vector<2x5x8xf32>
    %c1_188 = arith.constant 1 : index
    %c2_189 = arith.constant 2 : index
    %c0_190 = arith.constant 0 : index
    %c0_191 = arith.constant 0 : index
    %279 = vector.load %arg24[%c1_188, %c2_189, %c0_190, %c0_191] : memref<3x8x5x8xf32, #tpu.memory_space<vmem>>, vector<1x2x5x8xf32>
    %280 = vector.shape_cast %279 : vector<1x2x5x8xf32> to vector<2x5x8xf32>
    %281 = vector.shape_cast %278 : vector<2x5x8xf32> to vector<1x2x5x8xf32>
    tpu.vector_store %arg24[%c1_188, %c2_189, %c0_190, %c0_191], %281 {strides = array<i32>} : memref<3x8x5x8xf32, #tpu.memory_space<vmem>>, vector<1x2x5x8xf32>,
    %282 = vector.extract_strided_slice %261 {offsets = [0, 0, 72], sizes = [2, 5, 8], strides = [1, 1, 1]} : vector<2x5x96xf32> to vector<2x5x8xf32>
    %c2_192 = arith.constant 2 : index
    %c2_193 = arith.constant 2 : index
    %c0_194 = arith.constant 0 : index
    %c0_195 = arith.constant 0 : index
    %283 = vector.load %arg24[%c2_192, %c2_193, %c0_194, %c0_195] : memref<3x8x5x8xf32, #tpu.memory_space<vmem>>, vector<1x2x5x8xf32>
    %284 = vector.shape_cast %283 : vector<1x2x5x8xf32> to vector<2x5x8xf32>
    %285 = vector.shape_cast %282 : vector<2x5x8xf32> to vector<1x2x5x8xf32>
    tpu.vector_store %arg24[%c2_192, %c2_193, %c0_194, %c0_195], %285 {strides = array<i32>} : memref<3x8x5x8xf32, #tpu.memory_space<vmem>>, vector<1x2x5x8xf32>,
    %286 = vector.extract_strided_slice %261 {offsets = [0, 0, 16], sizes = [2, 5, 8], strides = [1, 1, 1]} : vector<2x5x96xf32> to vector<2x5x8xf32>
    %c0_196 = arith.constant 0 : index
    %c4_197 = arith.constant 4 : index
    %c0_198 = arith.constant 0 : index
    %c0_199 = arith.constant 0 : index
    %287 = vector.load %arg24[%c0_196, %c4_197, %c0_198, %c0_199] : memref<3x8x5x8xf32, #tpu.memory_space<vmem>>, vector<1x2x5x8xf32>
    %288 = vector.shape_cast %287 : vector<1x2x5x8xf32> to vector<2x5x8xf32>
    %289 = vector.shape_cast %286 : vector<2x5x8xf32> to vector<1x2x5x8xf32>
    tpu.vector_store %arg24[%c0_196, %c4_197, %c0_198, %c0_199], %289 {strides = array<i32>} : memref<3x8x5x8xf32, #tpu.memory_space<vmem>>, vector<1x2x5x8xf32>,
    %290 = vector.extract_strided_slice %261 {offsets = [0, 0, 48], sizes = [2, 5, 8], strides = [1, 1, 1]} : vector<2x5x96xf32> to vector<2x5x8xf32>
    %c1_200 = arith.constant 1 : index
    %c4_201 = arith.constant 4 : index
    %c0_202 = arith.constant 0 : index
    %c0_203 = arith.constant 0 : index
    %291 = vector.load %arg24[%c1_200, %c4_201, %c0_202, %c0_203] : memref<3x8x5x8xf32, #tpu.memory_space<vmem>>, vector<1x2x5x8xf32>
    %292 = vector.shape_cast %291 : vector<1x2x5x8xf32> to vector<2x5x8xf32>
    %293 = vector.shape_cast %290 : vector<2x5x8xf32> to vector<1x2x5x8xf32>
    tpu.vector_store %arg24[%c1_200, %c4_201, %c0_202, %c0_203], %293 {strides = array<i32>} : memref<3x8x5x8xf32, #tpu.memory_space<vmem>>, vector<1x2x5x8xf32>,
    %294 = vector.extract_strided_slice %261 {offsets = [0, 0, 80], sizes = [2, 5, 8], strides = [1, 1, 1]} : vector<2x5x96xf32> to vector<2x5x8xf32>
    %c2_204 = arith.constant 2 : index
    %c4_205 = arith.constant 4 : index
    %c0_206 = arith.constant 0 : index
    %c0_207 = arith.constant 0 : index
    %295 = vector.load %arg24[%c2_204, %c4_205, %c0_206, %c0_207] : memref<3x8x5x8xf32, #tpu.memory_space<vmem>>, vector<1x2x5x8xf32>
    %296 = vector.shape_cast %295 : vector<1x2x5x8xf32> to vector<2x5x8xf32>
    %297 = vector.shape_cast %294 : vector<2x5x8xf32> to vector<1x2x5x8xf32>
    tpu.vector_store %arg24[%c2_204, %c4_205, %c0_206, %c0_207], %297 {strides = array<i32>} : memref<3x8x5x8xf32, #tpu.memory_space<vmem>>, vector<1x2x5x8xf32>,
    %298 = vector.extract_strided_slice %261 {offsets = [0, 0, 24], sizes = [2, 5, 8], strides = [1, 1, 1]} : vector<2x5x96xf32> to vector<2x5x8xf32>
    %c0_208 = arith.constant 0 : index
    %c6_209 = arith.constant 6 : index
    %c0_210 = arith.constant 0 : index
    %c0_211 = arith.constant 0 : index
    %299 = vector.load %arg24[%c0_208, %c6_209, %c0_210, %c0_211] : memref<3x8x5x8xf32, #tpu.memory_space<vmem>>, vector<1x2x5x8xf32>
    %300 = vector.shape_cast %299 : vector<1x2x5x8xf32> to vector<2x5x8xf32>
    %301 = vector.shape_cast %298 : vector<2x5x8xf32> to vector<1x2x5x8xf32>
    tpu.vector_store %arg24[%c0_208, %c6_209, %c0_210, %c0_211], %301 {strides = array<i32>} : memref<3x8x5x8xf32, #tpu.memory_space<vmem>>, vector<1x2x5x8xf32>,
    %302 = vector.extract_strided_slice %261 {offsets = [0, 0, 56], sizes = [2, 5, 8], strides = [1, 1, 1]} : vector<2x5x96xf32> to vector<2x5x8xf32>
    %c1_212 = arith.constant 1 : index
    %c6_213 = arith.constant 6 : index
    %c0_214 = arith.constant 0 : index
    %c0_215 = arith.constant 0 : index
    %303 = vector.load %arg24[%c1_212, %c6_213, %c0_214, %c0_215] : memref<3x8x5x8xf32, #tpu.memory_space<vmem>>, vector<1x2x5x8xf32>
    %304 = vector.shape_cast %303 : vector<1x2x5x8xf32> to vector<2x5x8xf32>
    %305 = vector.shape_cast %302 : vector<2x5x8xf32> to vector<1x2x5x8xf32>
    tpu.vector_store %arg24[%c1_212, %c6_213, %c0_214, %c0_215], %305 {strides = array<i32>} : memref<3x8x5x8xf32, #tpu.memory_space<vmem>>, vector<1x2x5x8xf32>,
    %306 = vector.extract_strided_slice %261 {offsets = [0, 0, 88], sizes = [2, 5, 8], strides = [1, 1, 1]} : vector<2x5x96xf32> to vector<2x5x8xf32>
    %c2_216 = arith.constant 2 : index
    %c6_217 = arith.constant 6 : index
    %c0_218 = arith.constant 0 : index
    %c0_219 = arith.constant 0 : index
    %307 = vector.load %arg24[%c2_216, %c6_217, %c0_218, %c0_219] : memref<3x8x5x8xf32, #tpu.memory_space<vmem>>, vector<1x2x5x8xf32>
    %308 = vector.shape_cast %307 : vector<1x2x5x8xf32> to vector<2x5x8xf32>
    %309 = vector.shape_cast %306 : vector<2x5x8xf32> to vector<1x2x5x8xf32>
    tpu.vector_store %arg24[%c2_216, %c6_217, %c0_218, %c0_219], %309 {strides = array<i32>} : memref<3x8x5x8xf32, #tpu.memory_space<vmem>>, vector<1x2x5x8xf32>,
    %c0_220 = arith.constant 0 : index
    %c0_221 = arith.constant 0 : index
    %c0_222 = arith.constant 0 : index
    %c0_223 = arith.constant 0 : index
    %310 = vector.load %arg24[%c0_220, %c0_221, %c0_222, %c0_223] : memref<3x8x5x8xf32, #tpu.memory_space<vmem>>, vector<1x8x5x8xf32>
    %311 = vector.shape_cast %310 : vector<1x8x5x8xf32> to vector<8x5x8xf32>
    %312 = arith.truncf %311 : vector<8x5x8xf32> to vector<8x5x8xbf16>
    %c1_224 = arith.constant 1 : index
    %c0_225 = arith.constant 0 : index
    %c0_226 = arith.constant 0 : index
    %c0_227 = arith.constant 0 : index
    %313 = vector.load %arg24[%c1_224, %c0_225, %c0_226, %c0_227] : memref<3x8x5x8xf32, #tpu.memory_space<vmem>>, vector<1x8x5x8xf32>
    %314 = vector.shape_cast %313 : vector<1x8x5x8xf32> to vector<8x5x8xf32>
    %315 = arith.truncf %314 : vector<8x5x8xf32> to vector<8x5x8xbf16>
    %c2_228 = arith.constant 2 : index
    %c0_229 = arith.constant 0 : index
    %c0_230 = arith.constant 0 : index
    %c0_231 = arith.constant 0 : index
    %316 = vector.load %arg24[%c2_228, %c0_229, %c0_230, %c0_231] : memref<3x8x5x8xf32, #tpu.memory_space<vmem>>, vector<1x8x5x8xf32>
    %317 = vector.shape_cast %316 : vector<1x8x5x8xf32> to vector<8x5x8xf32>
    %318 = arith.truncf %317 : vector<8x5x8xf32> to vector<8x5x8xbf16>
    "tpu.trace_start"() <{level = 10 : i32, message = "gqd,gkd->gqk"}> : () -> ()
    %cst_232 = arith.constant dense<0.000000e+00> : vector<8x5x5xf32>
    %319 = tpu.matmul %312, %315, %cst_232 {dimension_numbers = #tpu.dot_dimension_numbers<[2], [2], [1], [1], [0, 0, 0, 1, 1, 1], [0], [0]>} : vector<8x5x8xbf16>, vector<8x5x8xbf16>, vector<8x5x5xf32> -> vector<8x5x5xf32>
    "tpu.trace_stop"() : () -> ()
    %cst_233 = arith.constant 0.353553385 : f32
    %320 = vector.broadcast %cst_233 : f32 to vector<8x5x5xf32>
    %321 = arith.mulf %319, %320 : vector<8x5x5xf32>
    %cst_234 = arith.constant dense<0xFF800000> : vector<8x5xf32>
    %322 = vector.multi_reduction <maximumf>, %321, %cst_234 [2] : vector<8x5x5xf32> to vector<8x5xf32>
    %323 = vector.shape_cast %322 : vector<8x5xf32> to vector<8x5x1xf32>
    %324 = vector.broadcast %323 : vector<8x5x1xf32> to vector<8x5x5xf32>
    %325 = arith.subf %321, %324 : vector<8x5x5xf32>
    %326 = math.exp %325 : vector<8x5x5xf32>
    %cst_235 = arith.constant dense<0.000000e+00> : vector<8x5xf32>
    %327 = vector.multi_reduction <add>, %326, %cst_235 [2] : vector<8x5x5xf32> to vector<8x5xf32>
    %328 = vector.shape_cast %327 : vector<8x5xf32> to vector<8x5x1xf32>
    %329 = tpu.reciprocal %328 {approx = true} : vector<8x5x1xf32> -> vector<8x5x1xf32>
    %330 = vector.broadcast %329 : vector<8x5x1xf32> to vector<8x5x5xf32>
    %331 = arith.mulf %326, %330 : vector<8x5x5xf32>
    %332 = arith.truncf %331 : vector<8x5x5xf32> to vector<8x5x5xbf16>
    "tpu.trace_start"() <{level = 10 : i32, message = "gqk,gkd->gqd"}> : () -> ()
    %cst_236 = arith.constant dense<0.000000e+00> : vector<8x5x8xf32>
    %333 = tpu.matmul %332, %318, %cst_236 {dimension_numbers = #tpu.dot_dimension_numbers<[2], [1], [1], [2], [0, 0, 0, 1, 1, 2], [0], [0]>} : vector<8x5x5xbf16>, vector<8x5x8xbf16>, vector<8x5x8xf32> -> vector<8x5x8xf32>
    "tpu.trace_stop"() : () -> ()
    %334 = vector.shape_cast %333 : vector<8x5x8xf32> to vector<4x10x8xf32>
    %335 = vector.extract_strided_slice %334 {offsets = [0, 0, 0], sizes = [1, 10, 8], strides = [1, 1, 1]} : vector<4x10x8xf32> to vector<1x10x8xf32>
    %336 = vector.shape_cast %335 : vector<1x10x8xf32> to vector<10x8xf32>
    %337 = arith.truncf %336 : vector<10x8xf32> to vector<10x8xbf16>
    %338 = vector.extract_strided_slice %222 {offsets = [0, 0], sizes = [8, 32], strides = [1, 1]} : vector<32x32xbf16> to vector<8x32xbf16>
    %cst_237 = arith.constant dense<0.000000e+00> : vector<10x32xf32>
    %339 = tpu.matmul %337, %338, %cst_237 {dimension_numbers = #tpu.dot_dimension_numbers<[1], [0], [0], [1], [0, 0, 1, 1], [], []>} : vector<10x8xbf16>, vector<8x32xbf16>, vector<10x32xf32> -> vector<10x32xf32>
    %340 = vector.broadcast %224 : vector<1x32xf32> to vector<10x32xf32>
    %341 = arith.addf %340, %339 : vector<10x32xf32>
    %342 = vector.extract_strided_slice %334 {offsets = [1, 0, 0], sizes = [1, 10, 8], strides = [1, 1, 1]} : vector<4x10x8xf32> to vector<1x10x8xf32>
    %343 = vector.shape_cast %342 : vector<1x10x8xf32> to vector<10x8xf32>
    %344 = arith.truncf %343 : vector<10x8xf32> to vector<10x8xbf16>
    %345 = vector.extract_strided_slice %222 {offsets = [8, 0], sizes = [8, 32], strides = [1, 1]} : vector<32x32xbf16> to vector<8x32xbf16>
    %cst_238 = arith.constant dense<0.000000e+00> : vector<10x32xf32>
    %346 = tpu.matmul %344, %345, %cst_238 {dimension_numbers = #tpu.dot_dimension_numbers<[1], [0], [0], [1], [0, 0, 1, 1], [], []>} : vector<10x8xbf16>, vector<8x32xbf16>, vector<10x32xf32> -> vector<10x32xf32>
    %347 = arith.addf %341, %346 : vector<10x32xf32>
    %348 = vector.extract_strided_slice %334 {offsets = [2, 0, 0], sizes = [1, 10, 8], strides = [1, 1, 1]} : vector<4x10x8xf32> to vector<1x10x8xf32>
    %349 = vector.shape_cast %348 : vector<1x10x8xf32> to vector<10x8xf32>
    %350 = arith.truncf %349 : vector<10x8xf32> to vector<10x8xbf16>
    %351 = vector.extract_strided_slice %222 {offsets = [16, 0], sizes = [8, 32], strides = [1, 1]} : vector<32x32xbf16> to vector<8x32xbf16>
    %cst_239 = arith.constant dense<0.000000e+00> : vector<10x32xf32>
    %352 = tpu.matmul %350, %351, %cst_239 {dimension_numbers = #tpu.dot_dimension_numbers<[1], [0], [0], [1], [0, 0, 1, 1], [], []>} : vector<10x8xbf16>, vector<8x32xbf16>, vector<10x32xf32> -> vector<10x32xf32>
    %353 = arith.addf %347, %352 : vector<10x32xf32>
    %354 = vector.extract_strided_slice %334 {offsets = [3, 0, 0], sizes = [1, 10, 8], strides = [1, 1, 1]} : vector<4x10x8xf32> to vector<1x10x8xf32>
    %355 = vector.shape_cast %354 : vector<1x10x8xf32> to vector<10x8xf32>
    %356 = arith.truncf %355 : vector<10x8xf32> to vector<10x8xbf16>
    %357 = vector.extract_strided_slice %222 {offsets = [24, 0], sizes = [8, 32], strides = [1, 1]} : vector<32x32xbf16> to vector<8x32xbf16>
    %cst_240 = arith.constant dense<0.000000e+00> : vector<10x32xf32>
    %358 = tpu.matmul %356, %357, %cst_240 {dimension_numbers = #tpu.dot_dimension_numbers<[1], [0], [0], [1], [0, 0, 1, 1], [], []>} : vector<10x8xbf16>, vector<8x32xbf16>, vector<10x32xf32> -> vector<10x32xf32>
    %359 = arith.addf %353, %358 : vector<10x32xf32>
    %360 = arith.addf %212, %359 : vector<10x32xf32>
    %cst_241 = arith.constant dense<0.000000e+00> : vector<10xf32>
    %361 = vector.multi_reduction <add>, %360, %cst_241 [1] : vector<10x32xf32> to vector<10xf32>
    %362 = vector.shape_cast %361 : vector<10xf32> to vector<10x1xf32>
    %cst_242 = arith.constant 3.200000e+01 : f32
    %363 = vector.broadcast %cst_242 : f32 to vector<10x1xf32>
    %364 = arith.divf %362, %363 : vector<10x1xf32>
    %365 = vector.broadcast %364 : vector<10x1xf32> to vector<10x32xf32>
    %366 = arith.subf %360, %365 : vector<10x32xf32>
    %367 = arith.mulf %366, %366 : vector<10x32xf32>
    %cst_243 = arith.constant dense<0.000000e+00> : vector<10xf32>
    %368 = vector.multi_reduction <add>, %367, %cst_243 [1] : vector<10x32xf32> to vector<10xf32>
    %369 = vector.shape_cast %368 : vector<10xf32> to vector<10x1xf32>
    %cst_244 = arith.constant 3.200000e+01 : f32
    %370 = vector.broadcast %cst_244 : f32 to vector<10x1xf32>
    %371 = arith.divf %369, %370 : vector<10x1xf32>
    %cst_245 = arith.constant 9.99999974E-6 : f32
    %372 = vector.broadcast %cst_245 : f32 to vector<10x1xf32>
    %373 = arith.addf %371, %372 : vector<10x1xf32>
    %374 = math.rsqrt %373 : vector<10x1xf32>
    %375 = vector.broadcast %374 : vector<10x1xf32> to vector<10x32xf32>
    %376 = arith.mulf %366, %375 : vector<10x32xf32>
    %377 = vector.broadcast %226 : vector<1x32xf32> to vector<10x32xf32>
    %378 = arith.mulf %376, %377 : vector<10x32xf32>
    %379 = vector.broadcast %228 : vector<1x32xf32> to vector<10x32xf32>
    %380 = arith.addf %378, %379 : vector<10x32xf32>
    %381 = arith.truncf %380 : vector<10x32xf32> to vector<10x32xbf16>
    %cst_246 = arith.constant dense<0.000000e+00> : vector<10x128xf32>
    %382 = tpu.matmul %381, %230, %cst_246 {dimension_numbers = #tpu.dot_dimension_numbers<[1], [0], [0], [1], [0, 0, 1, 1], [], []>} : vector<10x32xbf16>, vector<32x128xbf16>, vector<10x128xf32> -> vector<10x128xf32>
    %383 = vector.broadcast %232 : vector<1x128xf32> to vector<10x128xf32>
    %384 = arith.addf %382, %383 : vector<10x128xf32>
    %cst_247 = arith.constant 1.702000e+00 : f32
    %385 = vector.broadcast %cst_247 : f32 to vector<10x128xf32>
    %386 = arith.mulf %385, %384 : vector<10x128xf32>
    %387 = arith.negf %386 : vector<10x128xf32>
    %388 = math.exp %387 : vector<10x128xf32>
    %cst_248 = arith.constant 1.000000e+00 : f32
    %389 = vector.broadcast %cst_248 : f32 to vector<10x128xf32>
    %390 = arith.addf %389, %388 : vector<10x128xf32>
    %391 = arith.divf %389, %390 : vector<10x128xf32>
    %392 = arith.mulf %384, %391 : vector<10x128xf32>
    %393 = arith.truncf %392 : vector<10x128xf32> to vector<10x128xbf16>
    %cst_249 = arith.constant dense<0.000000e+00> : vector<10x32xf32>
    %394 = tpu.matmul %393, %234, %cst_249 {dimension_numbers = #tpu.dot_dimension_numbers<[1], [0], [0], [1], [0, 0, 1, 1], [], []>} : vector<10x128xbf16>, vector<128x32xbf16>, vector<10x32xf32> -> vector<10x32xf32>
    %395 = arith.addf %360, %394 : vector<10x32xf32>
    %396 = vector.broadcast %236 : vector<1x32xf32> to vector<10x32xf32>
    %397 = arith.addf %395, %396 : vector<10x32xf32>
    %c0_250 = arith.constant 0 : index
    %c0_251 = arith.constant 0 : index
    %398 = vector.load %arg20[%c0_250, %c0_251] : memref<2x10xf32, #tpu.memory_space<vmem>>, vector<2x10xf32>
    %cst_252 = arith.constant dense<0.000000e+00> : vector<2x32xf32>
    %399 = tpu.matmul %398, %397, %cst_252 {dimension_numbers = #tpu.dot_dimension_numbers<[1], [0], [0], [1], [0, 0, 1, 1], [], []>} : vector<2x10xf32>, vector<10x32xf32>, vector<2x32xf32> -> vector<2x32xf32>
    %c0_253 = arith.constant 0 : index
    %c0_254 = arith.constant 0 : index
    %400 = vector.load %arg17[%c0_253, %c0_254] : memref<1x32xf32, #tpu.memory_space<vmem>>, vector<1x32xf32>
    %c0_255 = arith.constant 0 : index
    %c0_256 = arith.constant 0 : index
    %401 = vector.load %arg18[%c0_255, %c0_256] : memref<1x32xf32, #tpu.memory_space<vmem>>, vector<1x32xf32>
    %cst_257 = arith.constant dense<0.000000e+00> : vector<2xf32>
    %402 = vector.multi_reduction <add>, %399, %cst_257 [1] : vector<2x32xf32> to vector<2xf32>
    %403 = vector.shape_cast %402 : vector<2xf32> to vector<2x1xf32>
    %cst_258 = arith.constant 3.200000e+01 : f32
    %404 = vector.broadcast %cst_258 : f32 to vector<2x1xf32>
    %405 = arith.divf %403, %404 : vector<2x1xf32>
    %406 = vector.broadcast %405 : vector<2x1xf32> to vector<2x32xf32>
    %407 = arith.subf %399, %406 : vector<2x32xf32>
    %408 = arith.mulf %407, %407 : vector<2x32xf32>
    %cst_259 = arith.constant dense<0.000000e+00> : vector<2xf32>
    %409 = vector.multi_reduction <add>, %408, %cst_259 [1] : vector<2x32xf32> to vector<2xf32>
    %410 = vector.shape_cast %409 : vector<2xf32> to vector<2x1xf32>
    %cst_260 = arith.constant 3.200000e+01 : f32
    %411 = vector.broadcast %cst_260 : f32 to vector<2x1xf32>
    %412 = arith.divf %410, %411 : vector<2x1xf32>
    %cst_261 = arith.constant 9.99999974E-6 : f32
    %413 = vector.broadcast %cst_261 : f32 to vector<2x1xf32>
    %414 = arith.addf %412, %413 : vector<2x1xf32>
    %415 = math.rsqrt %414 : vector<2x1xf32>
    %416 = vector.broadcast %415 : vector<2x1xf32> to vector<2x32xf32>
    %417 = arith.mulf %407, %416 : vector<2x32xf32>
    %418 = vector.broadcast %400 : vector<1x32xf32> to vector<2x32xf32>
    %419 = arith.mulf %417, %418 : vector<2x32xf32>
    %420 = vector.broadcast %401 : vector<1x32xf32> to vector<2x32xf32>
    %421 = arith.addf %419, %420 : vector<2x32xf32>
    %422 = arith.truncf %421 : vector<2x32xf32> to vector<2x32xbf16>
    %c0_262 = arith.constant 0 : index
    %c0_263 = arith.constant 0 : index
    %423 = vector.load %arg19[%c0_262, %c0_263] : memref<32x32xbf16, #tpu.memory_space<vmem>>, vector<32x32xbf16>
    %cst_264 = arith.constant dense<0.000000e+00> : vector<2x32xf32>
    %424 = tpu.matmul %422, %423, %cst_264 {dimension_numbers = #tpu.dot_dimension_numbers<[1], [0], [0], [1], [0, 0, 1, 1], [], []>} : vector<2x32xbf16>, vector<32x32xbf16>, vector<2x32xf32> -> vector<2x32xf32>
    %425 = arith.mulf %424, %424 : vector<2x32xf32>
    %cst_265 = arith.constant dense<0.000000e+00> : vector<2xf32>
    %426 = vector.multi_reduction <add>, %425, %cst_265 [1] : vector<2x32xf32> to vector<2xf32>
    %427 = vector.shape_cast %426 : vector<2xf32> to vector<2x1xf32>
    %cst_266 = arith.constant 9.99999996E-13 : f32
    %428 = vector.broadcast %cst_266 : f32 to vector<2x1xf32>
    %429 = arith.addf %427, %428 : vector<2x1xf32>
    %430 = math.rsqrt %429 : vector<2x1xf32>
    %431 = vector.broadcast %430 : vector<2x1xf32> to vector<2x32xf32>
    %432 = arith.mulf %424, %431 : vector<2x32xf32>
    %c0_267 = arith.constant 0 : index
    %c0_268 = arith.constant 0 : index
    %433 = vector.load %arg21[%c0_267, %c0_268] : memref<3x32xf32, #tpu.memory_space<vmem>>, vector<3x32xf32>
    %434 = tpu.transpose %433, [1, 0] : vector<3x32xf32> -> vector<32x3xf32>
    %cst_269 = arith.constant dense<0.000000e+00> : vector<2x3xf32>
    %435 = tpu.matmul %432, %434, %cst_269 {dimension_numbers = #tpu.dot_dimension_numbers<[1], [0], [0], [1], [0, 0, 1, 1], [], []>} : vector<2x32xf32>, vector<32x3xf32>, vector<2x3xf32> -> vector<2x3xf32>
    %c0_270 = arith.constant 0 : index
    %c0_271 = arith.constant 0 : index
    %436 = vector.load %arg22[%c0_270, %c0_271] : memref<1x1xf32, #tpu.memory_space<vmem>>, vector<1x1xf32>
    %437 = vector.extract %436[0, 0] : f32 from vector<1x1xf32>
    %438 = vector.broadcast %437 : f32 to vector<2x3xf32>
    %439 = arith.mulf %438, %435 : vector<2x3xf32>
    %c0_272 = arith.constant 0 : index
    %c0_273 = arith.constant 0 : index
    %440 = vector.load %arg23[%c0_272, %c0_273] : memref<2x3xf32, #tpu.memory_space<vmem>>, vector<2x3xf32>
    tpu.vector_store %arg23[%c0_272, %c0_273], %439 {strides = array<i32>} : memref<2x3xf32, #tpu.memory_space<vmem>>, vector<2x3xf32>,
    return
  }
}

</mosaic_0001>

<bundles_post_ra>
// kernel: tile.9
= control target key start
LH: loop header
LB: loop body
LE: loop exit
PB: predicated region body
PF: predicated region fallthrough
CT: control target
= control target key end

     0   :  { %vm3_vm0 = vcmask 261120   ;;  %s34_s0 = inlined_call_operand.vmem [shape: f32[2,5,32], index: 0, kind: input, shape index: {}]   ;;  %s35_s1 = inlined_call_operand.vmem [shape: f32[10,32], index: 1, kind: output, shape index: {}]  }
   0x1   :  { %v2_v0 = vld [vmem:[%s34_s0] sm:$0x1f]   ;;  %v10_v1 = vld [vmem:[%s34_s0 + $0x8] sm:$0x1f]  }
   0x2   :  { %4 = vst.msk [vmem:[%s35_s1] sm:$0x1f] %vm3_vm0, %v2_v0   ;;  %11 = vst.msk [vmem:[%s35_s1 + $0x5] sm:$0x1f] %vm3_vm0, %v10_v1  }

// kernel: custom_clip_forward.2
= control target key start
LH: loop header
LB: loop body
LE: loop exit
PB: predicated region body
PF: predicated region fallthrough
CT: control target
= control target key end

     0   :  { %vm102_vm0 = vcmask 261120   ;;  %vm235_vm1 = vcmask 64512   ;;  %v5562_v52 = vmov 0.0   ;;  %s5563_s28 = smov 96   ;;  %s5564_s29 = smov 88   ;;  %vm5565_vm2 = vmmov 0   ;;  %s6696_s0 = inlined_call_operand.vmem [shape: f32[24,32], index: 0, kind: input, shape index: {}]   ;;  %s6697_s4 = inlined_call_operand.vmem [shape: bf16[2,32,96], index: 4, kind: input, shape index: {}]   ;;  %s6698_s2 = inlined_call_operand.vmem [shape: f32[2,1,32], index: 2, kind: input, shape index: {}]   ;;  %s6699_s3 = inlined_call_operand.vmem [shape: f32[2,1,32], index: 3, kind: input, shape index: {}]   ;;  %s6700_s5 = inlined_call_operand.vmem [shape: f32[2,1,96], index: 5, kind: input, shape index: {}]   ;;  %s6701_s6 = inlined_call_operand.vmem [shape: bf16[2,32,32], index: 6, kind: input, shape index: {}]   ;;  %s6702_s7 = inlined_call_operand.vmem [shape: f32[2,1,32], index: 7, kind: input, shape index: {}]   ;;  %s6703_s10 = inlined_call_operand.vmem [shape: bf16[2,32,128], index: 10, kind: input, shape index: {}]   ;;  %s6704_s8 = inlined_call_operand.vmem [shape: f32[2,1,32], index: 8, kind: input, shape index: {}]   ;;  %s6705_s9 = inlined_call_operand.vmem [shape: f32[2,1,32], index: 9, kind: input, shape index: {}]   ;;  %s6706_s12 = inlined_call_operand.vmem [shape: bf16[2,128,32], index: 12, kind: input, shape index: {}]   ;;  %s6707_s11 = inlined_call_operand.vmem [shape: f32[2,1,128], index: 11, kind: input, shape index: {}]   ;;  %s6708_s13 = inlined_call_operand.vmem [shape: f32[2,1,32], index: 13, kind: input, shape index: {}]   ;;  %s6709_s1 = inlined_call_operand.vmem [shape: f32[3,24], index: 1, kind: input, shape index: {}]   ;;  %s6710_s16 = inlined_call_operand.vmem [shape: bf16[32,32], index: 16, kind: input, shape index: {}]   ;;  %s6711_s14 = inlined_call_operand.vmem [shape: f32[1,32], index: 14, kind: input, shape index: {}]   ;;  %s6712_s15 = inlined_call_operand.vmem [shape: f32[1,32], index: 15, kind: input, shape index: {}]   ;;  %s6713_s17 = inlined_call_operand.vmem [shape: f32[3,32], index: 17, kind: output, shape index: {}]  }
   0x1   :  { %6726 = sst [smem:[#allocation3_spill]] %s6696_s0  ;;  %v4612_v34 = vld [vmem:[%s6698_s2] ss:$0 sm:$0xff]  ;;  %4949 = vmatprep.subr.bf16.mxu0 %v5562_v52  ;;  %4951 = vmatprep.mubr.msk.bf16.mxu0 %vm5565_vm2, %v5562_v52  ;;  %s5566_s0 = smov 80   ;;  %vm1180_vm3 = vcmask 1043456   ;;  %vm4436_vm5 = vcmask 195584  }
   0x2   :  { %6727 = sst [smem:[#allocation4_spill]] %s6697_s4  ;;  %s6728_s26 = sld [smem:[#allocation3_spill]]  ;;  %v4613_v40 = vld [vmem:[%s6699_s3] ss:$0 sm:$0xff]  ;;  %vm4512_vm6 = vcmask 256000  }
   0x3   :  { %s6729_s19 = sld [smem:[#allocation4_spill]]  ;;  %v4614_v48 = vld [vmem:[%s6700_s5] ss:$0 sm:$0xff]  ;;  %s5567_s30 = smov 120  }
   0x4   :  { %s6724_s18 = smov 72   ;;  %s5569_s4 = smov 112  }
   0x5   :  { %s5570_s20 = smov 104   ;;  %s6720_s21 = smov 56  }
   0x6   :  { %s6722_s22 = smov 64   ;;  %s6718_s23 = smov 48  }
   0x7   :  { %s6716_s24 = smov 40  }
   0x8   :  { %v63_v0 = vld [vmem:[%s6728_s26] sm:$0xff]  ;;  %v65_v1 = vld [vmem:[%s6728_s26 + $0x10] sm:$0xff]  ;;  %v64_v2 = vld [vmem:[%s6728_s26 + $0x8] sm:$0xff] }
   0x9   :  { %v103_v3 = vsel %vm102_vm0, %v63_v0, 0.0  ;;  %v109_v4 = vsel %vm102_vm0, %v65_v1, 0.0  ;;  %v106_v5 = vsel %vm102_vm0, %v64_v2, 0.0  ;;  %v5385_v21 = vld [vmem:[%s6729_s19] sm:$0xff]   ;;  %v5386_v22 = vld [vmem:[%s6729_s19 + $0x8] sm:$0xff]  }
   0xa   :  { %104 = vadd.xlane.f32.xlu0 %v103_v3  ;;  %110 = vadd.xlane.f32.xlu1 %v109_v4 }
   0xb   :  { %4935 = vmatprep.subr.bf16.mxu1 %v5385_v21 }
   0xc   :  { %4936 = vmatpush3.bf16.msra.mxu1 %v5385_v21 }
   0xd   :  { %4937 = vmatprep.subr.bf16.mxu1 %v5386_v22 }
   0xe   :  { %107 = vadd.xlane.f32.xlu0 %v106_v5 }
  0x10   :  { %4938 = vmatpush3.bf16.msra.mxu1 %v5386_v22 }
  0x11   :  { %4943 = vmatprep.subr.bf16.mxu1 %v5562_v52 }
  0x97   :  { %v105_v6 = vpop.xlane.xlu0 %104  ;;  %v111_v7 = vpop.xlane.xlu1 %110 }
  0x98   :  { %v113_v8 = vmul.f32 0.03125, %v105_v6  ;;  %v115_v9 = vmul.f32 0.03125, %v111_v7 }
  0x9a   :  { %v116_v10 = vsub.f32 %v63_v0, %v113_v8  ;;  %v118_v11 = vsub.f32 %v65_v1, %v115_v9 }
  0x9b   :  { %v108_v12 = vpop.xlane.xlu0 %107 }
  0x9c   :  { %v114_v13 = vmul.f32 0.03125, %v108_v12  ;;  %v119_v14 = vmul.f32 %v116_v10, %v116_v10  ;;  %v121_v15 = vmul.f32 %v118_v11, %v118_v11 }
  0x9e   :  { %v117_v16 = vsub.f32 %v64_v2, %v114_v13  ;;  %v122_v17 = vsel %vm102_vm0, %v119_v14, 0.0  ;;  %v128_v18 = vsel %vm102_vm0, %v121_v15, 0.0 }
  0x9f   :  { %123 = vadd.xlane.f32.xlu1 %v122_v17 }
  0xa0   :  { %v120_v19 = vmul.f32 %v117_v16, %v117_v16 }
  0xa2   :  { %v125_v20 = vsel %vm102_vm0, %v120_v19, 0.0 }
  0xa3   :  { %129 = vadd.xlane.f32.xlu1 %v128_v18  ;;  %126 = vadd.xlane.f32.xlu0 %v125_v20 }
 0x12c   :  { %v124_v23 = vpop.xlane.xlu1 %123 }
 0x12d   :  { %v131_v24 = vmul.f32 0.03125, %v124_v23 }
 0x12f   :  { %v134_v25 = vadd.f32 1e-05, %v131_v24 }
 0x130   :  { %v130_v26 = vpop.xlane.xlu1 %129  ;;  %v127_v27 = vpop.xlane.xlu0 %126 }
 0x131   :  { %5411 = vrsqrt.f32 %v134_v25  ;;  %v133_v28 = vmul.f32 0.03125, %v130_v26  ;;  %v132_v29 = vmul.f32 0.03125, %v127_v27 }
 0x133   :  { %v136_v30 = vadd.f32 1e-05, %v133_v28  ;;  %v135_v31 = vadd.f32 1e-05, %v132_v29 }
 0x135   :  { %5413 = vrsqrt.f32 %v136_v30 }
 0x136   :  { %5415 = vrsqrt.f32 %v135_v31 }
 0x13b   :  { %v5412_v32 = vpop.eup %5411 }
 0x13c   :  { %v140_v33 = vmul.f32 %v5412_v32, %v116_v10 }
 0x13e   :  { %v149_v39 = vmul.f32 %v4612_v34, %v140_v33 }
 0x13f   :  { %v5414_v35 = vpop.eup %5413 }
 0x140   :  { %v5416_v36 = vpop.eup %5415  ;;  %v142_v37 = vmul.f32 %v5414_v35, %v118_v11  ;;  %v158_v44 = vadd.f32 %v4613_v40, %v149_v39 }
 0x141   :  { %v141_v38 = vmul.f32 %v5416_v36, %v117_v16 }
 0x142   :  { %v151_v41 = vmul.f32 %v4612_v34, %v142_v37 }
 0x143   :  { %v150_v42 = vmul.f32 %v4612_v34, %v141_v38 }
 0x144   :  { %v160_v43 = vadd.f32 %v4613_v40, %v151_v41 }
 0x145   :  { %v159_v45 = vadd.f32 %v4613_v40, %v150_v42 }
 0x146   :  { %v162_v46 = vpack.c.bf16 %v160_v43, %v160_v43 }
 0x147   :  { %v161_v47 = vpack.c.bf16 %v159_v45, %v158_v44 }
 0x149   :  { %4939 = vmatprep.mubr.msk.bf16.mxu1 %vm102_vm0, %v161_v47 }
 0x14a   :  { %4940 = vmatmul.mubr.msk.bf16.vlgmr.msra.gmra.mrb[0].mxu1 %vm102_vm0, %v162_v46 }
 0x14b   :  { %4945 = vmatprep.mubr.msk.bf16.mxu1 %vm5565_vm2, %v5562_v52 }
 0x21d   :  { %v4941_v49 = vpop.f32.mrb[0].mxu1 }
 0x21e   :  { %v5698_v50 = vadd.f32 %v4941_v49, %v4614_v48  ;;  %v221_v51 = vpop.f32.mrb[1].mxu1 }
 0x21f   :  { %v5702_v53 = vadd.f32 %v4614_v48, %v221_v51  ;;  %v4942_v54 = vpop.f32.mrb[2].mxu1 }
 0x220   :  { %v224_v55 = vpop.f32.mrb[3].mxu1  ;;  %238 = vst.msk [vmem:[#allocation2 + $0x10] sm:$0xff] %vm235_vm1, %v5698_v50 }
 0x221   :  { %v5706_v56 = vadd.f32 %v4614_v48, %v224_v55  ;;  %242 = vrot.lane.b32.xlu0 %v5702_v53, %s5563_s28  ;;  %236 = vst.msk [vmem:[#allocation2] sm:$0xff] %vm235_vm1, %v5702_v53 }
 0x223   :  { %244 = vrot.lane.b32.xlu1 %v5706_v56, %s5563_s28  ;;  %237 = vst.msk [vmem:[#allocation2 + $0x8] sm:$0xff] %vm235_vm1, %v5706_v56 }
 0x225   :  { %283 = vrot.lane.b32.xlu0 %v5706_v56, %s5564_s29 }
 0x227   :  { %246 = vrot.lane.b32.xlu1 %v5698_v50, %s5563_s28  ;;  %v387_v22 = vld [vmem:[#allocation2 + $0x10] sm:$0xff] }
 0x228   :  { %v385_v7 = vld [vmem:[#allocation2] sm:$0xff]  ;;  %v399_v27 = vpack.c.bf16 %v387_v22, %v387_v22 }
 0x229   :  { %285 = vrot.lane.b32.xlu0 %v5698_v50, %s5564_s29  ;;  %v397_v12 = vpack.c.bf16 %v385_v7, %v385_v7 }
 0x22a   :  { %v386_v11 = vld [vmem:[#allocation2 + $0x8] sm:$0xff] }
 0x22b   :  { %281 = vrot.lane.b32.xlu1 %v5702_v53, %s5564_s29  ;;  %v398_v16 = vpack.c.bf16 %v386_v11, %v386_v11 }
 0x22d   :  { %320 = vrot.lane.b32.xlu0 %v5702_v53, %s5566_s0 }
 0x22f   :  { %268 = vrot.lane.b32.xlu1 %v5702_v53, %s5567_s30 }
 0x231   :  { %322 = vrot.lane.b32.xlu0 %v5706_v56, %s5566_s0 }
 0x233   :  { %270 = vrot.lane.b32.xlu1 %v5706_v56, %s5567_s30 }
 0x235   :  { %324 = vrot.lane.b32.xlu0 %v5698_v50, %s5566_s0 }
 0x237   :  { %272 = vrot.lane.b32.xlu1 %v5698_v50, %s5567_s30 }
 0x239   :  { %359 = vrot.lane.b32.xlu0 %v5702_v53, %s6724_s18 }
 0x23b   :  { %307 = vrot.lane.b32.xlu1 %v5702_v53, %s5569_s4 }
 0x23d   :  { %361 = vrot.lane.b32.xlu0 %v5706_v56, %s6724_s18 }
 0x23f   :  { %309 = vrot.lane.b32.xlu1 %v5706_v56, %s5569_s4 }
 0x241   :  { %363 = vrot.lane.b32.xlu0 %v5698_v50, %s6724_s18 }
 0x243   :  { %311 = vrot.lane.b32.xlu1 %v5698_v50, %s5569_s4 }
 0x245   :  { %350 = vrot.lane.b32.xlu0 %v5698_v50, %s5570_s20 }
 0x247   :  { %346 = vrot.lane.b32.xlu1 %v5702_v53, %s5570_s20 }
 0x249   :  { %294 = vrot.lane.b32.xlu0 %v5702_v53, %s6720_s21 }
 0x24b   :  { %348 = vrot.lane.b32.xlu1 %v5706_v56, %s5570_s20 }
 0x24d   :  { %257 = vrot.lane.b32.xlu0 %v5706_v56, %s6722_s22 }
 0x24f   :  { %255 = vrot.lane.b32.xlu1 %v5702_v53, %s6722_s22 }
 0x253   :  { %259 = vrot.lane.b32.xlu1 %v5698_v50, %s6722_s22 }
 0x257   :  { %296 = vrot.lane.b32.xlu1 %v5706_v56, %s6720_s21 }
 0x293   :  { %v243_v57 = vpop.permute.xlu0 %242 }
 0x294   :  { %252 = vst.msk [vmem:[#allocation2 + $0x60] sm:$0xff] %vm235_vm1, %v243_v57 }
 0x295   :  { %v245_v58 = vpop.permute.xlu1 %244 }
 0x296   :  { %253 = vst.msk [vmem:[#allocation2 + $0x68] sm:$0xff] %vm235_vm1, %v245_v58 }
 0x297   :  { %v284_v59 = vpop.permute.xlu0 %283 }
 0x298   :  { %292 = vst.msk [vmem:[#allocation2 + $0x80] sm:$0xff] %vm235_vm1, %v284_v59 }
 0x299   :  { %v247_v60 = vpop.permute.xlu1 %246 }
 0x29a   :  { %254 = vst.msk [vmem:[#allocation2 + $0x70] sm:$0xff] %vm235_vm1, %v247_v60 }
 0x29b   :  { %v286_v61 = vpop.permute.xlu0 %285  ;;  %v409_v62 = vld [vmem:[#allocation2 + $0x60] sm:$0xff] }
 0x29c   :  { %293 = vst.msk [vmem:[#allocation2 + $0x88] sm:$0xff] %vm235_vm1, %v286_v61  ;;  %v421_v63 = vpack.c.bf16 %v409_v62, %v409_v62 }
 0x29d   :  { %v282_v0 = vpop.permute.xlu1 %281  ;;  %v410_v1 = vld [vmem:[#allocation2 + $0x68] sm:$0xff] }
 0x29e   :  { %291 = vst.msk [vmem:[#allocation2 + $0x78] sm:$0xff] %vm235_vm1, %v282_v0  ;;  %v461_v2 = vsel %vm235_vm1, %v421_v63, 0  ;;  %v422_v3 = vpack.c.bf16 %v410_v1, %v410_v1 }
 0x29f   :  { %4944 = vmatpush3.bf16.xpose.msra.mxu1 %v461_v2  ;;  %v321_v4 = vpop.permute.xlu0 %320  ;;  %v413_v19 = vld [vmem:[#allocation2 + $0x80] sm:$0xff] }
 0x2a0   :  { %330 = vst.msk [vmem:[#allocation2 + $0x90] sm:$0xff] %vm235_vm1, %v321_v4  ;;  %v507_v5 = vsel %vm235_vm1, %v422_v3, 0  ;;  %4955 = vmatprep.subr.bf16.mxu1 %v5562_v52  ;;  %v425_v24 = vpack.c.bf16 %v413_v19, %v413_v19 }
 0x2a1   :  { %4950 = vmatpush3.bf16.xpose.msra.mxu0 %v507_v5  ;;  %v269_v6 = vpop.permute.xlu1 %268  ;;  %v411_v8 = vld [vmem:[#allocation2 + $0x70] sm:$0xff] }
 0x2a2   :  { %278 = vst.msk [vmem:[#allocation2 + $0x18] sm:$0xff] %vm235_vm1, %v269_v6  ;;  %v423_v9 = vpack.c.bf16 %v411_v8, %v411_v8  ;;  %4961 = vmatprep.subr.bf16.mxu0 %v5562_v52  ;;  %v645_v30 = vsel %vm235_vm1, %v425_v24, 0 }
 0x2a3   :  { %v323_v10 = vpop.permute.xlu0 %322  ;;  %v414_v23 = vld [vmem:[#allocation2 + $0x88] sm:$0xff] }
 0x2a4   :  { %331 = vst.msk [vmem:[#allocation2 + $0x98] sm:$0xff] %vm235_vm1, %v323_v10  ;;  %v553_v15 = vsel %vm235_vm1, %v423_v9, 0  ;;  %v426_v28 = vpack.c.bf16 %v414_v23, %v414_v23 }
 0x2a5   :  { %v271_v13 = vpop.permute.xlu1 %270  ;;  %v412_v14 = vld [vmem:[#allocation2 + $0x78] sm:$0xff] }
 0x2a6   :  { %279 = vst.msk [vmem:[#allocation2 + $0x20] sm:$0xff] %vm235_vm1, %v271_v13  ;;  %4946 = vmatmul.mubr.msk.bf16.vlgmr.msra.gmra.mrb[4].mxu1 %vm235_vm1, %v397_v12  ;;  %v424_v17 = vpack.c.bf16 %v412_v14, %v412_v14  ;;  %v691_v34 = vsel %vm235_vm1, %v426_v28, 0 }
 0x2a7   :  { %v325_v18 = vpop.permute.xlu0 %324  ;;  %4956 = vmatpush3.bf16.xpose.msra.mxu1 %v553_v15  ;;  %4957 = vmatprep.mubr.msk.bf16.mxu1 %vm5565_vm2, %v5562_v52  ;;  %v415_v33 = vld [vmem:[#allocation2 + $0x90] sm:$0xff] }
 0x2a8   :  { %332 = vst.msk [vmem:[#allocation2 + $0xa0] sm:$0xff] %vm235_vm1, %v325_v18  ;;  %4952 = vmatmul.mubr.msk.bf16.vlgmr.msra.gmra.mrb[0].mxu0 %vm235_vm1, %v398_v16  ;;  %v599_v20 = vsel %vm235_vm1, %v424_v17, 0  ;;  %4967 = vmatprep.subr.bf16.mxu1 %v5562_v52  ;;  %v427_v38 = vpack.c.bf16 %v415_v33, %v415_v33 }
 0x2a9   :  { %4962 = vmatpush3.bf16.xpose.msra.mxu0 %v599_v20  ;;  %v273_v21 = vpop.permute.xlu1 %272  ;;  %4963 = vmatprep.mubr.msk.bf16.mxu0 %vm5565_vm2, %v5562_v52  ;;  %v388_v26 = vld [vmem:[#allocation2 + $0x18] sm:$0xff] }
 0x2aa   :  { %280 = vst.msk [vmem:[#allocation2 + $0x28] sm:$0xff] %vm235_vm1, %v273_v21  ;;  %4973 = vmatprep.subr.bf16.mxu0 %v5562_v52  ;;  %v400_v31 = vpack.c.bf16 %v388_v26, %v388_v26  ;;  %v737_v44 = vsel %vm235_vm1, %v427_v38, 0 }
 0x2ab   :  { %v360_v25 = vpop.permute.xlu0 %359  ;;  %v416_v37 = vld [vmem:[#allocation2 + $0x98] sm:$0xff] }
 0x2ac   :  { %369 = vst.msk [vmem:[#allocation2 + $0xa8] sm:$0xff] %vm235_vm1, %v360_v25  ;;  %v428_v42 = vpack.c.bf16 %v416_v37, %v416_v37  ;;  %v57_v25 = vlaneseq }
 0x2ad   :  { %v308_v29 = vpop.permute.xlu1 %307  ;;  %v389_v36 = vld [vmem:[#allocation2 + $0x20] sm:$0xff] }
 0x2ae   :  { %317 = vst.msk [vmem:[#allocation2 + $0x30] sm:$0xff] %vm235_vm1, %v308_v29  ;;  %4958 = vmatmul.mubr.msk.bf16.vlgmr.msra.gmra.mrb[8].mxu1 %vm235_vm1, %v399_v27  ;;  %v401_v41 = vpack.c.bf16 %v389_v36, %v389_v36  ;;  %v783_v48 = vsel %vm235_vm1, %v428_v42, 0  ;;  %v58_v26 = vshrl.u32 %v57_v25, 7  ;;  %v60_v27 = vand.u32 127, %v57_v25 }
 0x2af   :  { %v362_v32 = vpop.permute.xlu0 %361  ;;  %4968 = vmatpush3.bf16.xpose.msra.mxu1 %v645_v30  ;;  %4969 = vmatprep.mubr.msk.bf16.mxu1 %vm5565_vm2, %v5562_v52  ;;  %v417_v47 = vld [vmem:[#allocation2 + $0xa0] sm:$0xff] }
 0x2b0   :  { %370 = vst.msk [vmem:[#allocation2 + $0xb0] sm:$0xff] %vm235_vm1, %v362_v32  ;;  %4964 = vmatmul.mubr.msk.bf16.vlgmr.msra.gmra.mrb[4].mxu0 %vm235_vm1, %v400_v31  ;;  %4979 = vmatprep.subr.bf16.mxu1 %v5562_v52  ;;  %v429_v55 = vpack.c.bf16 %v417_v47, %v417_v47  ;;  %vm61_vm4 = vcmp.gt.s32.totalorder %v60_v27, %v58_v26 }
 0x2b1   :  { %v310_v35 = vpop.permute.xlu1 %309  ;;  %4974 = vmatpush3.bf16.xpose.msra.mxu0 %v691_v34  ;;  %4975 = vmatprep.mubr.msk.bf16.mxu0 %vm5565_vm2, %v5562_v52  ;;  %v390_v40 = vld [vmem:[#allocation2 + $0x28] sm:$0xff]  ;;  %v5859_v29 = vsel %vm61_vm4, -1e+09, %v5562_v52 }
 0x2b2   :  { %318 = vst.msk [vmem:[#allocation2 + $0x38] sm:$0xff] %vm235_vm1, %v310_v35  ;;  %4985 = vmatprep.subr.bf16.mxu0 %v5562_v52  ;;  %v402_v45 = vpack.c.bf16 %v390_v40, %v390_v40  ;;  %v829_v62 = vsel %vm235_vm1, %v429_v55, 0 }
 0x2b3   :  { %v364_v39 = vpop.permute.xlu0 %363  ;;  %v418_v54 = vld [vmem:[#allocation2 + $0xa8] sm:$0xff] }
 0x2b4   :  { %371 = vst.msk [vmem:[#allocation2 + $0xb8] sm:$0xff] %vm235_vm1, %v364_v39  ;;  %v430_v60 = vpack.c.bf16 %v418_v54, %v418_v54 }
 0x2b5   :  { %v312_v43 = vpop.permute.xlu1 %311  ;;  %v391_v51 = vld [vmem:[#allocation2 + $0x30] sm:$0xff] }
 0x2b6   :  { %319 = vst.msk [vmem:[#allocation2 + $0x40] sm:$0xff] %vm235_vm1, %v312_v43  ;;  %4970 = vmatmul.mubr.msk.bf16.vlgmr.msra.gmra.mrb[12].mxu1 %vm235_vm1, %v401_v41  ;;  %v403_v59 = vpack.c.bf16 %v391_v51, %v391_v51  ;;  %v875_v2 = vsel %vm235_vm1, %v430_v60, 0 }
 0x2b7   :  { %v351_v46 = vpop.permute.xlu0 %350  ;;  %4980 = vmatpush3.bf16.xpose.msra.mxu1 %v737_v44  ;;  %4981 = vmatprep.mubr.msk.bf16.mxu1 %vm5565_vm2, %v5562_v52  ;;  %v419_v1 = vld [vmem:[#allocation2 + $0xb0] sm:$0xff] }
 0x2b8   :  { %358 = vst.msk [vmem:[#allocation2 + $0x58] sm:$0xff] %vm235_vm1, %v351_v46  ;;  %4976 = vmatmul.mubr.msk.bf16.vlgmr.msra.gmra.mrb[8].mxu0 %vm235_vm1, %v402_v45  ;;  %4991 = vmatprep.subr.bf16.mxu1 %v5562_v52  ;;  %v431_v6 = vpack.c.bf16 %v419_v1, %v419_v1 }
 0x2b9   :  { %v347_v49 = vpop.permute.xlu1 %346  ;;  %4986 = vmatpush3.bf16.xpose.msra.mxu0 %v783_v48  ;;  %4987 = vmatprep.mubr.msk.bf16.mxu0 %vm5565_vm2, %v5562_v52  ;;  %v392_v58 = vld [vmem:[#allocation2 + $0x38] sm:$0xff] }
 0x2ba   :  { %356 = vst.msk [vmem:[#allocation2 + $0x48] sm:$0xff] %vm235_vm1, %v347_v49  ;;  %4997 = vmatprep.subr.bf16.mxu0 %v5562_v52  ;;  %v404_v63 = vpack.c.bf16 %v392_v58, %v392_v58  ;;  %v921_v11 = vsel %vm235_vm1, %v431_v6, 0 }
 0x2bb   :  { %v295_v57 = vpop.permute.xlu0 %294  ;;  %v420_v5 = vld [vmem:[#allocation2 + $0xb8] sm:$0xff] }
 0x2bc   :  { %304 = vst.msk [vmem:[#allocation2 + $0xd8] sm:$0xff] %vm235_vm1, %v295_v57  ;;  %v432_v9 = vpack.c.bf16 %v420_v5, %v420_v5 }
 0x2bd   :  { %v349_v61 = vpop.permute.xlu1 %348  ;;  %v393_v4 = vld [vmem:[#allocation2 + $0x40] sm:$0xff] }
 0x2be   :  { %357 = vst.msk [vmem:[#allocation2 + $0x50] sm:$0xff] %vm235_vm1, %v349_v61  ;;  %4982 = vmatmul.mubr.msk.bf16.vlgmr.msra.gmra.mrb[16].mxu1 %vm235_vm1, %v403_v59  ;;  %v405_v8 = vpack.c.bf16 %v393_v4, %v393_v4  ;;  %v967_v13 = vsel %vm235_vm1, %v432_v9, 0 }
 0x2bf   :  { %v258_v0 = vpop.permute.xlu0 %257  ;;  %4992 = vmatpush3.bf16.xpose.msra.mxu1 %v829_v62  ;;  %4993 = vmatprep.mubr.msk.bf16.mxu1 %vm5565_vm2, %v5562_v52  ;;  %v396_v19 = vld [vmem:[#allocation2 + $0x58] sm:$0xff] }
 0x2c0   :  { %266 = vst.msk [vmem:[#allocation2 + $0xc8] sm:$0xff] %vm235_vm1, %v258_v0  ;;  %4988 = vmatmul.mubr.msk.bf16.vlgmr.msra.gmra.mrb[12].mxu0 %vm235_vm1, %v404_v63  ;;  %5003 = vmatprep.subr.bf16.mxu1 %v5562_v52  ;;  %v408_v23 = vpack.c.bf16 %v396_v19, %v396_v19 }
 0x2c1   :  { %v256_v3 = vpop.permute.xlu1 %255  ;;  %4998 = vmatpush3.bf16.xpose.msra.mxu0 %v875_v2  ;;  %4999 = vmatprep.mubr.msk.bf16.mxu0 %vm5565_vm2, %v5562_v52  ;;  %v394_v7 = vld [vmem:[#allocation2 + $0x48] sm:$0xff] }
 0x2c2   :  { %265 = vst.msk [vmem:[#allocation2 + $0xc0] sm:$0xff] %vm235_vm1, %v256_v3  ;;  %5009 = vmatprep.subr.bf16.mxu0 %v5562_v52  ;;  %v406_v12 = vpack.c.bf16 %v394_v7, %v394_v7 }
 0x2c5   :  { %v260_v10 = vpop.permute.xlu1 %259  ;;  %v395_v15 = vld [vmem:[#allocation2 + $0x50] sm:$0xff] }
 0x2c6   :  { %267 = vst.msk [vmem:[#allocation2 + $0xd0] sm:$0xff] %vm235_vm1, %v260_v10  ;;  %4994 = vmatmul.mubr.msk.bf16.vlgmr.msra.gmra.mrb[20].mxu1 %vm235_vm1, %v405_v8  ;;  %v407_v20 = vpack.c.bf16 %v395_v15, %v395_v15 }
 0x2c7   :  { %5004 = vmatpush3.bf16.xpose.msra.mxu1 %v921_v11  ;;  %5005 = vmatprep.mubr.msk.bf16.mxu1 %vm5565_vm2, %v5562_v52  ;;  %v434_v17 = vld [vmem:[#allocation2 + $0xc8] sm:$0xff] }
 0x2c8   :  { %5000 = vmatmul.mubr.msk.bf16.vlgmr.msra.gmra.mrb[16].mxu0 %vm235_vm1, %v406_v12  ;;  %5015 = vmatprep.subr.bf16.mxu1 %v5562_v52  ;;  %v446_v21 = vpack.c.bf16 %v434_v17, %v434_v17 }
 0x2c9   :  { %v297_v14 = vpop.permute.xlu1 %296  ;;  %5010 = vmatpush3.bf16.xpose.msra.mxu0 %v967_v13  ;;  %5011 = vmatprep.mubr.msk.bf16.mxu0 %vm5565_vm2, %v5562_v52  ;;  %v433_v16 = vld [vmem:[#allocation2 + $0xc0] sm:$0xff] }
 0x2ca   :  { %305 = vst.msk [vmem:[#allocation2 + $0xe0] sm:$0xff] %vm235_vm1, %v297_v14  ;;  %v445_v18 = vpack.c.bf16 %v433_v16, %v433_v16  ;;  %5021 = vmatprep.subr.bf16.mxu0 %v5562_v52  ;;  %v1228_v24 = vsel %vm1180_vm3, %v446_v21, 0 }
 0x2cc   :  { %v1182_v22 = vsel %vm1180_vm3, %v445_v18, 0 }
 0x2ce   :  { %5006 = vmatmul.mubr.msk.bf16.vlgmr.msra.gmra.mrb[24].mxu1 %vm235_vm1, %v407_v20 }
 0x2cf   :  { %5016 = vmatpush3.bf16.msra.mxu1 %v1182_v22  ;;  %5017 = vmatprep.mubr.msk.bf16.mxu1 %vm5565_vm2, %v5562_v52 }
 0x2d0   :  { %5012 = vmatmul.mubr.msk.bf16.vlgmr.msra.gmra.mrb[20].mxu0 %vm235_vm1, %v408_v23  ;;  %5027 = vmatprep.subr.bf16.mxu1 %v5562_v52 }
 0x2d1   :  { %5022 = vmatpush3.bf16.msra.mxu0 %v1228_v24  ;;  %5023 = vmatprep.mubr.msk.bf16.mxu0 %vm5565_vm2, %v5562_v52 }
 0x2d2   :  { %5033 = vmatprep.subr.bf16.mxu0 %v5562_v52 }
 0x379   :  { %v497_v28 = vpop.f32.mrb[4].mxu1 }
 0x37a   :  { %v1009_v30 = vmul.f32 0.35355338, %v497_v28  ;;  %v4947_v31 = vpop.f32.mrb[5].mxu1 }
 0x37b   :  { %v500_v32 = vpop.f32.mrb[6].mxu1  ;;  %v543_v33 = vpop.f32.mrb[0].mxu0 }
 0x37c   :  { %v1010_v34 = vmul.f32 0.35355338, %v543_v33  ;;  %v4948_v35 = vpop.f32.mrb[7].mxu1  ;;  %v4953_v36 = vpop.f32.mrb[1].mxu0  ;;  %v5862_v37 = vadd.f32 %v1009_v30, %v5859_v29 }
 0x37d   :  { %v546_v38 = vpop.f32.mrb[2].mxu0 }
 0x37e   :  { %v4954_v39 = vpop.f32.mrb[3].mxu0  ;;  %v1033_v40 = vsel %vm235_vm1, %v5862_v37, -inf  ;;  %v5867_v41 = vadd.f32 %v1010_v34, %v5859_v29 }
 0x37f   :  { %1034 = vmax.xlane.f32.xlu1 %v1033_v40 }
 0x380   :  { %v1036_v42 = vsel %vm235_vm1, %v5867_v41, -inf }
 0x381   :  { %1037 = vmax.xlane.f32.xlu0 %v1036_v42  ;;  %v589_v43 = vpop.f32.mrb[8].mxu1 }
 0x382   :  { %v1011_v44 = vmul.f32 0.35355338, %v589_v43  ;;  %v4959_v45 = vpop.f32.mrb[9].mxu1 }
 0x383   :  { %v592_v46 = vpop.f32.mrb[10].mxu1  ;;  %v635_v47 = vpop.f32.mrb[4].mxu0 }
 0x384   :  { %v1012_v48 = vmul.f32 0.35355338, %v635_v47  ;;  %v4960_v49 = vpop.f32.mrb[11].mxu1  ;;  %v4965_v51 = vpop.f32.mrb[5].mxu0  ;;  %v5872_v54 = vadd.f32 %v1011_v44, %v5859_v29 }
 0x385   :  { %v638_v55 = vpop.f32.mrb[6].mxu0 }
 0x386   :  { %v4966_v57 = vpop.f32.mrb[7].mxu0  ;;  %v1039_v58 = vsel %vm235_vm1, %v5872_v54, -inf  ;;  %v5877_v59 = vadd.f32 %v1012_v48, %v5859_v29 }
 0x387   :  { %1040 = vmax.xlane.f32.xlu0 %v1039_v58 }
 0x388   :  { %v1042_v63 = vsel %vm235_vm1, %v5877_v59, -inf }
 0x389   :  { %v681_v60 = vpop.f32.mrb[12].mxu1 }
 0x38a   :  { %v1013_v61 = vmul.f32 0.35355338, %v681_v60  ;;  %v4971_v62 = vpop.f32.mrb[13].mxu1 }
 0x38b   :  { %v727_v0 = vpop.f32.mrb[8].mxu0  ;;  %1043 = vmax.xlane.f32.xlu0 %v1042_v63  ;;  %v684_v1 = vpop.f32.mrb[14].mxu1 }
 0x38c   :  { %v1014_v2 = vmul.f32 0.35355338, %v727_v0  ;;  %v4972_v3 = vpop.f32.mrb[15].mxu1  ;;  %v4977_v4 = vpop.f32.mrb[9].mxu0  ;;  %v5882_v5 = vadd.f32 %v1013_v61, %v5859_v29 }
 0x38d   :  { %v730_v6 = vpop.f32.mrb[10].mxu0 }
 0x38e   :  { %v4978_v7 = vpop.f32.mrb[11].mxu0  ;;  %v1045_v8 = vsel %vm235_vm1, %v5882_v5, -inf  ;;  %v5887_v9 = vadd.f32 %v1014_v2, %v5859_v29 }
 0x38f   :  { %1046 = vmax.xlane.f32.xlu1 %v1045_v8 }
 0x390   :  { %v1048_v10 = vsel %vm235_vm1, %v5887_v9, -inf }
 0x391   :  { %1049 = vmax.xlane.f32.xlu0 %v1048_v10  ;;  %v773_v11 = vpop.f32.mrb[16].mxu1 }
 0x392   :  { %v4983_v12 = vpop.f32.mrb[17].mxu1  ;;  %v1015_v36 = vmul.f32 0.35355338, %v773_v11 }
 0x393   :  { %v776_v13 = vpop.f32.mrb[18].mxu1  ;;  %v819_v14 = vpop.f32.mrb[12].mxu0 }
 0x394   :  { %v4984_v15 = vpop.f32.mrb[19].mxu1  ;;  %v4989_v16 = vpop.f32.mrb[13].mxu0  ;;  %v1016_v38 = vmul.f32 0.35355338, %v819_v14  ;;  %v5896_v40 = vadd.f32 %v1015_v36, %v5859_v29 }
 0x395   :  { %v822_v17 = vpop.f32.mrb[14].mxu0 }
 0x396   :  { %v4990_v18 = vpop.f32.mrb[15].mxu0  ;;  %v5899_v43 = vadd.f32 %v1016_v38, %v5859_v29  ;;  %v1051_v45 = vsel %vm235_vm1, %v5896_v40, -inf }
 0x398   :  { %v1054_v48 = vsel %vm235_vm1, %v5899_v43, -inf }
 0x399   :  { %v865_v19 = vpop.f32.mrb[20].mxu1 }
 0x39a   :  { %v4995_v20 = vpop.f32.mrb[21].mxu1  ;;  %v1017_v39 = vmul.f32 0.35355338, %v865_v19 }
 0x39b   :  { %v868_v21 = vpop.f32.mrb[22].mxu1  ;;  %v911_v22 = vpop.f32.mrb[16].mxu0 }
 0x39c   :  { %v4996_v23 = vpop.f32.mrb[23].mxu1  ;;  %v5001_v24 = vpop.f32.mrb[17].mxu0  ;;  %v1018_v42 = vmul.f32 0.35355338, %v911_v22  ;;  %v5904_v46 = vadd.f32 %v1017_v39, %v5859_v29 }
 0x39d   :  { %v914_v25 = vpop.f32.mrb[18].mxu0 }
 0x39e   :  { %v5002_v26 = vpop.f32.mrb[19].mxu0  ;;  %v5909_v49 = vadd.f32 %v1018_v42, %v5859_v29  ;;  %v1057_v51 = vsel %vm235_vm1, %v5904_v46, -inf }
 0x3a0   :  { %333 = vrot.lane.b32.xlu1 %v5702_v53, %s6718_s23  ;;  %v1060_v57 = vsel %vm235_vm1, %v5909_v49, -inf }
 0x3a1   :  { %v957_v27 = vpop.f32.mrb[24].mxu1 }
 0x3a2   :  { %v5007_v28 = vpop.f32.mrb[25].mxu1  ;;  %v1019_v44 = vmul.f32 0.35355338, %v957_v27 }
 0x3a3   :  { %v960_v30 = vpop.f32.mrb[26].mxu1  ;;  %v1003_v31 = vpop.f32.mrb[20].mxu0 }
 0x3a4   :  { %v5008_v32 = vpop.f32.mrb[27].mxu1  ;;  %v5013_v33 = vpop.f32.mrb[21].mxu0  ;;  %v1020_v47 = vmul.f32 0.35355338, %v1003_v31  ;;  %v5914_v55 = vadd.f32 %v1019_v44, %v5859_v29 }
 0x3a5   :  { %v1006_v34 = vpop.f32.mrb[22].mxu0 }
 0x3a6   :  { %v5014_v35 = vpop.f32.mrb[23].mxu0  ;;  %v5919_v58 = vadd.f32 %v1020_v47, %v5859_v29  ;;  %v1063_v60 = vsel %vm235_vm1, %v5914_v55, -inf }
 0x3a7   :  { %298 = vrot.lane.b32.xlu0 %v5698_v50, %s6720_s21 }
 0x3a8   :  { %v1066_v61 = vsel %vm235_vm1, %v5919_v58, -inf }
 0x3c4   :  { %1052 = vmax.xlane.f32.xlu1 %v1051_v45 }
 0x3c6   :  { %1055 = vmax.xlane.f32.xlu0 %v1054_v48 }
 0x3c8   :  { %1058 = vmax.xlane.f32.xlu1 %v1057_v51 }
 0x3ca   :  { %1061 = vmax.xlane.f32.xlu0 %v1060_v57 }
 0x3cc   :  { %1064 = vmax.xlane.f32.xlu1 %v1063_v60 }
 0x3ce   :  { %1067 = vmax.xlane.f32.xlu0 %v1066_v61 }
 0x3dd   :  { %337 = vrot.lane.b32.xlu1 %v5698_v50, %s6718_s23 }
 0x3e4   :  { %335 = vrot.lane.b32.xlu0 %v5706_v56, %s6718_s23 }
 0x40c   :  { %v1035_v62 = vpop.xlane.xlu1 %1034 }
 0x40d   :  { %v1069_v63 = vsub.f32 %v5862_v37, %v1035_v62 }
 0x40e   :  { %v1038_v0 = vpop.xlane.xlu0 %1037 }
 0x40f   :  { %v1081_v1 = vmul.f32 1.442695, %v1069_v63  ;;  %v1070_v2 = vsub.f32 %v5867_v41, %v1038_v0 }
 0x411   :  { %5417 = vpow2.f32 %v1081_v1  ;;  %v1083_v3 = vmul.f32 1.442695, %v1070_v2 }
 0x413   :  { %5419 = vpow2.f32 %v1083_v3 }
 0x414   :  { %v1041_v4 = vpop.xlane.xlu0 %1040 }
 0x415   :  { %v1071_v6 = vsub.f32 %v5872_v54, %v1041_v4 }
 0x417   :  { %v1085_v7 = vmul.f32 1.442695, %v1071_v6 }
 0x418   :  { %v1044_v8 = vpop.xlane.xlu0 %1043 }
 0x419   :  { %5421 = vpow2.f32 %v1085_v7  ;;  %v1072_v10 = vsub.f32 %v5877_v59, %v1044_v8  ;;  %v435_v7 = vld [vmem:[#allocation2 + $0xd0] sm:$0xff] }
 0x41b   :  { %v5933_v11 = vpop.eup %5417  ;;  %v1087_v12 = vmul.f32 1.442695, %v1072_v10  ;;  %v436_v10 = vld [vmem:[#allocation2 + $0xd8] sm:$0xff] }
 0x41c   :  { %v1047_v13 = vpop.xlane.xlu1 %1046  ;;  %v1105_v37 = vsel %vm235_vm1, %v5933_v11, 0.0 }
 0x41d   :  { %v5937_v14 = vpop.eup %5419  ;;  %5423 = vpow2.f32 %v1087_v12  ;;  %v1073_v41 = vsub.f32 %v5882_v5, %v1047_v13  ;;  %1106 = vadd.xlane.f32.xlu1 %v1105_v37  ;;  %v447_v37 = vpack.c.bf16 %v435_v7, %v435_v7 }
 0x41e   :  { %v1050_v15 = vpop.xlane.xlu0 %1049  ;;  %v1108_v54 = vsel %vm235_vm1, %v5937_v14, 0.0 }
 0x41f   :  { %v1089_v16 = vmul.f32 1.442695, %v1073_v41  ;;  %v1074_v59 = vsub.f32 %v5887_v9, %v1050_v15  ;;  %1109 = vadd.xlane.f32.xlu0 %v1108_v54  ;;  %v448_v15 = vpack.c.bf16 %v436_v10, %v436_v10 }
 0x420   :  { %v334_v17 = vpop.permute.xlu1 %333 }
 0x421   :  { %5425 = vpow2.f32 %v1089_v16  ;;  %v1091_v18 = vmul.f32 1.442695, %v1074_v59  ;;  %343 = vst.msk [vmem:[#allocation2 + $0xf0] sm:$0xff] %vm235_vm1, %v334_v17  ;;  %v1320_v59 = vsel %vm1180_vm3, %v448_v15, 0 }
 0x422   :  { %v299_v19 = vpop.permute.xlu0 %298 }
 0x423   :  { %v5944_v20 = vpop.eup %5421  ;;  %5427 = vpow2.f32 %v1091_v18  ;;  %306 = vst.msk [vmem:[#allocation2 + $0xe8] sm:$0xff] %vm235_vm1, %v299_v19 }
 0x424   :  { %v1111_v5 = vsel %vm235_vm1, %v5944_v20, 0.0 }
 0x425   :  { %1112 = vadd.xlane.f32.xlu1 %v1111_v5 }
 0x427   :  { %v5949_v21 = vpop.eup %5423 }
 0x428   :  { %v1114_v9 = vsel %vm235_vm1, %v5949_v21, 0.0 }
 0x429   :  { %1115 = vadd.xlane.f32.xlu0 %v1114_v9 }
 0x42a   :  { %v438_v5 = vld [vmem:[#allocation2 + $0xe8] sm:$0xff] }
 0x42b   :  { %v5953_v22 = vpop.eup %5425 }
 0x42c   :  { %v1117_v23 = vsel %vm235_vm1, %v5953_v22, 0.0 }
 0x42d   :  { %v5957_v24 = vpop.eup %5427  ;;  %1118 = vadd.xlane.f32.xlu1 %v1117_v23 }
 0x42e   :  { %v1120_v25 = vsel %vm235_vm1, %v5957_v24, 0.0 }
 0x42f   :  { %1121 = vadd.xlane.f32.xlu0 %v1120_v25 }
 0x451   :  { %v1053_v26 = vpop.xlane.xlu1 %1052 }
 0x452   :  { %v1075_v27 = vsub.f32 %v5896_v40, %v1053_v26 }
 0x453   :  { %v1056_v28 = vpop.xlane.xlu0 %1055 }
 0x454   :  { %v1093_v30 = vmul.f32 1.442695, %v1075_v27  ;;  %v1076_v31 = vsub.f32 %v5899_v43, %v1056_v28  ;;  %v450_v27 = vpack.c.bf16 %v438_v5, %v438_v5  ;;  %v439_v28 = vld [vmem:[#allocation2 + $0xf0] sm:$0xff]  ;;  %v74_v5 = vld [vmem:[%s6701_s6 + $0x4] sm:$0xf] }
 0x455   :  { %v1059_v32 = vpop.xlane.xlu1 %1058 }
 0x456   :  { %5429 = vpow2.f32 %v1093_v30  ;;  %v1095_v33 = vmul.f32 1.442695, %v1076_v31  ;;  %v1077_v34 = vsub.f32 %v5904_v46, %v1059_v32  ;;  %v451_v32 = vpack.c.bf16 %v439_v28, %v439_v28 }
 0x457   :  { %v1062_v35 = vpop.xlane.xlu0 %1061 }
 0x458   :  { %5431 = vpow2.f32 %v1095_v33  ;;  %v1097_v36 = vmul.f32 1.442695, %v1077_v34  ;;  %v1078_v38 = vsub.f32 %v5909_v49, %v1062_v35 }
 0x459   :  { %v1065_v39 = vpop.xlane.xlu1 %1064 }
 0x45a   :  { %5433 = vpow2.f32 %v1097_v36  ;;  %v1099_v42 = vmul.f32 1.442695, %v1078_v38  ;;  %v1079_v44 = vsub.f32 %v5914_v55, %v1065_v39 }
 0x45b   :  { %v1068_v40 = vpop.xlane.xlu0 %1067 }
 0x45c   :  { %5435 = vpow2.f32 %v1099_v42  ;;  %v1101_v45 = vmul.f32 1.442695, %v1079_v44  ;;  %v1080_v43 = vsub.f32 %v5919_v58, %v1068_v40 }
 0x45d   :  { %v338_v47 = vpop.permute.xlu1 %337 }
 0x45e   :  { %5437 = vpow2.f32 %v1101_v45  ;;  %v1103_v48 = vmul.f32 1.442695, %v1080_v43  ;;  %345 = vst.msk [vmem:[#allocation2 + $0x100] sm:$0xff] %vm235_vm1, %v338_v47 }
 0x45f   :  { %v336_v46 = vpop.permute.xlu0 %335 }
 0x460   :  { %v5968_v51 = vpop.eup %5429  ;;  %5439 = vpow2.f32 %v1103_v48  ;;  %344 = vst.msk [vmem:[#allocation2 + $0xf8] sm:$0xff] %vm235_vm1, %v336_v46 }
 0x461   :  { %v1123_v49 = vsel %vm235_vm1, %v5968_v51, 0.0 }
 0x462   :  { %v5973_v55 = vpop.eup %5431  ;;  %1124 = vadd.xlane.f32.xlu1 %v1123_v49 }
 0x463   :  { %v1126_v57 = vsel %vm235_vm1, %v5973_v55, 0.0 }
 0x464   :  { %v5977_v58 = vpop.eup %5433  ;;  %1127 = vadd.xlane.f32.xlu0 %v1126_v57 }
 0x465   :  { %v1129_v60 = vsel %vm235_vm1, %v5977_v58, 0.0  ;;  %v441_v47 = vld [vmem:[#allocation2 + $0x100] sm:$0xff] }
 0x466   :  { %v5981_v61 = vpop.eup %5435  ;;  %1130 = vadd.xlane.f32.xlu1 %v1129_v60  ;;  %v453_v60 = vpack.c.bf16 %v441_v47, %v441_v47 }
 0x467   :  { %v1132_v62 = vsel %vm235_vm1, %v5981_v61, 0.0  ;;  %v440_v34 = vld [vmem:[#allocation2 + $0xf8] sm:$0xff] }
 0x468   :  { %v5985_v63 = vpop.eup %5437  ;;  %1133 = vadd.xlane.f32.xlu0 %v1132_v62  ;;  %v452_v38 = vpack.c.bf16 %v440_v34, %v440_v34 }
 0x469   :  { %v1135_v0 = vsel %vm235_vm1, %v5985_v63, 0.0 }
 0x46a   :  { %v5989_v1 = vpop.eup %5439  ;;  %1136 = vadd.xlane.f32.xlu1 %v1135_v0  ;;  %v1504_v42 = vsel %vm1180_vm3, %v452_v38, 0 }
 0x46b   :  { %v1138_v2 = vsel %vm235_vm1, %v5989_v1, 0.0 }
 0x46c   :  { %1139 = vadd.xlane.f32.xlu0 %v1138_v2 }
 0x47b   :  { %374 = vrot.lane.b32.xlu1 %v5706_v56, %s6716_s24 }
 0x47f   :  { %376 = vrot.lane.b32.xlu1 %v5698_v50, %s6716_s24 }
 0x482   :  { %372 = vrot.lane.b32.xlu0 %v5702_v53, %s6716_s24  ;;  %v1274_v53 = vsel %vm1180_vm3, %v447_v37, 0 }
 0x4aa   :  { %v1107_v3 = vpop.xlane.xlu1 %1106 }
 0x4ab   :  { %5441 = vrcp.f32 %v1107_v3 }
 0x4ac   :  { %v1110_v4 = vpop.xlane.xlu0 %1109 }
 0x4ad   :  { %5443 = vrcp.f32 %v1110_v4 }
 0x4b2   :  { %v1113_v6 = vpop.xlane.xlu1 %1112 }
 0x4b3   :  { %5445 = vrcp.f32 %v1113_v6  ;;  %v1550_v6 = vsel %vm1180_vm3, %v453_v60, 0 }
 0x4b5   :  { %v5442_v8 = vpop.eup %5441 }
 0x4b6   :  { %v1153_v12 = vmul.f32 %v5442_v8, %v5933_v11  ;;  %v1116_v13 = vpop.xlane.xlu0 %1115  ;;  %v437_v11 = vld [vmem:[#allocation2 + $0xe0] sm:$0xff] }
 0x4b7   :  { %v5444_v56 = vpop.eup %5443  ;;  %5447 = vrcp.f32 %v1116_v13  ;;  %v449_v19 = vpack.c.bf16 %v437_v11, %v437_v11 }
 0x4b8   :  { %v1154_v50 = vmul.f32 %v5444_v56, %v5937_v14  ;;  %v1165_v41 = vpack.c.bf16 %v1153_v12, %v1153_v12 }
 0x4b9   :  { %v1366_v26 = vsel %vm1180_vm3, %v449_v19, 0 }
 0x4ba   :  { %5018 = vmatmul.mubr.msk.bf16.vlgmr.msra.gmra.mrb[28].mxu1 %vm235_vm1, %v1165_v41  ;;  %v1119_v54 = vpop.xlane.xlu1 %1118  ;;  %v1166_v16 = vpack.c.bf16 %v1154_v50, %v1154_v50 }
 0x4bb   :  { %5028 = vmatpush3.bf16.msra.mxu1 %v1274_v53  ;;  %5449 = vrcp.f32 %v1119_v54  ;;  %5029 = vmatprep.mubr.msk.bf16.mxu1 %vm5565_vm2, %v5562_v52 }
 0x4bc   :  { %5024 = vmatmul.mubr.msk.bf16.vlgmr.msra.gmra.mrb[24].mxu0 %vm235_vm1, %v1166_v16  ;;  %v1122_v17 = vpop.xlane.xlu0 %1121  ;;  %5039 = vmatprep.subr.bf16.mxu1 %v5562_v52 }
 0x4bd   :  { %v5446_v14 = vpop.eup %5445  ;;  %5034 = vmatpush3.bf16.msra.mxu0 %v1320_v59  ;;  %5451 = vrcp.f32 %v1122_v17  ;;  %5035 = vmatprep.mubr.msk.bf16.mxu0 %vm5565_vm2, %v5562_v52 }
 0x4be   :  { %v1155_v18 = vmul.f32 %v5446_v14, %v5944_v20  ;;  %5045 = vmatprep.subr.bf16.mxu0 %v5562_v52 }
 0x4c0   :  { %v1167_v9 = vpack.c.bf16 %v1155_v18, %v1155_v18 }
 0x4c1   :  { %v5448_v23 = vpop.eup %5447 }
 0x4c2   :  { %v1156_v25 = vmul.f32 %v5448_v23, %v5949_v21  ;;  %5030 = vmatmul.mubr.msk.bf16.vlgmr.msra.gmra.mrb[32].mxu1 %vm235_vm1, %v1167_v9  ;;  %v1412_v21 = vsel %vm1180_vm3, %v450_v27, 0  ;;  %v75_v9 = vld [vmem:[%s6701_s6 + $0x8] sm:$0xf]  ;;  %v76_v23 = vld [vmem:[%s6701_s6 + $0xc] sm:$0xf] }
 0x4c3   :  { %5040 = vmatpush3.bf16.msra.mxu1 %v1366_v26  ;;  %5041 = vmatprep.mubr.msk.bf16.mxu1 %vm5565_vm2, %v5562_v52  ;;  %v1931_v60 = vsel %vm1180_vm3, %v76_v23, 0 }
 0x4c4   :  { %v1168_v30 = vpack.c.bf16 %v1156_v25, %v1156_v25  ;;  %5051 = vmatprep.subr.bf16.mxu1 %v5562_v52 }
 0x4c5   :  { %v5450_v20 = vpop.eup %5449 }
 0x4c6   :  { %v1157_v31 = vmul.f32 %v5450_v20, %v5953_v22  ;;  %5036 = vmatmul.mubr.msk.bf16.vlgmr.msra.gmra.mrb[28].mxu0 %vm235_vm1, %v1168_v30  ;;  %v1458_v22 = vsel %vm1180_vm3, %v451_v32, 0 }
 0x4c7   :  { %v5452_v33 = vpop.eup %5451  ;;  %5046 = vmatpush3.bf16.msra.mxu0 %v1412_v21  ;;  %5047 = vmatprep.mubr.msk.bf16.mxu0 %vm5565_vm2, %v5562_v52 }
 0x4c8   :  { %v1158_v35 = vmul.f32 %v5452_v33, %v5957_v24  ;;  %v1169_v36 = vpack.c.bf16 %v1157_v31, %v1157_v31  ;;  %5057 = vmatprep.subr.bf16.mxu0 %v5562_v52 }
 0x4ca   :  { %5042 = vmatmul.mubr.msk.bf16.vlgmr.msra.gmra.mrb[36].mxu1 %vm235_vm1, %v1169_v36  ;;  %v1170_v39 = vpack.c.bf16 %v1158_v35, %v1158_v35  ;;  %v1869_v36 = vsel %vm1180_vm3, %v75_v9, 0 }
 0x4cb   :  { %5052 = vmatpush3.bf16.msra.mxu1 %v1458_v22  ;;  %5053 = vmatprep.mubr.msk.bf16.mxu1 %vm5565_vm2, %v5562_v52 }
 0x4cc   :  { %5063 = vmatprep.subr.bf16.mxu1 %v5562_v52 }
 0x4ce   :  { %5048 = vmatmul.mubr.msk.bf16.vlgmr.msra.gmra.mrb[32].mxu0 %vm235_vm1, %v1170_v39 }
 0x4cf   :  { %5058 = vmatpush3.bf16.msra.mxu0 %v1504_v42  ;;  %5059 = vmatprep.mubr.msk.bf16.mxu0 %vm5565_vm2, %v5562_v52 }
 0x4d0   :  { %5069 = vmatprep.subr.bf16.mxu0 %v5562_v52 }
 0x4ef   :  { %v1125_v24 = vpop.xlane.xlu1 %1124 }
 0x4f0   :  { %5453 = vrcp.f32 %v1125_v24 }
 0x4f1   :  { %v1128_v44 = vpop.xlane.xlu0 %1127 }
 0x4f2   :  { %5455 = vrcp.f32 %v1128_v44 }
 0x4f3   :  { %v1131_v40 = vpop.xlane.xlu1 %1130 }
 0x4f4   :  { %5457 = vrcp.f32 %v1131_v40 }
 0x4f5   :  { %v1134_v45 = vpop.xlane.xlu0 %1133 }
 0x4f6   :  { %5459 = vrcp.f32 %v1134_v45 }
 0x4f7   :  { %v1137_v43 = vpop.xlane.xlu1 %1136 }
 0x4f8   :  { %5461 = vrcp.f32 %v1137_v43 }
 0x4f9   :  { %v1140_v48 = vpop.xlane.xlu0 %1139 }
 0x4fa   :  { %v5454_v46 = vpop.eup %5453  ;;  %5463 = vrcp.f32 %v1140_v48 }
 0x4fb   :  { %v1159_v49 = vmul.f32 %v5454_v46, %v5968_v51  ;;  %v375_v57 = vpop.permute.xlu1 %374 }
 0x4fc   :  { %v5456_v62 = vpop.eup %5455  ;;  %383 = vst.msk [vmem:[#allocation2 + $0x110] sm:$0xff] %vm235_vm1, %v375_v57 }
 0x4fd   :  { %v1160_v0 = vmul.f32 %v5456_v62, %v5973_v55  ;;  %v373_v2 = vpop.permute.xlu0 %372  ;;  %v1171_v3 = vpack.c.bf16 %v1159_v49, %v1159_v49 }
 0x4fe   :  { %v5458_v4 = vpop.eup %5457  ;;  %382 = vst.msk [vmem:[#allocation2 + $0x108] sm:$0xff] %vm235_vm1, %v373_v2 }
 0x4ff   :  { %5054 = vmatmul.mubr.msk.bf16.vlgmr.msra.gmra.mrb[40].mxu1 %vm235_vm1, %v1171_v3  ;;  %v377_v7 = vpop.permute.xlu1 %376  ;;  %v1172_v8 = vpack.c.bf16 %v1160_v0, %v1160_v0  ;;  %v1161_v51 = vmul.f32 %v5458_v4, %v5977_v58 }
 0x500   :  { %5064 = vmatpush3.bf16.msra.mxu1 %v1550_v6  ;;  %384 = vst.msk [vmem:[#allocation2 + $0x118] sm:$0xff] %vm235_vm1, %v377_v7  ;;  %5065 = vmatprep.mubr.msk.bf16.mxu1 %vm5565_vm2, %v5562_v52  ;;  %v5460_v55 = vpop.eup %5459 }
 0x501   :  { %5060 = vmatmul.mubr.msk.bf16.vlgmr.msra.gmra.mrb[36].mxu0 %vm235_vm1, %v1172_v8  ;;  %5075 = vmatprep.subr.bf16.mxu1 %v5562_v52  ;;  %v1173_v13 = vpack.c.bf16 %v1161_v51, %v1161_v51  ;;  %v1162_v50 = vmul.f32 %v5460_v55, %v5981_v61 }
 0x502   :  { %5071 = vmatprep.mubr.msk.bf16.mxu0 %vm5565_vm2, %v5562_v52  ;;  %v5462_v56 = vpop.eup %5461 }
 0x503   :  { %v443_v10 = vld [vmem:[#allocation2 + $0x110] sm:$0xff]  ;;  %v1163_v16 = vmul.f32 %v5462_v56, %v5985_v63  ;;  %v1174_v11 = vpack.c.bf16 %v1162_v50, %v1162_v50  ;;  %v73_v63 = vld [vmem:[%s6701_s6] sm:$0xf] }
 0x504   :  { %v455_v12 = vpack.c.bf16 %v443_v10, %v443_v10  ;;  %v5464_v61 = vpop.eup %5463  ;;  %v1739_v19 = vsel %vm1180_vm3, %v73_v63, 0 }
 0x505   :  { %v442_v37 = vld [vmem:[#allocation2 + $0x108] sm:$0xff]  ;;  %v1175_v17 = vpack.c.bf16 %v1163_v16, %v1163_v16  ;;  %v1164_v14 = vmul.f32 %v5464_v61, %v5989_v1  ;;  %v1807_v1 = vsel %vm1180_vm3, %v74_v5, 0 }
 0x506   :  { %v1642_v41 = vsel %vm1180_vm3, %v455_v12, 0  ;;  %v454_v15 = vpack.c.bf16 %v442_v37, %v442_v37 }
 0x507   :  { %5066 = vmatmul.mubr.msk.bf16.vlgmr.msra.gmra.mrb[44].mxu1 %vm235_vm1, %v1173_v13  ;;  %v444_v58 = vld [vmem:[#allocation2 + $0x118] sm:$0xff]  ;;  %v1176_v18 = vpack.c.bf16 %v1164_v14, %v1164_v14 }
 0x508   :  { %5076 = vmatpush3.bf16.msra.mxu1 %v1642_v41  ;;  %v1596_v53 = vsel %vm1180_vm3, %v454_v15, 0  ;;  %v456_v54 = vpack.c.bf16 %v444_v58, %v444_v58  ;;  %5077 = vmatprep.mubr.msk.bf16.mxu1 %vm5565_vm2, %v5562_v52 }
 0x509   :  { %5070 = vmatpush3.bf16.msra.mxu0 %v1596_v53  ;;  %5363 = vmatprep.subr.msk.bf16.mxu1 %vm1180_vm3, %v73_v63 }
 0x50a   :  { %5081 = vmatprep.subr.bf16.mxu0 %v5562_v52  ;;  %v1688_v59 = vsel %vm1180_vm3, %v456_v54, 0 }
 0x50c   :  { %5072 = vmatmul.mubr.msk.bf16.vlgmr.msra.gmra.mrb[40].mxu0 %vm235_vm1, %v1174_v11 }
 0x50d   :  { %5082 = vmatpush3.bf16.msra.mxu0 %v1688_v59  ;;  %5083 = vmatprep.mubr.msk.bf16.mxu0 %vm5565_vm2, %v5562_v52 }
 0x50e   :  { %5364 = vmatprep.subr.msk.bf16.mxu0 %vm1180_vm3, %v74_v5 }
 0x50f   :  { %5078 = vmatmul.mubr.msk.bf16.vlgmr.msra.gmra.mrb[48].mxu1 %vm235_vm1, %v1175_v17 }
 0x510   :  { %5088 = vmatpush3.bf16.msra.mxu1 %v1739_v19 }
 0x511   :  { %5365 = vmatprep.subr.msk.bf16.mxu1 %vm1180_vm3, %v75_v9 }
 0x514   :  { %5084 = vmatmul.mubr.msk.bf16.vlgmr.msra.gmra.mrb[44].mxu0 %vm235_vm1, %v1176_v18 }
 0x515   :  { %5094 = vmatpush3.bf16.msra.mxu0 %v1807_v1 }
 0x516   :  { %5366 = vmatprep.subr.msk.bf16.mxu0 %vm1180_vm3, %v76_v23 }
 0x58d   :  { %v1218_v25 = vpop.f32.mrb[28].mxu1 }
 0x58e   :  { %v5019_v26 = vpop.f32.mrb[29].mxu1 }
 0x58f   :  { %v1221_v27 = vpop.f32.mrb[30].mxu1  ;;  %v1264_v28 = vpop.f32.mrb[24].mxu0 }
 0x590   :  { %v1730_v30 = vpack.c.bf16 %v1264_v28, %v1218_v25  ;;  %v5020_v20 = vpop.f32.mrb[31].mxu1  ;;  %v5025_v31 = vpop.f32.mrb[25].mxu0  ;;  %v4645_v25 = vld [vmem:[%s6702_s7] ss:$0 sm:$0xff] }
 0x591   :  { %v1267_v21 = vpop.f32.mrb[26].mxu0 }
 0x592   :  { %v5026_v32 = vpop.f32.mrb[27].mxu0  ;;  %5089 = vmatprep.mubr.msk.bf16.mxu1 %vm235_vm1, %v1730_v30 }
 0x595   :  { %v1310_v33 = vpop.f32.mrb[32].mxu1 }
 0x596   :  { %v1731_v34 = vpack.c.bf16 %v1310_v33, %v1310_v33  ;;  %v5031_v35 = vpop.f32.mrb[33].mxu1 }
 0x597   :  { %v1313_v22 = vpop.f32.mrb[34].mxu1 }
 0x598   :  { %v5032_v38 = vpop.f32.mrb[35].mxu1  ;;  %5090 = vmatmul.mubr.msk.bf16.vlgmr.msra.gmra.mrb[52].mxu1 %vm235_vm1, %v1731_v34 }
 0x599   :  { %v1356_v39 = vpop.f32.mrb[28].mxu0  ;;  %5100 = vmatpush3.bf16.msra.mxu1 %v1869_v36 }
 0x59a   :  { %v5037_v42 = vpop.f32.mrb[29].mxu0 }
 0x59b   :  { %v1359_v24 = vpop.f32.mrb[30].mxu0 }
 0x59c   :  { %v5038_v44 = vpop.f32.mrb[31].mxu0 }
 0x59d   :  { %v1402_v40 = vpop.f32.mrb[36].mxu1 }
 0x59e   :  { %v1798_v45 = vpack.c.bf16 %v1402_v40, %v1356_v39  ;;  %v5043_v43 = vpop.f32.mrb[37].mxu1 }
 0x59f   :  { %v1405_v47 = vpop.f32.mrb[38].mxu1 }
 0x5a0   :  { %v5044_v48 = vpop.f32.mrb[39].mxu1  ;;  %5095 = vmatprep.mubr.msk.bf16.mxu0 %vm235_vm1, %v1798_v45 }
 0x5a1   :  { %v1448_v46 = vpop.f32.mrb[32].mxu0 }
 0x5a2   :  { %v1799_v49 = vpack.c.bf16 %v1448_v46, %v1448_v46  ;;  %v5049_v57 = vpop.f32.mrb[33].mxu0  ;;  %v5559_v46 = vld [vmem:[%s6728_s26] sm:$0xff] }
 0x5a3   :  { %v1451_v62 = vpop.f32.mrb[34].mxu0 }
 0x5a4   :  { %v5050_v0 = vpop.f32.mrb[35].mxu0  ;;  %5096 = vmatmul.mubr.msk.bf16.vlgmr.msra.gmra.mrb[48].mxu0 %vm235_vm1, %v1799_v49 }
 0x5a5   :  { %5106 = vmatpush3.bf16.msra.mxu0 %v1931_v60  ;;  %v5560_v60 = vld [vmem:[%s6728_s26 + $0x8] sm:$0xff] }
 0x5d2   :  { %v1494_v2 = vpop.f32.mrb[40].mxu1 }
 0x5d3   :  { %v5055_v3 = vpop.f32.mrb[41].mxu1 }
 0x5d4   :  { %v1497_v4 = vpop.f32.mrb[42].mxu1  ;;  %v1540_v6 = vpop.f32.mrb[36].mxu0 }
 0x5d5   :  { %v1860_v7 = vpack.c.bf16 %v1540_v6, %v1494_v2  ;;  %v5056_v8 = vpop.f32.mrb[43].mxu1  ;;  %v5061_v51 = vpop.f32.mrb[37].mxu0  ;;  %v5561_v2 = vld [vmem:[%s6728_s26 + $0x10] sm:$0xff] }
 0x5d6   :  { %v1543_v55 = vpop.f32.mrb[38].mxu0 }
 0x5d7   :  { %v5062_v10 = vpop.f32.mrb[39].mxu0  ;;  %5101 = vmatprep.mubr.msk.bf16.mxu1 %vm235_vm1, %v1860_v7 }
 0x5da   :  { %v1586_v12 = vpop.f32.mrb[44].mxu1 }
 0x5db   :  { %v1861_v13 = vpack.c.bf16 %v1586_v12, %v1586_v12  ;;  %v5067_v37 = vpop.f32.mrb[45].mxu1 }
 0x5dc   :  { %v1589_v56 = vpop.f32.mrb[46].mxu1 }
 0x5dd   :  { %v5068_v50 = vpop.f32.mrb[47].mxu1  ;;  %5102 = vmatmul.mubr.msk.bf16.vlgmr.msra.gmra.mrb[56].mxu1 %vm235_vm1, %v1861_v13 }
 0x5df   :  { %v1632_v41 = vpop.f32.mrb[40].mxu0 }
 0x5e0   :  { %v5073_v15 = vpop.f32.mrb[41].mxu0 }
 0x5e1   :  { %v1635_v58 = vpop.f32.mrb[42].mxu0 }
 0x5e2   :  { %v5074_v53 = vpop.f32.mrb[43].mxu0  ;;  %v1678_v54 = vpop.f32.mrb[48].mxu1 }
 0x5e3   :  { %v1922_v16 = vpack.c.bf16 %v1678_v54, %v1632_v41  ;;  %v5079_v11 = vpop.f32.mrb[49].mxu1 }
 0x5e4   :  { %v1681_v61 = vpop.f32.mrb[50].mxu1  ;;  %v5388_v11 = vld [vmem:[%s6703_s10 + $0x8] sm:$0xff]  }
 0x5e5   :  { %v5080_v59 = vpop.f32.mrb[51].mxu1  ;;  %5107 = vmatprep.mubr.msk.bf16.mxu0 %vm235_vm1, %v1922_v16  ;;  %v5387_v16 = vld [vmem:[%s6703_s10] sm:$0xff]  }
 0x5e6   :  { %5111 = vmatprep.subr.bf16.mxu1 %v5387_v16 }
 0x5e7   :  { %v1724_v17 = vpop.f32.mrb[44].mxu0  ;;  %5112 = vmatpush3.bf16.msra.mxu1 %v5387_v16 }
 0x5e8   :  { %v1923_v14 = vpack.c.bf16 %v1724_v17, %v1724_v17  ;;  %v5085_v18 = vpop.f32.mrb[45].mxu0  ;;  %5113 = vmatprep.subr.bf16.mxu1 %v5388_v11 }
 0x5e9   :  { %v1727_v63 = vpop.f32.mrb[46].mxu0 }
 0x5ea   :  { %v5086_v19 = vpop.f32.mrb[47].mxu0  ;;  %5108 = vmatmul.mubr.msk.bf16.vlgmr.msra.gmra.mrb[52].mxu0 %vm235_vm1, %v1923_v14 }
 0x5eb   :  { %5114 = vmatpush3.bf16.msra.mxu1 %v5388_v11 }
 0x66b   :  { %v5091_v5 = vpop.f32.mrb[52].mxu1 }
 0x66c   :  { %v1775_v1 = vpop.f32.mrb[53].mxu1  ;;  %v1797_v26 = vadd.f32 %v5091_v5, %v4645_v25 }
 0x66d   :  { %v5092_v9 = vpop.f32.mrb[54].mxu1  ;;  %v1795_v27 = vadd.f32 %v4645_v25, %v1775_v1 }
 0x66e   :  { %v1778_v23 = vpop.f32.mrb[55].mxu1 }
 0x66f   :  { %v1796_v31 = vadd.f32 %v4645_v25, %v1778_v23  ;;  %v4652_v23 = vld [vmem:[%s6704_s8] ss:$0 sm:$0xff] }
 0x677   :  { %v5097_v28 = vpop.f32.mrb[48].mxu0 }
 0x678   :  { %v1859_v30 = vadd.f32 %v5097_v28, %v1797_v26  ;;  %v1843_v20 = vpop.f32.mrb[49].mxu0 }
 0x679   :  { %v1857_v21 = vadd.f32 %v1843_v20, %v1795_v27  ;;  %v5098_v32 = vpop.f32.mrb[50].mxu0 }
 0x67a   :  { %v1846_v33 = vpop.f32.mrb[51].mxu0 }
 0x67b   :  { %v1858_v34 = vadd.f32 %v1846_v33, %v1796_v31 }
 0x6b0   :  { %v5103_v35 = vpop.f32.mrb[56].mxu1 }
 0x6b1   :  { %v1921_v36 = vadd.f32 %v5103_v35, %v1859_v30  ;;  %v1905_v22 = vpop.f32.mrb[57].mxu1  ;;  %v4653_v30 = vld [vmem:[%s6705_s9] ss:$0 sm:$0xff] }
 0x6b2   :  { %v1919_v38 = vadd.f32 %v1905_v22, %v1857_v21  ;;  %v5104_v39 = vpop.f32.mrb[58].mxu1 }
 0x6b3   :  { %v1908_v42 = vpop.f32.mrb[59].mxu1  ;;  %v5390_v39 = vld [vmem:[%s6706_s12 + $0x8] sm:$0xff]  }
 0x6b4   :  { %v1920_v24 = vadd.f32 %v1908_v42, %v1858_v34  ;;  %v5391_v42 = vld [vmem:[%s6706_s12 + $0x10] sm:$0xff]  }
 0x6bd   :  { %v5109_v44 = vpop.f32.mrb[52].mxu0 }
 0x6be   :  { %v1983_v40 = vadd.f32 %v5109_v44, %v1921_v36  ;;  %v1967_v45 = vpop.f32.mrb[53].mxu0  ;;  %v5393_v44 = vld [vmem:[%s6706_s12 + $0x20] sm:$0xff]  }
 0x6bf   :  { %v1981_v43 = vadd.f32 %v1967_v45, %v1919_v38  ;;  %v5110_v47 = vpop.f32.mrb[54].mxu0  ;;  %v5389_v38 = vld [vmem:[%s6706_s12] sm:$0xff]   ;;  %v5395_v45 = vld [vmem:[%s6706_s12 + $0x30] sm:$0xff]  }
 0x6c0   :  { %v1970_v48 = vpop.f32.mrb[55].mxu0  ;;  %v6110_v3 = vadd.f32 %v5561_v2, %v1983_v40  ;;  %5119 = vmatprep.subr.bf16.mxu0 %v5389_v38  ;;  %v5394_v40 = vld [vmem:[%s6706_s12 + $0x28] sm:$0xff]   ;;  %v4654_v47 = vld [vmem:[%s6707_s11] ss:$0 sm:$0xff] }
 0x6c1   :  { %v6098_v49 = vadd.f32 %v5559_v46, %v1981_v43  ;;  %v1982_v57 = vadd.f32 %v1970_v48, %v1920_v24  ;;  %5120 = vmatpush3.bf16.msra.mxu0 %v5389_v38  ;;  %v5392_v24 = vld [vmem:[%s6706_s12 + $0x18] sm:$0xff]  }
 0x6c2   :  { %v1993_v6 = vsel %vm102_vm0, %v6110_v3, 0.0  ;;  %5121 = vmatprep.subr.bf16.mxu0 %v5390_v39  ;;  %v5396_v43 = vld [vmem:[%s6706_s12 + $0x38] sm:$0xff]  }
 0x6c3   :  { %v6103_v62 = vadd.f32 %v5560_v60, %v1982_v57  ;;  %v1987_v0 = vsel %vm102_vm0, %v6098_v49, 0.0 }
 0x6c4   :  { %1988 = vadd.xlane.f32.xlu1 %v1987_v0 }
 0x6c5   :  { %v1990_v4 = vsel %vm102_vm0, %v6103_v62, 0.0  ;;  %5122 = vmatpush3.bf16.msra.mxu0 %v5390_v39 }
 0x6c6   :  { %1991 = vadd.xlane.f32.xlu0 %v1990_v4  ;;  %5123 = vmatprep.subr.bf16.mxu0 %v5391_v42 }
 0x6c9   :  { %5124 = vmatpush3.bf16.msra.mxu0 %v5391_v42 }
 0x6ca   :  { %1994 = vadd.xlane.f32.xlu0 %v1993_v6  ;;  %5125 = vmatprep.subr.bf16.mxu0 %v5392_v24 }
 0x6cd   :  { %5126 = vmatpush3.bf16.msra.mxu0 %v5392_v24  ;;  %v5397_v24 = vld [vmem:[%s6729_s19 + $0x10] sm:$0xff]  }
 0x6ce   :  { %5127 = vmatprep.subr.bf16.mxu0 %v5393_v44  ;;  %5139 = vmatprep.subr.bf16.mxu1 %v5397_v24 }
 0x6d1   :  { %5128 = vmatpush3.bf16.msra.mxu0 %v5393_v44  ;;  %v5398_v44 = vld [vmem:[%s6729_s19 + $0x18] sm:$0xff]  }
 0x6d2   :  { %5129 = vmatprep.subr.bf16.mxu0 %v5394_v40 }
 0x6d5   :  { %5130 = vmatpush3.bf16.msra.mxu0 %v5394_v40 }
 0x6d6   :  { %5131 = vmatprep.subr.bf16.mxu0 %v5395_v45 }
 0x6d9   :  { %5132 = vmatpush3.bf16.msra.mxu0 %v5395_v45 }
 0x6da   :  { %5133 = vmatprep.subr.bf16.mxu0 %v5396_v43 }
 0x6dd   :  { %5134 = vmatpush3.bf16.msra.mxu0 %v5396_v43 }
 0x6de   :  { %5165 = vmatprep.subr.bf16.mxu0 %v5562_v52 }
 0x751   :  { %v1989_v7 = vpop.xlane.xlu1 %1988 }
 0x752   :  { %v1996_v8 = vmul.f32 0.03125, %v1989_v7 }
 0x753   :  { %v1992_v51 = vpop.xlane.xlu0 %1991 }
 0x754   :  { %v1999_v55 = vsub.f32 %v6098_v49, %v1996_v8  ;;  %v1997_v10 = vmul.f32 0.03125, %v1992_v51 }
 0x756   :  { %v2000_v12 = vsub.f32 %v6103_v62, %v1997_v10  ;;  %v2002_v13 = vmul.f32 %v1999_v55, %v1999_v55 }
 0x757   :  { %v1995_v37 = vpop.xlane.xlu0 %1994 }
 0x758   :  { %v1998_v56 = vmul.f32 0.03125, %v1995_v37  ;;  %v2005_v50 = vsel %vm102_vm0, %v2002_v13, 0.0  ;;  %v2003_v41 = vmul.f32 %v2000_v12, %v2000_v12 }
 0x759   :  { %2006 = vadd.xlane.f32.xlu0 %v2005_v50 }
 0x75a   :  { %v2001_v15 = vsub.f32 %v6110_v3, %v1998_v56  ;;  %v2008_v58 = vsel %vm102_vm0, %v2003_v41, 0.0 }
 0x75b   :  { %2009 = vadd.xlane.f32.xlu1 %v2008_v58 }
 0x75c   :  { %v2004_v53 = vmul.f32 %v2001_v15, %v2001_v15 }
 0x75e   :  { %v2011_v54 = vsel %vm102_vm0, %v2004_v53, 0.0 }
 0x75f   :  { %2012 = vadd.xlane.f32.xlu0 %v2011_v54 }
 0x7e6   :  { %v2007_v61 = vpop.xlane.xlu0 %2006 }
 0x7e7   :  { %v2014_v59 = vmul.f32 0.03125, %v2007_v61 }
 0x7e8   :  { %v2010_v17 = vpop.xlane.xlu1 %2009 }
 0x7e9   :  { %v2017_v14 = vadd.f32 1e-05, %v2014_v59  ;;  %v2015_v18 = vmul.f32 0.03125, %v2010_v17 }
 0x7eb   :  { %5465 = vrsqrt.f32 %v2017_v14  ;;  %v2018_v63 = vadd.f32 1e-05, %v2015_v18  ;;  %v4670_v14 = vld [vmem:[%s6708_s13] ss:$0 sm:$0xff] }
 0x7ec   :  { %v2013_v19 = vpop.xlane.xlu0 %2012 }
 0x7ed   :  { %5467 = vrsqrt.f32 %v2018_v63  ;;  %v2016_v5 = vmul.f32 0.03125, %v2013_v19 }
 0x7ef   :  { %v2019_v1 = vadd.f32 1e-05, %v2016_v5 }
 0x7f1   :  { %5469 = vrsqrt.f32 %v2019_v1 }
 0x7f5   :  { %v5466_v9 = vpop.eup %5465 }
 0x7f6   :  { %v2023_v25 = vmul.f32 %v5466_v9, %v1999_v55 }
 0x7f7   :  { %v5468_v26 = vpop.eup %5467 }
 0x7f8   :  { %v2024_v27 = vmul.f32 %v5468_v26, %v2000_v12  ;;  %v2032_v28 = vmul.f32 %v4652_v23, %v2023_v25 }
 0x7fa   :  { %v2033_v20 = vmul.f32 %v4652_v23, %v2024_v27  ;;  %v2041_v32 = vadd.f32 %v4653_v30, %v2032_v28 }
 0x7fb   :  { %v5470_v31 = vpop.eup %5469 }
 0x7fc   :  { %v2025_v21 = vmul.f32 %v5470_v31, %v2001_v15  ;;  %v2042_v33 = vadd.f32 %v4653_v30, %v2033_v20 }
 0x7fe   :  { %v2044_v34 = vpack.c.bf16 %v2042_v33, %v2041_v32  ;;  %v2034_v35 = vmul.f32 %v4652_v23, %v2025_v21 }
 0x800   :  { %5115 = vmatprep.mubr.msk.bf16.mxu1 %vm102_vm0, %v2044_v34  ;;  %v2043_v36 = vadd.f32 %v4653_v30, %v2034_v35 }
 0x802   :  { %v2045_v22 = vpack.c.bf16 %v2043_v36, %v2043_v36 }
 0x804   :  { %5116 = vmatmul.mubr.msk.bf16.vlgmr.msra.gmra.mrb[60].mxu1 %vm102_vm0, %v2045_v22 }
 0x805   :  { %5140 = vmatpush3.bf16.msra.mxu1 %v5397_v24 }
 0x806   :  { %5141 = vmatprep.subr.bf16.mxu1 %v5398_v44 }
 0x809   :  { %5142 = vmatpush3.bf16.msra.mxu1 %v5398_v44 }
 0x80a   :  { %5147 = vmatprep.subr.bf16.mxu1 %v5562_v52 }
 0x8d7   :  { %v5117_v48 = vpop.f32.mrb[60].mxu1 }
 0x8d8   :  { %v2113_v46 = vadd.f32 %v5117_v48, %v4654_v47  ;;  %v2104_v57 = vpop.f32.mrb[61].mxu1 }
 0x8d9   :  { %v2105_v60 = vadd.f32 %v4654_v47, %v2104_v57  ;;  %v5118_v0 = vpop.f32.mrb[62].mxu1 }
 0x8da   :  { %v4661_v2 = vmul.f32 -1.702, %v2113_v46  ;;  %v2107_v4 = vpop.f32.mrb[63].mxu1 }
 0x8db   :  { %v4659_v6 = vmul.f32 -1.702, %v2105_v60  ;;  %v2108_v7 = vadd.f32 %v4654_v47, %v2107_v4  ;;  %v4707_v4 = vld [vmem:[%s6698_s2 + $0x1] ss:$0 sm:$0xff] }
 0x8dc   :  { %v2128_v8 = vmul.f32 1.442695, %v4661_v2 }
 0x8dd   :  { %v2124_v51 = vmul.f32 1.442695, %v4659_v6  ;;  %v4660_v55 = vmul.f32 -1.702, %v2108_v7 }
 0x8de   :  { %5471 = vpow2.f32 %v2128_v8  ;;  %v4708_v8 = vld [vmem:[%s6699_s3 + $0x1] ss:$0 sm:$0xff] }
 0x8df   :  { %5473 = vpow2.f32 %v2124_v51  ;;  %v2126_v10 = vmul.f32 1.442695, %v4660_v55 }
 0x8e1   :  { %5475 = vpow2.f32 %v2126_v10 }
 0x8e8   :  { %v5472_v12 = vpop.eup %5471 }
 0x8e9   :  { %v5474_v13 = vpop.eup %5473  ;;  %v2132_v37 = vadd.f32 1.0, %v5472_v12 }
 0x8ea   :  { %v2130_v56 = vadd.f32 1.0, %v5474_v13 }
 0x8eb   :  { %v5476_v50 = vpop.eup %5475  ;;  %5477 = vrcp.f32 %v2132_v37 }
 0x8ec   :  { %5479 = vrcp.f32 %v2130_v56  ;;  %v2131_v41 = vadd.f32 1.0, %v5476_v50 }
 0x8ee   :  { %5481 = vrcp.f32 %v2131_v41 }
 0x8f5   :  { %v5478_v15 = vpop.eup %5477 }
 0x8f6   :  { %v5480_v58 = vpop.eup %5479  ;;  %v2141_v54 = vmul.f32 %v5478_v15, %v2113_v46 }
 0x8f7   :  { %v2139_v16 = vmul.f32 %v5480_v58, %v2105_v60 }
 0x8f8   :  { %v5482_v53 = vpop.eup %5481  ;;  %v2143_v59 = vpack.c.bf16 %v2141_v54, %v2141_v54 }
 0x8f9   :  { %v2140_v11 = vmul.f32 %v5482_v53, %v2108_v7  ;;  %v4709_v53 = vld [vmem:[%s6700_s5 + $0x1] ss:$0 sm:$0xff]  ;;  %s6730_s5 = smov 72  }
 0x8fb   :  { %v2142_v61 = vpack.c.bf16 %v2140_v11, %v2139_v16 }
 0x8fd   :  { %5135 = vmatprep.mubr.bf16.mxu0 %v2142_v61 }
 0x8fe   :  { %5136 = vmatmul.mubr.bf16.vlgmr.msra.gmra.mrb[56].mxu0 %v2143_v59 }
 0x8ff   :  { %5167 = vmatprep.mubr.msk.bf16.mxu0 %vm5565_vm2, %v5562_v52 }
 0x9d1   :  { %v5137_v17 = vpop.f32.mrb[56].mxu0 }
 0x9d2   :  { %v2226_v18 = vpop.f32.mrb[57].mxu0  ;;  %v2242_v63 = vadd.f32 %v5137_v17, %v6110_v3 }
 0x9d3   :  { %v2240_v19 = vadd.f32 %v2226_v18, %v6098_v49  ;;  %v5138_v5 = vpop.f32.mrb[58].mxu0 }
 0x9d4   :  { %v2229_v1 = vpop.f32.mrb[59].mxu0  ;;  %v6174_v25 = vadd.f32 %v4670_v14, %v2242_v63 }
 0x9d5   :  { %v6171_v9 = vadd.f32 %v4670_v14, %v2240_v19  ;;  %v2241_v23 = vadd.f32 %v2229_v1, %v6103_v62 }
 0x9d6   :  { %v2306_v49 = vsel %vm102_vm0, %v6174_v25, 0.0 }
 0x9d7   :  { %v6176_v26 = vadd.f32 %v4670_v14, %v2241_v23  ;;  %v2300_v27 = vsel %vm102_vm0, %v6171_v9, 0.0 }
 0x9d8   :  { %2301 = vadd.xlane.f32.xlu1 %v2300_v27 }
 0x9d9   :  { %v2303_v28 = vsel %vm102_vm0, %v6176_v26, 0.0 }
 0x9da   :  { %2304 = vadd.xlane.f32.xlu0 %v2303_v28 }
 0x9dc   :  { %2307 = vadd.xlane.f32.xlu1 %v2306_v49 }
 0xa65   :  { %v2302_v3 = vpop.xlane.xlu1 %2301 }
 0xa66   :  { %v2309_v30 = vmul.f32 0.03125, %v2302_v3 }
 0xa67   :  { %v2305_v20 = vpop.xlane.xlu0 %2304 }
 0xa68   :  { %v2312_v62 = vsub.f32 %v6171_v9, %v2309_v30  ;;  %v2310_v31 = vmul.f32 0.03125, %v2305_v20 }
 0xa69   :  { %v2308_v21 = vpop.xlane.xlu1 %2307 }
 0xa6a   :  { %v2313_v32 = vsub.f32 %v6176_v26, %v2310_v31  ;;  %v2311_v33 = vmul.f32 0.03125, %v2308_v21  ;;  %v2315_v34 = vmul.f32 %v2312_v62, %v2312_v62 }
 0xa6c   :  { %v2314_v35 = vsub.f32 %v6174_v25, %v2311_v33  ;;  %v2318_v36 = vsel %vm102_vm0, %v2315_v34, 0.0  ;;  %v2316_v22 = vmul.f32 %v2313_v32, %v2313_v32 }
 0xa6d   :  { %2319 = vadd.xlane.f32.xlu0 %v2318_v36 }
 0xa6e   :  { %v2321_v38 = vsel %vm102_vm0, %v2316_v22, 0.0  ;;  %v2317_v39 = vmul.f32 %v2314_v35, %v2314_v35 }
 0xa6f   :  { %2322 = vadd.xlane.f32.xlu1 %v2321_v38 }
 0xa70   :  { %v2324_v42 = vsel %vm102_vm0, %v2317_v39, 0.0 }
 0xa71   :  { %2325 = vadd.xlane.f32.xlu0 %v2324_v42 }
 0xafa   :  { %v2320_v40 = vpop.xlane.xlu0 %2319 }
 0xafb   :  { %v2327_v45 = vmul.f32 0.03125, %v2320_v40 }
 0xafc   :  { %v2323_v43 = vpop.xlane.xlu1 %2322 }
 0xafd   :  { %v2330_v47 = vadd.f32 1e-05, %v2327_v45  ;;  %v2328_v48 = vmul.f32 0.03125, %v2323_v43 }
 0xafe   :  { %v2326_v46 = vpop.xlane.xlu0 %2325 }
 0xaff   :  { %5483 = vrsqrt.f32 %v2330_v47  ;;  %v2331_v57 = vadd.f32 1e-05, %v2328_v48  ;;  %v2329_v60 = vmul.f32 0.03125, %v2326_v46 }
 0xb01   :  { %5485 = vrsqrt.f32 %v2331_v57  ;;  %v2332_v0 = vadd.f32 1e-05, %v2329_v60 }
 0xb03   :  { %5487 = vrsqrt.f32 %v2332_v0 }
 0xb09   :  { %v5484_v2 = vpop.eup %5483 }
 0xb0a   :  { %v2336_v6 = vmul.f32 %v5484_v2, %v2312_v62 }
 0xb0b   :  { %v5486_v7 = vpop.eup %5485 }
 0xb0c   :  { %v2337_v51 = vmul.f32 %v5486_v7, %v2313_v32  ;;  %v2345_v55 = vmul.f32 %v4707_v4, %v2336_v6 }
 0xb0d   :  { %v5488_v10 = vpop.eup %5487 }
 0xb0e   :  { %v2338_v12 = vmul.f32 %v5488_v10, %v2314_v35  ;;  %v2346_v13 = vmul.f32 %v4707_v4, %v2337_v51  ;;  %v2354_v37 = vadd.f32 %v4708_v8, %v2345_v55 }
 0xb10   :  { %v2355_v56 = vadd.f32 %v4708_v8, %v2346_v13  ;;  %v2347_v50 = vmul.f32 %v4707_v4, %v2338_v12 }
 0xb12   :  { %v2357_v41 = vpack.c.bf16 %v2355_v56, %v2354_v37  ;;  %v2356_v15 = vadd.f32 %v4708_v8, %v2347_v50 }
 0xb14   :  { %5143 = vmatprep.mubr.msk.bf16.mxu1 %vm102_vm0, %v2357_v41  ;;  %v2358_v58 = vpack.c.bf16 %v2356_v15, %v2356_v15 }
 0xb16   :  { %5144 = vmatmul.mubr.msk.bf16.vlgmr.msra.gmra.mrb[64].mxu1 %vm102_vm0, %v2358_v58 }
 0xb17   :  { %5149 = vmatprep.mubr.msk.bf16.mxu1 %vm5565_vm2, %v5562_v52 }
 0xbe9   :  { %v5145_v54 = vpop.f32.mrb[64].mxu1 }
 0xbea   :  { %v6210_v16 = vadd.f32 %v5145_v54, %v4709_v53  ;;  %v2417_v11 = vpop.f32.mrb[65].mxu1 }
 0xbeb   :  { %v6212_v61 = vadd.f32 %v4709_v53, %v2417_v11  ;;  %v5146_v59 = vpop.f32.mrb[66].mxu1 }
 0xbec   :  { %2433 = vst.msk [vmem:[#allocation2 + $0x10] sm:$0xff] %vm235_vm1, %v6210_v16  ;;  %v2420_v17 = vpop.f32.mrb[67].mxu1 }
 0xbed   :  { %2431 = vst.msk [vmem:[#allocation2] sm:$0xff] %vm235_vm1, %v6212_v61  ;;  %v6218_v14 = vadd.f32 %v4709_v53, %v2420_v17  ;;  %2437 = vrot.lane.b32.xlu1 %v6212_v61, %s5563_s28 }
 0xbef   :  { %2432 = vst.msk [vmem:[#allocation2 + $0x8] sm:$0xff] %vm235_vm1, %v6218_v14  ;;  %2439 = vrot.lane.b32.xlu0 %v6218_v14, %s5563_s28 }
 0xbf1   :  { %2441 = vrot.lane.b32.xlu1 %v6210_v16, %s5563_s28  ;;  %s6731_s28 = smov 64  }
 0xbf3   :  { %2461 = vrot.lane.b32.xlu0 %v6212_v61, %s5567_s30  ;;  %v2571_v7 = vld [vmem:[#allocation2 + $0x10] sm:$0xff] }
 0xbf4   :  { %v2569_v62 = vld [vmem:[#allocation2] sm:$0xff]  ;;  %v2583_v12 = vpack.c.bf16 %v2571_v7, %v2571_v7 }
 0xbf5   :  { %2473 = vrot.lane.b32.xlu1 %v6212_v61, %s5564_s29  ;;  %v2581_v33 = vpack.c.bf16 %v2569_v62, %v2569_v62 }
 0xbf6   :  { %v2570_v24 = vld [vmem:[#allocation2 + $0x8] sm:$0xff] }
 0xbf7   :  { %2463 = vrot.lane.b32.xlu0 %v6218_v14, %s5567_s30  ;;  %v2582_v47 = vpack.c.bf16 %v2570_v24, %v2570_v24 }
 0xbf9   :  { %2475 = vrot.lane.b32.xlu1 %v6218_v14, %s5564_s29 }
 0xbfb   :  { %2465 = vrot.lane.b32.xlu0 %v6210_v16, %s5567_s30  ;;  %s6734_s30 = smov 40  }
 0xbfd   :  { %2477 = vrot.lane.b32.xlu1 %v6210_v16, %s5564_s29  ;;  %s6732_s29 = smov 56  }
 0xbff   :  { %2497 = vrot.lane.b32.xlu0 %v6212_v61, %s5569_s4 }
 0xc01   :  { %2509 = vrot.lane.b32.xlu1 %v6212_v61, %s5566_s0 }
 0xc03   :  { %2499 = vrot.lane.b32.xlu0 %v6218_v14, %s5569_s4 }
 0xc05   :  { %2511 = vrot.lane.b32.xlu1 %v6218_v14, %s5566_s0 }
 0xc07   :  { %2501 = vrot.lane.b32.xlu0 %v6210_v16, %s5569_s4 }
 0xc09   :  { %2513 = vrot.lane.b32.xlu1 %v6210_v16, %s5566_s0  ;;  %s6733_s0 = smov 48  }
 0xc0b   :  { %2533 = vrot.lane.b32.xlu0 %v6212_v61, %s5570_s20 }
 0xc0d   :  { %2545 = vrot.lane.b32.xlu1 %v6212_v61, %s6730_s5 }
 0xc0f   :  { %2535 = vrot.lane.b32.xlu0 %v6218_v14, %s5570_s20 }
 0xc11   :  { %2547 = vrot.lane.b32.xlu1 %v6218_v14, %s6730_s5 }
 0xc13   :  { %2449 = vrot.lane.b32.xlu0 %v6212_v61, %s6731_s28 }
 0xc15   :  { %2549 = vrot.lane.b32.xlu1 %v6210_v16, %s6730_s5 }
 0xc17   :  { %2453 = vrot.lane.b32.xlu0 %v6210_v16, %s6731_s28 }
 0xc19   :  { %2537 = vrot.lane.b32.xlu1 %v6210_v16, %s5570_s20 }
 0xc1d   :  { %2485 = vrot.lane.b32.xlu1 %v6212_v61, %s6732_s29 }
 0xc21   :  { %2451 = vrot.lane.b32.xlu1 %v6218_v14, %s6731_s28 }
 0xc5f   :  { %v2438_v18 = vpop.permute.xlu1 %2437 }
 0xc60   :  { %2446 = vst.msk [vmem:[#allocation2 + $0x60] sm:$0xff] %vm235_vm1, %v2438_v18 }
 0xc61   :  { %v2440_v63 = vpop.permute.xlu0 %2439 }
 0xc62   :  { %2447 = vst.msk [vmem:[#allocation2 + $0x68] sm:$0xff] %vm235_vm1, %v2440_v63 }
 0xc63   :  { %v2442_v19 = vpop.permute.xlu1 %2441 }
 0xc64   :  { %2448 = vst.msk [vmem:[#allocation2 + $0x70] sm:$0xff] %vm235_vm1, %v2442_v19 }
 0xc65   :  { %v2462_v5 = vpop.permute.xlu0 %2461 }
 0xc66   :  { %2470 = vst.msk [vmem:[#allocation2 + $0x18] sm:$0xff] %vm235_vm1, %v2462_v5 }
 0xc67   :  { %v2474_v1 = vpop.permute.xlu1 %2473  ;;  %v2593_v23 = vld [vmem:[#allocation2 + $0x60] sm:$0xff] }
 0xc68   :  { %2482 = vst.msk [vmem:[#allocation2 + $0x78] sm:$0xff] %vm235_vm1, %v2474_v1  ;;  %v2605_v27 = vpack.c.bf16 %v2593_v23, %v2593_v23 }
 0xc69   :  { %v2464_v28 = vpop.permute.xlu0 %2463  ;;  %v2594_v30 = vld [vmem:[#allocation2 + $0x68] sm:$0xff] }
 0xc6a   :  { %2471 = vst.msk [vmem:[#allocation2 + $0x20] sm:$0xff] %vm235_vm1, %v2464_v28  ;;  %v2645_v49 = vsel %vm235_vm1, %v2605_v27, 0  ;;  %v2606_v31 = vpack.c.bf16 %v2594_v30, %v2594_v30 }
 0xc6b   :  { %5148 = vmatpush3.bf16.xpose.msra.mxu1 %v2645_v49  ;;  %v2476_v3 = vpop.permute.xlu1 %2475  ;;  %v2595_v39 = vld [vmem:[#allocation2 + $0x70] sm:$0xff] }
 0xc6c   :  { %2483 = vst.msk [vmem:[#allocation2 + $0x80] sm:$0xff] %vm235_vm1, %v2476_v3  ;;  %5153 = vmatprep.subr.bf16.mxu1 %v5562_v52  ;;  %v2691_v22 = vsel %vm235_vm1, %v2606_v31, 0  ;;  %v2607_v40 = vpack.c.bf16 %v2595_v39, %v2595_v39 }
 0xc6d   :  { %v2466_v20 = vpop.permute.xlu0 %2465  ;;  %v2572_v44 = vld [vmem:[#allocation2 + $0x18] sm:$0xff] }
 0xc6e   :  { %2472 = vst.msk [vmem:[#allocation2 + $0x28] sm:$0xff] %vm235_vm1, %v2466_v20  ;;  %v2584_v48 = vpack.c.bf16 %v2572_v44, %v2572_v44  ;;  %v2737_v0 = vsel %vm235_vm1, %v2607_v40, 0 }
 0xc6f   :  { %v2478_v21 = vpop.permute.xlu1 %2477  ;;  %v2596_v32 = vld [vmem:[#allocation2 + $0x78] sm:$0xff] }
 0xc70   :  { %2484 = vst.msk [vmem:[#allocation2 + $0x88] sm:$0xff] %vm235_vm1, %v2478_v21  ;;  %v2608_v34 = vpack.c.bf16 %v2596_v32, %v2596_v32 }
 0xc71   :  { %v2498_v35 = vpop.permute.xlu0 %2497  ;;  %v2573_v54 = vld [vmem:[#allocation2 + $0x20] sm:$0xff] }
 0xc72   :  { %2506 = vst.msk [vmem:[#allocation2 + $0x30] sm:$0xff] %vm235_vm1, %v2498_v35  ;;  %5150 = vmatmul.mubr.msk.bf16.vlgmr.msra.gmra.mrb[68].mxu1 %vm235_vm1, %v2581_v33  ;;  %v2783_v36 = vsel %vm235_vm1, %v2608_v34, 0  ;;  %v2585_v63 = vpack.c.bf16 %v2573_v54, %v2573_v54 }
 0xc73   :  { %5166 = vmatpush3.bf16.xpose.msra.mxu0 %v2783_v36  ;;  %v2510_v38 = vpop.permute.xlu1 %2509  ;;  %5154 = vmatpush3.bf16.xpose.msra.mxu1 %v2691_v22  ;;  %v2597_v4 = vld [vmem:[#allocation2 + $0x80] sm:$0xff] }
 0xc74   :  { %2518 = vst.msk [vmem:[#allocation2 + $0x90] sm:$0xff] %vm235_vm1, %v2510_v38  ;;  %5155 = vmatprep.mubr.msk.bf16.mxu1 %vm5565_vm2, %v5562_v52  ;;  %5159 = vmatprep.subr.bf16.mxu1 %v5562_v52  ;;  %v2609_v51 = vpack.c.bf16 %v2597_v4, %v2597_v4 }
 0xc75   :  { %v2500_v42 = vpop.permute.xlu0 %2499  ;;  %5177 = vmatprep.subr.bf16.mxu0 %v5562_v52  ;;  %v2574_v8 = vld [vmem:[#allocation2 + $0x28] sm:$0xff] }
 0xc76   :  { %2507 = vst.msk [vmem:[#allocation2 + $0x38] sm:$0xff] %vm235_vm1, %v2500_v42  ;;  %v2586_v13 = vpack.c.bf16 %v2574_v8, %v2574_v8  ;;  %v2829_v41 = vsel %vm235_vm1, %v2609_v51, 0 }
 0xc77   :  { %v2512_v45 = vpop.permute.xlu1 %2511  ;;  %v2598_v43 = vld [vmem:[#allocation2 + $0x88] sm:$0xff] }
 0xc78   :  { %2519 = vst.msk [vmem:[#allocation2 + $0x98] sm:$0xff] %vm235_vm1, %v2512_v45  ;;  %v2610_v46 = vpack.c.bf16 %v2598_v43, %v2598_v43 }
 0xc79   :  { %v2502_v57 = vpop.permute.xlu0 %2501  ;;  %v2575_v3 = vld [vmem:[#allocation2 + $0x30] sm:$0xff] }
 0xc7a   :  { %2508 = vst.msk [vmem:[#allocation2 + $0x40] sm:$0xff] %vm235_vm1, %v2502_v57  ;;  %5156 = vmatmul.mubr.msk.bf16.vlgmr.msra.gmra.mrb[72].mxu1 %vm235_vm1, %v2582_v47  ;;  %5168 = vmatmul.mubr.msk.bf16.vlgmr.msra.gmra.mrb[60].mxu0 %vm235_vm1, %v2584_v48  ;;  %v2875_v60 = vsel %vm235_vm1, %v2610_v46, 0  ;;  %v2587_v21 = vpack.c.bf16 %v2575_v3, %v2575_v3 }
 0xc7b   :  { %5178 = vmatpush3.bf16.xpose.msra.mxu0 %v2875_v60  ;;  %v2514_v2 = vpop.permute.xlu1 %2513  ;;  %5160 = vmatpush3.bf16.xpose.msra.mxu1 %v2737_v0  ;;  %v2599_v58 = vld [vmem:[#allocation2 + $0x90] sm:$0xff] }
 0xc7c   :  { %2520 = vst.msk [vmem:[#allocation2 + $0xa0] sm:$0xff] %vm235_vm1, %v2514_v2  ;;  %5161 = vmatprep.mubr.msk.bf16.mxu1 %vm5565_vm2, %v5562_v52  ;;  %5179 = vmatprep.mubr.msk.bf16.mxu0 %vm5565_vm2, %v5562_v52  ;;  %v2611_v59 = vpack.c.bf16 %v2599_v58, %v2599_v58 }
 0xc7d   :  { %v2534_v6 = vpop.permute.xlu0 %2533  ;;  %5171 = vmatprep.subr.bf16.mxu1 %v5562_v52  ;;  %5189 = vmatprep.subr.bf16.mxu0 %v5562_v52  ;;  %v2576_v11 = vld [vmem:[#allocation2 + $0x38] sm:$0xff] }
 0xc7e   :  { %2542 = vst.msk [vmem:[#allocation2 + $0x48] sm:$0xff] %vm235_vm1, %v2534_v6  ;;  %v2588_v19 = vpack.c.bf16 %v2576_v11, %v2576_v11  ;;  %v2921_v27 = vsel %vm235_vm1, %v2611_v59, 0 }
 0xc7f   :  { %v2546_v55 = vpop.permute.xlu1 %2545  ;;  %v2600_v10 = vld [vmem:[#allocation2 + $0x98] sm:$0xff] }
 0xc80   :  { %2554 = vst.msk [vmem:[#allocation2 + $0xa8] sm:$0xff] %vm235_vm1, %v2546_v55  ;;  %v2612_v37 = vpack.c.bf16 %v2600_v10, %v2600_v10 }
 0xc81   :  { %v2536_v56 = vpop.permute.xlu0 %2535  ;;  %v2577_v38 = vld [vmem:[#allocation2 + $0x40] sm:$0xff] }
 0xc82   :  { %2543 = vst.msk [vmem:[#allocation2 + $0x50] sm:$0xff] %vm235_vm1, %v2536_v56  ;;  %5162 = vmatmul.mubr.msk.bf16.vlgmr.msra.gmra.mrb[76].mxu1 %vm235_vm1, %v2583_v12  ;;  %5180 = vmatmul.mubr.msk.bf16.vlgmr.msra.gmra.mrb[64].mxu0 %vm235_vm1, %v2586_v13  ;;  %v2967_v50 = vsel %vm235_vm1, %v2612_v37, 0  ;;  %v2589_v24 = vpack.c.bf16 %v2577_v38, %v2577_v38 }
 0xc83   :  { %5190 = vmatpush3.bf16.xpose.msra.mxu0 %v2967_v50  ;;  %v2548_v15 = vpop.permute.xlu1 %2547  ;;  %5172 = vmatpush3.bf16.xpose.msra.mxu1 %v2829_v41  ;;  %v2601_v49 = vld [vmem:[#allocation2 + $0xa0] sm:$0xff] }
 0xc84   :  { %2555 = vst.msk [vmem:[#allocation2 + $0xb0] sm:$0xff] %vm235_vm1, %v2548_v15  ;;  %5173 = vmatprep.mubr.msk.bf16.mxu1 %vm5565_vm2, %v5562_v52  ;;  %5191 = vmatprep.mubr.msk.bf16.mxu0 %vm5565_vm2, %v5562_v52  ;;  %v2613_v20 = vpack.c.bf16 %v2601_v49, %v2601_v49 }
 0xc85   :  { %v2450_v53 = vpop.permute.xlu0 %2449  ;;  %5183 = vmatprep.subr.bf16.mxu1 %v5562_v52  ;;  %5201 = vmatprep.subr.bf16.mxu0 %v5562_v52  ;;  %v2578_v30 = vld [vmem:[#allocation2 + $0x48] sm:$0xff] }
 0xc86   :  { %2458 = vst.msk [vmem:[#allocation2 + $0xc0] sm:$0xff] %vm235_vm1, %v2450_v53  ;;  %v2590_v32 = vpack.c.bf16 %v2578_v30, %v2578_v30  ;;  %v3013_v35 = vsel %vm235_vm1, %v2613_v20, 0 }
 0xc87   :  { %v2550_v17 = vpop.permute.xlu1 %2549  ;;  %v2602_v18 = vld [vmem:[#allocation2 + $0xa8] sm:$0xff] }
 0xc88   :  { %2556 = vst.msk [vmem:[#allocation2 + $0xb8] sm:$0xff] %vm235_vm1, %v2550_v17  ;;  %v2614_v5 = vpack.c.bf16 %v2602_v18, %v2602_v18 }
 0xc89   :  { %v2454_v1 = vpop.permute.xlu0 %2453  ;;  %v2579_v48 = vld [vmem:[#allocation2 + $0x50] sm:$0xff] }
 0xc8a   :  { %2460 = vst.msk [vmem:[#allocation2 + $0xd0] sm:$0xff] %vm235_vm1, %v2454_v1  ;;  %5174 = vmatmul.mubr.msk.bf16.vlgmr.msra.gmra.mrb[80].mxu1 %vm235_vm1, %v2585_v63  ;;  %5192 = vmatmul.mubr.msk.bf16.vlgmr.msra.gmra.mrb[68].mxu0 %vm235_vm1, %v2588_v19  ;;  %v3059_v23 = vsel %vm235_vm1, %v2614_v5, 0  ;;  %v2591_v60 = vpack.c.bf16 %v2579_v48, %v2579_v48 }
 0xc8b   :  { %5202 = vmatpush3.bf16.xpose.msra.mxu0 %v3059_v23  ;;  %v2538_v28 = vpop.permute.xlu1 %2537  ;;  %5184 = vmatpush3.bf16.xpose.msra.mxu1 %v2921_v27  ;;  %v2603_v22 = vld [vmem:[#allocation2 + $0xb0] sm:$0xff] }
 0xc8c   :  { %2544 = vst.msk [vmem:[#allocation2 + $0x58] sm:$0xff] %vm235_vm1, %v2538_v28  ;;  %5185 = vmatprep.mubr.msk.bf16.mxu1 %vm5565_vm2, %v5562_v52  ;;  %5203 = vmatprep.mubr.msk.bf16.mxu0 %vm5565_vm2, %v5562_v52  ;;  %v2615_v42 = vpack.c.bf16 %v2603_v22, %v2603_v22 }
 0xc8d   :  { %5195 = vmatprep.subr.bf16.mxu1 %v5562_v52  ;;  %5213 = vmatprep.subr.bf16.mxu0 %v5562_v52  ;;  %v2617_v43 = vld [vmem:[#allocation2 + $0xc0] sm:$0xff] }
 0xc8e   :  { %v3105_v40 = vsel %vm235_vm1, %v2615_v42, 0  ;;  %v2629_v57 = vpack.c.bf16 %v2617_v43, %v2617_v43 }
 0xc8f   :  { %v2486_v62 = vpop.permute.xlu1 %2485  ;;  %v2604_v31 = vld [vmem:[#allocation2 + $0xb8] sm:$0xff] }
 0xc90   :  { %2494 = vst.msk [vmem:[#allocation2 + $0xd8] sm:$0xff] %vm235_vm1, %v2486_v62  ;;  %v2616_v33 = vpack.c.bf16 %v2604_v31, %v2604_v31  ;;  %v3365_v0 = vsel %vm1180_vm3, %v2629_v57, 0 }
 0xc92   :  { %5186 = vmatmul.mubr.msk.bf16.vlgmr.msra.gmra.mrb[84].mxu1 %vm235_vm1, %v2587_v21  ;;  %5204 = vmatmul.mubr.msk.bf16.vlgmr.msra.gmra.mrb[72].mxu0 %vm235_vm1, %v2590_v32  ;;  %v3151_v34 = vsel %vm235_vm1, %v2616_v33, 0 }
 0xc93   :  { %5214 = vmatpush3.bf16.xpose.msra.mxu0 %v3151_v34  ;;  %v2452_v36 = vpop.permute.xlu1 %2451  ;;  %5196 = vmatpush3.bf16.xpose.msra.mxu1 %v3013_v35  ;;  %v2580_v39 = vld [vmem:[#allocation2 + $0x58] sm:$0xff] }
 0xc94   :  { %2459 = vst.msk [vmem:[#allocation2 + $0xc8] sm:$0xff] %vm235_vm1, %v2452_v36  ;;  %5197 = vmatprep.mubr.msk.bf16.mxu1 %vm5565_vm2, %v5562_v52  ;;  %5215 = vmatprep.mubr.msk.bf16.mxu0 %vm5565_vm2, %v5562_v52  ;;  %v2592_v44 = vpack.c.bf16 %v2580_v39, %v2580_v39 }
 0xc95   :  { %5207 = vmatprep.subr.bf16.mxu1 %v5562_v52  ;;  %5225 = vmatprep.subr.bf16.mxu0 %v5562_v52 }
 0xc9a   :  { %5198 = vmatmul.mubr.msk.bf16.vlgmr.msra.gmra.mrb[88].mxu1 %vm235_vm1, %v2589_v24  ;;  %5216 = vmatmul.mubr.msk.bf16.vlgmr.msra.gmra.mrb[76].mxu0 %vm235_vm1, %v2592_v44 }
 0xc9b   :  { %5208 = vmatpush3.bf16.xpose.msra.mxu1 %v3105_v40  ;;  %v2618_v45 = vld [vmem:[#allocation2 + $0xc8] sm:$0xff]  ;;  %5209 = vmatprep.mubr.msk.bf16.mxu1 %vm5565_vm2, %v5562_v52 }
 0xc9c   :  { %v2630_v47 = vpack.c.bf16 %v2618_v45, %v2618_v45  ;;  %5219 = vmatprep.subr.bf16.mxu1 %v5562_v52  ;;  %5227 = vmatprep.mubr.msk.bf16.mxu0 %vm5565_vm2, %v5562_v52 }
 0xc9e   :  { %v3411_v46 = vsel %vm1180_vm3, %v2630_v47, 0 }
 0xc9f   :  { %5226 = vmatpush3.bf16.msra.mxu0 %v3411_v46 }
 0xca0   :  { %5237 = vmatprep.subr.bf16.mxu0 %v5562_v52 }
 0xca2   :  { %5210 = vmatmul.mubr.msk.bf16.vlgmr.msra.gmra.mrb[92].mxu1 %vm235_vm1, %v2591_v60 }
 0xca3   :  { %5220 = vmatpush3.bf16.msra.mxu1 %v3365_v0  ;;  %5221 = vmatprep.mubr.msk.bf16.mxu1 %vm5565_vm2, %v5562_v52 }
 0xca4   :  { %5231 = vmatprep.subr.bf16.mxu1 %v5562_v52 }
 0xd45   :  { %v2681_v2 = vpop.f32.mrb[68].mxu1 }
 0xd46   :  { %v3193_v4 = vmul.f32 0.35355338, %v2681_v2  ;;  %v5151_v6 = vpop.f32.mrb[69].mxu1 }
 0xd47   :  { %v2684_v7 = vpop.f32.mrb[70].mxu1 }
 0xd48   :  { %v6362_v8 = vadd.f32 %v3193_v4, %v5859_v29  ;;  %v5152_v51 = vpop.f32.mrb[71].mxu1 }
 0xd4a   :  { %v3217_v55 = vsel %vm235_vm1, %v6362_v8, -inf }
 0xd4b   :  { %3218 = vmax.xlane.f32.xlu0 %v3217_v55 }
 0xd4d   :  { %v2727_v10 = vpop.f32.mrb[72].mxu1  ;;  %v2819_v12 = vpop.f32.mrb[60].mxu0 }
 0xd4e   :  { %v3194_v13 = vmul.f32 0.35355338, %v2727_v10  ;;  %v3196_v37 = vmul.f32 0.35355338, %v2819_v12  ;;  %v5157_v56 = vpop.f32.mrb[73].mxu1  ;;  %v5169_v50 = vpop.f32.mrb[61].mxu0 }
 0xd4f   :  { %v2730_v41 = vpop.f32.mrb[74].mxu1  ;;  %v2822_v15 = vpop.f32.mrb[62].mxu0 }
 0xd50   :  { %v6367_v58 = vadd.f32 %v3194_v13, %v5859_v29  ;;  %v6370_v53 = vadd.f32 %v3196_v37, %v5859_v29  ;;  %v5158_v54 = vpop.f32.mrb[75].mxu1  ;;  %v5170_v11 = vpop.f32.mrb[63].mxu0 }
 0xd52   :  { %v3226_v59 = vsel %vm235_vm1, %v6370_v53, -inf  ;;  %v3220_v17 = vsel %vm235_vm1, %v6367_v58, -inf }
 0xd53   :  { %3227 = vmax.xlane.f32.xlu0 %v3226_v59  ;;  %3221 = vmax.xlane.f32.xlu1 %v3220_v17 }
 0xd55   :  { %v2773_v18 = vpop.f32.mrb[76].mxu1  ;;  %v2911_v63 = vpop.f32.mrb[64].mxu0 }
 0xd56   :  { %v3195_v19 = vmul.f32 0.35355338, %v2773_v18  ;;  %v3198_v5 = vmul.f32 0.35355338, %v2911_v63  ;;  %v5163_v1 = vpop.f32.mrb[77].mxu1  ;;  %v5181_v23 = vpop.f32.mrb[65].mxu0 }
 0xd57   :  { %v2776_v27 = vpop.f32.mrb[78].mxu1  ;;  %v2914_v28 = vpop.f32.mrb[66].mxu0 }
 0xd58   :  { %v6377_v49 = vadd.f32 %v3195_v19, %v5859_v29  ;;  %v6380_v3 = vadd.f32 %v3198_v5, %v5859_v29  ;;  %v5164_v30 = vpop.f32.mrb[79].mxu1  ;;  %v5182_v20 = vpop.f32.mrb[67].mxu0 }
 0xd5a   :  { %v3232_v62 = vsel %vm235_vm1, %v6380_v3, -inf  ;;  %v3223_v31 = vsel %vm235_vm1, %v6377_v49, -inf }
 0xd5b   :  { %3233 = vmax.xlane.f32.xlu1 %v3232_v62  ;;  %3224 = vmax.xlane.f32.xlu0 %v3223_v31 }
 0xd5d   :  { %v2865_v21 = vpop.f32.mrb[80].mxu1  ;;  %v3003_v32 = vpop.f32.mrb[68].mxu0 }
 0xd5e   :  { %v3197_v33 = vmul.f32 0.35355338, %v2865_v21  ;;  %v3200_v34 = vmul.f32 0.35355338, %v3003_v32  ;;  %v5175_v35 = vpop.f32.mrb[81].mxu1  ;;  %v5193_v36 = vpop.f32.mrb[69].mxu0 }
 0xd5f   :  { %v2868_v22 = vpop.f32.mrb[82].mxu1  ;;  %v3006_v38 = vpop.f32.mrb[70].mxu0 }
 0xd60   :  { %v6387_v39 = vadd.f32 %v3197_v33, %v5859_v29  ;;  %v6390_v42 = vadd.f32 %v3200_v34, %v5859_v29  ;;  %v5176_v24 = vpop.f32.mrb[83].mxu1  ;;  %v5194_v44 = vpop.f32.mrb[71].mxu0 }
 0xd62   :  { %v3238_v40 = vsel %vm235_vm1, %v6390_v42, -inf  ;;  %v3229_v45 = vsel %vm235_vm1, %v6387_v39, -inf }
 0xd63   :  { %3239 = vmax.xlane.f32.xlu1 %v3238_v40  ;;  %3230 = vmax.xlane.f32.xlu0 %v3229_v45 }
 0xd65   :  { %v2957_v43 = vpop.f32.mrb[84].mxu1  ;;  %v3095_v47 = vpop.f32.mrb[72].mxu0 }
 0xd66   :  { %v5187_v48 = vpop.f32.mrb[85].mxu1  ;;  %v5205_v46 = vpop.f32.mrb[73].mxu0  ;;  %v3202_v15 = vmul.f32 0.35355338, %v3095_v47  ;;  %v3199_v54 = vmul.f32 0.35355338, %v2957_v43 }
 0xd67   :  { %v2960_v57 = vpop.f32.mrb[86].mxu1  ;;  %v3098_v60 = vpop.f32.mrb[74].mxu0 }
 0xd68   :  { %v5188_v0 = vpop.f32.mrb[87].mxu1  ;;  %v5206_v2 = vpop.f32.mrb[75].mxu0  ;;  %v6401_v11 = vadd.f32 %v3202_v15, %v5859_v29  ;;  %v6404_v59 = vadd.f32 %v3199_v54, %v5859_v29 }
 0xd6a   :  { %v3244_v63 = vsel %vm235_vm1, %v6401_v11, -inf  ;;  %v3235_v23 = vsel %vm235_vm1, %v6404_v59, -inf }
 0xd6d   :  { %v3049_v4 = vpop.f32.mrb[88].mxu1  ;;  %v3187_v6 = vpop.f32.mrb[76].mxu0 }
 0xd6e   :  { %v5199_v7 = vpop.f32.mrb[89].mxu1  ;;  %v5217_v51 = vpop.f32.mrb[77].mxu0  ;;  %v3201_v17 = vmul.f32 0.35355338, %v3049_v4  ;;  %v3204_v18 = vmul.f32 0.35355338, %v3187_v6 }
 0xd6f   :  { %v3052_v55 = vpop.f32.mrb[90].mxu1  ;;  %v3190_v10 = vpop.f32.mrb[78].mxu0 }
 0xd70   :  { %v5200_v12 = vpop.f32.mrb[91].mxu1  ;;  %v5218_v13 = vpop.f32.mrb[79].mxu0  ;;  %v6409_v19 = vadd.f32 %v3201_v17, %v5859_v29  ;;  %v6412_v5 = vadd.f32 %v3204_v18, %v5859_v29 }
 0xd72   :  { %v3250_v28 = vsel %vm235_vm1, %v6412_v5, -inf  ;;  %v3241_v30 = vsel %vm235_vm1, %v6409_v19, -inf }
 0xd74   :  { %2489 = vrot.lane.b32.xlu1 %v6210_v16, %s6732_s29 }
 0xd75   :  { %v3141_v37 = vpop.f32.mrb[92].mxu1 }
 0xd76   :  { %v5211_v56 = vpop.f32.mrb[93].mxu1  ;;  %v3203_v1 = vmul.f32 0.35355338, %v3141_v37 }
 0xd77   :  { %v3144_v50 = vpop.f32.mrb[94].mxu1 }
 0xd78   :  { %v5212_v41 = vpop.f32.mrb[95].mxu1  ;;  %v6417_v27 = vadd.f32 %v3203_v1, %v5859_v29 }
 0xd79   :  { %2487 = vrot.lane.b32.xlu0 %v6218_v14, %s6732_s29 }
 0xd7a   :  { %v3247_v20 = vsel %vm235_vm1, %v6417_v27, -inf }
 0xd98   :  { %3245 = vmax.xlane.f32.xlu1 %v3244_v63  ;;  %3236 = vmax.xlane.f32.xlu0 %v3235_v23 }
 0xd9c   :  { %3251 = vmax.xlane.f32.xlu1 %v3250_v28  ;;  %3242 = vmax.xlane.f32.xlu0 %v3241_v30 }
 0xda0   :  { %3248 = vmax.xlane.f32.xlu0 %v3247_v20 }
 0xdad   :  { %2523 = vrot.lane.b32.xlu1 %v6218_v14, %s6733_s0 }
 0xdb6   :  { %2521 = vrot.lane.b32.xlu0 %v6212_v61, %s6733_s0 }
 0xdd8   :  { %v3219_v29 = vpop.xlane.xlu0 %3218 }
 0xdd9   :  { %v3253_v62 = vsub.f32 %v6362_v8, %v3219_v29 }
 0xddb   :  { %v3265_v31 = vmul.f32 1.442695, %v3253_v62 }
 0xddd   :  { %5489 = vpow2.f32 %v3265_v31 }
 0xde0   :  { %v3228_v21 = vpop.xlane.xlu0 %3227  ;;  %v3222_v32 = vpop.xlane.xlu1 %3221 }
 0xde1   :  { %v3256_v33 = vsub.f32 %v6370_v53, %v3228_v21  ;;  %v3254_v34 = vsub.f32 %v6367_v58, %v3222_v32 }
 0xde3   :  { %v3271_v35 = vmul.f32 1.442695, %v3256_v33  ;;  %v3267_v36 = vmul.f32 1.442695, %v3254_v34 }
 0xde5   :  { %5491 = vpow2.f32 %v3271_v35 }
 0xde6   :  { %5493 = vpow2.f32 %v3267_v36  ;;  %v2619_v36 = vld [vmem:[#allocation2 + $0xd0] sm:$0xff] }
 0xde7   :  { %v6432_v22 = vpop.eup %5489 }
 0xde8   :  { %v3234_v38 = vpop.xlane.xlu1 %3233  ;;  %v3225_v24 = vpop.xlane.xlu0 %3224  ;;  %v3289_v44 = vsel %vm235_vm1, %v6432_v22, 0.0 }
 0xde9   :  { %v3258_v8 = vsub.f32 %v6380_v3, %v3234_v38  ;;  %v3255_v40 = vsub.f32 %v6377_v49, %v3225_v24  ;;  %3290 = vadd.xlane.f32.xlu0 %v3289_v44  ;;  %v2631_v44 = vpack.c.bf16 %v2619_v36, %v2619_v36 }
 0xdeb   :  { %v3275_v45 = vmul.f32 1.442695, %v3258_v8  ;;  %v3269_v53 = vmul.f32 1.442695, %v3255_v40  ;;  %v3457_v40 = vsel %vm1180_vm3, %v2631_v44, 0 }
 0xded   :  { %5495 = vpow2.f32 %v3275_v45 }
 0xdee   :  { %5497 = vpow2.f32 %v3269_v53  ;;  %v2620_v53 = vld [vmem:[#allocation2 + $0xd8] sm:$0xff] }
 0xdef   :  { %v6438_v58 = vpop.eup %5491 }
 0xdf0   :  { %v3240_v43 = vpop.xlane.xlu1 %3239  ;;  %v3231_v47 = vpop.xlane.xlu0 %3230  ;;  %v3298_v48 = vsel %vm235_vm1, %v6438_v58, 0.0 }
 0xdf1   :  { %v6442_v46 = vpop.eup %5493  ;;  %v3260_v57 = vsub.f32 %v6390_v42, %v3240_v43  ;;  %v3257_v3 = vsub.f32 %v6387_v39, %v3231_v47  ;;  %3299 = vadd.xlane.f32.xlu1 %v3298_v48  ;;  %v2632_v48 = vpack.c.bf16 %v2620_v53, %v2620_v53 }
 0xdf2   :  { %v3292_v4 = vsel %vm235_vm1, %v6442_v46, 0.0 }
 0xdf3   :  { %v3279_v49 = vmul.f32 1.442695, %v3260_v57  ;;  %v3273_v60 = vmul.f32 1.442695, %v3257_v3 }
 0xdf4   :  { %v2490_v0 = vpop.permute.xlu1 %2489  ;;  %v2488_v2 = vpop.permute.xlu0 %2487 }
 0xdf5   :  { %5499 = vpow2.f32 %v3279_v49  ;;  %2496 = vst.msk [vmem:[#allocation2 + $0xe8] sm:$0xff] %vm235_vm1, %v2490_v0  ;;  %2495 = vst.msk [vmem:[#allocation2 + $0xe0] sm:$0xff] %vm235_vm1, %v2488_v2  ;;  %3293 = vadd.xlane.f32.xlu1 %v3292_v4  ;;  %v3503_v49 = vsel %vm1180_vm3, %v2632_v48, 0 }
 0xdf6   :  { %5501 = vpow2.f32 %v3273_v60 }
 0xdf7   :  { %v6450_v6 = vpop.eup %5495 }
 0xdf8   :  { %v3304_v39 = vsel %vm235_vm1, %v6450_v6, 0.0  ;;  %v6454_v42 = vpop.eup %5497 }
 0xdf9   :  { %3305 = vadd.xlane.f32.xlu0 %v3304_v39  ;;  %v3295_v7 = vsel %vm235_vm1, %v6454_v42, 0.0 }
 0xdfc   :  { %v2621_v60 = vld [vmem:[#allocation2 + $0xe0] sm:$0xff]  ;;  %v2622_v0 = vld [vmem:[#allocation2 + $0xe8] sm:$0xff] }
 0xdfd   :  { %3296 = vadd.xlane.f32.xlu0 %v3295_v7  ;;  %v2633_v7 = vpack.c.bf16 %v2621_v60, %v2621_v60 }
 0xdff   :  { %v6458_v51 = vpop.eup %5499 }
 0xe00   :  { %v6460_v55 = vpop.eup %5501  ;;  %v3310_v10 = vsel %vm235_vm1, %v6458_v51, 0.0 }
 0xe01   :  { %v3301_v12 = vsel %vm235_vm1, %v6460_v55, 0.0  ;;  %3311 = vadd.xlane.f32.xlu0 %v3310_v10  ;;  %v2634_v10 = vpack.c.bf16 %v2622_v0, %v2622_v0 }
 0xe02   :  { %3302 = vadd.xlane.f32.xlu1 %v3301_v12 }
 0xe25   :  { %v3246_v13 = vpop.xlane.xlu1 %3245  ;;  %v3237_v37 = vpop.xlane.xlu0 %3236 }
 0xe26   :  { %v3262_v56 = vsub.f32 %v6401_v11, %v3246_v13  ;;  %v3259_v50 = vsub.f32 %v6404_v59, %v3237_v37 }
 0xe28   :  { %v3283_v41 = vmul.f32 1.442695, %v3262_v56  ;;  %v3277_v15 = vmul.f32 1.442695, %v3259_v50  ;;  %v3549_v50 = vsel %vm1180_vm3, %v2633_v7, 0 }
 0xe29   :  { %v3252_v54 = vpop.xlane.xlu1 %3251  ;;  %v3243_v17 = vpop.xlane.xlu0 %3242 }
 0xe2a   :  { %5503 = vpow2.f32 %v3283_v41  ;;  %v3264_v18 = vsub.f32 %v6412_v5, %v3252_v54  ;;  %v3261_v62 = vsub.f32 %v6409_v19, %v3243_v17 }
 0xe2b   :  { %5505 = vpow2.f32 %v3277_v15 }
 0xe2c   :  { %v3287_v63 = vmul.f32 1.442695, %v3264_v18  ;;  %v3281_v31 = vmul.f32 1.442695, %v3261_v62 }
 0xe2d   :  { %v2524_v1 = vpop.permute.xlu1 %2523  ;;  %v3249_v23 = vpop.xlane.xlu0 %3248 }
 0xe2e   :  { %5507 = vpow2.f32 %v3287_v63  ;;  %2531 = vst.msk [vmem:[#allocation2 + $0xf8] sm:$0xff] %vm235_vm1, %v2524_v1  ;;  %v3263_v21 = vsub.f32 %v6417_v27, %v3249_v23 }
 0xe2f   :  { %5509 = vpow2.f32 %v3281_v31 }
 0xe30   :  { %v3285_v32 = vmul.f32 1.442695, %v3263_v21 }
 0xe31   :  { %v2522_v28 = vpop.permute.xlu0 %2521 }
 0xe32   :  { %2530 = vst.msk [vmem:[#allocation2 + $0xf0] sm:$0xff] %vm235_vm1, %v2522_v28  ;;  %5511 = vpow2.f32 %v3285_v32 }
 0xe34   :  { %v6471_v11 = vpop.eup %5503 }
 0xe35   :  { %v6473_v59 = vpop.eup %5505  ;;  %v3316_v30 = vsel %vm235_vm1, %v6471_v11, 0.0  ;;  %v2624_v15 = vld [vmem:[#allocation2 + $0xf8] sm:$0xff] }
 0xe36   :  { %v3307_v5 = vsel %vm235_vm1, %v6473_v59, 0.0  ;;  %3317 = vadd.xlane.f32.xlu0 %v3316_v30  ;;  %v2636_v18 = vpack.c.bf16 %v2624_v15, %v2624_v15 }
 0xe37   :  { %3308 = vadd.xlane.f32.xlu1 %v3307_v5 }
 0xe38   :  { %v6479_v20 = vpop.eup %5507 }
 0xe39   :  { %v3322_v29 = vsel %vm235_vm1, %v6479_v20, 0.0  ;;  %v6491_v33 = vpop.eup %5509  ;;  %v2623_v41 = vld [vmem:[#allocation2 + $0xf0] sm:$0xff] }
 0xe3a   :  { %3323 = vadd.xlane.f32.xlu0 %v3322_v29  ;;  %v3313_v34 = vsel %vm235_vm1, %v6491_v33, 0.0  ;;  %v2635_v17 = vpack.c.bf16 %v2623_v41, %v2623_v41 }
 0xe48   :  { %2557 = vrot.lane.b32.xlu1 %v6212_v61, %s6734_s30  ;;  %v6495_v61 = vpop.eup %5511 }
 0xe4c   :  { %2559 = vrot.lane.b32.xlu1 %v6218_v14, %s6734_s30  ;;  %v3319_v14 = vsel %vm235_vm1, %v6495_v61, 0.0 }
 0xe50   :  { %2525 = vrot.lane.b32.xlu0 %v6210_v16, %s6733_s0 }
 0xe70   :  { %3314 = vadd.xlane.f32.xlu1 %v3313_v34 }
 0xe74   :  { %3320 = vadd.xlane.f32.xlu1 %v3319_v14 }
 0xe76   :  { %v3291_v35 = vpop.xlane.xlu0 %3290 }
 0xe77   :  { %5513 = vrcp.f32 %v3291_v35 }
 0xe7e   :  { %v3300_v19 = vpop.xlane.xlu1 %3299 }
 0xe81   :  { %v5514_v27 = vpop.eup %5513 }
 0xe82   :  { %v3337_v38 = vmul.f32 %v5514_v27, %v6432_v22  ;;  %v3294_v24 = vpop.xlane.xlu1 %3293 }
 0xe83   :  { %5515 = vrcp.f32 %v3294_v24 }
 0xe84   :  { %v3349_v8 = vpack.c.bf16 %v3337_v38, %v3337_v38  ;;  %5517 = vrcp.f32 %v3300_v19 }
 0xe85   :  { %2561 = vrot.lane.b32.xlu1 %v6210_v16, %s6734_s30 }
 0xe86   :  { %5222 = vmatmul.mubr.msk.bf16.vlgmr.msra.gmra.mrb[96].mxu1 %vm235_vm1, %v3349_v8  ;;  %v3306_v45 = vpop.xlane.xlu0 %3305 }
 0xe87   :  { %5232 = vmatpush3.bf16.msra.mxu1 %v3457_v40  ;;  %5233 = vmatprep.mubr.msk.bf16.mxu1 %vm5565_vm2, %v5562_v52 }
 0xe88   :  { %5243 = vmatprep.subr.bf16.mxu1 %v5562_v52 }
 0xe8a   :  { %v3297_v22 = vpop.xlane.xlu0 %3296 }
 0xe8b   :  { %5519 = vrcp.f32 %v3297_v22 }
 0xe8c   :  { %5521 = vrcp.f32 %v3306_v45 }
 0xe8d   :  { %v5516_v43 = vpop.eup %5515 }
 0xe8e   :  { %v3338_v47 = vmul.f32 %v5516_v43, %v6442_v46  ;;  %v5518_v3 = vpop.eup %5517  ;;  %v3312_v4 = vpop.xlane.xlu0 %3311 }
 0xe8f   :  { %v3303_v16 = vpop.xlane.xlu1 %3302  ;;  %v3340_v2 = vmul.f32 %v5518_v3, %v6438_v58  ;;  %v3595_v58 = vsel %vm1180_vm3, %v2634_v10, 0  ;;  %v4678_v3 = vld [vmem:[%s6701_s6 + $0x10] sm:$0xf] }
 0xe90   :  { %5523 = vrcp.f32 %v3303_v16  ;;  %v3350_v57 = vpack.c.bf16 %v3338_v47, %v3338_v47  ;;  %v3922_v10 = vsel %vm1180_vm3, %v4678_v3, 0 }
 0xe91   :  { %5525 = vrcp.f32 %v3312_v4  ;;  %v3352_v13 = vpack.c.bf16 %v3340_v2, %v3340_v2  ;;  %v4679_v4 = vld [vmem:[%s6701_s6 + $0x14] sm:$0xf] }
 0xe92   :  { %5228 = vmatmul.mubr.msk.bf16.vlgmr.msra.gmra.mrb[80].mxu0 %vm235_vm1, %v3350_v57 }
 0xe93   :  { %5238 = vmatpush3.bf16.msra.mxu0 %v3503_v49  ;;  %5239 = vmatprep.mubr.msk.bf16.mxu0 %vm5565_vm2, %v5562_v52 }
 0xe94   :  { %5249 = vmatprep.subr.bf16.mxu0 %v5562_v52 }
 0xe95   :  { %v5520_v46 = vpop.eup %5519 }
 0xe96   :  { %v3339_v39 = vmul.f32 %v5520_v46, %v6454_v42  ;;  %v5522_v37 = vpop.eup %5521 }
 0xe97   :  { %v3342_v42 = vmul.f32 %v5522_v37, %v6450_v6  ;;  %v3641_v6 = vsel %vm1180_vm3, %v2635_v17, 0 }
 0xe98   :  { %v3351_v12 = vpack.c.bf16 %v3339_v39, %v3339_v39 }
 0xe99   :  { %v3354_v1 = vpack.c.bf16 %v3342_v42, %v3342_v42 }
 0xe9a   :  { %v5524_v56 = vpop.eup %5523  ;;  %5234 = vmatmul.mubr.msk.bf16.vlgmr.msra.gmra.mrb[100].mxu1 %vm235_vm1, %v3351_v12  ;;  %5240 = vmatmul.mubr.msk.bf16.vlgmr.msra.gmra.mrb[84].mxu0 %vm235_vm1, %v3352_v13 }
 0xe9b   :  { %5244 = vmatpush3.bf16.msra.mxu1 %v3549_v50  ;;  %5250 = vmatpush3.bf16.msra.mxu0 %v3595_v58  ;;  %v3341_v54 = vmul.f32 %v5524_v56, %v6460_v55  ;;  %v5526_v23 = vpop.eup %5525  ;;  %v3687_v55 = vsel %vm1180_vm3, %v2636_v18, 0 }
 0xe9c   :  { %5245 = vmatprep.mubr.msk.bf16.mxu1 %vm5565_vm2, %v5562_v52  ;;  %5251 = vmatprep.mubr.msk.bf16.mxu0 %vm5565_vm2, %v5562_v52  ;;  %v3344_v28 = vmul.f32 %v5526_v23, %v6458_v51 }
 0xe9d   :  { %5255 = vmatprep.subr.bf16.mxu1 %v5562_v52  ;;  %5261 = vmatprep.subr.bf16.mxu0 %v5562_v52  ;;  %v3353_v63 = vpack.c.bf16 %v3341_v54, %v3341_v54  ;;  %v4681_v54 = vld [vmem:[%s6701_s6 + $0x1c] sm:$0xf] }
 0xe9e   :  { %v3356_v30 = vpack.c.bf16 %v3344_v28, %v3344_v28 }
 0xea2   :  { %5246 = vmatmul.mubr.msk.bf16.vlgmr.msra.gmra.mrb[104].mxu1 %vm235_vm1, %v3353_v63  ;;  %5252 = vmatmul.mubr.msk.bf16.vlgmr.msra.gmra.mrb[88].mxu0 %vm235_vm1, %v3354_v1 }
 0xea3   :  { %5256 = vmatpush3.bf16.msra.mxu1 %v3641_v6  ;;  %5262 = vmatpush3.bf16.msra.mxu0 %v3687_v55 }
 0xea4   :  { %5263 = vmatprep.mubr.msk.bf16.mxu0 %vm5565_vm2, %v5562_v52  ;;  %5257 = vmatprep.mubr.msk.bf16.mxu1 %vm5565_vm2, %v5562_v52 }
 0xea5   :  { %5273 = vmatprep.subr.bf16.mxu0 %v5562_v52  ;;  %5267 = vmatprep.subr.bf16.mxu1 %v5562_v52 }
 0xeaa   :  { %5264 = vmatmul.mubr.msk.bf16.vlgmr.msra.gmra.mrb[92].mxu0 %vm235_vm1, %v3356_v30 }
 0xeab   :  { %5275 = vmatprep.mubr.msk.bf16.mxu0 %vm5565_vm2, %v5562_v52 }
 0xec3   :  { %v3318_v5 = vpop.xlane.xlu0 %3317 }
 0xec4   :  { %v3309_v29 = vpop.xlane.xlu1 %3308  ;;  %5527 = vrcp.f32 %v3318_v5 }
 0xec5   :  { %5529 = vrcp.f32 %v3309_v29 }
 0xec7   :  { %v3324_v51 = vpop.xlane.xlu0 %3323 }
 0xec8   :  { %v2558_v62 = vpop.permute.xlu1 %2557 }
 0xec9   :  { %2566 = vst.msk [vmem:[#allocation2 + $0x108] sm:$0xff] %vm235_vm1, %v2558_v62 }
 0xecb   :  { %v2526_v31 = vpop.permute.xlu0 %2525 }
 0xecc   :  { %v2560_v21 = vpop.permute.xlu1 %2559  ;;  %2532 = vst.msk [vmem:[#allocation2 + $0x100] sm:$0xff] %vm235_vm1, %v2526_v31 }
 0xecd   :  { %2567 = vst.msk [vmem:[#allocation2 + $0x110] sm:$0xff] %vm235_vm1, %v2560_v21 }
 0xece   :  { %v5528_v32 = vpop.eup %5527 }
 0xecf   :  { %v5530_v34 = vpop.eup %5529  ;;  %v3346_v19 = vmul.f32 %v5528_v32, %v6471_v11 }
 0xed0   :  { %v3343_v14 = vmul.f32 %v5530_v34, %v6473_v59  ;;  %v2626_v35 = vld [vmem:[#allocation2 + $0x108] sm:$0xff] }
 0xed1   :  { %v2638_v36 = vpack.c.bf16 %v2626_v35, %v2626_v35  ;;  %v3358_v8 = vpack.c.bf16 %v3346_v19, %v3346_v19  ;;  %v4114_v35 = vsel %vm1180_vm3, %v4681_v54, 0 }
 0xed2   :  { %v3355_v27 = vpack.c.bf16 %v3343_v14, %v3343_v14 }
 0xed3   :  { %v3779_v38 = vsel %vm1180_vm3, %v2638_v36, 0  ;;  %v2625_v24 = vld [vmem:[#allocation2 + $0x100] sm:$0xff] }
 0xed4   :  { %5258 = vmatmul.mubr.msk.bf16.vlgmr.msra.gmra.mrb[108].mxu1 %vm235_vm1, %v3355_v27  ;;  %5274 = vmatpush3.bf16.msra.mxu0 %v3779_v38  ;;  %v2637_v44 = vpack.c.bf16 %v2625_v24, %v2625_v24  ;;  %v2627_v22 = vld [vmem:[#allocation2 + $0x110] sm:$0xff] }
 0xed5   :  { %5269 = vmatprep.mubr.msk.bf16.mxu1 %vm5565_vm2, %v5562_v52  ;;  %5285 = vmatprep.subr.bf16.mxu0 %v5562_v52  ;;  %v2639_v47 = vpack.c.bf16 %v2627_v22, %v2627_v22 }
 0xed6   :  { %v3733_v59 = vsel %vm1180_vm3, %v2637_v44, 0 }
 0xed7   :  { %5276 = vmatmul.mubr.msk.bf16.vlgmr.msra.gmra.mrb[96].mxu0 %vm235_vm1, %v3358_v8  ;;  %5268 = vmatpush3.bf16.msra.mxu1 %v3733_v59  ;;  %v3825_v49 = vsel %vm1180_vm3, %v2639_v47, 0 }
 0xed8   :  { %5279 = vmatprep.subr.bf16.mxu1 %v5562_v52  ;;  %5287 = vmatprep.mubr.msk.bf16.mxu0 %vm5565_vm2, %v5562_v52 }
 0xefd   :  { %v3315_v11 = vpop.xlane.xlu1 %3314 }
 0xefe   :  { %5531 = vrcp.f32 %v3315_v11 }
 0xeff   :  { %5533 = vrcp.f32 %v3324_v51 }
 0xf01   :  { %v3321_v40 = vpop.xlane.xlu1 %3320 }
 0xf02   :  { %5535 = vrcp.f32 %v3321_v40 }
 0xf05   :  { %v2562_v45 = vpop.permute.xlu1 %2561 }
 0xf06   :  { %2568 = vst.msk [vmem:[#allocation2 + $0x118] sm:$0xff] %vm235_vm1, %v2562_v45 }
 0xf08   :  { %v5532_v53 = vpop.eup %5531 }
 0xf09   :  { %v3345_v43 = vmul.f32 %v5532_v53, %v6491_v33  ;;  %v5534_v48 = vpop.eup %5533 }
 0xf0a   :  { %v3348_v0 = vmul.f32 %v5534_v48, %v6479_v20  ;;  %v3990_v20 = vsel %vm1180_vm3, %v4679_v4, 0 }
 0xf0b   :  { %v3357_v16 = vpack.c.bf16 %v3345_v43, %v3345_v43 }
 0xf0c   :  { %v5536_v57 = vpop.eup %5535  ;;  %v3360_v39 = vpack.c.bf16 %v3348_v0, %v3348_v0 }
 0xf0d   :  { %5270 = vmatmul.mubr.msk.bf16.vlgmr.msra.gmra.mrb[112].mxu1 %vm235_vm1, %v3357_v16  ;;  %v2628_v60 = vld [vmem:[#allocation2 + $0x118] sm:$0xff]  ;;  %v3347_v33 = vmul.f32 %v5536_v57, %v6495_v61 }
 0xf0e   :  { %5280 = vmatpush3.bf16.msra.mxu1 %v3825_v49  ;;  %v2640_v2 = vpack.c.bf16 %v2628_v60, %v2628_v60  ;;  %5281 = vmatprep.mubr.msk.bf16.mxu1 %vm5565_vm2, %v5562_v52  ;;  %v4680_v61 = vld [vmem:[%s6701_s6 + $0x18] sm:$0xf] }
 0xf0f   :  { %5367 = vmatprep.subr.msk.bf16.mxu1 %vm1180_vm3, %v4678_v3  ;;  %v3359_v7 = vpack.c.bf16 %v3347_v33, %v3347_v33  ;;  %v4052_v6 = vsel %vm1180_vm3, %v4680_v61, 0 }
 0xf10   :  { %v3871_v46 = vsel %vm1180_vm3, %v2640_v2, 0 }
 0xf11   :  { %5286 = vmatpush3.bf16.msra.mxu0 %v3871_v46 }
 0xf12   :  { %5368 = vmatprep.subr.msk.bf16.mxu0 %vm1180_vm3, %v4679_v4 }
 0xf14   :  { %5288 = vmatmul.mubr.msk.bf16.vlgmr.msra.gmra.mrb[100].mxu0 %vm235_vm1, %v3360_v39 }
 0xf15   :  { %5282 = vmatmul.mubr.msk.bf16.vlgmr.msra.gmra.mrb[116].mxu1 %vm235_vm1, %v3359_v7  ;;  %5298 = vmatpush3.bf16.msra.mxu0 %v3990_v20 }
 0xf16   :  { %5292 = vmatpush3.bf16.msra.mxu1 %v3922_v10  ;;  %5370 = vmatprep.subr.msk.bf16.mxu0 %vm1180_vm3, %v4681_v54 }
 0xf17   :  { %5369 = vmatprep.subr.msk.bf16.mxu1 %vm1180_vm3, %v4680_v61 }
 0xf59   :  { %v3401_v12 = vpop.f32.mrb[96].mxu1 }
 0xf5a   :  { %v5223_v13 = vpop.f32.mrb[97].mxu1 }
 0xf5b   :  { %v3404_v37 = vpop.f32.mrb[98].mxu1 }
 0xf5c   :  { %v5224_v56 = vpop.f32.mrb[99].mxu1 }
 0xf5d   :  { %v4740_v56 = vld [vmem:[%s6702_s7 + $0x1] ss:$0 sm:$0xff] }
 0xf65   :  { %v3447_v50 = vpop.f32.mrb[80].mxu0 }
 0xf66   :  { %v3913_v58 = vpack.c.bf16 %v3447_v50, %v3401_v12  ;;  %v5229_v41 = vpop.f32.mrb[81].mxu0 }
 0xf67   :  { %v3450_v15 = vpop.f32.mrb[82].mxu0 }
 0xf68   :  { %v5230_v42 = vpop.f32.mrb[83].mxu0  ;;  %5293 = vmatprep.mubr.msk.bf16.mxu1 %vm235_vm1, %v3913_v58 }
 0xf6d   :  { %v3493_v17 = vpop.f32.mrb[100].mxu1  ;;  %v3539_v18 = vpop.f32.mrb[84].mxu0 }
 0xf6e   :  { %v3914_v63 = vpack.c.bf16 %v3493_v17, %v3493_v17  ;;  %v5235_v1 = vpop.f32.mrb[101].mxu1  ;;  %v5241_v23 = vpop.f32.mrb[85].mxu0 }
 0xf6f   :  { %v3496_v55 = vpop.f32.mrb[102].mxu1  ;;  %v3542_v28 = vpop.f32.mrb[86].mxu0 }
 0xf70   :  { %v5236_v30 = vpop.f32.mrb[103].mxu1  ;;  %v5242_v5 = vpop.f32.mrb[87].mxu0  ;;  %5294 = vmatmul.mubr.msk.bf16.vlgmr.msra.gmra.mrb[120].mxu1 %vm235_vm1, %v3914_v63 }
 0xf71   :  { %5304 = vmatpush3.bf16.msra.mxu1 %v4052_v6 }
 0xf75   :  { %v3585_v29 = vpop.f32.mrb[104].mxu1  ;;  %v3631_v51 = vpop.f32.mrb[88].mxu0 }
 0xf76   :  { %v3981_v62 = vpack.c.bf16 %v3585_v29, %v3539_v18  ;;  %v3982_v31 = vpack.c.bf16 %v3631_v51, %v3631_v51  ;;  %v5247_v21 = vpop.f32.mrb[105].mxu1  ;;  %v5253_v32 = vpop.f32.mrb[89].mxu0 }
 0xf77   :  { %v3588_v34 = vpop.f32.mrb[106].mxu1  ;;  %v3634_v14 = vpop.f32.mrb[90].mxu0 }
 0xf78   :  { %v5248_v19 = vpop.f32.mrb[107].mxu1  ;;  %v5254_v36 = vpop.f32.mrb[91].mxu0  ;;  %5299 = vmatprep.mubr.msk.bf16.mxu0 %vm235_vm1, %v3981_v62 }
 0xf79   :  { %5300 = vmatmul.mubr.msk.bf16.vlgmr.msra.gmra.mrb[104].mxu0 %vm235_vm1, %v3982_v31 }
 0xf7a   :  { %5310 = vmatpush3.bf16.msra.mxu0 %v4114_v35 }
 0xf7d   :  { %v3723_v27 = vpop.f32.mrb[92].mxu0 }
 0xf7e   :  { %v5265_v38 = vpop.f32.mrb[93].mxu0 }
 0xf7f   :  { %v3726_v24 = vpop.f32.mrb[94].mxu0 }
 0xf80   :  { %v5266_v44 = vpop.f32.mrb[95].mxu0 }
 0xfa7   :  { %v3677_v8 = vpop.f32.mrb[108].mxu1 }
 0xfa8   :  { %v4043_v59 = vpack.c.bf16 %v3723_v27, %v3677_v8  ;;  %v5259_v11 = vpop.f32.mrb[109].mxu1 }
 0xfa9   :  { %v3680_v40 = vpop.f32.mrb[110].mxu1 }
 0xfaa   :  { %v5260_v45 = vpop.f32.mrb[111].mxu1  ;;  %v3815_v22 = vpop.f32.mrb[96].mxu0  ;;  %5305 = vmatprep.mubr.msk.bf16.mxu1 %vm235_vm1, %v4043_v59 }
 0xfab   :  { %v5277_v53 = vpop.f32.mrb[97].mxu0 }
 0xfac   :  { %v3818_v43 = vpop.f32.mrb[98].mxu0 }
 0xfad   :  { %v5278_v47 = vpop.f32.mrb[99].mxu0 }
 0xfe0   :  { %v3769_v48 = vpop.f32.mrb[112].mxu1 }
 0xfe1   :  { %v4044_v16 = vpack.c.bf16 %v3769_v48, %v3769_v48  ;;  %v5271_v57 = vpop.f32.mrb[113].mxu1 }
 0xfe2   :  { %v3772_v3 = vpop.f32.mrb[114].mxu1  ;;  %v5399_v57 = vld [vmem:[%s6703_s10 + $0x10] sm:$0xff]  }
 0xfe3   :  { %v5272_v49 = vpop.f32.mrb[115].mxu1  ;;  %5306 = vmatmul.mubr.msk.bf16.vlgmr.msra.gmra.mrb[124].mxu1 %vm235_vm1, %v4044_v16  ;;  %v5400_v3 = vld [vmem:[%s6703_s10 + $0x18] sm:$0xff]   ;;  %5315 = vmatprep.subr.bf16.mxu1 %v5399_v57 }
 0xfe4   :  { %5316 = vmatpush3.bf16.msra.mxu1 %v5399_v57 }
 0xfe5   :  { %5317 = vmatprep.subr.bf16.mxu1 %v5400_v3 }
 0xfe7   :  { %v3907_v60 = vpop.f32.mrb[100].mxu0 }
 0xfe8   :  { %v3861_v0 = vpop.f32.mrb[116].mxu1  ;;  %v5289_v2 = vpop.f32.mrb[101].mxu0  ;;  %v4106_v39 = vpack.c.bf16 %v3907_v60, %v3907_v60  ;;  %5318 = vmatpush3.bf16.msra.mxu1 %v5400_v3 }
 0xfe9   :  { %v4105_v33 = vpack.c.bf16 %v3861_v0, %v3815_v22  ;;  %v5283_v4 = vpop.f32.mrb[117].mxu1  ;;  %v3910_v46 = vpop.f32.mrb[102].mxu0 }
 0xfea   :  { %v3864_v20 = vpop.f32.mrb[118].mxu1  ;;  %v5290_v7 = vpop.f32.mrb[103].mxu0 }
 0xfeb   :  { %v5284_v10 = vpop.f32.mrb[119].mxu1  ;;  %5311 = vmatprep.mubr.msk.bf16.mxu0 %vm235_vm1, %v4105_v33 }
 0xfec   :  { %5312 = vmatmul.mubr.msk.bf16.vlgmr.msra.gmra.mrb[108].mxu0 %vm235_vm1, %v4106_v39 }
0x1043   :  { %v5295_v61 = vpop.f32.mrb[120].mxu1 }
0x1044   :  { %v3958_v12 = vpop.f32.mrb[121].mxu1  ;;  %v3980_v50 = vadd.f32 %v5295_v61, %v4740_v56  ;;  %v4747_v61 = vld [vmem:[%s6704_s8 + $0x1] ss:$0 sm:$0xff] }
0x1045   :  { %v5296_v13 = vpop.f32.mrb[122].mxu1  ;;  %v3978_v58 = vadd.f32 %v4740_v56, %v3958_v12 }
0x1046   :  { %v3961_v37 = vpop.f32.mrb[123].mxu1 }
0x1047   :  { %v3979_v54 = vadd.f32 %v4740_v56, %v3961_v37 }
0x104c   :  { %v5301_v41 = vpop.f32.mrb[104].mxu0 }
0x104d   :  { %v4042_v15 = vadd.f32 %v5301_v41, %v3980_v50  ;;  %v4026_v42 = vpop.f32.mrb[105].mxu0 }
0x104e   :  { %v4040_v17 = vadd.f32 %v4026_v42, %v3978_v58  ;;  %v5302_v18 = vpop.f32.mrb[106].mxu0  ;;  %v4748_v58 = vld [vmem:[%s6705_s9 + $0x1] ss:$0 sm:$0xff] }
0x104f   :  { %v4029_v63 = vpop.f32.mrb[107].mxu0 }
0x1050   :  { %v4041_v1 = vadd.f32 %v4029_v63, %v3979_v54 }
0x10b6   :  { %v5307_v23 = vpop.f32.mrb[124].mxu1 }
0x10b7   :  { %v4104_v6 = vadd.f32 %v5307_v23, %v4042_v15  ;;  %v4088_v55 = vpop.f32.mrb[125].mxu1  ;;  %v5402_v23 = vld [vmem:[%s6706_s12 + $0x48] sm:$0xff]  }
0x10b8   :  { %v4102_v28 = vadd.f32 %v4088_v55, %v4040_v17  ;;  %v5308_v30 = vpop.f32.mrb[126].mxu1  ;;  %v5404_v55 = vld [vmem:[%s6706_s12 + $0x58] sm:$0xff]  }
0x10b9   :  { %v4091_v5 = vpop.f32.mrb[127].mxu1  ;;  %v5406_v30 = vld [vmem:[%s6706_s12 + $0x68] sm:$0xff]  }
0x10ba   :  { %v4103_v29 = vadd.f32 %v4091_v5, %v4041_v1  ;;  %v5401_v1 = vld [vmem:[%s6706_s12 + $0x40] sm:$0xff]   ;;  %v5407_v5 = vld [vmem:[%s6706_s12 + $0x70] sm:$0xff]  }
0x10bb   :  { %5323 = vmatprep.subr.bf16.mxu0 %v5401_v1 }
0x10bc   :  { %5324 = vmatpush3.bf16.msra.mxu0 %v5401_v1 }
0x10bd   :  { %5325 = vmatprep.subr.bf16.mxu0 %v5402_v23 }
0x10bf   :  { %v5313_v51 = vpop.f32.mrb[108].mxu0 }
0x10c0   :  { %v4166_v62 = vadd.f32 %v5313_v51, %v4104_v6  ;;  %v4150_v31 = vpop.f32.mrb[109].mxu0  ;;  %5326 = vmatpush3.bf16.msra.mxu0 %v5402_v23  ;;  %v5403_v6 = vld [vmem:[%s6706_s12 + $0x50] sm:$0xff]   ;;  %v4749_v51 = vld [vmem:[%s6707_s11 + $0x1] ss:$0 sm:$0xff]  ;;  %v4767_v23 = vld [vmem:[%s6711_s14] ss:$0 sm:$0xff] }
0x10c1   :  { %v4164_v21 = vadd.f32 %v4150_v31, %v4102_v28  ;;  %v5314_v32 = vpop.f32.mrb[110].mxu0  ;;  %5327 = vmatprep.subr.bf16.mxu0 %v5403_v6  ;;  %v5405_v28 = vld [vmem:[%s6706_s12 + $0x60] sm:$0xff]  }
0x10c2   :  { %v4153_v34 = vpop.f32.mrb[111].mxu0  ;;  %v6602_v19 = vadd.f32 %v4166_v62, %v6174_v25 }
0x10c3   :  { %v6599_v14 = vadd.f32 %v4164_v21, %v6171_v9  ;;  %v4165_v35 = vadd.f32 %v4153_v34, %v4103_v29  ;;  %v5408_v29 = vld [vmem:[%s6706_s12 + $0x78] sm:$0xff]  }
0x10c4   :  { %v4176_v24 = vsel %vm102_vm0, %v6602_v19, 0.0  ;;  %5328 = vmatpush3.bf16.msra.mxu0 %v5403_v6 }
0x10c5   :  { %v6605_v36 = vadd.f32 %v4165_v35, %v6176_v26  ;;  %v4170_v27 = vsel %vm102_vm0, %v6599_v14, 0.0  ;;  %5329 = vmatprep.subr.bf16.mxu0 %v5404_v55 }
0x10c6   :  { %4171 = vadd.xlane.f32.xlu0 %v4170_v27 }
0x10c7   :  { %v4173_v38 = vsel %vm102_vm0, %v6605_v36, 0.0 }
0x10c8   :  { %4174 = vadd.xlane.f32.xlu1 %v4173_v38  ;;  %5330 = vmatpush3.bf16.msra.mxu0 %v5404_v55  ;;  %v4768_v55 = vld [vmem:[%s6712_s15] ss:$0 sm:$0xff] }
0x10c9   :  { %5331 = vmatprep.subr.bf16.mxu0 %v5405_v28 }
0x10ca   :  { %4177 = vadd.xlane.f32.xlu0 %v4176_v24 }
0x10cc   :  { %5332 = vmatpush3.bf16.msra.mxu0 %v5405_v28 }
0x10cd   :  { %5333 = vmatprep.subr.bf16.mxu0 %v5406_v30 }
0x10d0   :  { %5334 = vmatpush3.bf16.msra.mxu0 %v5406_v30 }
0x10d1   :  { %5335 = vmatprep.subr.bf16.mxu0 %v5407_v5 }
0x10d4   :  { %5336 = vmatpush3.bf16.msra.mxu0 %v5407_v5 }
0x10d5   :  { %5337 = vmatprep.subr.bf16.mxu0 %v5408_v29 }
0x10d8   :  { %5338 = vmatpush3.bf16.msra.mxu0 %v5408_v29 }
0x1153   :  { %v4172_v9 = vpop.xlane.xlu0 %4171 }
0x1154   :  { %v4179_v44 = vmul.f32 0.03125, %v4172_v9 }
0x1155   :  { %v4175_v8 = vpop.xlane.xlu1 %4174 }
0x1156   :  { %v4182_v25 = vsub.f32 %v6599_v14, %v4179_v44  ;;  %v4180_v59 = vmul.f32 0.03125, %v4175_v8 }
0x1157   :  { %v4178_v26 = vpop.xlane.xlu0 %4177 }
0x1158   :  { %v4183_v11 = vsub.f32 %v6605_v36, %v4180_v59  ;;  %v4181_v40 = vmul.f32 0.03125, %v4178_v26  ;;  %v4185_v45 = vmul.f32 %v4182_v25, %v4182_v25 }
0x115a   :  { %v4184_v22 = vsub.f32 %v6602_v19, %v4181_v40  ;;  %v4188_v53 = vsel %vm102_vm0, %v4185_v45, 0.0  ;;  %v4186_v43 = vmul.f32 %v4183_v11, %v4183_v11 }
0x115b   :  { %4189 = vadd.xlane.f32.xlu0 %v4188_v53 }
0x115c   :  { %v4187_v47 = vmul.f32 %v4184_v22, %v4184_v22  ;;  %v4191_v16 = vsel %vm102_vm0, %v4186_v43, 0.0 }
0x115e   :  { %v4194_v48 = vsel %vm102_vm0, %v4187_v47, 0.0 }
0x115f   :  { %4195 = vadd.xlane.f32.xlu1 %v4194_v48  ;;  %4192 = vadd.xlane.f32.xlu0 %v4191_v16 }
0x11e8   :  { %v4190_v49 = vpop.xlane.xlu0 %4189 }
0x11e9   :  { %v4197_v60 = vmul.f32 0.03125, %v4190_v49 }
0x11eb   :  { %v4200_v0 = vadd.f32 1e-05, %v4197_v60  ;;  %v5575_v60 = vmov 0.0|0.0  }
0x11ec   :  { %v4193_v2 = vpop.xlane.xlu0 %4192  ;;  %v4196_v33 = vpop.xlane.xlu1 %4195  ;;  %5360 = vmatprep.subr.bf16.mxu1 %v5575_v60 }
0x11ed   :  { %5537 = vrsqrt.f32 %v4200_v0  ;;  %v4198_v4 = vmul.f32 0.03125, %v4193_v2  ;;  %v4199_v46 = vmul.f32 0.03125, %v4196_v33 }
0x11ef   :  { %v4201_v39 = vadd.f32 1e-05, %v4198_v4  ;;  %v4202_v20 = vadd.f32 1e-05, %v4199_v46  ;;  %v4765_v46 = vld [vmem:[%s6708_s13 + $0x1] ss:$0 sm:$0xff] }
0x11f1   :  { %5539 = vrsqrt.f32 %v4201_v39 }
0x11f2   :  { %5541 = vrsqrt.f32 %v4202_v20 }
0x11f7   :  { %v5538_v7 = vpop.eup %5537 }
0x11f8   :  { %v4206_v10 = vmul.f32 %v5538_v7, %v4182_v25 }
0x11fa   :  { %v4215_v56 = vmul.f32 %v4747_v61, %v4206_v10 }
0x11fb   :  { %v5540_v12 = vpop.eup %5539 }
0x11fc   :  { %v5542_v13 = vpop.eup %5541  ;;  %v4207_v37 = vmul.f32 %v5540_v12, %v4183_v11  ;;  %v4224_v42 = vadd.f32 %v4748_v58, %v4215_v56 }
0x11fd   :  { %v4208_v50 = vmul.f32 %v5542_v13, %v4184_v22 }
0x11fe   :  { %v4216_v41 = vmul.f32 %v4747_v61, %v4207_v37 }
0x11ff   :  { %v4217_v15 = vmul.f32 %v4747_v61, %v4208_v50 }
0x1200   :  { %v4225_v54 = vadd.f32 %v4748_v58, %v4216_v41 }
0x1201   :  { %v4226_v17 = vadd.f32 %v4748_v58, %v4217_v15 }
0x1202   :  { %v4227_v18 = vpack.c.bf16 %v4225_v54, %v4224_v42  ;;  %v5409_v42 = vld [vmem:[%s6710_s16] sm:$0xff]   ;;  %v5410_v54 = vld [vmem:[%s6710_s16 + $0x8] sm:$0xff]  }
0x1203   :  { %v4228_v63 = vpack.c.bf16 %v4226_v17, %v4226_v17 }
0x1204   :  { %5319 = vmatprep.mubr.msk.bf16.mxu1 %vm102_vm0, %v4227_v18 }
0x1205   :  { %5320 = vmatmul.mubr.msk.bf16.vlgmr.msra.gmra.mrb[128].mxu1 %vm102_vm0, %v4228_v63 }
0x1206   :  { %5349 = vmatprep.mubr.msk.f32.mxu1 %vm5565_vm2, %v5562_v52 }
0x12d8   :  { %v5321_v62 = vpop.f32.mrb[128].mxu1 }
0x12d9   :  { %v4296_v31 = vadd.f32 %v5321_v62, %v4749_v51  ;;  %v4287_v21 = vpop.f32.mrb[129].mxu1 }
0x12da   :  { %v4288_v32 = vadd.f32 %v4749_v51, %v4287_v21  ;;  %v5322_v34 = vpop.f32.mrb[130].mxu1 }
0x12db   :  { %v4756_v35 = vmul.f32 -1.702, %v4296_v31  ;;  %v4290_v27 = vpop.f32.mrb[131].mxu1 }
0x12dc   :  { %v4754_v38 = vmul.f32 -1.702, %v4288_v32  ;;  %v4291_v24 = vadd.f32 %v4749_v51, %v4290_v27 }
0x12dd   :  { %v4311_v9 = vmul.f32 1.442695, %v4756_v35 }
0x12de   :  { %v4307_v44 = vmul.f32 1.442695, %v4754_v38  ;;  %v4755_v8 = vmul.f32 -1.702, %v4291_v24 }
0x12df   :  { %5543 = vpow2.f32 %v4311_v9 }
0x12e0   :  { %5545 = vpow2.f32 %v4307_v44  ;;  %v4309_v25 = vmul.f32 1.442695, %v4755_v8 }
0x12e2   :  { %5547 = vpow2.f32 %v4309_v25 }
0x12e9   :  { %v5544_v59 = vpop.eup %5543 }
0x12ea   :  { %v5546_v26 = vpop.eup %5545  ;;  %v4315_v11 = vadd.f32 1.0, %v5544_v59 }
0x12eb   :  { %v4313_v40 = vadd.f32 1.0, %v5546_v26 }
0x12ec   :  { %v5548_v45 = vpop.eup %5547  ;;  %5549 = vrcp.f32 %v4315_v11 }
0x12ed   :  { %5551 = vrcp.f32 %v4313_v40  ;;  %v4314_v22 = vadd.f32 1.0, %v5548_v45 }
0x12ef   :  { %5553 = vrcp.f32 %v4314_v22 }
0x12f6   :  { %v5550_v53 = vpop.eup %5549 }
0x12f7   :  { %v5552_v43 = vpop.eup %5551  ;;  %v4324_v48 = vmul.f32 %v5550_v53, %v4296_v31 }
0x12f8   :  { %v4322_v16 = vmul.f32 %v5552_v43, %v4288_v32 }
0x12f9   :  { %v5554_v47 = vpop.eup %5553  ;;  %v4326_v49 = vpack.c.bf16 %v4324_v48, %v4324_v48 }
0x12fa   :  { %v4323_v57 = vmul.f32 %v5554_v47, %v4291_v24 }
0x12fc   :  { %v4325_v3 = vpack.c.bf16 %v4323_v57, %v4322_v16 }
0x12fe   :  { %5339 = vmatprep.mubr.bf16.mxu0 %v4325_v3 }
0x12ff   :  { %5340 = vmatmul.mubr.bf16.vlgmr.msra.gmra.mrb[112].mxu0 %v4326_v49 }
0x13d2   :  { %v5341_v0 = vpop.f32.mrb[112].mxu0 }
0x13d3   :  { %v4409_v2 = vpop.f32.mrb[113].mxu0  ;;  %v4425_v61 = vadd.f32 %v5341_v0, %v6602_v19 }
0x13d4   :  { %v4423_v33 = vadd.f32 %v4409_v2, %v6599_v14  ;;  %v5342_v4 = vpop.f32.mrb[114].mxu0  ;;  %v4435_v14 = vld [vmem:[%s6709_s1] sm:$0x7] }
0x13d5   :  { %v4412_v39 = vpop.f32.mrb[115].mxu0  ;;  %v4434_v13 = vadd.f32 %v4765_v46, %v4425_v61 }
0x13d6   :  { %v4424_v20 = vadd.f32 %v4412_v39, %v6605_v36  ;;  %v4432_v7 = vadd.f32 %v4765_v46, %v4423_v33 }
0x13d8   :  { %v4433_v10 = vadd.f32 %v4765_v46, %v4424_v20 }
0x13da   :  { %v5361_v12 = vpack.c.bf16 %v4433_v10, %v4432_v7 }
0x13dc   :  { %5362 = vmatpush3.bf16.msra.mxu1 %v5361_v12 }
0x13dd   :  { %5347 = vmatprep.subr.mxu1 %v5562_v52 }
0x13e0   :  { %5348 = vmatpush3.msra.mxu1 %v4434_v13 }
0x13e1   :  { %5350 = vmatmul.mubr.msk.f32.vlgmr.msra.gmra.mrb[132].mxu1 %vm4436_vm5, %v4435_v14  ;;  %5352 = vmatprep.subr.bf16.mxu1 %v5562_v52 }
0x13e2   :  { %5356 = vmatprep.mubr.msk.bf16.mxu1 %vm5565_vm2, %v5562_v52  ;;  %5353 = vmatpush3.bf16.msra.mxu1 %v5409_v42 }
0x13e3   :  { %5354 = vmatprep.subr.bf16.mxu1 %v5562_v52 }
0x13e6   :  { %5355 = vmatpush3.bf16.msra.mxu1 %v5410_v54 }
0x14b4   :  { %v4506_v36 = vpop.f32.mrb[132].mxu1 }
0x14b5   :  { %v4513_v19 = vsel %vm4512_vm6, %v4506_v36, 0.0  ;;  %v5351_v37 = vpop.f32.mrb[133].mxu1 }
0x14b6   :  { %4514 = vadd.xlane.f32.xlu0 %v4513_v19 }
0x1543   :  { %v4515_v56 = vpop.xlane.xlu0 %4514 }
0x1544   :  { %v4516_v50 = vmul.f32 0.03125, %v4515_v56 }
0x1546   :  { %v4517_v58 = vsub.f32 %v4506_v36, %v4516_v50 }
0x1548   :  { %v4518_v41 = vmul.f32 %v4517_v58, %v4517_v58 }
0x154a   :  { %v4519_v15 = vsel %vm4512_vm6, %v4518_v41, 0.0 }
0x154b   :  { %4520 = vadd.xlane.f32.xlu1 %v4519_v15 }
0x15d8   :  { %v4521_v17 = vpop.xlane.xlu1 %4520 }
0x15d9   :  { %v4522_v18 = vmul.f32 0.03125, %v4521_v17 }
0x15db   :  { %v4523_v63 = vadd.f32 1e-05, %v4522_v18 }
0x15dd   :  { %5555 = vrsqrt.f32 %v4523_v63 }
0x15e7   :  { %v5556_v1 = vpop.eup %5555 }
0x15e8   :  { %v4525_v6 = vmul.f32 %v5556_v1, %v4517_v58 }
0x15ea   :  { %v4532_v28 = vmul.f32 %v4767_v23, %v4525_v6 }
0x15ec   :  { %v4539_v30 = vadd.f32 %v4768_v55, %v4532_v28 }
0x15ee   :  { %v4540_v5 = vpack.c.bf16 %v4539_v30, %v4539_v30 }
0x15f0   :  { %5357 = vmatmul.mubr.msk.bf16.vlgmr.msra.gmra.mrb[136].mxu1 %vm102_vm0, %v4540_v5 }
0x16c3   :  { %v4594_v52 = vpop.f32.mrb[136].mxu1 }
0x16c4   :  { %v4600_v29 = vmul.f32 %v4594_v52, %v4594_v52  ;;  %v5358_v51 = vpop.f32.mrb[137].mxu1 }
0x16c5   :  { %v4597_v62 = vpop.f32.mrb[138].mxu1 }
0x16c6   :  { %v5359_v31 = vpop.f32.mrb[139].mxu1  ;;  %v4601_v21 = vsel %vm4512_vm6, %v4600_v29, 0.0 }
0x16c7   :  { %4602 = vadd.xlane.f32.xlu0 %v4601_v21 }
0x1754   :  { %v4603_v32 = vpop.xlane.xlu0 %4602 }
0x1755   :  { %v4604_v34 = vadd.f32 1e-12, %v4603_v32 }
0x1757   :  { %5557 = vrsqrt.f32 %v4604_v34 }
0x1761   :  { %v5558_v35 = vpop.eup %5557 }
0x1762   :  { %v4606_v27 = vmul.f32 %v5558_v35, %v4594_v52 }
0x1764   :  { %4607 = vst.msk [vmem:[%s6713_s17] sm:$0x7] %vm4512_vm6, %v4606_v27 }

// kernel: custom_clip_forward.3
= control target key start
LH: loop header
LB: loop body
LE: loop exit
PB: predicated region body
PF: predicated region fallthrough
CT: control target
= control target key end

     0   :  { %s7097_s0 = inlined_call_operand.vmem [shape: f32[10,192], index: 0, kind: input, shape index: {}]   ;;  %s7098_s1 = inlined_call_operand.vmem [shape: bf16[192,32], index: 1, kind: input, shape index: {}]   ;;  %s7099_s2 = inlined_call_operand.vmem [shape: f32[10,32], index: 2, kind: input, shape index: {}]   ;;  %s7100_s3 = inlined_call_operand.vmem [shape: f32[1,32], index: 3, kind: input, shape index: {}]   ;;  %s7101_s4 = inlined_call_operand.vmem [shape: f32[1,32], index: 4, kind: input, shape index: {}]   ;;  %s7102_s5 = inlined_call_operand.vmem [shape: f32[2,1,32], index: 5, kind: input, shape index: {}]   ;;  %s7103_s6 = inlined_call_operand.vmem [shape: f32[2,1,32], index: 6, kind: input, shape index: {}]   ;;  %s7104_s7 = inlined_call_operand.vmem [shape: bf16[2,32,96], index: 7, kind: input, shape index: {}]   ;;  %s7105_s8 = inlined_call_operand.vmem [shape: f32[2,1,96], index: 8, kind: input, shape index: {}]   ;;  %s7106_s9 = inlined_call_operand.vmem [shape: bf16[2,32,32], index: 9, kind: input, shape index: {}]   ;;  %s7107_s10 = inlined_call_operand.vmem [shape: f32[2,1,32], index: 10, kind: input, shape index: {}]   ;;  %s7108_s11 = inlined_call_operand.vmem [shape: f32[2,1,32], index: 11, kind: input, shape index: {}]   ;;  %s7109_s12 = inlined_call_operand.vmem [shape: f32[2,1,32], index: 12, kind: input, shape index: {}]   ;;  %s7110_s13 = inlined_call_operand.vmem [shape: bf16[2,32,128], index: 13, kind: input, shape index: {}]   ;;  %s7111_s14 = inlined_call_operand.vmem [shape: f32[2,1,128], index: 14, kind: input, shape index: {}]   ;;  %s7112_s15 = inlined_call_operand.vmem [shape: bf16[2,128,32], index: 15, kind: input, shape index: {}]   ;;  %s7113_s16 = inlined_call_operand.vmem [shape: f32[2,1,32], index: 16, kind: input, shape index: {}]   ;;  %s7114_s17 = inlined_call_operand.vmem [shape: f32[1,32], index: 17, kind: input, shape index: {}]   ;;  %s7115_s18 = inlined_call_operand.vmem [shape: f32[1,32], index: 18, kind: input, shape index: {}]   ;;  %s7116_s19 = inlined_call_operand.vmem [shape: bf16[32,32], index: 19, kind: input, shape index: {}]   ;;  %s7117_s20 = inlined_call_operand.vmem [shape: f32[2,10], index: 20, kind: input, shape index: {}]   ;;  %s7118_s21 = inlined_call_operand.vmem [shape: f32[3,32], index: 21, kind: input, shape index: {}]   ;;  %s7119_s22 = inlined_call_operand.<no memory space> [shape: f32[1,1], index: 22, kind: input, shape index: {}]   ;;  %s7120_s23 = inlined_call_operand.hbm [shape: f32[2,3], index: 23, kind: output, shape index: {}]  }
   0x1   :  { %7137 = sst [smem:[#allocation7_spill]] %s7097_s0  ;;  %v28_v0 = vstv %s7119_s22 }
   0x2   :  { %7138 = sst [smem:[#allocation8_spill]] %s7098_s1  ;;  %29 = vst [vmem:[#allocation3] sm:$0x1] %v28_v0 }
   0x3   :  { %7139 = sst [smem:[#allocation9_spill]] %s7099_s2 }
   0x4   :  { %7140 = sst [smem:[#allocation10_spill]] %s7100_s3 }
   0x5   :  { %7141 = sst [smem:[#allocation11_spill]] %s7101_s4 }
   0x6   :  { %7142 = sst [smem:[#allocation12_spill]] %s7102_s5 }
   0x7   :  { %7143 = sst [smem:[#allocation13_spill]] %s7103_s6 }
   0x8   :  { %7144 = sst [smem:[#allocation14_spill]] %s7104_s7 }
   0x9   :  { %s7145_s5 = sld [smem:[#allocation8_spill]]  ;;  %v5946_v2 = vmov 0   ;;  %s7146_s29 = sld [smem:[#allocation7_spill]]  ;;  %vm182_vm0 = vcmask 523264  }
   0xa   :  { %186 = vmatprep.subr.bf16.mxu0 %v5946_v2 }
   0xf   :  { %v5780_v1 = vld [vmem:[%s7145_s5] sm:$0xff]   ;;  %v5781_v3 = vld [vmem:[%s7145_s5 + $0x8] sm:$0xff]   ;;  %v5782_v4 = vld [vmem:[%s7145_s5 + $0x10] sm:$0xff]  }
  0x10   :  { %187 = vmatpush1.bf16.msra.mxu0 %v5780_v1  ;;  %v5783_v5 = vld [vmem:[%s7145_s5 + $0x18] sm:$0xff]   ;;  %v79_v6 = vld [vmem:[%s7146_s29 + $0x8] sm:$0xff]  ;;  %v5784_v8 = vld [vmem:[%s7145_s5 + $0x20] sm:$0xff]  }
  0x11   :  { %188 = vmatprep.subr.bf16.mxu0 %v5946_v2  ;;  %v81_v7 = vld [vmem:[%s7146_s29 + $0x18] sm:$0x3]  ;;  %v5785_v10 = vld [vmem:[%s7145_s5 + $0x28] sm:$0xff]   ;;  %v5786_v11 = vld [vmem:[%s7145_s5 + $0x30] sm:$0xff]  }
  0x12   :  { %v83_v9 = vpack.c.bf16 %v81_v7, %v79_v6  ;;  %v5787_v12 = vld [vmem:[%s7145_s5 + $0x38] sm:$0xff]   ;;  %v5788_v13 = vld [vmem:[%s7145_s5 + $0x40] sm:$0xff]  }
  0x14   :  { %189 = vmatpush1.bf16.msra.mxu0 %v5781_v3  ;;  %5159 = vmatprep.mubr.msk.bf16.mxu0 %vm182_vm0, %v83_v9 }
  0x15   :  { %190 = vmatprep.subr.bf16.mxu0 %v5946_v2 }
  0x18   :  { %191 = vmatpush1.bf16.msra.mxu0 %v5782_v4 }
  0x19   :  { %192 = vmatprep.subr.bf16.mxu0 %v5946_v2 }
  0x1c   :  { %193 = vmatpush1.bf16.msra.mxu0 %v5783_v5 }
  0x1d   :  { %194 = vmatprep.subr.bf16.mxu0 %v5946_v2 }
  0x20   :  { %195 = vmatpush1.bf16.msra.mxu0 %v5784_v8 }
  0x21   :  { %196 = vmatprep.subr.bf16.mxu0 %v5946_v2 }
  0x24   :  { %197 = vmatpush1.bf16.msra.mxu0 %v5785_v10 }
  0x25   :  { %198 = vmatprep.subr.bf16.mxu0 %v5946_v2 }
  0x28   :  { %199 = vmatpush1.bf16.msra.mxu0 %v5786_v11 }
  0x29   :  { %200 = vmatprep.subr.bf16.mxu0 %v5946_v2 }
  0x2c   :  { %201 = vmatpush1.bf16.msra.mxu0 %v5787_v12 }
  0x2d   :  { %202 = vmatprep.subr.bf16.mxu0 %v5946_v2 }
  0x2e   :  { %30 = vsyncpa [#allocation5], 0  ;;  %v5789_v14 = vld [vmem:[%s7145_s5 + $0x48] sm:$0xff]   ;;  %v5790_v15 = vld [vmem:[%s7145_s5 + $0x50] sm:$0xff]   ;;  %s7147_s22 = sld [smem:[#allocation9_spill]]  ;;  %vm229_vm1 = vcmask 261120  }
  0x2f   :  { %v5791_v16 = vld [vmem:[%s7145_s5 + $0x58] sm:$0xff]   ;;  %v78_v17 = vld [vmem:[%s7146_s29] sm:$0xff]  ;;  %v80_v18 = vld [vmem:[%s7146_s29 + $0x10] sm:$0x3]  ;;  %vm233_vm2 = vcmask 254976   ;;  %s7148_s28 = sld [smem:[#allocation10_spill]] }
  0x30   :  { %203 = vmatpush1.bf16.msra.mxu0 %v5788_v13  ;;  %v82_v19 = vpack.c.bf16 %v80_v18, %v78_v17  ;;  %s7149_s4 = sld [smem:[#allocation11_spill]]  ;;  %s7150_s25 = sld [smem:[#allocation14_spill]]  ;;  %v5947_v5 = vmov 0.0   ;;  %vm5948_vm3 = vmmov 0   ;;  %vm568_vm4 = vcmask 61440  }
  0x31   :  { %204 = vmatprep.subr.bf16.mxu0 %v5946_v2  ;;  %5423 = vmatprep.subr.bf16.mxu1 %v5947_v5  ;;  %s7152_s5 = sld [smem:[#allocation13_spill]]  ;;  %s5950_s3 = smov 96   ;;  %vm718_vm5 = vcmask 64512   ;;  %vm1095_vm6 = vcmask 36864   ;;  %vm1196_vm7 = vcmask 1041408   ;;  %vm1197_vm8 = vcmask 1042432  }
  0x32   :  { %5427 = vmatprep.mubr.msk.bf16.mxu1 %vm5948_vm3, %v5947_v5  ;;  %s5951_s0 = smov 88   ;;  %s5953_s30 = smov 120   ;;  %vm1192_vm9 = vcmask 39936   ;;  %vm1955_vm10 = vcmask 1043456   ;;  %vm5963_vm11 = vmmov 1   ;;  %vm4877_vm13 = vcmask 80896  }
  0x33   :  { %s5954_s24 = smov 72   ;;  %s7135_s1 = smov 104   ;;  %vm5757_vm12 = vmpackc.low %vm1196_vm7, %vm5963_vm11  ;;  %vm5131_vm14 = vcmask 17408  }
  0x34   :  { %205 = vmatpush1.bf16.msra.mxu0 %v5789_v14  ;;  %v108_v20 = vld [vmem:[%s7147_s22] sm:$0xff]  ;;  %v109_v22 = vld [vmem:[%s7147_s22 + $0x8] sm:$0x3]  ;;  %s7151_s22 = sld [smem:[#allocation12_spill]]  ;;  %s5956_s26 = smov 112  }
  0x35   :  { %206 = vmatprep.subr.bf16.mxu0 %v5946_v2  ;;  %v5160_v47 = vld [vmem:[%s7148_s28] ss:$0 sm:$0xff]  ;;  %s7133_s2 = smov 64   ;;  %s7131_s6 = smov 56  }
  0x36   :  { %v5161_v49 = vld [vmem:[%s7149_s4] ss:$0 sm:$0xff]  ;;  %v5793_v6 = vld [vmem:[%s7150_s25 + $0x8] sm:$0xff]   ;;  %s5952_s4 = smov 80   ;;  %s7129_s27 = smov 48  }
  0x37   :  { %v5792_v4 = vld [vmem:[%s7150_s25] sm:$0xff]   ;;  %s7127_s7 = smov 40  }
  0x38   :  { %207 = vmatpush1.bf16.msra.mxu0 %v5790_v15  ;;  %5424 = vmatpush3.bf16.msra.mxu1 %v5792_v4 }
  0x39   :  { %208 = vmatprep.subr.bf16.mxu0 %v5946_v2  ;;  %5425 = vmatprep.subr.bf16.mxu1 %v5947_v5 }
  0x3a   :  { %v5162_v15 = vld [vmem:[%s7151_s22] ss:$0 sm:$0xff] }
  0x3c   :  { %209 = vmatpush1.bf16.msra.mxu0 %v5791_v16  ;;  %5426 = vmatpush3.bf16.msra.mxu1 %v5793_v6 }
  0x3d   :  { %5473 = vmatprep.subr.bf16.mxu0 %v5947_v5  ;;  %5431 = vmatprep.subr.bf16.mxu1 %v5947_v5 }
  0x3f   :  { %219 = vmatmul.mubr.bf16.vlgmr.msra.gmra.mrb[0].mxu0 %v82_v19  ;;  %v5163_v19 = vld [vmem:[%s7152_s5] ss:$0 sm:$0xff] }
  0x40   :  { %5475 = vmatprep.mubr.msk.bf16.mxu0 %vm5948_vm3, %v5947_v5 }
 0x112   :  { %v220_v21 = vpop.f32.mrb[0].mxu0 }
 0x113   :  { %v221_v23 = vadd.f32 %v220_v21, %v108_v20  ;;  %v222_v24 = vpop.f32.mrb[1].mxu0 }
 0x114   :  { %v223_v25 = vpop.f32.mrb[2].mxu0  ;;  %v5949_v24 = vmov 1966171168  }
 0x115   :  { %v224_v26 = vadd.f32 %v223_v25, %v109_v22  ;;  %v225_v27 = vpop.f32.mrb[3].mxu0  ;;  %v230_v28 = vsel %vm229_vm1, %v221_v23, 0.0  ;;  %v419_v25 = vunpack.c.l.s4 %v5949_v24 }
 0x116   :  { %231 = vadd.xlane.f32.xlu0 %v230_v28 }
 0x117   :  { %v234_v29 = vsel %vm233_vm2, %v224_v26, 0.0  ;;  %v420_v27 = vunpack.c.0.s8 %v419_v25 }
 0x11a   :  { %235 = vadd.xlane.f32.xlu0 %v234_v29  ;;  %v5164_v29 = vld [vmem:[%s7105_s8] ss:$0 sm:$0xff] }
 0x1a3   :  { %v232_v30 = vpop.xlane.xlu0 %231 }
 0x1a4   :  { %v238_v31 = vmul.f32 0.03125, %v232_v30 }
 0x1a6   :  { %v240_v32 = vsub.f32 %v221_v23, %v238_v31 }
 0x1a7   :  { %v236_v33 = vpop.xlane.xlu0 %235 }
 0x1a8   :  { %v239_v34 = vmul.f32 0.03125, %v236_v33  ;;  %v242_v35 = vmul.f32 %v240_v32, %v240_v32 }
 0x1aa   :  { %v241_v36 = vsub.f32 %v224_v26, %v239_v34  ;;  %v244_v37 = vsel %vm229_vm1, %v242_v35, 0.0  ;;  %v421_v26 = vlaneseq }
 0x1ab   :  { %245 = vadd.xlane.f32.xlu1 %v244_v37 }
 0x1ac   :  { %v243_v38 = vmul.f32 %v241_v36, %v241_v36  ;;  %v422_v28 = vshrl.u32 %v421_v26, 7 }
 0x1ae   :  { %v247_v39 = vsel %vm233_vm2, %v243_v38, 0.0  ;;  %v6190_v30 = vsub.s32 %v420_v27, %v422_v28 }
 0x1af   :  { %248 = vadd.xlane.f32.xlu1 %v247_v39 }
 0x238   :  { %v246_v40 = vpop.xlane.xlu1 %245 }
 0x239   :  { %v250_v41 = vmul.f32 0.03125, %v246_v40 }
 0x23b   :  { %v252_v42 = vadd.f32 1e-05, %v250_v41 }
 0x23c   :  { %v249_v43 = vpop.xlane.xlu1 %248 }
 0x23d   :  { %5818 = vrsqrt.f32 %v252_v42  ;;  %v251_v44 = vmul.f32 0.03125, %v249_v43 }
 0x23f   :  { %v253_v45 = vadd.f32 1e-05, %v251_v44 }
 0x241   :  { %5820 = vrsqrt.f32 %v253_v45 }
 0x247   :  { %v5819_v46 = vpop.eup %5818 }
 0x248   :  { %v256_v48 = vmul.f32 %v5819_v46, %v240_v32 }
 0x24a   :  { %v264_v50 = vmul.f32 %v5160_v47, %v256_v48 }
 0x24b   :  { %v5821_v51 = vpop.eup %5820 }
 0x24c   :  { %v6152_v52 = vadd.f32 %v5161_v49, %v264_v50  ;;  %v257_v53 = vmul.f32 %v5821_v51, %v241_v36 }
 0x24e   :  { %v310_v54 = vsel %vm229_vm1, %v6152_v52, 0.0  ;;  %v265_v55 = vmul.f32 %v5160_v47, %v257_v53 }
 0x24f   :  { %311 = vadd.xlane.f32.xlu0 %v310_v54 }
 0x250   :  { %v6156_v56 = vadd.f32 %v5161_v49, %v265_v55 }
 0x252   :  { %v313_v57 = vsel %vm233_vm2, %v6156_v56, 0.0 }
 0x253   :  { %314 = vadd.xlane.f32.xlu1 %v313_v57 }
 0x2dc   :  { %v312_v58 = vpop.xlane.xlu0 %311 }
 0x2dd   :  { %v316_v59 = vmul.f32 0.03125, %v312_v58 }
 0x2df   :  { %v318_v60 = vsub.f32 %v6152_v52, %v316_v59 }
 0x2e0   :  { %v315_v61 = vpop.xlane.xlu1 %314 }
 0x2e1   :  { %v317_v62 = vmul.f32 0.03125, %v315_v61  ;;  %v320_v63 = vmul.f32 %v318_v60, %v318_v60 }
 0x2e3   :  { %v319_v0 = vsub.f32 %v6156_v56, %v317_v62  ;;  %v322_v1 = vsel %vm229_vm1, %v320_v63, 0.0 }
 0x2e4   :  { %323 = vadd.xlane.f32.xlu0 %v322_v1 }
 0x2e5   :  { %v321_v2 = vmul.f32 %v319_v0, %v319_v0 }
 0x2e7   :  { %v325_v3 = vsel %vm233_vm2, %v321_v2, 0.0 }
 0x2e8   :  { %326 = vadd.xlane.f32.xlu1 %v325_v3 }
 0x371   :  { %v324_v7 = vpop.xlane.xlu0 %323 }
 0x372   :  { %v328_v8 = vmul.f32 0.03125, %v324_v7 }
 0x374   :  { %v330_v9 = vadd.f32 1e-05, %v328_v8 }
 0x375   :  { %v327_v10 = vpop.xlane.xlu1 %326 }
 0x376   :  { %5822 = vrsqrt.f32 %v330_v9  ;;  %v329_v11 = vmul.f32 0.03125, %v327_v10 }
 0x378   :  { %v331_v12 = vadd.f32 1e-05, %v329_v11 }
 0x37a   :  { %5824 = vrsqrt.f32 %v331_v12 }
 0x380   :  { %v5823_v13 = vpop.eup %5822 }
 0x381   :  { %v334_v14 = vmul.f32 %v5823_v13, %v318_v60 }
 0x383   :  { %v342_v18 = vmul.f32 %v5162_v15, %v334_v14 }
 0x384   :  { %v5825_v16 = vpop.eup %5824 }
 0x385   :  { %v335_v17 = vmul.f32 %v5825_v16, %v319_v0  ;;  %v350_v21 = vadd.f32 %v5163_v19, %v342_v18 }
 0x387   :  { %v343_v20 = vmul.f32 %v5162_v15, %v335_v17 }
 0x389   :  { %v351_v22 = vadd.f32 %v5163_v19, %v343_v20 }
 0x38b   :  { %v352_v23 = vpack.c.bf16 %v351_v22, %v350_v21 }
 0x38d   :  { %5428 = vmatmul.mubr.msk.bf16.vlgmr.msra.gmra.mrb[0].mxu1 %vm229_vm1, %v352_v23 }
 0x38e   :  { %5433 = vmatprep.mubr.msk.bf16.mxu1 %vm5948_vm3, %v5947_v5 }
 0x460   :  { %v408_v31 = vpop.f32.mrb[0].mxu1 }
 0x461   :  { %v409_v32 = vadd.f32 %v5164_v29, %v408_v31  ;;  %v5429_v33 = vpop.f32.mrb[1].mxu1 }
 0x462   :  { %v411_v34 = vpop.f32.mrb[2].mxu1 }
 0x463   :  { %v417_v35 = vcombine.high %v409_v32, %v409_v32  ;;  %v424_v36 = vrot.slane %v409_v32, %v6190_v30  ;;  %v412_v37 = vadd.f32 %v5164_v29, %v411_v34  ;;  %v5430_v38 = vpop.f32.mrb[3].mxu1 }
 0x465   :  { %v431_v39 = vrot.slane %v417_v35, %v6190_v30  ;;  %v432_v40 = vcombine.high %v424_v36, %v424_v36  ;;  %v472_v41 = vrot.slane %v412_v37, %v6190_v30  ;;  %v440_v42 = vrot.slane %v424_v36, %v6190_v30 }
 0x467   :  { %v433_v43 = vcombine.high %v431_v39, %v431_v39  ;;  %v447_v44 = vrot.slane %v431_v39, %v6190_v30  ;;  %v454_v45 = vrot.slane %v432_v40, %v6190_v30  ;;  %v473_v46 = vcombine.high %v472_v41, %v472_v41 }
 0x468   :  { %v480_v53 = vrot.slane %v472_v41, %v6190_v30 }
 0x469   :  { %v461_v47 = vrot.slane %v433_v43, %v6190_v30  ;;  %v463_v48 = vcombine.high %v447_v44, %v447_v44  ;;  %v488_v49 = vcombine.low %v440_v42, %v454_v45  ;;  %v5168_v50 = vcombine.high %v440_v42, %v454_v45 }
 0x46a   :  { %v510_v51 = vrot.slane %v447_v44, %v6190_v30  ;;  %v487_v54 = vrot.slane %v473_v46, %v6190_v30 }
 0x46b   :  { %v496_v55 = vrot.slane %v488_v49, %v6190_v30  ;;  %v503_v57 = vrot.slane %v5168_v50, %v6190_v30  ;;  %v527_v58 = vcombine.low %v461_v47, %v463_v48  ;;  %v465_v59 = vcombine.high %v461_v47, %v461_v47 }
 0x46c   :  { %v525_v62 = vrot.slane %v510_v51, %v6190_v30  ;;  %v549_v2 = vrot.slane %v487_v54, %v6190_v30 }
 0x46d   :  { %v511_v60 = vcombine.low %v496_v55, %v503_v57  ;;  %v528_v61 = vcombine.low %v465_v59, %v480_v53  ;;  %v535_v0 = vrot.slane %v527_v58, %v6190_v30 }
 0x46e   :  { %v564_v7 = vrot.slane %v549_v2, %v6190_v30 }
 0x46f   :  { %v518_v63 = vrot.slane %v511_v60, %v6190_v30  ;;  %v542_v1 = vrot.slane %v528_v61, %v6190_v30 }
 0x471   :  { %v6209_v3 = vcombine.low %v518_v63, %v525_v62  ;;  %v550_v4 = vcombine.low %v535_v0, %v542_v1 }
 0x473   :  { %v557_v6 = vrot.slane %v550_v4, %v6190_v30  ;;  %571 = vrot.lane.b32.xlu0 %v6209_v3, %s5950_s3  ;;  %569 = vst.msk [vmem:[#allocation2] sm:$0x1f] %vm568_vm4, %v6209_v3 }
 0x475   :  { %v6217_v8 = vcombine.low %v557_v6, %v564_v7 }
 0x477   :  { %600 = vrot.lane.b32.xlu0 %v6217_v8, %s5951_s0  ;;  %573 = vrot.lane.b32.xlu1 %v6217_v8, %s5950_s3  ;;  %570 = vst.msk [vmem:[#allocation2 + $0x8] sm:$0x1f] %vm568_vm4, %v6217_v8 }
 0x47a   :  { %v670_v20 = vld [vmem:[#allocation2] sm:$0x1f] }
 0x47b   :  { %625 = vrot.lane.b32.xlu0 %v6209_v3, %s5952_s4  ;;  %598 = vrot.lane.b32.xlu1 %v6209_v3, %s5951_s0  ;;  %v678_v24 = vpack.c.bf16 %v670_v20, %v670_v20 }
 0x47e   :  { %v671_v29 = vld [vmem:[#allocation2 + $0x8] sm:$0x1f] }
 0x47f   :  { %627 = vrot.lane.b32.xlu0 %v6217_v8, %s5952_s4  ;;  %589 = vrot.lane.b32.xlu1 %v6209_v3, %s5953_s30  ;;  %v679_v33 = vpack.c.bf16 %v671_v29, %v671_v29 }
 0x483   :  { %652 = vrot.lane.b32.xlu0 %v6209_v3, %s5954_s24  ;;  %591 = vrot.lane.b32.xlu1 %v6217_v8, %s5953_s30 }
 0x487   :  { %643 = vrot.lane.b32.xlu0 %v6209_v3, %s7135_s1  ;;  %616 = vrot.lane.b32.xlu1 %v6209_v3, %s5956_s26 }
 0x48b   :  { %618 = vrot.lane.b32.xlu1 %v6217_v8, %s5956_s26 }
 0x48f   :  { %654 = vrot.lane.b32.xlu1 %v6217_v8, %s5954_s24 }
 0x493   :  { %645 = vrot.lane.b32.xlu1 %v6217_v8, %s7135_s1 }
 0x4e5   :  { %v572_v9 = vpop.permute.xlu0 %571 }
 0x4e6   :  { %578 = vst.msk [vmem:[#allocation2 + $0x40] sm:$0x1f] %vm568_vm4, %v572_v9 }
 0x4e9   :  { %v601_v10 = vpop.permute.xlu0 %600  ;;  %v574_v11 = vpop.permute.xlu1 %573 }
 0x4ea   :  { %606 = vst.msk [vmem:[#allocation2 + $0x58] sm:$0x1f] %vm568_vm4, %v601_v10  ;;  %579 = vst.msk [vmem:[#allocation2 + $0x48] sm:$0x1f] %vm568_vm4, %v574_v11 }
 0x4ed   :  { %v626_v12 = vpop.permute.xlu0 %625  ;;  %v599_v13 = vpop.permute.xlu1 %598  ;;  %v686_v14 = vld [vmem:[#allocation2 + $0x40] sm:$0x1f] }
 0x4ee   :  { %632 = vst.msk [vmem:[#allocation2 + $0x60] sm:$0x1f] %vm568_vm4, %v626_v12  ;;  %605 = vst.msk [vmem:[#allocation2 + $0x50] sm:$0x1f] %vm568_vm4, %v599_v13  ;;  %v694_v15 = vpack.c.bf16 %v686_v14, %v686_v14 }
 0x4f0   :  { %v723_v16 = vsel %vm718_vm5, %v694_v15, 0 }
 0x4f1   :  { %5432 = vmatpush3.bf16.xpose.msra.mxu1 %v723_v16  ;;  %v628_v17 = vpop.permute.xlu0 %627  ;;  %v590_v18 = vpop.permute.xlu1 %589  ;;  %v687_v19 = vld [vmem:[#allocation2 + $0x48] sm:$0x1f]  ;;  %v689_v36 = vld [vmem:[#allocation2 + $0x58] sm:$0x1f] }
 0x4f2   :  { %633 = vst.msk [vmem:[#allocation2 + $0x68] sm:$0x1f] %vm568_vm4, %v628_v17  ;;  %596 = vst.msk [vmem:[#allocation2 + $0x10] sm:$0x1f] %vm568_vm4, %v590_v18  ;;  %5437 = vmatprep.subr.bf16.mxu1 %v5947_v5  ;;  %v695_v21 = vpack.c.bf16 %v687_v19, %v687_v19  ;;  %v697_v38 = vpack.c.bf16 %v689_v36, %v689_v36 }
 0x4f4   :  { %v769_v25 = vsel %vm718_vm5, %v695_v21, 0  ;;  %v861_v41 = vsel %vm718_vm5, %v697_v38, 0 }
 0x4f5   :  { %v653_v22 = vpop.permute.xlu0 %652  ;;  %v592_v23 = vpop.permute.xlu1 %591  ;;  %v688_v28 = vld [vmem:[#allocation2 + $0x50] sm:$0x1f]  ;;  %v690_v43 = vld [vmem:[#allocation2 + $0x60] sm:$0x1f] }
 0x4f6   :  { %659 = vst.msk [vmem:[#allocation2 + $0x70] sm:$0x1f] %vm568_vm4, %v653_v22  ;;  %597 = vst.msk [vmem:[#allocation2 + $0x18] sm:$0x1f] %vm568_vm4, %v592_v23  ;;  %v696_v31 = vpack.c.bf16 %v688_v28, %v688_v28  ;;  %v698_v47 = vpack.c.bf16 %v690_v43, %v690_v43 }
 0x4f8   :  { %5434 = vmatmul.mubr.msk.bf16.vlgmr.msra.gmra.mrb[4].mxu1 %vm718_vm5, %v678_v24  ;;  %v815_v34 = vsel %vm718_vm5, %v696_v31, 0  ;;  %v907_v50 = vsel %vm718_vm5, %v698_v47, 0 }
 0x4f9   :  { %v644_v26 = vpop.permute.xlu0 %643  ;;  %5438 = vmatpush3.bf16.xpose.msra.mxu1 %v769_v25  ;;  %v617_v27 = vpop.permute.xlu1 %616  ;;  %5439 = vmatprep.mubr.msk.bf16.mxu1 %vm5948_vm3, %v5947_v5  ;;  %v672_v37 = vld [vmem:[#allocation2 + $0x10] sm:$0x1f]  ;;  %v691_v51 = vld [vmem:[#allocation2 + $0x68] sm:$0x1f] }
 0x4fa   :  { %650 = vst.msk [vmem:[#allocation2 + $0x30] sm:$0x1f] %vm568_vm4, %v644_v26  ;;  %623 = vst.msk [vmem:[#allocation2 + $0x20] sm:$0x1f] %vm568_vm4, %v617_v27  ;;  %5443 = vmatprep.subr.bf16.mxu1 %v5947_v5  ;;  %v680_v40 = vpack.c.bf16 %v672_v37, %v672_v37  ;;  %v699_v55 = vpack.c.bf16 %v691_v51, %v691_v51 }
 0x4fc   :  { %v953_v58 = vsel %vm718_vm5, %v699_v55, 0 }
 0x4fd   :  { %v619_v32 = vpop.permute.xlu1 %618  ;;  %v673_v45 = vld [vmem:[#allocation2 + $0x18] sm:$0x1f]  ;;  %v692_v59 = vld [vmem:[#allocation2 + $0x70] sm:$0x1f] }
 0x4fe   :  { %624 = vst.msk [vmem:[#allocation2 + $0x28] sm:$0x1f] %vm568_vm4, %v619_v32  ;;  %v681_v48 = vpack.c.bf16 %v673_v45, %v673_v45  ;;  %v700_v61 = vpack.c.bf16 %v692_v59, %v692_v59 }
 0x500   :  { %5440 = vmatmul.mubr.msk.bf16.vlgmr.msra.gmra.mrb[8].mxu1 %vm718_vm5, %v679_v33  ;;  %v999_v63 = vsel %vm718_vm5, %v700_v61, 0 }
 0x501   :  { %v655_v35 = vpop.permute.xlu1 %654  ;;  %5444 = vmatpush3.bf16.xpose.msra.mxu1 %v815_v34  ;;  %5445 = vmatprep.mubr.msk.bf16.mxu1 %vm5948_vm3, %v5947_v5  ;;  %v674_v54 = vld [vmem:[#allocation2 + $0x20] sm:$0x1f]  ;;  %v676_v0 = vld [vmem:[#allocation2 + $0x30] sm:$0x1f] }
 0x502   :  { %660 = vst.msk [vmem:[#allocation2 + $0x78] sm:$0x1f] %vm568_vm4, %v655_v35  ;;  %5449 = vmatprep.subr.bf16.mxu1 %v5947_v5  ;;  %v682_v57 = vpack.c.bf16 %v674_v54, %v674_v54  ;;  %v684_v1 = vpack.c.bf16 %v676_v0, %v676_v0 }
 0x505   :  { %v646_v39 = vpop.permute.xlu1 %645  ;;  %v675_v60 = vld [vmem:[#allocation2 + $0x28] sm:$0x1f] }
 0x506   :  { %651 = vst.msk [vmem:[#allocation2 + $0x38] sm:$0x1f] %vm568_vm4, %v646_v39  ;;  %v683_v62 = vpack.c.bf16 %v675_v60, %v675_v60 }
 0x508   :  { %5446 = vmatmul.mubr.msk.bf16.vlgmr.msra.gmra.mrb[12].mxu1 %vm718_vm5, %v680_v40 }
 0x509   :  { %5450 = vmatpush3.bf16.xpose.msra.mxu1 %v861_v41  ;;  %v693_v42 = vld [vmem:[#allocation2 + $0x78] sm:$0x1f]  ;;  %5451 = vmatprep.mubr.msk.bf16.mxu1 %vm5948_vm3, %v5947_v5 }
 0x50a   :  { %v701_v44 = vpack.c.bf16 %v693_v42, %v693_v42  ;;  %5455 = vmatprep.subr.bf16.mxu1 %v5947_v5 }
 0x50c   :  { %v1045_v46 = vsel %vm718_vm5, %v701_v44, 0 }
 0x50d   :  { %5474 = vmatpush3.bf16.xpose.msra.mxu0 %v1045_v46  ;;  %v677_v49 = vld [vmem:[#allocation2 + $0x38] sm:$0x1f] }
 0x50e   :  { %5485 = vmatprep.subr.bf16.mxu0 %v5947_v5  ;;  %v685_v53 = vpack.c.bf16 %v677_v49, %v677_v49 }
 0x510   :  { %5452 = vmatmul.mubr.msk.bf16.vlgmr.msra.gmra.mrb[16].mxu1 %vm718_vm5, %v681_v48 }
 0x511   :  { %5456 = vmatpush3.bf16.xpose.msra.mxu1 %v907_v50  ;;  %5457 = vmatprep.mubr.msk.bf16.mxu1 %vm5948_vm3, %v5947_v5 }
 0x512   :  { %5461 = vmatprep.subr.bf16.mxu1 %v5947_v5 }
 0x514   :  { %5476 = vmatmul.mubr.msk.bf16.vlgmr.msra.gmra.mrb[4].mxu0 %vm718_vm5, %v685_v53 }
 0x515   :  { %5487 = vmatprep.mubr.msk.bf16.mxu0 %vm5948_vm3, %v5947_v5 }
 0x518   :  { %5458 = vmatmul.mubr.msk.bf16.vlgmr.msra.gmra.mrb[20].mxu1 %vm718_vm5, %v682_v57 }
 0x519   :  { %5462 = vmatpush3.bf16.xpose.msra.mxu1 %v953_v58  ;;  %5463 = vmatprep.mubr.msk.bf16.mxu1 %vm5948_vm3, %v5947_v5 }
 0x51a   :  { %5467 = vmatprep.subr.bf16.mxu1 %v5947_v5 }
 0x520   :  { %5464 = vmatmul.mubr.msk.bf16.vlgmr.msra.gmra.mrb[24].mxu1 %vm718_vm5, %v683_v62 }
 0x521   :  { %5468 = vmatpush3.bf16.xpose.msra.mxu1 %v999_v63  ;;  %5469 = vmatprep.mubr.msk.bf16.mxu1 %vm5948_vm3, %v5947_v5 }
 0x522   :  { %5479 = vmatprep.subr.bf16.mxu1 %v5947_v5 }
 0x528   :  { %5470 = vmatmul.mubr.msk.bf16.vlgmr.msra.gmra.mrb[28].mxu1 %vm718_vm5, %v684_v1 }
 0x529   :  { %5481 = vmatprep.mubr.msk.bf16.mxu1 %vm5948_vm3, %v5947_v5 }
 0x5cb   :  { %v759_v2 = vpop.f32.mrb[4].mxu1 }
 0x5cc   :  { %v6301_v4 = vmul.f32 0.35355338, %v759_v2  ;;  %v5435_v6 = vpop.f32.mrb[5].mxu1 }
 0x5cd   :  { %v762_v7 = vpop.f32.mrb[6].mxu1 }
 0x5ce   :  { %v5436_v9 = vpop.f32.mrb[7].mxu1  ;;  %v1096_v10 = vsel %vm1095_vm6, %v6301_v4, -inf }
 0x5cf   :  { %1097 = vmax.xlane.f32.xlu0 %v1096_v10 }
 0x5d3   :  { %v805_v11 = vpop.f32.mrb[8].mxu1 }
 0x5d4   :  { %v5441_v12 = vpop.f32.mrb[9].mxu1  ;;  %v1088_v32 = vmul.f32 0.35355338, %v805_v11 }
 0x5d5   :  { %v808_v13 = vpop.f32.mrb[10].mxu1 }
 0x5d6   :  { %v5442_v14 = vpop.f32.mrb[11].mxu1  ;;  %v1099_v40 = vsel %vm1095_vm6, %v1088_v32, -inf }
 0x5db   :  { %v851_v15 = vpop.f32.mrb[12].mxu1 }
 0x5dc   :  { %v6305_v16 = vmul.f32 0.35355338, %v851_v15  ;;  %v5447_v17 = vpop.f32.mrb[13].mxu1 }
 0x5dd   :  { %v854_v18 = vpop.f32.mrb[14].mxu1  ;;  %v5959_v17 = vmov 65535  }
 0x5de   :  { %v5448_v19 = vpop.f32.mrb[15].mxu1  ;;  %v1102_v20 = vsel %vm1095_vm6, %v6305_v16, -inf  ;;  %v1198_v18 = vsel %vm1196_vm7, 4294967295, %v5959_v17 }
 0x5df   :  { %1103 = vmax.xlane.f32.xlu0 %v1102_v20 }
 0x5e3   :  { %v897_v21 = vpop.f32.mrb[16].mxu1 }
 0x5e4   :  { %v6309_v22 = vmul.f32 0.35355338, %v897_v21  ;;  %v5453_v23 = vpop.f32.mrb[17].mxu1 }
 0x5e5   :  { %v900_v24 = vpop.f32.mrb[18].mxu1 }
 0x5e6   :  { %v5454_v25 = vpop.f32.mrb[19].mxu1  ;;  %v1105_v26 = vsel %vm1095_vm6, %v6309_v22, -inf }
 0x5e7   :  { %v1081_v27 = vpop.f32.mrb[4].mxu0  ;;  %1106 = vmax.xlane.f32.xlu0 %v1105_v26 }
 0x5e8   :  { %v1094_v28 = vmul.f32 0.35355338, %v1081_v27  ;;  %v5477_v29 = vpop.f32.mrb[5].mxu0 }
 0x5e9   :  { %v1084_v31 = vpop.f32.mrb[6].mxu0 }
 0x5ea   :  { %v5478_v33 = vpop.f32.mrb[7].mxu0  ;;  %v1117_v34 = vsel %vm1095_vm6, %v1094_v28, -inf }
 0x5eb   :  { %1118 = vmax.xlane.f32.xlu1 %v1117_v34  ;;  %v943_v35 = vpop.f32.mrb[20].mxu1 }
 0x5ec   :  { %v1091_v36 = vmul.f32 0.35355338, %v943_v35  ;;  %v5459_v37 = vpop.f32.mrb[21].mxu1 }
 0x5ed   :  { %v946_v38 = vpop.f32.mrb[22].mxu1 }
 0x5ee   :  { %v5460_v39 = vpop.f32.mrb[23].mxu1  ;;  %v1108_v41 = vsel %vm1095_vm6, %v1091_v36, -inf }
 0x5ef   :  { %1100 = vmax.xlane.f32.xlu1 %v1099_v40  ;;  %1109 = vmax.xlane.f32.xlu0 %v1108_v41 }
 0x5f3   :  { %v989_v42 = vpop.f32.mrb[24].mxu1 }
 0x5f4   :  { %v5465_v43 = vpop.f32.mrb[25].mxu1  ;;  %v6320_v50 = vmul.f32 0.35355338, %v989_v42 }
 0x5f5   :  { %v992_v44 = vpop.f32.mrb[26].mxu1 }
 0x5f6   :  { %v5466_v45 = vpop.f32.mrb[27].mxu1  ;;  %v1111_v53 = vsel %vm1095_vm6, %v6320_v50, -inf }
 0x5fb   :  { %v1035_v46 = vpop.f32.mrb[28].mxu1 }
 0x5fc   :  { %v5471_v47 = vpop.f32.mrb[29].mxu1  ;;  %v6322_v51 = vmul.f32 0.35355338, %v1035_v46 }
 0x5fd   :  { %v1038_v48 = vpop.f32.mrb[30].mxu1 }
 0x5fe   :  { %v5472_v49 = vpop.f32.mrb[31].mxu1  ;;  %v1114_v54 = vsel %vm1095_vm6, %v6322_v51, -inf }
 0x600   :  { %582 = vrot.lane.b32.xlu1 %v6217_v8, %s7133_s2 }
 0x605   :  { %580 = vrot.lane.b32.xlu0 %v6209_v3, %s7133_s2 }
 0x624   :  { %1112 = vmax.xlane.f32.xlu1 %v1111_v53  ;;  %1115 = vmax.xlane.f32.xlu0 %v1114_v54 }
 0x635   :  { %609 = vrot.lane.b32.xlu1 %v6217_v8, %s7131_s6 }
 0x63a   :  { %607 = vrot.lane.b32.xlu0 %v6209_v3, %s7131_s6 }
 0x65c   :  { %v1098_v55 = vpop.xlane.xlu0 %1097 }
 0x65d   :  { %v1120_v57 = vsub.f32 %v6301_v4, %v1098_v55 }
 0x65f   :  { %v1128_v58 = vmul.f32 1.442695, %v1120_v57 }
 0x661   :  { %5826 = vpow2.f32 %v1128_v58 }
 0x66b   :  { %v6333_v59 = vpop.eup %5826 }
 0x66c   :  { %v1144_v60 = vsel %vm1095_vm6, %v6333_v59, 0.0  ;;  %v1104_v61 = vpop.xlane.xlu0 %1103 }
 0x66d   :  { %1145 = vadd.xlane.f32.xlu0 %v1144_v60  ;;  %v1122_v62 = vsub.f32 %v6305_v16, %v1104_v61 }
 0x66f   :  { %v1132_v6 = vmul.f32 1.442695, %v1122_v62 }
 0x674   :  { %v1107_v63 = vpop.xlane.xlu0 %1106 }
 0x675   :  { %v1123_v7 = vsub.f32 %v6309_v22, %v1107_v63  ;;  %v6346_v22 = vsel %vm1197_vm8, %v1198_v18, 0 }
 0x677   :  { %v1134_v12 = vmul.f32 1.442695, %v1123_v7 }
 0x678   :  { %v1119_v0 = vpop.xlane.xlu1 %1118 }
 0x679   :  { %v1127_v1 = vsub.f32 %v1094_v28, %v1119_v0 }
 0x67b   :  { %v1142_v2 = vmul.f32 1.442695, %v1127_v1 }
 0x67c   :  { %v1101_v9 = vpop.xlane.xlu1 %1100  ;;  %v1110_v4 = vpop.xlane.xlu0 %1109 }
 0x67d   :  { %5828 = vpow2.f32 %v1142_v2  ;;  %v1121_v10 = vsub.f32 %v1088_v32, %v1101_v9  ;;  %v1124_v13 = vsub.f32 %v1091_v36, %v1110_v4 }
 0x67e   :  { %5830 = vpow2.f32 %v1132_v6 }
 0x67f   :  { %v1130_v11 = vmul.f32 1.442695, %v1121_v10  ;;  %v1136_v16 = vmul.f32 1.442695, %v1124_v13 }
 0x680   :  { %v583_v14 = vpop.permute.xlu1 %582  ;;  %v581_v15 = vpop.permute.xlu0 %580 }
 0x681   :  { %5832 = vpow2.f32 %v1130_v11  ;;  %588 = vst.msk [vmem:[#allocation2 + $0x88] sm:$0x1f] %vm568_vm4, %v583_v14  ;;  %587 = vst.msk [vmem:[#allocation2 + $0x80] sm:$0x1f] %vm568_vm4, %v581_v15 }
 0x682   :  { %5834 = vpow2.f32 %v1134_v12 }
 0x683   :  { %5836 = vpow2.f32 %v1136_v16 }
 0x687   :  { %v6342_v19 = vpop.eup %5828 }
 0x688   :  { %v1165_v20 = vsel %vm1095_vm6, %v6342_v19, 0.0  ;;  %v702_v21 = vld [vmem:[#allocation2 + $0x80] sm:$0x1f]  ;;  %v703_v23 = vld [vmem:[#allocation2 + $0x88] sm:$0x1f]  ;;  %v6348_v26 = vpop.eup %5830 }
 0x689   :  { %1166 = vadd.xlane.f32.xlu0 %v1165_v20  ;;  %v710_v24 = vpack.c.bf16 %v702_v21, %v702_v21  ;;  %v711_v25 = vpack.c.bf16 %v703_v23, %v703_v23  ;;  %v1150_v32 = vsel %vm1095_vm6, %v6348_v26, 0.0 }
 0x68b   :  { %v6350_v27 = vpop.eup %5832  ;;  %v1201_v28 = vand.u32 %v6346_v22, %v710_v24  ;;  %v1247_v29 = vand.u32 %v6346_v22, %v711_v25 }
 0x68c   :  { %v1147_v31 = vsel %vm1095_vm6, %v6350_v27, 0.0  ;;  %v6358_v33 = vpop.eup %5834 }
 0x68d   :  { %5480 = vmatpush3.bf16.msra.mxu1 %v1201_v28  ;;  %5486 = vmatpush3.bf16.msra.mxu0 %v1247_v29  ;;  %v1153_v34 = vsel %vm1095_vm6, %v6358_v33, 0.0  ;;  %v6364_v35 = vpop.eup %5836 }
 0x68e   :  { %1148 = vadd.xlane.f32.xlu1 %v1147_v31  ;;  %1151 = vadd.xlane.f32.xlu0 %v1150_v32  ;;  %v1156_v36 = vsel %vm1095_vm6, %v6364_v35, 0.0 }
 0x68f   :  { %5491 = vmatprep.subr.bf16.mxu1 %v5947_v5  ;;  %5497 = vmatprep.subr.bf16.mxu0 %v5947_v5 }
 0x692   :  { %1154 = vadd.xlane.f32.xlu1 %v1153_v34 }
 0x696   :  { %1157 = vadd.xlane.f32.xlu1 %v1156_v36 }
 0x6a7   :  { %636 = vrot.lane.b32.xlu1 %v6217_v8, %s7129_s27 }
 0x6ab   :  { %661 = vrot.lane.b32.xlu1 %v6209_v3, %s7127_s7 }
 0x6b1   :  { %v1113_v37 = vpop.xlane.xlu1 %1112  ;;  %v1116_v38 = vpop.xlane.xlu0 %1115 }
 0x6b2   :  { %v1125_v39 = vsub.f32 %v6320_v50, %v1113_v37  ;;  %v1126_v43 = vsub.f32 %v6322_v51, %v1116_v38 }
 0x6b4   :  { %v1138_v40 = vmul.f32 1.442695, %v1125_v39  ;;  %v1140_v44 = vmul.f32 1.442695, %v1126_v43 }
 0x6b5   :  { %v610_v41 = vpop.permute.xlu1 %609  ;;  %v608_v42 = vpop.permute.xlu0 %607 }
 0x6b6   :  { %5838 = vpow2.f32 %v1138_v40  ;;  %615 = vst.msk [vmem:[#allocation2 + $0x98] sm:$0x1f] %vm568_vm4, %v610_v41  ;;  %614 = vst.msk [vmem:[#allocation2 + $0x90] sm:$0x1f] %vm568_vm4, %v608_v42 }
 0x6b7   :  { %5840 = vpow2.f32 %v1140_v44 }
 0x6bd   :  { %v704_v50 = vld [vmem:[#allocation2 + $0x90] sm:$0x1f]  ;;  %v705_v61 = vld [vmem:[#allocation2 + $0x98] sm:$0x1f] }
 0x6be   :  { %v712_v53 = vpack.c.bf16 %v704_v50, %v704_v50  ;;  %v713_v63 = vpack.c.bf16 %v705_v61, %v705_v61 }
 0x6c0   :  { %v6376_v45 = vpop.eup %5838  ;;  %v1293_v57 = vand.u32 %v6346_v22, %v712_v53  ;;  %v1339_v4 = vand.u32 %v6346_v22, %v713_v63 }
 0x6c1   :  { %v1159_v46 = vsel %vm1095_vm6, %v6376_v45, 0.0  ;;  %v6380_v47 = vpop.eup %5840 }
 0x6c2   :  { %1160 = vadd.xlane.f32.xlu0 %v1159_v46  ;;  %v1162_v48 = vsel %vm1095_vm6, %v6380_v47, 0.0  ;;  %v282_v46 = vld [vmem:[%s7106_s9 + $0x4] sm:$0xf] }
 0x6cf   :  { %1163 = vadd.xlane.f32.xlu1 %v1162_v48 }
 0x6d8   :  { %634 = vrot.lane.b32.xlu0 %v6209_v3, %s7129_s27 }
 0x6e0   :  { %663 = vrot.lane.b32.xlu1 %v6217_v8, %s7127_s7 }
 0x6fa   :  { %v1146_v49 = vpop.xlane.xlu0 %1145 }
 0x6fb   :  { %5842 = vrcp.f32 %v1146_v49 }
 0x705   :  { %v5843_v51 = vpop.eup %5842 }
 0x706   :  { %v1176_v54 = vmul.f32 %v5843_v51, %v6333_v59 }
 0x708   :  { %v1184_v55 = vpack.c.bf16 %v1176_v54, %v1176_v54 }
 0x70a   :  { %5482 = vmatmul.mubr.msk.bf16.vlgmr.msra.gmra.mrb[32].mxu1 %vm1192_vm9, %v1184_v55 }
 0x70b   :  { %5492 = vmatpush3.bf16.msra.mxu1 %v1293_v57  ;;  %5493 = vmatprep.mubr.msk.bf16.mxu1 %vm5948_vm3, %v5947_v5 }
 0x70c   :  { %5503 = vmatprep.subr.bf16.mxu1 %v5947_v5 }
 0x716   :  { %v1167_v3 = vpop.xlane.xlu0 %1166 }
 0x71b   :  { %v1149_v8 = vpop.xlane.xlu1 %1148  ;;  %v1152_v58 = vpop.xlane.xlu0 %1151 }
 0x71c   :  { %5844 = vrcp.f32 %v1149_v8 }
 0x71d   :  { %5846 = vrcp.f32 %v1152_v58 }
 0x71f   :  { %v1155_v60 = vpop.xlane.xlu1 %1154 }
 0x720   :  { %5848 = vrcp.f32 %v1155_v60 }
 0x723   :  { %v1158_v59 = vpop.xlane.xlu1 %1157 }
 0x724   :  { %5850 = vrcp.f32 %v1158_v59 }
 0x726   :  { %v5845_v62 = vpop.eup %5844 }
 0x727   :  { %v5847_v0 = vpop.eup %5846  ;;  %v1177_v1 = vmul.f32 %v5845_v62, %v6350_v27  ;;  %v637_v2 = vpop.permute.xlu1 %636 }
 0x728   :  { %v1178_v6 = vmul.f32 %v5847_v0, %v6348_v26  ;;  %642 = vst.msk [vmem:[#allocation2 + $0xa8] sm:$0x1f] %vm568_vm4, %v637_v2 }
 0x729   :  { %v1185_v7 = vpack.c.bf16 %v1177_v1, %v1177_v1 }
 0x72a   :  { %v5849_v9 = vpop.eup %5848  ;;  %v1186_v10 = vpack.c.bf16 %v1178_v6, %v1178_v6 }
 0x72b   :  { %5488 = vmatmul.mubr.msk.bf16.vlgmr.msra.gmra.mrb[8].mxu0 %vm1192_vm9, %v1185_v7  ;;  %v662_v11 = vpop.permute.xlu1 %661  ;;  %v1179_v12 = vmul.f32 %v5849_v9, %v6358_v33 }
 0x72c   :  { %5498 = vmatpush3.bf16.msra.mxu0 %v1339_v4  ;;  %668 = vst.msk [vmem:[#allocation2 + $0xb0] sm:$0x1f] %vm568_vm4, %v662_v11  ;;  %5494 = vmatmul.mubr.msk.bf16.vlgmr.msra.gmra.mrb[36].mxu1 %vm1192_vm9, %v1186_v10 }
 0x72d   :  { %5499 = vmatprep.mubr.msk.bf16.mxu0 %vm5948_vm3, %v5947_v5  ;;  %5509 = vmatprep.subr.bf16.mxu0 %v5947_v5  ;;  %v1187_v15 = vpack.c.bf16 %v1179_v12, %v1179_v12 }
 0x72e   :  { %5505 = vmatprep.mubr.msk.bf16.mxu1 %vm5948_vm3, %v5947_v5  ;;  %v5851_v20 = vpop.eup %5850 }
 0x72f   :  { %v707_v13 = vld [vmem:[#allocation2 + $0xa8] sm:$0x1f]  ;;  %v1180_v28 = vmul.f32 %v5851_v20, %v6364_v35 }
 0x730   :  { %v715_v14 = vpack.c.bf16 %v707_v13, %v707_v13 }
 0x731   :  { %v1188_v34 = vpack.c.bf16 %v1180_v28, %v1180_v28 }
 0x732   :  { %v1431_v16 = vand.u32 %v6346_v22, %v715_v14 }
 0x733   :  { %5500 = vmatmul.mubr.msk.bf16.vlgmr.msra.gmra.mrb[12].mxu0 %vm1192_vm9, %v1187_v15  ;;  %v708_v25 = vld [vmem:[#allocation2 + $0xb0] sm:$0x1f] }
 0x734   :  { %5510 = vmatpush3.bf16.msra.mxu0 %v1431_v16  ;;  %5511 = vmatprep.mubr.msk.bf16.mxu0 %vm5948_vm3, %v5947_v5  ;;  %v716_v32 = vpack.c.bf16 %v708_v25, %v708_v25 }
 0x735   :  { %5521 = vmatprep.subr.bf16.mxu0 %v5947_v5 }
 0x736   :  { %v1477_v36 = vand.u32 %v6346_v22, %v716_v32 }
 0x74f   :  { %v1161_v17 = vpop.xlane.xlu0 %1160 }
 0x750   :  { %5852 = vrcp.f32 %v1161_v17 }
 0x751   :  { %5854 = vrcp.f32 %v1167_v3 }
 0x753   :  { %v635_v18 = vpop.permute.xlu0 %634 }
 0x754   :  { %641 = vst.msk [vmem:[#allocation2 + $0xa0] sm:$0x1f] %vm568_vm4, %v635_v18 }
 0x75a   :  { %v5853_v21 = vpop.eup %5852 }
 0x75b   :  { %v1181_v23 = vmul.f32 %v5853_v21, %v6376_v45  ;;  %v706_v24 = vld [vmem:[#allocation2 + $0xa0] sm:$0x1f]  ;;  %v5855_v35 = vpop.eup %5854 }
 0x75c   :  { %v1164_v26 = vpop.xlane.xlu1 %1163  ;;  %v714_v27 = vpack.c.bf16 %v706_v24, %v706_v24  ;;  %v1183_v41 = vmul.f32 %v5855_v35, %v6342_v19  ;;  %v281_v19 = vld [vmem:[%s7106_s9] sm:$0xf] }
 0x75d   :  { %5856 = vrcp.f32 %v1164_v26  ;;  %v1189_v29 = vpack.c.bf16 %v1181_v23, %v1181_v23  ;;  %v1957_v45 = vsel %vm1955_vm10, %v281_v19, 0 }
 0x75e   :  { %v1385_v31 = vand.u32 %v6346_v22, %v714_v27  ;;  %v1191_v44 = vpack.c.bf16 %v1183_v41, %v1183_v41 }
 0x75f   :  { %5512 = vmatmul.mubr.msk.bf16.vlgmr.msra.gmra.mrb[16].mxu0 %vm1192_vm9, %v1189_v29 }
 0x760   :  { %v664_v33 = vpop.permute.xlu1 %663  ;;  %5504 = vmatpush3.bf16.msra.mxu1 %v1385_v31  ;;  %5523 = vmatprep.mubr.msk.bf16.mxu0 %vm5948_vm3, %v5947_v5 }
 0x761   :  { %669 = vst.msk [vmem:[#allocation2 + $0xb8] sm:$0x1f] %vm568_vm4, %v664_v33  ;;  %5515 = vmatprep.subr.bf16.mxu1 %v5947_v5 }
 0x763   :  { %5506 = vmatmul.mubr.msk.bf16.vlgmr.msra.gmra.mrb[40].mxu1 %vm1192_vm9, %v1188_v34 }
 0x764   :  { %5516 = vmatpush3.bf16.msra.mxu1 %v1477_v36  ;;  %5517 = vmatprep.mubr.msk.bf16.mxu1 %vm5948_vm3, %v5947_v5 }
 0x765   :  { %5527 = vmatprep.subr.bf16.mxu1 %v5947_v5 }
 0x767   :  { %v5857_v37 = vpop.eup %5856 }
 0x768   :  { %v1182_v38 = vmul.f32 %v5857_v37, %v6380_v47  ;;  %v709_v39 = vld [vmem:[#allocation2 + $0xb8] sm:$0x1f]  ;;  %v2079_v47 = vsel %vm1955_vm10, %v282_v46, 0 }
 0x769   :  { %v717_v40 = vpack.c.bf16 %v709_v39, %v709_v39 }
 0x76a   :  { %v1190_v42 = vpack.c.bf16 %v1182_v38, %v1182_v38 }
 0x76b   :  { %v1523_v43 = vand.u32 %v6346_v22, %v717_v40 }
 0x76c   :  { %5518 = vmatmul.mubr.msk.bf16.vlgmr.msra.gmra.mrb[44].mxu1 %vm1192_vm9, %v1190_v42 }
 0x76d   :  { %5522 = vmatpush3.bf16.msra.mxu0 %v1523_v43  ;;  %5529 = vmatprep.mubr.msk.bf16.mxu1 %vm5948_vm3, %v5947_v5 }
 0x76e   :  { %5533 = vmatprep.subr.bf16.mxu0 %v5947_v5  ;;  %5528 = vmatpush3.bf16.msra.mxu1 %v1957_v45 }
 0x76f   :  { %5539 = vmatprep.subr.bf16.mxu1 %v5947_v5 }
 0x770   :  { %5524 = vmatmul.mubr.msk.bf16.vlgmr.msra.gmra.mrb[20].mxu0 %vm1192_vm9, %v1191_v44 }
 0x771   :  { %5535 = vmatprep.mubr.msk.bf16.mxu0 %vm5948_vm3, %v5947_v5  ;;  %5534 = vmatpush3.bf16.msra.mxu0 %v2079_v47 }
 0x772   :  { %5545 = vmatprep.subr.bf16.mxu0 %v5947_v5 }
 0x7dd   :  { %v1237_v48 = vpop.f32.mrb[32].mxu1 }
 0x7de   :  { %v5483_v49 = vpop.f32.mrb[33].mxu1  ;;  %v1580_v53 = vrot.slane %v1237_v48, %v6190_v30  ;;  %v1573_v55 = vcombine.high %v1237_v48, %v1237_v48 }
 0x7df   :  { %v1240_v50 = vpop.f32.mrb[34].mxu1 }
 0x7e0   :  { %v5484_v51 = vpop.f32.mrb[35].mxu1  ;;  %v1588_v54 = vcombine.high %v1580_v53, %v1580_v53  ;;  %v1595_v3 = vrot.slane %v1580_v53, %v6190_v30  ;;  %v1587_v8 = vrot.slane %v1573_v55, %v6190_v30  ;;  %v283_v55 = vld [vmem:[%s7106_s9 + $0x8] sm:$0xf] }
 0x7e2   :  { %v1609_v57 = vrot.slane %v1588_v54, %v6190_v30  ;;  %v1602_v7 = vrot.slane %v1587_v8, %v6190_v30 }
 0x7e4   :  { %v1885_v58 = vcombine.low %v1595_v3, %v1609_v57  ;;  %v5185_v60 = vcombine.high %v1595_v3, %v1609_v57 }
 0x7e6   :  { %v1895_v13 = vrot.slane %v1885_v58, %v6190_v30  ;;  %v1902_v14 = vrot.slane %v5185_v60, %v6190_v30 }
 0x7e8   :  { %v1917_v27 = vcombine.low %v1895_v13, %v1902_v14 }
 0x7ea   :  { %v1925_v47 = vrot.slane %v1917_v27, %v6190_v30 }
 0x7fe   :  { %v1283_v59 = vpop.f32.mrb[8].mxu0 }
 0x7ff   :  { %v1612_v61 = vcombine.high %v1283_v59, %v1283_v59  ;;  %v1619_v62 = vrot.slane %v1283_v59, %v6190_v30  ;;  %v1329_v63 = vpop.f32.mrb[36].mxu1  ;;  %v5489_v0 = vpop.f32.mrb[9].mxu0 }
 0x800   :  { %v1658_v1 = vrot.slane %v1329_v63, %v6190_v30  ;;  %v5495_v2 = vpop.f32.mrb[37].mxu1  ;;  %v1286_v6 = vpop.f32.mrb[10].mxu0  ;;  %v1651_v15 = vcombine.high %v1329_v63, %v1329_v63 }
 0x801   :  { %v1626_v9 = vrot.slane %v1612_v61, %v6190_v30  ;;  %v1627_v4 = vcombine.high %v1619_v62, %v1619_v62  ;;  %v1634_v10 = vrot.slane %v1619_v62, %v6190_v30  ;;  %v1332_v11 = vpop.f32.mrb[38].mxu1  ;;  %v5490_v12 = vpop.f32.mrb[11].mxu0  ;;  %v2195_v62 = vsel %vm1955_vm10, %v283_v55, 0 }
 0x802   :  { %v1666_v16 = vcombine.high %v1658_v1, %v1658_v1  ;;  %v5496_v17 = vpop.f32.mrb[39].mxu1  ;;  %v1665_v29 = vrot.slane %v1651_v15, %v6190_v30  ;;  %v1673_v31 = vrot.slane %v1658_v1, %v6190_v30 }
 0x803   :  { %v1648_v18 = vrot.slane %v1627_v4, %v6190_v30  ;;  %v1649_v20 = vcombine.high %v1634_v10, %v1634_v10  ;;  %v1887_v21 = vcombine.low %v1602_v7, %v1634_v10  ;;  %v1641_v24 = vrot.slane %v1626_v9, %v6190_v30  ;;  %v284_v4 = vld [vmem:[%s7106_s9 + $0xc] sm:$0xf] }
 0x804   :  { %v1687_v23 = vrot.slane %v1666_v16, %v6190_v30  ;;  %v1680_v45 = vrot.slane %v1665_v29, %v6190_v30  ;;  %v2311_v13 = vsel %vm1955_vm10, %v284_v4, 0 }
 0x805   :  { %v1650_v25 = vcombine.high %v1648_v18, %v1648_v18  ;;  %v1888_v26 = vcombine.low %v1648_v18, %v1649_v20  ;;  %v1909_v28 = vrot.slane %v1887_v21, %v6190_v30 }
 0x806   :  { %v1375_v32 = vpop.f32.mrb[12].mxu0  ;;  %v2008_v38 = vcombine.low %v1673_v31, %v1687_v23  ;;  %v5188_v39 = vcombine.high %v1673_v31, %v1687_v23 }
 0x807   :  { %v1916_v33 = vrot.slane %v1888_v26, %v6190_v30  ;;  %v1934_v34 = vcombine.low %v1650_v25, %v1641_v24  ;;  %v1690_v36 = vcombine.high %v1375_v32, %v1375_v32  ;;  %v1697_v35 = vrot.slane %v1375_v32, %v6190_v30  ;;  %v5501_v37 = vpop.f32.mrb[13].mxu0 }
 0x808   :  { %v1378_v40 = vpop.f32.mrb[14].mxu0  ;;  %v2018_v50 = vrot.slane %v2008_v38, %v6190_v30  ;;  %v2025_v51 = vrot.slane %v5188_v39, %v6190_v30 }
 0x809   :  { %v1918_v41 = vcombine.low %v1909_v28, %v1916_v33  ;;  %v1941_v42 = vrot.slane %v1934_v34, %v6190_v30  ;;  %v1704_v43 = vrot.slane %v1690_v36, %v6190_v30  ;;  %v1705_v44 = vcombine.high %v1697_v35, %v1697_v35  ;;  %v5502_v19 = vpop.f32.mrb[15].mxu0 }
 0x80a   :  { %v1712_v46 = vrot.slane %v1697_v35, %v6190_v30  ;;  %v2040_v63 = vcombine.low %v2018_v50, %v2025_v51 }
 0x80b   :  { %v1932_v48 = vrot.slane %v1918_v41, %v6190_v30  ;;  %v1726_v49 = vrot.slane %v1705_v44, %v6190_v30  ;;  %v1948_v3 = vrot.slane %v1941_v42, %v6190_v30  ;;  %v1719_v8 = vrot.slane %v1704_v43, %v6190_v30 }
 0x80c   :  { %v1727_v53 = vcombine.high %v1712_v46, %v1712_v46  ;;  %v2010_v54 = vcombine.low %v1680_v45, %v1712_v46  ;;  %v2048_v7 = vrot.slane %v2040_v63, %v6190_v30 }
 0x80d   :  { %v1933_v57 = vcombine.low %v1925_v47, %v1932_v48  ;;  %v1728_v58 = vcombine.high %v1726_v49, %v1726_v49 }
 0x80e   :  { %v2011_v60 = vcombine.low %v1726_v49, %v1727_v53  ;;  %v2032_v0 = vrot.slane %v2010_v54, %v6190_v30 }
 0x80f   :  { %v2057_v59 = vcombine.low %v1728_v58, %v1719_v8  ;;  %v1951_v61 = vpack.c.bf16 %v1948_v3, %v1933_v57 }
 0x810   :  { %v2039_v1 = vrot.slane %v2011_v60, %v6190_v30 }
 0x811   :  { %5530 = vmatmul.mubr.msk.bf16.vlgmr.msra.gmra.mrb[48].mxu1 %vm718_vm5, %v1951_v61  ;;  %v2064_v6 = vrot.slane %v2057_v59, %v6190_v30 }
 0x812   :  { %v2041_v2 = vcombine.low %v2032_v0, %v2039_v1  ;;  %5540 = vmatpush3.bf16.msra.mxu1 %v2195_v62  ;;  %5541 = vmatprep.mubr.msk.bf16.mxu1 %vm5948_vm3, %v5947_v5 }
 0x813   :  { %5551 = vmatprep.subr.bf16.mxu1 %v5947_v5  ;;  %v2071_v11 = vrot.slane %v2064_v6, %v6190_v30 }
 0x814   :  { %v2055_v9 = vrot.slane %v2041_v2, %v6190_v30 }
 0x816   :  { %v2056_v10 = vcombine.low %v2048_v7, %v2055_v9 }
 0x818   :  { %v2074_v12 = vpack.c.bf16 %v2071_v11, %v2056_v10 }
 0x81a   :  { %5536 = vmatmul.mubr.msk.bf16.vlgmr.msra.gmra.mrb[24].mxu0 %vm718_vm5, %v2074_v12 }
 0x81b   :  { %5546 = vmatpush3.bf16.msra.mxu0 %v2311_v13  ;;  %5547 = vmatprep.mubr.msk.bf16.mxu0 %vm5948_vm3, %v5947_v5 }
 0x81c   :  { %5559 = vmatprep.subr.bf16.mxu0 %v5947_v5 }
 0x832   :  { %v1467_v14 = vpop.f32.mrb[16].mxu0 }
 0x833   :  { %v1775_v15 = vrot.slane %v1467_v14, %v6190_v30  ;;  %v5513_v16 = vpop.f32.mrb[17].mxu0  ;;  %v1768_v17 = vcombine.high %v1467_v14, %v1467_v14 }
 0x834   :  { %v1470_v18 = vpop.f32.mrb[18].mxu0 }
 0x835   :  { %v1783_v20 = vcombine.high %v1775_v15, %v1775_v15  ;;  %v1790_v21 = vrot.slane %v1775_v15, %v6190_v30  ;;  %v5514_v23 = vpop.f32.mrb[19].mxu0  ;;  %v1782_v29 = vrot.slane %v1768_v17, %v6190_v30 }
 0x836   :  { %v1421_v24 = vpop.f32.mrb[40].mxu1 }
 0x837   :  { %v1804_v25 = vrot.slane %v1783_v20, %v6190_v30  ;;  %v1805_v26 = vcombine.high %v1790_v21, %v1790_v21  ;;  %v1729_v27 = vcombine.high %v1421_v24, %v1421_v24  ;;  %v5507_v28 = vpop.f32.mrb[41].mxu1  ;;  %v1736_v31 = vrot.slane %v1421_v24, %v6190_v30 }
 0x838   :  { %v1424_v32 = vpop.f32.mrb[42].mxu1  ;;  %v1797_v39 = vrot.slane %v1782_v29, %v6190_v30 }
 0x839   :  { %v1743_v33 = vrot.slane %v1729_v27, %v6190_v30  ;;  %v5508_v34 = vpop.f32.mrb[43].mxu1  ;;  %v1806_v36 = vcombine.high %v1804_v25, %v1804_v25  ;;  %v1744_v35 = vcombine.high %v1736_v31, %v1736_v31  ;;  %v2127_v37 = vcombine.low %v1804_v25, %v1805_v26 }
 0x83a   :  { %v1751_v40 = vrot.slane %v1736_v31, %v6190_v30 }
 0x83b   :  { %v1758_v38 = vrot.slane %v1743_v33, %v6190_v30  ;;  %v1765_v41 = vrot.slane %v1744_v35, %v6190_v30  ;;  %v2173_v43 = vcombine.low %v1806_v36, %v1797_v39  ;;  %v2155_v45 = vrot.slane %v2127_v37, %v6190_v30 }
 0x83d   :  { %v2126_v42 = vcombine.low %v1758_v38, %v1790_v21  ;;  %v2124_v44 = vcombine.low %v1751_v40, %v1765_v41  ;;  %v5190_v19 = vcombine.high %v1751_v40, %v1765_v41  ;;  %v2180_v57 = vrot.slane %v2173_v43, %v6190_v30 }
 0x83f   :  { %v2148_v46 = vrot.slane %v2126_v42, %v6190_v30  ;;  %v1513_v47 = vpop.f32.mrb[44].mxu1  ;;  %v2134_v48 = vrot.slane %v2124_v44, %v6190_v30  ;;  %v2141_v49 = vrot.slane %v5190_v19, %v6190_v30  ;;  %v2187_v9 = vrot.slane %v2180_v57, %v6190_v30  ;;  %v5187_v44 = vld [vmem:[%s7107_s10] ss:$0 sm:$0xff] }
 0x840   :  { %v1807_v50 = vcombine.high %v1513_v47, %v1513_v47  ;;  %v1814_v51 = vrot.slane %v1513_v47, %v6190_v30  ;;  %v5519_v53 = vpop.f32.mrb[45].mxu1 }
 0x841   :  { %v2157_v54 = vcombine.low %v2148_v46, %v2155_v45  ;;  %v1516_v55 = vpop.f32.mrb[46].mxu1  ;;  %v2156_v3 = vcombine.low %v2134_v48, %v2141_v49 }
 0x842   :  { %v1822_v8 = vcombine.high %v1814_v51, %v1814_v51  ;;  %v5520_v58 = vpop.f32.mrb[47].mxu1  ;;  %v1821_v59 = vrot.slane %v1807_v50, %v6190_v30  ;;  %v1829_v63 = vrot.slane %v1814_v51, %v6190_v30 }
 0x843   :  { %v2171_v60 = vrot.slane %v2157_v54, %v6190_v30  ;;  %v1559_v61 = vpop.f32.mrb[20].mxu0  ;;  %v2164_v62 = vrot.slane %v2156_v3, %v6190_v30 }
 0x844   :  { %v1843_v0 = vrot.slane %v1822_v8, %v6190_v30  ;;  %v1846_v1 = vcombine.high %v1559_v61, %v1559_v61  ;;  %v5525_v2 = vpop.f32.mrb[21].mxu0  ;;  %v1853_v6 = vrot.slane %v1559_v61, %v6190_v30  ;;  %v1836_v13 = vrot.slane %v1821_v59, %v6190_v30 }
 0x845   :  { %v1562_v7 = vpop.f32.mrb[22].mxu0  ;;  %v2172_v4 = vcombine.low %v2164_v62, %v2171_v60 }
 0x846   :  { %v2240_v10 = vcombine.low %v1829_v63, %v1843_v0  ;;  %v5192_v11 = vcombine.high %v1829_v63, %v1843_v0  ;;  %v5526_v12 = vpop.f32.mrb[23].mxu0  ;;  %v1860_v14 = vrot.slane %v1846_v1, %v6190_v30  ;;  %v1861_v15 = vcombine.high %v1853_v6, %v1853_v6 }
 0x847   :  { %v1868_v16 = vrot.slane %v1853_v6, %v6190_v30  ;;  %v2190_v18 = vpack.c.bf16 %v2187_v9, %v2172_v4 }
 0x848   :  { %v2250_v17 = vrot.slane %v2240_v10, %v6190_v30  ;;  %v2257_v20 = vrot.slane %v5192_v11, %v6190_v30  ;;  %v1882_v21 = vrot.slane %v1861_v15, %v6190_v30  ;;  %v1875_v25 = vrot.slane %v1860_v14, %v6190_v30  ;;  %v5794_v15 = vld [vmem:[%s7110_s13] sm:$0xff]  }
 0x849   :  { %v1883_v23 = vcombine.high %v1868_v16, %v1868_v16  ;;  %v2242_v24 = vcombine.low %v1836_v13, %v1868_v16  ;;  %5542 = vmatmul.mubr.msk.bf16.vlgmr.msra.gmra.mrb[52].mxu1 %vm718_vm5, %v2190_v18  ;;  %v5795_v16 = vld [vmem:[%s7110_s13 + $0x8] sm:$0xff]  }
 0x84a   :  { %v1884_v26 = vcombine.high %v1882_v21, %v1882_v21  ;;  %5555 = vmatprep.mubr.msk.bf16.mxu1 %vm5948_vm3, %v5947_v5  ;;  %v2272_v28 = vcombine.low %v2250_v17, %v2257_v20  ;;  %5552 = vmatpush3.bf16.msra.mxu1 %v5794_v15 }
 0x84b   :  { %v2243_v27 = vcombine.low %v1882_v21, %v1883_v23  ;;  %v2264_v29 = vrot.slane %v2242_v24, %v6190_v30  ;;  %5553 = vmatprep.subr.bf16.mxu1 %v5947_v5 }
 0x84c   :  { %v2289_v32 = vcombine.low %v1884_v26, %v1875_v25  ;;  %v2280_v36 = vrot.slane %v2272_v28, %v6190_v30 }
 0x84d   :  { %v2271_v31 = vrot.slane %v2243_v27, %v6190_v30  ;;  %v5194_v27 = vld [vmem:[%s7108_s11] ss:$0 sm:$0xff] }
 0x84e   :  { %v2296_v34 = vrot.slane %v2289_v32, %v6190_v30  ;;  %5554 = vmatpush3.bf16.msra.mxu1 %v5795_v16  ;;  %v5195_v32 = vld [vmem:[%s7109_s12] ss:$0 sm:$0xff] }
 0x84f   :  { %v2273_v33 = vcombine.low %v2264_v29, %v2271_v31  ;;  %5579 = vmatprep.subr.bf16.mxu1 %v5947_v5 }
 0x850   :  { %v2303_v38 = vrot.slane %v2296_v34, %v6190_v30 }
 0x851   :  { %v2287_v35 = vrot.slane %v2273_v33, %v6190_v30 }
 0x853   :  { %v2288_v37 = vcombine.low %v2280_v36, %v2287_v35 }
 0x855   :  { %v2306_v39 = vpack.c.bf16 %v2303_v38, %v2288_v37  ;;  %v5796_v37 = vld [vmem:[%s7112_s15] sm:$0xff]   ;;  %v5797_v38 = vld [vmem:[%s7112_s15 + $0x8] sm:$0xff]  }
 0x857   :  { %5548 = vmatmul.mubr.msk.bf16.vlgmr.msra.gmra.mrb[28].mxu0 %vm718_vm5, %v2306_v39  ;;  %v5798_v39 = vld [vmem:[%s7112_s15 + $0x10] sm:$0xff]  }
 0x858   :  { %5575 = vmatprep.mubr.msk.bf16.mxu0 %vm5948_vm3, %v5947_v5  ;;  %5560 = vmatpush3.bf16.msra.mxu0 %v5796_v37 }
 0x859   :  { %5561 = vmatprep.subr.bf16.mxu0 %v5947_v5 }
 0x85c   :  { %5562 = vmatpush3.bf16.msra.mxu0 %v5797_v38 }
 0x85d   :  { %5563 = vmatprep.subr.bf16.mxu0 %v5947_v5 }
 0x860   :  { %5564 = vmatpush3.bf16.msra.mxu0 %v5798_v39  ;;  %v5248_v39 = vld [vmem:[%s7152_s5 + $0x1] ss:$0 sm:$0xff]  ;;  %s7155_s5 = smov 56  }
 0x861   :  { %5565 = vmatprep.subr.bf16.mxu0 %v5947_v5 }
 0x8e4   :  { %v1993_v40 = vpop.f32.mrb[48].mxu1 }
 0x8e5   :  { %v5531_v41 = vpop.f32.mrb[49].mxu1  ;;  %v2006_v19 = vadd.f32 %v5187_v44, %v1993_v40  ;;  %v5799_v40 = vld [vmem:[%s7112_s15 + $0x18] sm:$0xff]  }
 0x8e6   :  { %v1996_v42 = vpop.f32.mrb[50].mxu1  ;;  %5566 = vmatpush3.bf16.msra.mxu0 %v5799_v40  ;;  %v5800_v41 = vld [vmem:[%s7112_s15 + $0x20] sm:$0xff]  }
 0x8e7   :  { %v5532_v43 = vpop.f32.mrb[51].mxu1  ;;  %v2007_v46 = vadd.f32 %v5187_v44, %v1996_v42  ;;  %5567 = vmatprep.subr.bf16.mxu0 %v5947_v5  ;;  %v5801_v42 = vld [vmem:[%s7112_s15 + $0x28] sm:$0xff]   ;;  %v5803_v44 = vld [vmem:[%s7112_s15 + $0x38] sm:$0xff]  }
 0x8e8   :  { %v5802_v43 = vld [vmem:[%s7112_s15 + $0x30] sm:$0xff]  }
 0x8ea   :  { %5568 = vmatpush3.bf16.msra.mxu0 %v5800_v41 }
 0x8eb   :  { %5569 = vmatprep.subr.bf16.mxu0 %v5947_v5 }
 0x8ed   :  { %v2115_v45 = vpop.f32.mrb[24].mxu0 }
 0x8ee   :  { %v2122_v47 = vadd.f32 %v2115_v45, %v2006_v19  ;;  %v5537_v48 = vpop.f32.mrb[25].mxu0  ;;  %5570 = vmatpush3.bf16.msra.mxu0 %v5801_v42  ;;  %v5196_v19 = vld [vmem:[%s7111_s14] ss:$0 sm:$0xff] }
 0x8ef   :  { %v2118_v49 = vpop.f32.mrb[26].mxu0  ;;  %5571 = vmatprep.subr.bf16.mxu0 %v5947_v5 }
 0x8f0   :  { %v2123_v50 = vadd.f32 %v2118_v49, %v2007_v46  ;;  %v5538_v51 = vpop.f32.mrb[27].mxu0 }
 0x8f2   :  { %5572 = vmatpush3.bf16.msra.mxu0 %v5802_v43 }
 0x8f3   :  { %5573 = vmatprep.subr.bf16.mxu0 %v5947_v5 }
 0x8f6   :  { %5574 = vmatpush3.bf16.msra.mxu0 %v5803_v44  ;;  %v5249_v44 = vld [vmem:[%s7105_s8 + $0x1] ss:$0 sm:$0xff]  ;;  %s7153_s8 = smov 104  }
 0x8f7   :  { %5605 = vmatprep.subr.bf16.mxu0 %v5947_v5 }
 0x91c   :  { %v2231_v53 = vpop.f32.mrb[52].mxu1 }
 0x91d   :  { %v2238_v54 = vadd.f32 %v2231_v53, %v2122_v47  ;;  %v5543_v55 = vpop.f32.mrb[53].mxu1 }
 0x91e   :  { %v2234_v57 = vpop.f32.mrb[54].mxu1 }
 0x91f   :  { %v2239_v3 = vadd.f32 %v2234_v57, %v2123_v50  ;;  %v5544_v8 = vpop.f32.mrb[55].mxu1 }
 0x92a   :  { %v2347_v58 = vpop.f32.mrb[28].mxu0 }
 0x92b   :  { %v2354_v60 = vadd.f32 %v2347_v58, %v2238_v54  ;;  %v5549_v59 = vpop.f32.mrb[29].mxu0 }
 0x92c   :  { %v2350_v61 = vpop.f32.mrb[30].mxu0 }
 0x92d   :  { %v6544_v62 = vadd.f32 %v2354_v60, %v6152_v52  ;;  %v2355_v63 = vadd.f32 %v2350_v61, %v2239_v3  ;;  %v5550_v0 = vpop.f32.mrb[31].mxu0 }
 0x92f   :  { %v6547_v1 = vadd.f32 %v2355_v63, %v6156_v56  ;;  %v2358_v2 = vsel %vm229_vm1, %v6544_v62, 0.0 }
 0x930   :  { %2359 = vadd.xlane.f32.xlu0 %v2358_v2  ;;  %v5210_v2 = vld [vmem:[%s7113_s16] ss:$0 sm:$0xff] }
 0x931   :  { %v2361_v6 = vsel %vm233_vm2, %v6547_v1, 0.0 }
 0x932   :  { %2362 = vadd.xlane.f32.xlu1 %v2361_v6 }
 0x9bd   :  { %v2360_v7 = vpop.xlane.xlu0 %2359 }
 0x9be   :  { %v2364_v9 = vmul.f32 0.03125, %v2360_v7 }
 0x9bf   :  { %v2363_v4 = vpop.xlane.xlu1 %2362 }
 0x9c0   :  { %v2366_v10 = vsub.f32 %v6544_v62, %v2364_v9  ;;  %v2365_v52 = vmul.f32 0.03125, %v2363_v4 }
 0x9c2   :  { %v2367_v11 = vsub.f32 %v6547_v1, %v2365_v52  ;;  %v2368_v12 = vmul.f32 %v2366_v10, %v2366_v10 }
 0x9c4   :  { %v2370_v56 = vsel %vm229_vm1, %v2368_v12, 0.0  ;;  %v2369_v13 = vmul.f32 %v2367_v11, %v2367_v11 }
 0x9c5   :  { %2371 = vadd.xlane.f32.xlu0 %v2370_v56 }
 0x9c6   :  { %v2373_v14 = vsel %vm233_vm2, %v2369_v13, 0.0 }
 0x9c9   :  { %2374 = vadd.xlane.f32.xlu0 %v2373_v14 }
 0xa52   :  { %v2372_v17 = vpop.xlane.xlu0 %2371 }
 0xa53   :  { %v2376_v18 = vmul.f32 0.03125, %v2372_v17 }
 0xa55   :  { %v2378_v20 = vadd.f32 1e-05, %v2376_v18 }
 0xa56   :  { %v2375_v21 = vpop.xlane.xlu0 %2374 }
 0xa57   :  { %5858 = vrsqrt.f32 %v2378_v20  ;;  %v2377_v23 = vmul.f32 0.03125, %v2375_v21 }
 0xa59   :  { %v2379_v24 = vadd.f32 1e-05, %v2377_v23 }
 0xa5b   :  { %5860 = vrsqrt.f32 %v2379_v24  ;;  %v5804_v24 = vld [vmem:[%s7150_s25 + $0x10] sm:$0xff]  }
 0xa61   :  { %v5859_v25 = vpop.eup %5858 }
 0xa62   :  { %v2382_v26 = vmul.f32 %v5859_v25, %v2366_v10  ;;  %v5805_v25 = vld [vmem:[%s7150_s25 + $0x18] sm:$0xff]  }
 0xa64   :  { %v2390_v29 = vmul.f32 %v5194_v27, %v2382_v26 }
 0xa65   :  { %v5861_v28 = vpop.eup %5860 }
 0xa66   :  { %v2383_v31 = vmul.f32 %v5861_v28, %v2367_v11  ;;  %v2398_v34 = vadd.f32 %v5195_v32, %v2390_v29 }
 0xa68   :  { %v2391_v33 = vmul.f32 %v5194_v27, %v2383_v31 }
 0xa6a   :  { %v2399_v36 = vadd.f32 %v5195_v32, %v2391_v33 }
 0xa6c   :  { %v2400_v35 = vpack.c.bf16 %v2399_v36, %v2398_v34  ;;  %v5247_v34 = vld [vmem:[%s7151_s22 + $0x1] ss:$0 sm:$0xff]  ;;  %s7154_s22 = smov 64  }
 0xa6e   :  { %5556 = vmatmul.mubr.msk.bf16.vlgmr.msra.gmra.mrb[56].mxu1 %vm229_vm1, %v2400_v35 }
 0xa6f   :  { %5583 = vmatprep.mubr.msk.bf16.mxu1 %vm5948_vm3, %v5947_v5  ;;  %5580 = vmatpush3.bf16.msra.mxu1 %v5804_v24 }
 0xa70   :  { %5581 = vmatprep.subr.bf16.mxu1 %v5947_v5 }
 0xa73   :  { %5582 = vmatpush3.bf16.msra.mxu1 %v5805_v25 }
 0xa74   :  { %5587 = vmatprep.subr.bf16.mxu1 %v5947_v5 }
 0xb41   :  { %v2456_v45 = vpop.f32.mrb[56].mxu1 }
 0xb42   :  { %v2457_v46 = vadd.f32 %v5196_v19, %v2456_v45  ;;  %v5557_v47 = vpop.f32.mrb[57].mxu1 }
 0xb43   :  { %v2459_v48 = vpop.f32.mrb[58].mxu1 }
 0xb44   :  { %v5200_v49 = vmul.f32 -1.702, %v2457_v46  ;;  %v2460_v50 = vadd.f32 %v5196_v19, %v2459_v48  ;;  %v5558_v51 = vpop.f32.mrb[59].mxu1 }
 0xb46   :  { %v2467_v53 = vmul.f32 1.442695, %v5200_v49  ;;  %v5201_v54 = vmul.f32 -1.702, %v2460_v50 }
 0xb48   :  { %5862 = vpow2.f32 %v2467_v53  ;;  %v2469_v55 = vmul.f32 1.442695, %v5201_v54 }
 0xb4a   :  { %5864 = vpow2.f32 %v2469_v55 }
 0xb52   :  { %v5863_v57 = vpop.eup %5862 }
 0xb53   :  { %v2471_v3 = vadd.f32 1.0, %v5863_v57 }
 0xb54   :  { %v5865_v8 = vpop.eup %5864 }
 0xb55   :  { %5866 = vrcp.f32 %v2471_v3  ;;  %v2472_v58 = vadd.f32 1.0, %v5865_v8 }
 0xb57   :  { %5868 = vrcp.f32 %v2472_v58 }
 0xb5f   :  { %v5867_v60 = vpop.eup %5866 }
 0xb60   :  { %v2477_v61 = vmul.f32 %v5867_v60, %v2457_v46 }
 0xb61   :  { %v5869_v59 = vpop.eup %5868 }
 0xb62   :  { %v2478_v63 = vmul.f32 %v5869_v59, %v2460_v50 }
 0xb64   :  { %v2479_v0 = vpack.c.bf16 %v2478_v63, %v2477_v61 }
 0xb66   :  { %5576 = vmatmul.mubr.bf16.vlgmr.msra.gmra.mrb[32].mxu0 %v2479_v0 }
 0xb67   :  { %5607 = vmatprep.mubr.msk.bf16.mxu0 %vm5948_vm3, %v5947_v5 }
 0xc39   :  { %v2562_v6 = vpop.f32.mrb[32].mxu0 }
 0xc3a   :  { %v2569_v7 = vadd.f32 %v2562_v6, %v6544_v62  ;;  %v5577_v9 = vpop.f32.mrb[33].mxu0 }
 0xc3b   :  { %v2565_v4 = vpop.f32.mrb[34].mxu0 }
 0xc3c   :  { %v6615_v10 = vadd.f32 %v5210_v2, %v2569_v7  ;;  %v2570_v52 = vadd.f32 %v2565_v4, %v6547_v1  ;;  %v5578_v11 = vpop.f32.mrb[35].mxu0 }
 0xc3e   :  { %v6618_v12 = vadd.f32 %v5210_v2, %v2570_v52  ;;  %v2627_v56 = vsel %vm229_vm1, %v6615_v10, 0.0 }
 0xc3f   :  { %2628 = vadd.xlane.f32.xlu0 %v2627_v56 }
 0xc40   :  { %v2630_v13 = vsel %vm233_vm2, %v6618_v12, 0.0 }
 0xc41   :  { %2631 = vadd.xlane.f32.xlu1 %v2630_v13 }
 0xccc   :  { %v2629_v14 = vpop.xlane.xlu0 %2628 }
 0xccd   :  { %v2633_v15 = vmul.f32 0.03125, %v2629_v14 }
 0xcce   :  { %v2632_v62 = vpop.xlane.xlu1 %2631 }
 0xccf   :  { %v2635_v16 = vsub.f32 %v6615_v10, %v2633_v15  ;;  %v2634_v17 = vmul.f32 0.03125, %v2632_v62 }
 0xcd1   :  { %v2636_v18 = vsub.f32 %v6618_v12, %v2634_v17  ;;  %v2637_v1 = vmul.f32 %v2635_v16, %v2635_v16 }
 0xcd3   :  { %v2639_v20 = vsel %vm229_vm1, %v2637_v1, 0.0  ;;  %v2638_v21 = vmul.f32 %v2636_v18, %v2636_v18 }
 0xcd4   :  { %2640 = vadd.xlane.f32.xlu0 %v2639_v20 }
 0xcd5   :  { %v2642_v23 = vsel %vm233_vm2, %v2638_v21, 0.0 }
 0xcd6   :  { %2643 = vadd.xlane.f32.xlu1 %v2642_v23 }
 0xd61   :  { %v2641_v26 = vpop.xlane.xlu0 %2640 }
 0xd62   :  { %v2645_v27 = vmul.f32 0.03125, %v2641_v26 }
 0xd63   :  { %v2644_v28 = vpop.xlane.xlu1 %2643 }
 0xd64   :  { %v2647_v29 = vadd.f32 1e-05, %v2645_v27  ;;  %v2646_v31 = vmul.f32 0.03125, %v2644_v28 }
 0xd66   :  { %5870 = vrsqrt.f32 %v2647_v29  ;;  %v2648_v32 = vadd.f32 1e-05, %v2646_v31 }
 0xd68   :  { %5872 = vrsqrt.f32 %v2648_v32 }
 0xd70   :  { %v5871_v33 = vpop.eup %5870 }
 0xd71   :  { %v2651_v36 = vmul.f32 %v5871_v33, %v2635_v16 }
 0xd72   :  { %v5873_v35 = vpop.eup %5872 }
 0xd73   :  { %v2659_v37 = vmul.f32 %v5247_v34, %v2651_v36  ;;  %v2652_v38 = vmul.f32 %v5873_v35, %v2636_v18 }
 0xd75   :  { %v2660_v40 = vmul.f32 %v5247_v34, %v2652_v38  ;;  %v2667_v41 = vadd.f32 %v5248_v39, %v2659_v37 }
 0xd77   :  { %v2668_v42 = vadd.f32 %v5248_v39, %v2660_v40 }
 0xd79   :  { %v2669_v43 = vpack.c.bf16 %v2668_v42, %v2667_v41 }
 0xd7b   :  { %5584 = vmatmul.mubr.msk.bf16.vlgmr.msra.gmra.mrb[60].mxu1 %vm229_vm1, %v2669_v43 }
 0xd7c   :  { %5589 = vmatprep.mubr.msk.bf16.mxu1 %vm5948_vm3, %v5947_v5 }
 0xe4e   :  { %v2725_v19 = vpop.f32.mrb[60].mxu1 }
 0xe4f   :  { %v2726_v45 = vadd.f32 %v5249_v44, %v2725_v19  ;;  %v5585_v46 = vpop.f32.mrb[61].mxu1 }
 0xe50   :  { %v2728_v47 = vpop.f32.mrb[62].mxu1 }
 0xe51   :  { %v2734_v48 = vcombine.high %v2726_v45, %v2726_v45  ;;  %v2741_v49 = vrot.slane %v2726_v45, %v6190_v30  ;;  %v2729_v50 = vadd.f32 %v5249_v44, %v2728_v47  ;;  %v5586_v51 = vpop.f32.mrb[63].mxu1 }
 0xe53   :  { %v2748_v53 = vrot.slane %v2734_v48, %v6190_v30  ;;  %v2749_v54 = vcombine.high %v2741_v49, %v2741_v49  ;;  %v2789_v55 = vrot.slane %v2729_v50, %v6190_v30  ;;  %v2757_v57 = vrot.slane %v2741_v49, %v6190_v30 }
 0xe55   :  { %v2750_v3 = vcombine.high %v2748_v53, %v2748_v53  ;;  %v2764_v8 = vrot.slane %v2748_v53, %v6190_v30  ;;  %v2771_v58 = vrot.slane %v2749_v54, %v6190_v30  ;;  %v2790_v60 = vcombine.high %v2789_v55, %v2789_v55 }
 0xe56   :  { %v2797_v6 = vrot.slane %v2789_v55, %v6190_v30 }
 0xe57   :  { %v2778_v59 = vrot.slane %v2750_v3, %v6190_v30  ;;  %v2780_v61 = vcombine.high %v2764_v8, %v2764_v8  ;;  %v2805_v63 = vcombine.low %v2757_v57, %v2771_v58  ;;  %v5253_v0 = vcombine.high %v2757_v57, %v2771_v58 }
 0xe58   :  { %v2827_v2 = vrot.slane %v2764_v8, %v6190_v30  ;;  %v2804_v7 = vrot.slane %v2790_v60, %v6190_v30 }
 0xe59   :  { %v2813_v9 = vrot.slane %v2805_v63, %v6190_v30  ;;  %v2820_v4 = vrot.slane %v5253_v0, %v6190_v30  ;;  %v2844_v52 = vcombine.low %v2778_v59, %v2780_v61  ;;  %v2782_v11 = vcombine.high %v2778_v59, %v2778_v59 }
 0xe5a   :  { %v2842_v14 = vrot.slane %v2827_v2, %v6190_v30  ;;  %v2866_v17 = vrot.slane %v2804_v7, %v6190_v30 }
 0xe5b   :  { %v2828_v56 = vcombine.low %v2813_v9, %v2820_v4  ;;  %v2845_v13 = vcombine.low %v2782_v11, %v2797_v6  ;;  %v2852_v62 = vrot.slane %v2844_v52, %v6190_v30 }
 0xe5c   :  { %v2881_v21 = vrot.slane %v2866_v17, %v6190_v30 }
 0xe5d   :  { %v2835_v15 = vrot.slane %v2828_v56, %v6190_v30  ;;  %v2859_v16 = vrot.slane %v2845_v13, %v6190_v30 }
 0xe5f   :  { %v6665_v18 = vcombine.low %v2835_v15, %v2842_v14  ;;  %v2867_v1 = vcombine.low %v2852_v62, %v2859_v16 }
 0xe61   :  { %2885 = vst.msk [vmem:[#allocation2] sm:$0x1f] %vm568_vm4, %v6665_v18  ;;  %v2874_v20 = vrot.slane %v2867_v1, %v6190_v30  ;;  %2887 = vrot.lane.b32.xlu0 %v6665_v18, %s5950_s3 }
 0xe63   :  { %v6673_v23 = vcombine.low %v2874_v20, %v2881_v21 }
 0xe65   :  { %2886 = vst.msk [vmem:[#allocation2 + $0x8] sm:$0x1f] %vm568_vm4, %v6673_v23  ;;  %2903 = vrot.lane.b32.xlu0 %v6665_v18, %s5953_s30  ;;  %2889 = vrot.lane.b32.xlu1 %v6673_v23, %s5950_s3  ;;  %s7156_s3 = smov 48  }
 0xe68   :  { %v2975_v35 = vld [vmem:[#allocation2] sm:$0x1f] }
 0xe69   :  { %2935 = vrot.lane.b32.xlu0 %v6665_v18, %s5952_s4  ;;  %2911 = vrot.lane.b32.xlu1 %v6665_v18, %s5951_s0  ;;  %v2983_v40 = vpack.c.bf16 %v2975_v35, %v2975_v35 }
 0xe6c   :  { %v2976_v46 = vld [vmem:[#allocation2 + $0x8] sm:$0x1f] }
 0xe6d   :  { %2927 = vrot.lane.b32.xlu0 %v6665_v18, %s5956_s26  ;;  %2913 = vrot.lane.b32.xlu1 %v6673_v23, %s5951_s0  ;;  %v2984_v50 = vpack.c.bf16 %v2976_v46, %v2976_v46  ;;  %s7157_s0 = smov 40  }
 0xe71   :  { %2959 = vrot.lane.b32.xlu0 %v6665_v18, %s5954_s24  ;;  %2905 = vrot.lane.b32.xlu1 %v6673_v23, %s5953_s30 }
 0xe75   :  { %2951 = vrot.lane.b32.xlu0 %v6665_v18, %s7153_s8  ;;  %2937 = vrot.lane.b32.xlu1 %v6673_v23, %s5952_s4 }
 0xe79   :  { %2929 = vrot.lane.b32.xlu1 %v6673_v23, %s5956_s26 }
 0xe7d   :  { %2961 = vrot.lane.b32.xlu1 %v6673_v23, %s5954_s24 }
 0xe81   :  { %2953 = vrot.lane.b32.xlu1 %v6673_v23, %s7153_s8 }
 0xed3   :  { %v2888_v24 = vpop.permute.xlu0 %2887 }
 0xed4   :  { %2893 = vst.msk [vmem:[#allocation2 + $0x40] sm:$0x1f] %vm568_vm4, %v2888_v24 }
 0xed7   :  { %v2904_v25 = vpop.permute.xlu0 %2903  ;;  %v2890_v26 = vpop.permute.xlu1 %2889 }
 0xed8   :  { %2909 = vst.msk [vmem:[#allocation2 + $0x10] sm:$0x1f] %vm568_vm4, %v2904_v25  ;;  %2894 = vst.msk [vmem:[#allocation2 + $0x48] sm:$0x1f] %vm568_vm4, %v2890_v26 }
 0xedb   :  { %v2936_v27 = vpop.permute.xlu0 %2935  ;;  %v2912_v28 = vpop.permute.xlu1 %2911  ;;  %v2991_v29 = vld [vmem:[#allocation2 + $0x40] sm:$0x1f] }
 0xedc   :  { %2941 = vst.msk [vmem:[#allocation2 + $0x60] sm:$0x1f] %vm568_vm4, %v2936_v27  ;;  %2917 = vst.msk [vmem:[#allocation2 + $0x50] sm:$0x1f] %vm568_vm4, %v2912_v28  ;;  %v2999_v31 = vpack.c.bf16 %v2991_v29, %v2991_v29 }
 0xede   :  { %v3027_v32 = vsel %vm718_vm5, %v2999_v31, 0 }
 0xedf   :  { %5588 = vmatpush3.bf16.xpose.msra.mxu1 %v3027_v32  ;;  %v2928_v33 = vpop.permute.xlu0 %2927  ;;  %v2914_v34 = vpop.permute.xlu1 %2913  ;;  %v2992_v36 = vld [vmem:[#allocation2 + $0x48] sm:$0x1f]  ;;  %v2977_v58 = vld [vmem:[#allocation2 + $0x10] sm:$0x1f] }
 0xee0   :  { %2933 = vst.msk [vmem:[#allocation2 + $0x20] sm:$0x1f] %vm568_vm4, %v2928_v33  ;;  %2918 = vst.msk [vmem:[#allocation2 + $0x58] sm:$0x1f] %vm568_vm4, %v2914_v34  ;;  %5593 = vmatprep.subr.bf16.mxu1 %v5947_v5  ;;  %v3000_v37 = vpack.c.bf16 %v2992_v36, %v2992_v36  ;;  %v2985_v63 = vpack.c.bf16 %v2977_v58, %v2977_v58 }
 0xee2   :  { %v3073_v41 = vsel %vm718_vm5, %v3000_v37, 0 }
 0xee3   :  { %v2960_v38 = vpop.permute.xlu0 %2959  ;;  %v2906_v39 = vpop.permute.xlu1 %2905  ;;  %v2993_v19 = vld [vmem:[#allocation2 + $0x50] sm:$0x1f]  ;;  %v2995_v57 = vld [vmem:[#allocation2 + $0x60] sm:$0x1f] }
 0xee4   :  { %2965 = vst.msk [vmem:[#allocation2 + $0x70] sm:$0x1f] %vm568_vm4, %v2960_v38  ;;  %2910 = vst.msk [vmem:[#allocation2 + $0x18] sm:$0x1f] %vm568_vm4, %v2906_v39  ;;  %v3001_v48 = vpack.c.bf16 %v2993_v19, %v2993_v19  ;;  %v3003_v59 = vpack.c.bf16 %v2995_v57, %v2995_v57 }
 0xee6   :  { %5590 = vmatmul.mubr.msk.bf16.vlgmr.msra.gmra.mrb[64].mxu1 %vm718_vm5, %v2983_v40  ;;  %v3119_v53 = vsel %vm718_vm5, %v3001_v48, 0  ;;  %v3211_v2 = vsel %vm718_vm5, %v3003_v59, 0 }
 0xee7   :  { %v2952_v42 = vpop.permute.xlu0 %2951  ;;  %5594 = vmatpush3.bf16.xpose.msra.mxu1 %v3073_v41  ;;  %v2938_v43 = vpop.permute.xlu1 %2937  ;;  %v2994_v44 = vld [vmem:[#allocation2 + $0x58] sm:$0x1f]  ;;  %5595 = vmatprep.mubr.msk.bf16.mxu1 %vm5948_vm3, %v5947_v5  ;;  %v2979_v52 = vld [vmem:[#allocation2 + $0x20] sm:$0x1f] }
 0xee8   :  { %2957 = vst.msk [vmem:[#allocation2 + $0x30] sm:$0x1f] %vm568_vm4, %v2952_v42  ;;  %2942 = vst.msk [vmem:[#allocation2 + $0x68] sm:$0x1f] %vm568_vm4, %v2938_v43  ;;  %v3002_v45 = vpack.c.bf16 %v2994_v44, %v2994_v44  ;;  %5599 = vmatprep.subr.bf16.mxu1 %v5947_v5  ;;  %v2987_v13 = vpack.c.bf16 %v2979_v52, %v2979_v52 }
 0xeea   :  { %v3165_v47 = vsel %vm718_vm5, %v3002_v45, 0 }
 0xeeb   :  { %5606 = vmatpush3.bf16.xpose.msra.mxu0 %v3165_v47  ;;  %v2930_v49 = vpop.permute.xlu1 %2929  ;;  %v2978_v51 = vld [vmem:[#allocation2 + $0x18] sm:$0x1f]  ;;  %v2997_v7 = vld [vmem:[#allocation2 + $0x70] sm:$0x1f] }
 0xeec   :  { %2934 = vst.msk [vmem:[#allocation2 + $0x28] sm:$0x1f] %vm568_vm4, %v2930_v49  ;;  %5617 = vmatprep.subr.bf16.mxu0 %v5947_v5  ;;  %v2986_v3 = vpack.c.bf16 %v2978_v51, %v2978_v51  ;;  %v3005_v56 = vpack.c.bf16 %v2997_v7, %v2997_v7 }
 0xeee   :  { %5596 = vmatmul.mubr.msk.bf16.vlgmr.msra.gmra.mrb[68].mxu1 %vm718_vm5, %v2984_v50  ;;  %v3303_v15 = vsel %vm718_vm5, %v3005_v56, 0 }
 0xeef   :  { %v2962_v54 = vpop.permute.xlu1 %2961  ;;  %5600 = vmatpush3.bf16.xpose.msra.mxu1 %v3119_v53  ;;  %v2996_v55 = vld [vmem:[#allocation2 + $0x68] sm:$0x1f]  ;;  %5601 = vmatprep.mubr.msk.bf16.mxu1 %vm5948_vm3, %v5947_v5  ;;  %v2981_v16 = vld [vmem:[#allocation2 + $0x30] sm:$0x1f] }
 0xef0   :  { %2966 = vst.msk [vmem:[#allocation2 + $0x78] sm:$0x1f] %vm568_vm4, %v2962_v54  ;;  %v3004_v8 = vpack.c.bf16 %v2996_v55, %v2996_v55  ;;  %5611 = vmatprep.subr.bf16.mxu1 %v5947_v5  ;;  %v2989_v17 = vpack.c.bf16 %v2981_v16, %v2981_v16 }
 0xef2   :  { %5608 = vmatmul.mubr.msk.bf16.vlgmr.msra.gmra.mrb[36].mxu0 %vm718_vm5, %v2986_v3  ;;  %v3257_v60 = vsel %vm718_vm5, %v3004_v8, 0 }
 0xef3   :  { %5618 = vmatpush3.bf16.xpose.msra.mxu0 %v3257_v60  ;;  %v2954_v61 = vpop.permute.xlu1 %2953  ;;  %5619 = vmatprep.mubr.msk.bf16.mxu0 %vm5948_vm3, %v5947_v5  ;;  %v2980_v0 = vld [vmem:[#allocation2 + $0x28] sm:$0x1f] }
 0xef4   :  { %2958 = vst.msk [vmem:[#allocation2 + $0x38] sm:$0x1f] %vm568_vm4, %v2954_v61  ;;  %5629 = vmatprep.subr.bf16.mxu0 %v5947_v5  ;;  %v2988_v9 = vpack.c.bf16 %v2980_v0, %v2980_v0 }
 0xef6   :  { %5602 = vmatmul.mubr.msk.bf16.vlgmr.msra.gmra.mrb[72].mxu1 %vm718_vm5, %v2985_v63 }
 0xef7   :  { %5612 = vmatpush3.bf16.xpose.msra.mxu1 %v3211_v2  ;;  %v2998_v6 = vld [vmem:[#allocation2 + $0x78] sm:$0x1f]  ;;  %5613 = vmatprep.mubr.msk.bf16.mxu1 %vm5948_vm3, %v5947_v5 }
 0xef8   :  { %v3006_v4 = vpack.c.bf16 %v2998_v6, %v2998_v6  ;;  %5623 = vmatprep.subr.bf16.mxu1 %v5947_v5 }
 0xefa   :  { %5620 = vmatmul.mubr.msk.bf16.vlgmr.msra.gmra.mrb[40].mxu0 %vm718_vm5, %v2988_v9  ;;  %v3349_v11 = vsel %vm718_vm5, %v3006_v4, 0 }
 0xefb   :  { %5630 = vmatpush3.bf16.xpose.msra.mxu0 %v3349_v11  ;;  %5631 = vmatprep.mubr.msk.bf16.mxu0 %vm5948_vm3, %v5947_v5  ;;  %v2982_v14 = vld [vmem:[#allocation2 + $0x38] sm:$0x1f] }
 0xefc   :  { %5641 = vmatprep.subr.bf16.mxu0 %v5947_v5  ;;  %v2990_v62 = vpack.c.bf16 %v2982_v14, %v2982_v14 }
 0xefe   :  { %5614 = vmatmul.mubr.msk.bf16.vlgmr.msra.gmra.mrb[76].mxu1 %vm718_vm5, %v2987_v13 }
 0xeff   :  { %5624 = vmatpush3.bf16.xpose.msra.mxu1 %v3303_v15  ;;  %5625 = vmatprep.mubr.msk.bf16.mxu1 %vm5948_vm3, %v5947_v5 }
 0xf00   :  { %5635 = vmatprep.subr.bf16.mxu1 %v5947_v5 }
 0xf02   :  { %5632 = vmatmul.mubr.msk.bf16.vlgmr.msra.gmra.mrb[44].mxu0 %vm718_vm5, %v2990_v62 }
 0xf03   :  { %5643 = vmatprep.mubr.msk.bf16.mxu0 %vm5948_vm3, %v5947_v5 }
 0xf06   :  { %5626 = vmatmul.mubr.msk.bf16.vlgmr.msra.gmra.mrb[80].mxu1 %vm718_vm5, %v2989_v17 }
 0xf07   :  { %5637 = vmatprep.mubr.msk.bf16.mxu1 %vm5948_vm3, %v5947_v5 }
 0xfb9   :  { %v3063_v1 = vpop.f32.mrb[64].mxu1 }
 0xfba   :  { %v3391_v20 = vmul.f32 0.35355338, %v3063_v1  ;;  %v5591_v21 = vpop.f32.mrb[65].mxu1 }
 0xfbb   :  { %v3066_v24 = vpop.f32.mrb[66].mxu1 }
 0xfbc   :  { %v5592_v25 = vpop.f32.mrb[67].mxu1  ;;  %v3399_v26 = vsel %vm1095_vm6, %v3391_v20, -inf }
 0xfbd   :  { %3400 = vmax.xlane.f32.xlu0 %v3399_v26 }
 0xfc1   :  { %v3109_v27 = vpop.f32.mrb[68].mxu1 }
 0xfc2   :  { %v3392_v28 = vmul.f32 0.35355338, %v3109_v27  ;;  %v5597_v29 = vpop.f32.mrb[69].mxu1 }
 0xfc3   :  { %v3112_v31 = vpop.f32.mrb[70].mxu1 }
 0xfc4   :  { %v5598_v32 = vpop.f32.mrb[71].mxu1  ;;  %v3402_v33 = vsel %vm1095_vm6, %v3392_v28, -inf }
 0xfc5   :  { %v3201_v34 = vpop.f32.mrb[36].mxu0  ;;  %3403 = vmax.xlane.f32.xlu1 %v3402_v33 }
 0xfc6   :  { %v3394_v36 = vmul.f32 0.35355338, %v3201_v34  ;;  %v5609_v35 = vpop.f32.mrb[37].mxu0 }
 0xfc7   :  { %v3204_v37 = vpop.f32.mrb[38].mxu0 }
 0xfc8   :  { %v5610_v38 = vpop.f32.mrb[39].mxu0  ;;  %v3408_v39 = vsel %vm1095_vm6, %v3394_v36, -inf }
 0xfc9   :  { %3409 = vmax.xlane.f32.xlu0 %v3408_v39  ;;  %v3155_v40 = vpop.f32.mrb[72].mxu1 }
 0xfca   :  { %v3393_v41 = vmul.f32 0.35355338, %v3155_v40  ;;  %v5603_v42 = vpop.f32.mrb[73].mxu1 }
 0xfcb   :  { %v3158_v43 = vpop.f32.mrb[74].mxu1 }
 0xfcc   :  { %v5604_v44 = vpop.f32.mrb[75].mxu1  ;;  %v3405_v19 = vsel %vm1095_vm6, %v3393_v41, -inf }
 0xfcd   :  { %v3293_v45 = vpop.f32.mrb[40].mxu0  ;;  %3406 = vmax.xlane.f32.xlu0 %v3405_v19 }
 0xfce   :  { %v3396_v46 = vmul.f32 0.35355338, %v3293_v45  ;;  %v5621_v47 = vpop.f32.mrb[41].mxu0 }
 0xfcf   :  { %v3296_v48 = vpop.f32.mrb[42].mxu0 }
 0xfd0   :  { %v5622_v49 = vpop.f32.mrb[43].mxu0  ;;  %v3414_v50 = vsel %vm1095_vm6, %v3396_v46, -inf }
 0xfd1   :  { %3415 = vmax.xlane.f32.xlu1 %v3414_v50  ;;  %v3247_v51 = vpop.f32.mrb[76].mxu1 }
 0xfd2   :  { %v6762_v53 = vmul.f32 0.35355338, %v3247_v51  ;;  %v5615_v54 = vpop.f32.mrb[77].mxu1 }
 0xfd3   :  { %v3250_v55 = vpop.f32.mrb[78].mxu1 }
 0xfd4   :  { %v5616_v57 = vpop.f32.mrb[79].mxu1  ;;  %v3411_v3 = vsel %vm1095_vm6, %v6762_v53, -inf }
 0xfd5   :  { %v3385_v8 = vpop.f32.mrb[44].mxu0  ;;  %3412 = vmax.xlane.f32.xlu0 %v3411_v3 }
 0xfd6   :  { %v3398_v58 = vmul.f32 0.35355338, %v3385_v8  ;;  %v5633_v60 = vpop.f32.mrb[45].mxu0 }
 0xfd7   :  { %v3388_v59 = vpop.f32.mrb[46].mxu0 }
 0xfd8   :  { %v5634_v61 = vpop.f32.mrb[47].mxu0  ;;  %v3420_v63 = vsel %vm1095_vm6, %v3398_v58, -inf }
 0xfd9   :  { %3421 = vmax.xlane.f32.xlu1 %v3420_v63  ;;  %v3339_v0 = vpop.f32.mrb[80].mxu1 }
 0xfda   :  { %v5627_v2 = vpop.f32.mrb[81].mxu1  ;;  %v6773_v9 = vmul.f32 0.35355338, %v3339_v0 }
 0xfdb   :  { %v3342_v6 = vpop.f32.mrb[82].mxu1 }
 0xfdc   :  { %v5628_v7 = vpop.f32.mrb[83].mxu1  ;;  %v3417_v4 = vsel %vm1095_vm6, %v6773_v9, -inf }
 0xfea   :  { %2897 = vrot.lane.b32.xlu1 %v6673_v23, %s7154_s22 }
 0xfeb   :  { %2895 = vrot.lane.b32.xlu0 %v6665_v18, %s7154_s22 }
 0xfee   :  { %2921 = vrot.lane.b32.xlu1 %v6673_v23, %s7155_s5 }
0x100a   :  { %3418 = vmax.xlane.f32.xlu0 %v3417_v4 }
0x1020   :  { %2919 = vrot.lane.b32.xlu0 %v6665_v18, %s7155_s5 }
0x104a   :  { %v3401_v52 = vpop.xlane.xlu0 %3400 }
0x104b   :  { %v3423_v11 = vsub.f32 %v3391_v20, %v3401_v52 }
0x104d   :  { %v3431_v56 = vmul.f32 1.442695, %v3423_v11 }
0x104f   :  { %5874 = vpow2.f32 %v3431_v56 }
0x1052   :  { %v3404_v13 = vpop.xlane.xlu1 %3403 }
0x1053   :  { %v3424_v14 = vsub.f32 %v3392_v28, %v3404_v13 }
0x1055   :  { %v3433_v17 = vmul.f32 1.442695, %v3424_v14 }
0x1056   :  { %v3410_v15 = vpop.xlane.xlu0 %3409 }
0x1057   :  { %v3426_v62 = vsub.f32 %v3394_v36, %v3410_v15 }
0x1059   :  { %v6779_v16 = vpop.eup %5874  ;;  %v3437_v1 = vmul.f32 1.442695, %v3426_v62 }
0x105a   :  { %v3407_v21 = vpop.xlane.xlu0 %3406  ;;  %v3447_v24 = vsel %vm1095_vm6, %v6779_v16, 0.0 }
0x105b   :  { %5876 = vpow2.f32 %v3437_v1  ;;  %3448 = vadd.xlane.f32.xlu0 %v3447_v24  ;;  %v3425_v25 = vsub.f32 %v3393_v41, %v3407_v21 }
0x105c   :  { %5878 = vpow2.f32 %v3433_v17 }
0x105d   :  { %v3435_v27 = vmul.f32 1.442695, %v3425_v25 }
0x105e   :  { %v3416_v26 = vpop.xlane.xlu1 %3415 }
0x105f   :  { %v3428_v20 = vsub.f32 %v3396_v46, %v3416_v26 }
0x1061   :  { %v3441_v29 = vmul.f32 1.442695, %v3428_v20 }
0x1062   :  { %v3413_v31 = vpop.xlane.xlu0 %3412 }
0x1063   :  { %5880 = vpow2.f32 %v3441_v29  ;;  %v3427_v54 = vsub.f32 %v6762_v53, %v3413_v31 }
0x1064   :  { %5882 = vpow2.f32 %v3435_v27 }
0x1065   :  { %v6783_v28 = vpop.eup %5876  ;;  %v3439_v55 = vmul.f32 1.442695, %v3427_v54 }
0x1066   :  { %v3422_v32 = vpop.xlane.xlu1 %3421  ;;  %v2896_v33 = vpop.permute.xlu0 %2895  ;;  %v3456_v34 = vsel %vm1095_vm6, %v6783_v28, 0.0 }
0x1067   :  { %v6787_v36 = vpop.eup %5878  ;;  %v3430_v35 = vsub.f32 %v3398_v58, %v3422_v32  ;;  %2901 = vst.msk [vmem:[#allocation2 + $0x80] sm:$0x1f] %vm568_vm4, %v2896_v33  ;;  %3457 = vadd.xlane.f32.xlu1 %v3456_v34 }
0x1068   :  { %v3450_v39 = vsel %vm1095_vm6, %v6787_v36, 0.0 }
0x1069   :  { %v3445_v37 = vmul.f32 1.442695, %v3430_v35 }
0x106a   :  { %v2898_v38 = vpop.permute.xlu1 %2897 }
0x106b   :  { %5884 = vpow2.f32 %v3445_v37  ;;  %2902 = vst.msk [vmem:[#allocation2 + $0x88] sm:$0x1f] %vm568_vm4, %v2898_v38  ;;  %3451 = vadd.xlane.f32.xlu1 %v3450_v39 }
0x106c   :  { %5886 = vpow2.f32 %v3439_v55 }
0x106d   :  { %v6793_v40 = vpop.eup %5880 }
0x106e   :  { %v2922_v41 = vpop.permute.xlu1 %2921  ;;  %v3462_v42 = vsel %vm1095_vm6, %v6793_v40, 0.0  ;;  %v3007_v43 = vld [vmem:[#allocation2 + $0x80] sm:$0x1f]  ;;  %v6797_v44 = vpop.eup %5882 }
0x106f   :  { %2926 = vst.msk [vmem:[#allocation2 + $0x98] sm:$0x1f] %vm568_vm4, %v2922_v41  ;;  %3463 = vadd.xlane.f32.xlu0 %v3462_v42  ;;  %v3015_v19 = vpack.c.bf16 %v3007_v43, %v3007_v43  ;;  %v3453_v46 = vsel %vm1095_vm6, %v6797_v44, 0.0 }
0x1071   :  { %v3499_v45 = vand.u32 %v3015_v19, %v6346_v22 }
0x1072   :  { %v3008_v47 = vld [vmem:[#allocation2 + $0x88] sm:$0x1f] }
0x1073   :  { %5636 = vmatpush3.bf16.msra.mxu1 %v3499_v45  ;;  %3454 = vadd.xlane.f32.xlu0 %v3453_v46  ;;  %v3016_v48 = vpack.c.bf16 %v3008_v47, %v3008_v47 }
0x1074   :  { %5647 = vmatprep.subr.bf16.mxu1 %v5947_v5 }
0x1075   :  { %v6804_v49 = vpop.eup %5884  ;;  %v3545_v50 = vand.u32 %v3016_v48, %v6346_v22 }
0x1076   :  { %v3468_v51 = vsel %vm1095_vm6, %v6804_v49, 0.0  ;;  %v6819_v60 = vpop.eup %5886  ;;  %v3010_v14 = vld [vmem:[#allocation2 + $0x98] sm:$0x1f] }
0x1077   :  { %5642 = vmatpush3.bf16.msra.mxu0 %v3545_v50  ;;  %3469 = vadd.xlane.f32.xlu0 %v3468_v51  ;;  %v3459_v59 = vsel %vm1095_vm6, %v6819_v60, 0.0  ;;  %v3018_v62 = vpack.c.bf16 %v3010_v14, %v3010_v14 }
0x1078   :  { %5653 = vmatprep.subr.bf16.mxu0 %v5947_v5 }
0x1079   :  { %v3637_v24 = vand.u32 %v3018_v62, %v6346_v22 }
0x107c   :  { %2945 = vrot.lane.b32.xlu1 %v6673_v23, %s7156_s3 }
0x1080   :  { %2967 = vrot.lane.b32.xlu1 %v6665_v18, %s7157_s0 }
0x108d   :  { %2943 = vrot.lane.b32.xlu0 %v6665_v18, %s7156_s3 }
0x1097   :  { %v3419_v57 = vpop.xlane.xlu0 %3418 }
0x1098   :  { %v3429_v3 = vsub.f32 %v6773_v9, %v3419_v57 }
0x109a   :  { %v3443_v8 = vmul.f32 1.442695, %v3429_v3 }
0x109b   :  { %v2920_v58 = vpop.permute.xlu0 %2919 }
0x109c   :  { %5888 = vpow2.f32 %v3443_v8  ;;  %2925 = vst.msk [vmem:[#allocation2 + $0x90] sm:$0x1f] %vm568_vm4, %v2920_v58 }
0x10a3   :  { %v3009_v63 = vld [vmem:[#allocation2 + $0x90] sm:$0x1f] }
0x10a4   :  { %3460 = vadd.xlane.f32.xlu1 %v3459_v59  ;;  %v3017_v2 = vpack.c.bf16 %v3009_v63, %v3009_v63 }
0x10a6   :  { %v6823_v61 = vpop.eup %5888  ;;  %v3591_v4 = vand.u32 %v3017_v2, %v6346_v22 }
0x10a7   :  { %v3465_v18 = vsel %vm1095_vm6, %v6823_v61, 0.0 }
0x10a8   :  { %3466 = vadd.xlane.f32.xlu1 %v3465_v18 }
0x10b9   :  { %2969 = vrot.lane.b32.xlu1 %v6673_v23, %s7157_s0 }
0x10e8   :  { %v3449_v53 = vpop.xlane.xlu0 %3448 }
0x10e9   :  { %5890 = vrcp.f32 %v3449_v53 }
0x10f3   :  { %v5891_v0 = vpop.eup %5890 }
0x10f4   :  { %v3479_v6 = vmul.f32 %v5891_v0, %v6779_v16  ;;  %v3458_v7 = vpop.xlane.xlu1 %3457 }
0x10f6   :  { %v3487_v9 = vpack.c.bf16 %v3479_v6, %v3479_v6 }
0x10f8   :  { %v3452_v52 = vpop.xlane.xlu1 %3451  ;;  %5638 = vmatmul.mubr.msk.bf16.vlgmr.msra.gmra.mrb[84].mxu1 %vm1192_vm9, %v3487_v9 }
0x10f9   :  { %5892 = vrcp.f32 %v3452_v52  ;;  %5648 = vmatpush3.bf16.msra.mxu1 %v3591_v4  ;;  %5649 = vmatprep.mubr.msk.bf16.mxu1 %vm5948_vm3, %v5947_v5 }
0x10fa   :  { %5659 = vmatprep.subr.bf16.mxu1 %v5947_v5  ;;  %5894 = vrcp.f32 %v3458_v7 }
0x10fc   :  { %v2946_v23 = vpop.permute.xlu1 %2945  ;;  %v3464_v11 = vpop.xlane.xlu0 %3463 }
0x10fd   :  { %2950 = vst.msk [vmem:[#allocation2 + $0xa8] sm:$0x1f] %vm568_vm4, %v2946_v23 }
0x1100   :  { %v2968_v56 = vpop.permute.xlu1 %2967  ;;  %v3455_v13 = vpop.xlane.xlu0 %3454 }
0x1101   :  { %2973 = vst.msk [vmem:[#allocation2 + $0xb0] sm:$0x1f] %vm568_vm4, %v2968_v56  ;;  %5896 = vrcp.f32 %v3455_v13 }
0x1102   :  { %5898 = vrcp.f32 %v3464_v11 }
0x1103   :  { %v5893_v15 = vpop.eup %5892 }
0x1104   :  { %v3480_v16 = vmul.f32 %v5893_v15, %v6787_v36  ;;  %v3470_v17 = vpop.xlane.xlu0 %3469  ;;  %v5895_v21 = vpop.eup %5894  ;;  %v3012_v26 = vld [vmem:[#allocation2 + $0xa8] sm:$0x1f] }
0x1105   :  { %v3482_v20 = vmul.f32 %v5895_v21, %v6783_v28  ;;  %v3020_v29 = vpack.c.bf16 %v3012_v26, %v3012_v26 }
0x1106   :  { %v3488_v1 = vpack.c.bf16 %v3480_v16, %v3480_v16 }
0x1107   :  { %v3490_v33 = vpack.c.bf16 %v3482_v20, %v3482_v20  ;;  %v3729_v36 = vand.u32 %v3020_v29, %v6346_v22 }
0x1108   :  { %5644 = vmatmul.mubr.msk.bf16.vlgmr.msra.gmra.mrb[48].mxu0 %vm1192_vm9, %v3488_v1  ;;  %v2944_v25 = vpop.permute.xlu0 %2943  ;;  %v3013_v43 = vld [vmem:[#allocation2 + $0xb0] sm:$0x1f] }
0x1109   :  { %5654 = vmatpush3.bf16.msra.mxu0 %v3637_v24  ;;  %2949 = vst.msk [vmem:[#allocation2 + $0xa0] sm:$0x1f] %vm568_vm4, %v2944_v25  ;;  %5655 = vmatprep.mubr.msk.bf16.mxu0 %vm5948_vm3, %v5947_v5  ;;  %v3021_v19 = vpack.c.bf16 %v3013_v43, %v3013_v43 }
0x110a   :  { %5665 = vmatprep.subr.bf16.mxu0 %v5947_v5 }
0x110b   :  { %v5897_v27 = vpop.eup %5896  ;;  %v3775_v50 = vand.u32 %v3021_v19, %v6346_v22 }
0x110c   :  { %v3481_v31 = vmul.f32 %v5897_v27, %v6797_v44  ;;  %v5899_v34 = vpop.eup %5898 }
0x110d   :  { %v3484_v28 = vmul.f32 %v5899_v34, %v6793_v40 }
0x110e   :  { %v3489_v32 = vpack.c.bf16 %v3481_v31, %v3481_v31 }
0x110f   :  { %v3492_v39 = vpack.c.bf16 %v3484_v28, %v3484_v28 }
0x1110   :  { %5650 = vmatmul.mubr.msk.bf16.vlgmr.msra.gmra.mrb[88].mxu1 %vm1192_vm9, %v3489_v32  ;;  %5656 = vmatmul.mubr.msk.bf16.vlgmr.msra.gmra.mrb[52].mxu0 %vm1192_vm9, %v3490_v33  ;;  %v3011_v35 = vld [vmem:[#allocation2 + $0xa0] sm:$0x1f] }
0x1111   :  { %5666 = vmatpush3.bf16.msra.mxu0 %v3729_v36  ;;  %v3019_v37 = vpack.c.bf16 %v3011_v35, %v3011_v35  ;;  %5667 = vmatprep.mubr.msk.bf16.mxu0 %vm5948_vm3, %v5947_v5 }
0x1112   :  { %5661 = vmatprep.mubr.msk.bf16.mxu1 %vm5948_vm3, %v5947_v5  ;;  %5677 = vmatprep.subr.bf16.mxu0 %v5947_v5 }
0x1113   :  { %v3683_v38 = vand.u32 %v3019_v37, %v6346_v22 }
0x1115   :  { %5660 = vmatpush3.bf16.msra.mxu1 %v3683_v38 }
0x1116   :  { %5671 = vmatprep.subr.bf16.mxu1 %v5947_v5 }
0x1118   :  { %5668 = vmatmul.mubr.msk.bf16.vlgmr.msra.gmra.mrb[56].mxu0 %vm1192_vm9, %v3492_v39 }
0x1119   :  { %5679 = vmatprep.mubr.msk.bf16.mxu0 %vm5948_vm3, %v5947_v5 }
0x1131   :  { %v3461_v41 = vpop.xlane.xlu1 %3460 }
0x1132   :  { %5900 = vrcp.f32 %v3461_v41 }
0x1133   :  { %5902 = vrcp.f32 %v3470_v17 }
0x1135   :  { %v3467_v40 = vpop.xlane.xlu1 %3466 }
0x1136   :  { %5904 = vrcp.f32 %v3467_v40 }
0x1139   :  { %v2970_v42 = vpop.permute.xlu1 %2969 }
0x113a   :  { %2974 = vst.msk [vmem:[#allocation2 + $0xb8] sm:$0x1f] %vm568_vm4, %v2970_v42 }
0x113c   :  { %v5901_v44 = vpop.eup %5900 }
0x113d   :  { %v3483_v45 = vmul.f32 %v5901_v44, %v6819_v60  ;;  %v5903_v46 = vpop.eup %5902  ;;  %v5219_v60 = vld [vmem:[%s7106_s9 + $0x14] sm:$0xf] }
0x113e   :  { %v3486_v55 = vmul.f32 %v5903_v46, %v6804_v49  ;;  %v5218_v49 = vld [vmem:[%s7106_s9 + $0x10] sm:$0xf]  ;;  %v4376_v59 = vsel %vm1955_vm10, %v5219_v60, 0 }
0x113f   :  { %v3491_v47 = vpack.c.bf16 %v3483_v45, %v3483_v45 }
0x1140   :  { %v5905_v48 = vpop.eup %5904  ;;  %v3494_v58 = vpack.c.bf16 %v3486_v55, %v3486_v55 }
0x1141   :  { %5662 = vmatmul.mubr.msk.bf16.vlgmr.msra.gmra.mrb[92].mxu1 %vm1192_vm9, %v3491_v47  ;;  %v3014_v51 = vld [vmem:[#allocation2 + $0xb8] sm:$0x1f]  ;;  %v3485_v57 = vmul.f32 %v5905_v48, %v6823_v61 }
0x1142   :  { %5672 = vmatpush3.bf16.msra.mxu1 %v3775_v50  ;;  %v3022_v54 = vpack.c.bf16 %v3014_v51, %v3014_v51  ;;  %5673 = vmatprep.mubr.msk.bf16.mxu1 %vm5948_vm3, %v5947_v5 }
0x1143   :  { %5683 = vmatprep.subr.bf16.mxu1 %v5947_v5  ;;  %v3493_v8 = vpack.c.bf16 %v3485_v57, %v3485_v57 }
0x1144   :  { %v3821_v3 = vand.u32 %v3022_v54, %v6346_v22  ;;  %v4254_v22 = vsel %vm1955_vm10, %v5218_v49, 0 }
0x1146   :  { %5678 = vmatpush3.bf16.msra.mxu0 %v3821_v3 }
0x1147   :  { %5689 = vmatprep.subr.bf16.mxu0 %v5947_v5 }
0x1149   :  { %5674 = vmatmul.mubr.msk.bf16.vlgmr.msra.gmra.mrb[96].mxu1 %vm1192_vm9, %v3493_v8  ;;  %5680 = vmatmul.mubr.msk.bf16.vlgmr.msra.gmra.mrb[60].mxu0 %vm1192_vm9, %v3494_v58 }
0x114a   :  { %5685 = vmatprep.mubr.msk.bf16.mxu1 %vm5948_vm3, %v5947_v5  ;;  %5691 = vmatprep.mubr.msk.bf16.mxu0 %vm5948_vm3, %v5947_v5 }
0x114b   :  { %5684 = vmatpush3.bf16.msra.mxu1 %v4254_v22  ;;  %5690 = vmatpush3.bf16.msra.mxu0 %v4376_v59 }
0x114c   :  { %5695 = vmatprep.subr.bf16.mxu1 %v5947_v5  ;;  %5701 = vmatprep.subr.bf16.mxu0 %v5947_v5 }
0x11cb   :  { %v3535_v61 = vpop.f32.mrb[84].mxu1 }
0x11cc   :  { %v5639_v18 = vpop.f32.mrb[85].mxu1  ;;  %v3878_v53 = vrot.slane %v3535_v61, %v6190_v30  ;;  %v3871_v6 = vcombine.high %v3535_v61, %v3535_v61 }
0x11cd   :  { %v3538_v63 = vpop.f32.mrb[86].mxu1 }
0x11ce   :  { %v5640_v0 = vpop.f32.mrb[87].mxu1  ;;  %v3886_v2 = vcombine.high %v3878_v53, %v3878_v53  ;;  %v3893_v9 = vrot.slane %v3878_v53, %v6190_v30  ;;  %v3885_v4 = vrot.slane %v3871_v6, %v6190_v30 }
0x11cf   :  { %v5220_v0 = vld [vmem:[%s7106_s9 + $0x18] sm:$0xf] }
0x11d0   :  { %v3907_v7 = vrot.slane %v3886_v2, %v6190_v30  ;;  %v3900_v15 = vrot.slane %v3885_v4, %v6190_v30 }
0x11d2   :  { %v4183_v52 = vcombine.low %v3893_v9, %v3907_v7  ;;  %v5270_v23 = vcombine.high %v3893_v9, %v3907_v7 }
0x11d4   :  { %v4193_v62 = vrot.slane %v4183_v52, %v6190_v30  ;;  %v4200_v17 = vrot.slane %v5270_v23, %v6190_v30 }
0x11d6   :  { %v4215_v29 = vcombine.low %v4193_v62, %v4200_v17 }
0x11d8   :  { %v4223_v45 = vrot.slane %v4215_v29, %v6190_v30 }
0x11db   :  { %v3581_v11 = vpop.f32.mrb[48].mxu0 }
0x11dc   :  { %v3910_v56 = vcombine.high %v3581_v11, %v3581_v11  ;;  %v3917_v13 = vrot.slane %v3581_v11, %v6190_v30  ;;  %v5645_v14 = vpop.f32.mrb[49].mxu0 }
0x11dd   :  { %v3584_v16 = vpop.f32.mrb[50].mxu0 }
0x11de   :  { %v3924_v1 = vrot.slane %v3910_v56, %v6190_v30  ;;  %v3925_v21 = vcombine.high %v3917_v13, %v3917_v13  ;;  %v3932_v24 = vrot.slane %v3917_v13, %v6190_v30  ;;  %v5646_v25 = vpop.f32.mrb[51].mxu0  ;;  %v4492_v16 = vsel %vm1955_vm10, %v5220_v0, 0 }
0x11e0   :  { %v3946_v26 = vrot.slane %v3925_v21, %v6190_v30  ;;  %v3947_v20 = vcombine.high %v3932_v24, %v3932_v24  ;;  %v4185_v27 = vcombine.low %v3900_v15, %v3932_v24  ;;  %v3939_v31 = vrot.slane %v3924_v1, %v6190_v30 }
0x11e2   :  { %v3948_v32 = vcombine.high %v3946_v26, %v3946_v26  ;;  %v4186_v33 = vcombine.low %v3946_v26, %v3947_v20  ;;  %v4207_v34 = vrot.slane %v4185_v27, %v6190_v30  ;;  %v5221_v20 = vld [vmem:[%s7106_s9 + $0x1c] sm:$0xf] }
0x11e3   :  { %v3627_v36 = vpop.f32.mrb[88].mxu1  ;;  %v3673_v35 = vpop.f32.mrb[52].mxu0 }
0x11e4   :  { %v4214_v37 = vrot.slane %v4186_v33, %v6190_v30  ;;  %v4232_v28 = vcombine.low %v3948_v32, %v3939_v31  ;;  %v3949_v38 = vcombine.high %v3627_v36, %v3627_v36  ;;  %v3956_v39 = vrot.slane %v3627_v36, %v6190_v30  ;;  %v5651_v41 = vpop.f32.mrb[89].mxu1  ;;  %v5657_v40 = vpop.f32.mrb[53].mxu0 }
0x11e5   :  { %v3988_v42 = vcombine.high %v3673_v35, %v3673_v35  ;;  %v3995_v43 = vrot.slane %v3673_v35, %v6190_v30  ;;  %v3630_v44 = vpop.f32.mrb[90].mxu1  ;;  %v3676_v19 = vpop.f32.mrb[54].mxu0  ;;  %v4608_v32 = vsel %vm1955_vm10, %v5221_v20, 0 }
0x11e6   :  { %v4216_v46 = vcombine.low %v4207_v34, %v4214_v37  ;;  %v3963_v47 = vrot.slane %v3949_v38, %v6190_v30  ;;  %v3964_v48 = vcombine.high %v3956_v39, %v3956_v39  ;;  %v5652_v50 = vpop.f32.mrb[91].mxu1  ;;  %v5658_v51 = vpop.f32.mrb[55].mxu0  ;;  %v4239_v54 = vrot.slane %v4232_v28, %v6190_v30 }
0x11e7   :  { %v4002_v55 = vrot.slane %v3988_v42, %v6190_v30  ;;  %v4003_v57 = vcombine.high %v3995_v43, %v3995_v43  ;;  %v4010_v3 = vrot.slane %v3995_v43, %v6190_v30  ;;  %v3971_v58 = vrot.slane %v3956_v39, %v6190_v30 }
0x11e8   :  { %v4230_v8 = vrot.slane %v4216_v46, %v6190_v30  ;;  %v3978_v49 = vrot.slane %v3963_v47, %v6190_v30  ;;  %v3985_v22 = vrot.slane %v3964_v48, %v6190_v30  ;;  %v4246_v2 = vrot.slane %v4239_v54, %v6190_v30 }
0x11e9   :  { %v4024_v60 = vrot.slane %v4003_v57, %v6190_v30  ;;  %v4025_v59 = vcombine.high %v4010_v3, %v4010_v3  ;;  %v4017_v6 = vrot.slane %v4002_v55, %v6190_v30 }
0x11ea   :  { %v4231_v61 = vcombine.low %v4223_v45, %v4230_v8  ;;  %v4305_v18 = vcombine.low %v3971_v58, %v3985_v22  ;;  %v5273_v53 = vcombine.high %v3971_v58, %v3985_v22  ;;  %v4307_v63 = vcombine.low %v3978_v49, %v4010_v3 }
0x11eb   :  { %v4026_v7 = vcombine.high %v4024_v60, %v4024_v60  ;;  %v4308_v9 = vcombine.low %v4024_v60, %v4025_v59  ;;  %v3765_v4 = vpop.f32.mrb[56].mxu0 }
0x11ec   :  { %v4315_v52 = vrot.slane %v4305_v18, %v6190_v30  ;;  %v4322_v23 = vrot.slane %v5273_v53, %v6190_v30  ;;  %v4329_v11 = vrot.slane %v4307_v63, %v6190_v30  ;;  %v5669_v56 = vpop.f32.mrb[57].mxu0  ;;  %v4249_v62 = vpack.c.bf16 %v4246_v2, %v4231_v61 }
0x11ed   :  { %v4336_v13 = vrot.slane %v4308_v9, %v6190_v30  ;;  %v4354_v14 = vcombine.low %v4026_v7, %v4017_v6  ;;  %v3768_v15 = vpop.f32.mrb[58].mxu0  ;;  %v4073_v33 = vrot.slane %v3765_v4, %v6190_v30  ;;  %v4066_v35 = vcombine.high %v3765_v4, %v3765_v4 }
0x11ee   :  { %v4337_v17 = vcombine.low %v4315_v52, %v4322_v23  ;;  %v5670_v1 = vpop.f32.mrb[59].mxu0  ;;  %5686 = vmatmul.mubr.msk.bf16.vlgmr.msra.gmra.mrb[100].mxu1 %vm718_vm5, %v4249_v62 }
0x11ef   :  { %v4338_v21 = vcombine.low %v4329_v11, %v4336_v13  ;;  %v4361_v24 = vrot.slane %v4354_v14, %v6190_v30  ;;  %5696 = vmatpush3.bf16.msra.mxu1 %v4492_v16  ;;  %5697 = vmatprep.mubr.msk.bf16.mxu1 %vm5948_vm3, %v5947_v5  ;;  %v4081_v34 = vcombine.high %v4073_v33, %v4073_v33 }
0x11f0   :  { %v4345_v25 = vrot.slane %v4337_v17, %v6190_v30  ;;  %5707 = vmatprep.subr.bf16.mxu1 %v5947_v5  ;;  %v4088_v36 = vrot.slane %v4073_v33, %v6190_v30  ;;  %v4080_v39 = vrot.slane %v4066_v35, %v6190_v30 }
0x11f1   :  { %v4352_v26 = vrot.slane %v4338_v21, %v6190_v30  ;;  %v4368_v29 = vrot.slane %v4361_v24, %v6190_v30  ;;  %v4102_v37 = vrot.slane %v4081_v34, %v6190_v30 }
0x11f2   :  { %v4103_v28 = vcombine.high %v4088_v36, %v4088_v36  ;;  %v4095_v48 = vrot.slane %v4080_v39, %v6190_v30 }
0x11f3   :  { %v4353_v27 = vcombine.low %v4345_v25, %v4352_v26  ;;  %v4104_v44 = vcombine.high %v4102_v37, %v4102_v37 }
0x11f4   :  { %v4424_v47 = vcombine.low %v4102_v37, %v4103_v28 }
0x11f5   :  { %v4371_v31 = vpack.c.bf16 %v4368_v29, %v4353_v27  ;;  %v4470_v55 = vcombine.low %v4104_v44, %v4095_v48 }
0x11f6   :  { %v4452_v58 = vrot.slane %v4424_v47, %v6190_v30 }
0x11f7   :  { %5692 = vmatmul.mubr.msk.bf16.vlgmr.msra.gmra.mrb[64].mxu0 %vm718_vm5, %v4371_v31  ;;  %v4477_v4 = vrot.slane %v4470_v55, %v6190_v30 }
0x11f8   :  { %5702 = vmatpush3.bf16.msra.mxu0 %v4608_v32  ;;  %5703 = vmatprep.mubr.msk.bf16.mxu0 %vm5948_vm3, %v5947_v5 }
0x11f9   :  { %5715 = vmatprep.subr.bf16.mxu0 %v5947_v5  ;;  %v4484_v20 = vrot.slane %v4477_v4, %v6190_v30 }
0x1214   :  { %v3719_v38 = vpop.f32.mrb[92].mxu1 }
0x1215   :  { %v4027_v41 = vcombine.high %v3719_v38, %v3719_v38  ;;  %v4034_v40 = vrot.slane %v3719_v38, %v6190_v30  ;;  %v5663_v42 = vpop.f32.mrb[93].mxu1 }
0x1216   :  { %v3722_v43 = vpop.f32.mrb[94].mxu1 }
0x1217   :  { %v4041_v19 = vrot.slane %v4027_v41, %v6190_v30  ;;  %v4042_v45 = vcombine.high %v4034_v40, %v4034_v40  ;;  %v5664_v46 = vpop.f32.mrb[95].mxu1  ;;  %v4049_v50 = vrot.slane %v4034_v40, %v6190_v30 }
0x1219   :  { %v4056_v51 = vrot.slane %v4041_v19, %v6190_v30  ;;  %v4063_v54 = vrot.slane %v4042_v45, %v6190_v30 }
0x121b   :  { %v4421_v57 = vcombine.low %v4049_v50, %v4063_v54  ;;  %v5275_v3 = vcombine.high %v4049_v50, %v4063_v54  ;;  %v4423_v8 = vcombine.low %v4056_v51, %v4088_v36 }
0x121c   :  { %v3811_v49 = vpop.f32.mrb[96].mxu1  ;;  %v3857_v22 = vpop.f32.mrb[60].mxu0 }
0x121d   :  { %v4431_v60 = vrot.slane %v4421_v57, %v6190_v30  ;;  %v4438_v59 = vrot.slane %v5275_v3, %v6190_v30  ;;  %v4445_v61 = vrot.slane %v4423_v8, %v6190_v30  ;;  %v4105_v18 = vcombine.high %v3811_v49, %v3811_v49  ;;  %v5675_v53 = vpop.f32.mrb[97].mxu1  ;;  %v5681_v63 = vpop.f32.mrb[61].mxu0  ;;  %v5272_v57 = vld [vmem:[%s7107_s10 + $0x1] ss:$0 sm:$0xff] }
0x121e   :  { %v4112_v0 = vrot.slane %v3811_v49, %v6190_v30  ;;  %v4144_v2 = vcombine.high %v3857_v22, %v3857_v22  ;;  %v4151_v6 = vrot.slane %v3857_v22, %v6190_v30  ;;  %v3814_v7 = vpop.f32.mrb[98].mxu1  ;;  %v3860_v9 = vpop.f32.mrb[62].mxu0 }
0x121f   :  { %v4453_v52 = vcombine.low %v4431_v60, %v4438_v59  ;;  %v4454_v23 = vcombine.low %v4445_v61, %v4452_v58  ;;  %v4119_v11 = vrot.slane %v4105_v18, %v6190_v30  ;;  %v5676_v56 = vpop.f32.mrb[99].mxu1  ;;  %v5682_v13 = vpop.f32.mrb[63].mxu0 }
0x1220   :  { %v4120_v14 = vcombine.high %v4112_v0, %v4112_v0  ;;  %v4158_v15 = vrot.slane %v4144_v2, %v6190_v30  ;;  %v4159_v62 = vcombine.high %v4151_v6, %v4151_v6  ;;  %v4166_v21 = vrot.slane %v4151_v6, %v6190_v30 }
0x1221   :  { %v4461_v16 = vrot.slane %v4453_v52, %v6190_v30  ;;  %v4468_v17 = vrot.slane %v4454_v23, %v6190_v30  ;;  %v4134_v1 = vrot.slane %v4119_v11, %v6190_v30  ;;  %v4127_v24 = vrot.slane %v4112_v0, %v6190_v30 }
0x1222   :  { %v4141_v25 = vrot.slane %v4120_v14, %v6190_v30  ;;  %v4180_v26 = vrot.slane %v4159_v62, %v6190_v30  ;;  %v4181_v29 = vcombine.high %v4166_v21, %v4166_v21  ;;  %v4173_v34 = vrot.slane %v4158_v15, %v6190_v30 }
0x1223   :  { %v4469_v27 = vcombine.low %v4461_v16, %v4468_v17  ;;  %v4539_v31 = vcombine.low %v4134_v1, %v4166_v21 }
0x1224   :  { %v4537_v32 = vcombine.low %v4127_v24, %v4141_v25  ;;  %v5277_v33 = vcombine.high %v4127_v24, %v4141_v25  ;;  %v4182_v36 = vcombine.high %v4180_v26, %v4180_v26  ;;  %v4540_v35 = vcombine.low %v4180_v26, %v4181_v29  ;;  %v5806_v26 = vld [vmem:[%s7110_s13 + $0x10] sm:$0xff]  }
0x1225   :  { %v4561_v37 = vrot.slane %v4539_v31, %v6190_v30  ;;  %v4487_v28 = vpack.c.bf16 %v4484_v20, %v4469_v27  ;;  %v5807_v20 = vld [vmem:[%s7110_s13 + $0x18] sm:$0xff]  }
0x1226   :  { %v4547_v38 = vrot.slane %v4537_v32, %v6190_v30  ;;  %v4554_v39 = vrot.slane %v5277_v33, %v6190_v30  ;;  %v4586_v41 = vcombine.low %v4182_v36, %v4173_v34  ;;  %v4568_v40 = vrot.slane %v4540_v35, %v6190_v30 }
0x1227   :  { %5698 = vmatmul.mubr.msk.bf16.vlgmr.msra.gmra.mrb[104].mxu1 %vm718_vm5, %v4487_v28 }
0x1228   :  { %v4569_v42 = vcombine.low %v4547_v38, %v4554_v39  ;;  %5711 = vmatprep.mubr.msk.bf16.mxu1 %vm5948_vm3, %v5947_v5  ;;  %v4570_v43 = vcombine.low %v4561_v37, %v4568_v40  ;;  %v4593_v44 = vrot.slane %v4586_v41, %v6190_v30  ;;  %5708 = vmatpush3.bf16.msra.mxu1 %v5806_v26  ;;  %v5279_v37 = vld [vmem:[%s7108_s11 + $0x1] ss:$0 sm:$0xff] }
0x1229   :  { %5709 = vmatprep.subr.bf16.mxu1 %v5947_v5  ;;  %v5280_v41 = vld [vmem:[%s7109_s12 + $0x1] ss:$0 sm:$0xff]  ;;  %s5964_s12 = smov [#allocation4]  }
0x122a   :  { %v4577_v19 = vrot.slane %v4569_v42, %v6190_v30  ;;  %v4584_v45 = vrot.slane %v4570_v43, %v6190_v30  ;;  %v4600_v47 = vrot.slane %v4593_v44, %v6190_v30  ;;  %s5139_s30 = sshll.u32 %s5964_s12, 4  ;;  %s5140_s30 = int_to_ptr.vmem [resolvable:$true] %s5139_s30 }
0x122b   :  { %p5927_p1 = scmp.lt.s32.totalorder %s5140_s30, %s5140_s30 }
0x122c   :  { %v4585_v46 = vcombine.low %v4577_v19, %v4584_v45  ;;  %5710 = vmatpush3.bf16.msra.mxu1 %v5807_v20  ;;  %v5808_v19 = vld [vmem:[%s7112_s15 + $0x40] sm:$0xff]   ;;  %v5809_v45 = vld [vmem:[%s7112_s15 + $0x48] sm:$0xff]  }
0x122e   :  { %v4603_v48 = vpack.c.bf16 %v4600_v47, %v4585_v46  ;;  %v5810_v46 = vld [vmem:[%s7112_s15 + $0x50] sm:$0xff]   ;;  %v5811_v47 = vld [vmem:[%s7112_s15 + $0x58] sm:$0xff]  }
0x1230   :  { %5704 = vmatmul.mubr.msk.bf16.vlgmr.msra.gmra.mrb[68].mxu0 %vm718_vm5, %v4603_v48  ;;  %v5812_v48 = vld [vmem:[%s7112_s15 + $0x60] sm:$0xff]  }
0x1231   :  { %5731 = vmatprep.mubr.msk.bf16.mxu0 %vm5948_vm3, %v5947_v5  ;;  %5716 = vmatpush3.bf16.msra.mxu0 %v5808_v19 }
0x1232   :  { %5717 = vmatprep.subr.bf16.mxu0 %v5947_v5 }
0x1235   :  { %5718 = vmatpush3.bf16.msra.mxu0 %v5809_v45 }
0x1236   :  { %5719 = vmatprep.subr.bf16.mxu0 %v5947_v5 }
0x1239   :  { %5720 = vmatpush3.bf16.msra.mxu0 %v5810_v46 }
0x123a   :  { %5721 = vmatprep.subr.bf16.mxu0 %v5947_v5 }
0x123d   :  { %5722 = vmatpush3.bf16.msra.mxu0 %v5811_v47  ;;  %v5050_v47 = vld [vmem:[%s7118_s21] sm:$0x7]  ;;  %s5922_s21 = scalar_lea.vmem %s5140_s30, 32 }
0x123e   :  { %5723 = vmatprep.subr.bf16.mxu0 %v5947_v5  ;;  %p5923_p0 = scmp.ne.s32.totalorder %s5140_s30, %s5922_s21  ;;  %p5928_p2 = scmp.lt.s32.totalorder %s5922_s21, %s5922_s21 }
0x1240   :  { %p5929_p3 = por %p5928_p2, %p5927_p1 }
0x1241   :  { %5724 = vmatpush3.bf16.msra.mxu0 %v5812_v48  ;;  %v5127_v48 = vld [vmem:[#allocation3] sm:$0x1] }
0x1242   :  { %5725 = vmatprep.subr.bf16.mxu0 %v5947_v5  ;;  %5759 = vpush %v5127_v48  ;;  %p5930_p4 = pnand %p5929_p3, %p5923_p0 }
0x12c1   :  { %v4290_v50 = vpop.f32.mrb[100].mxu1 }
0x12c2   :  { %v5687_v51 = vpop.f32.mrb[101].mxu1  ;;  %v4303_v3 = vadd.f32 %v5272_v57, %v4290_v50  ;;  %v5813_v50 = vld [vmem:[%s7112_s15 + $0x68] sm:$0xff]  }
0x12c3   :  { %v4293_v54 = vpop.f32.mrb[102].mxu1  ;;  %5726 = vmatpush3.bf16.msra.mxu0 %v5813_v50  ;;  %v5814_v51 = vld [vmem:[%s7112_s15 + $0x70] sm:$0xff]  }
0x12c4   :  { %v5688_v55 = vpop.f32.mrb[103].mxu1  ;;  %v4304_v58 = vadd.f32 %v5272_v57, %v4293_v54  ;;  %5727 = vmatprep.subr.bf16.mxu0 %v5947_v5  ;;  %v5815_v54 = vld [vmem:[%s7112_s15 + $0x78] sm:$0xff]  }
0x12c5   :  { %v5281_v55 = vld [vmem:[%s7111_s14 + $0x1] ss:$0 sm:$0xff] }
0x12c7   :  { %5728 = vmatpush3.bf16.msra.mxu0 %v5814_v51 }
0x12c8   :  { %5729 = vmatprep.subr.bf16.mxu0 %v5947_v5 }
0x12ca   :  { %v4412_v8 = vpop.f32.mrb[64].mxu0 }
0x12cb   :  { %v4419_v49 = vadd.f32 %v4412_v8, %v4303_v3  ;;  %v5693_v22 = vpop.f32.mrb[65].mxu0  ;;  %5730 = vmatpush3.bf16.msra.mxu0 %v5815_v54 }
0x12cc   :  { %v4415_v30 = vpop.f32.mrb[66].mxu0 }
0x12cd   :  { %v4420_v60 = vadd.f32 %v4415_v30, %v4304_v58  ;;  %v5694_v59 = vpop.f32.mrb[67].mxu0 }
0x12fa   :  { %v4528_v61 = vpop.f32.mrb[104].mxu1 }
0x12fb   :  { %v4535_v18 = vadd.f32 %v4528_v61, %v4419_v49  ;;  %v5699_v53 = vpop.f32.mrb[105].mxu1 }
0x12fc   :  { %v4531_v63 = vpop.f32.mrb[106].mxu1 }
0x12fd   :  { %v4536_v0 = vadd.f32 %v4531_v63, %v4420_v60  ;;  %v5700_v2 = vpop.f32.mrb[107].mxu1 }
0x1303   :  { %v4644_v6 = vpop.f32.mrb[68].mxu0 }
0x1304   :  { %v4651_v7 = vadd.f32 %v4644_v6, %v4535_v18  ;;  %v5705_v9 = vpop.f32.mrb[69].mxu0 }
0x1305   :  { %v4647_v4 = vpop.f32.mrb[70].mxu0 }
0x1306   :  { %v6985_v52 = vadd.f32 %v4651_v7, %v6615_v10  ;;  %v4652_v23 = vadd.f32 %v4647_v4, %v4536_v0  ;;  %v5706_v11 = vpop.f32.mrb[71].mxu0 }
0x1308   :  { %v6988_v56 = vadd.f32 %v4652_v23, %v6618_v12  ;;  %v4655_v13 = vsel %vm229_vm1, %v6985_v52, 0.0  ;;  %v5962_v23 = vmov 0.0|0.0  }
0x1309   :  { %4656 = vadd.xlane.f32.xlu0 %v4655_v13  ;;  %5755 = vmatprep.subr.bf16.mxu1 %v5962_v23 }
0x130a   :  { %v4658_v14 = vsel %vm233_vm2, %v6988_v56, 0.0 }
0x130b   :  { %4659 = vadd.xlane.f32.xlu1 %v4658_v14 }
0x1396   :  { %v4657_v15 = vpop.xlane.xlu0 %4656 }
0x1397   :  { %v4661_v62 = vmul.f32 0.03125, %v4657_v15  ;;  %v5295_v15 = vld [vmem:[%s7113_s16 + $0x1] ss:$0 sm:$0xff] }
0x1398   :  { %v4660_v16 = vpop.xlane.xlu1 %4659 }
0x1399   :  { %v4663_v17 = vsub.f32 %v6985_v52, %v4661_v62  ;;  %v4662_v10 = vmul.f32 0.03125, %v4660_v16 }
0x139b   :  { %v4664_v1 = vsub.f32 %v6988_v56, %v4662_v10  ;;  %v4665_v21 = vmul.f32 %v4663_v17, %v4663_v17 }
0x139d   :  { %v4667_v12 = vsel %vm229_vm1, %v4665_v21, 0.0  ;;  %v4666_v24 = vmul.f32 %v4664_v1, %v4664_v1 }
0x139e   :  { %4668 = vadd.xlane.f32.xlu0 %v4667_v12 }
0x139f   :  { %v4670_v25 = vsel %vm233_vm2, %v4666_v24, 0.0 }
0x13a2   :  { %4671 = vadd.xlane.f32.xlu0 %v4670_v25 }
0x142b   :  { %v4669_v27 = vpop.xlane.xlu0 %4668 }
0x142c   :  { %v4673_v29 = vmul.f32 0.03125, %v4669_v27 }
0x142e   :  { %v4675_v31 = vadd.f32 1e-05, %v4673_v29 }
0x142f   :  { %v4672_v32 = vpop.xlane.xlu0 %4671 }
0x1430   :  { %5906 = vrsqrt.f32 %v4675_v31  ;;  %v4674_v33 = vmul.f32 0.03125, %v4672_v32  ;;  %v5816_v31 = vld [vmem:[%s7116_s19] sm:$0xff]   ;;  %v5817_v32 = vld [vmem:[%s7116_s19 + $0x8] sm:$0xff]  }
0x1432   :  { %v4676_v34 = vadd.f32 1e-05, %v4674_v33 }
0x1434   :  { %5908 = vrsqrt.f32 %v4676_v34 }
0x143a   :  { %v5907_v36 = vpop.eup %5906 }
0x143b   :  { %v4679_v35 = vmul.f32 %v5907_v36, %v4663_v17 }
0x143d   :  { %v4687_v38 = vmul.f32 %v5279_v37, %v4679_v35 }
0x143e   :  { %v5909_v28 = vpop.eup %5908 }
0x143f   :  { %v4680_v39 = vmul.f32 %v5909_v28, %v4664_v1  ;;  %v4695_v42 = vadd.f32 %v5280_v41, %v4687_v38  ;;  %v5299_v38 = vld [vmem:[%s7115_s18] ss:$0 sm:$0xff]  ;;  %s5760_s18 = spop %5759 }
0x1441   :  { %v4688_v40 = vmul.f32 %v5279_v37, %v4680_v39  ;;  %v5298_v37 = vld [vmem:[%s7114_s17] ss:$0 sm:$0xff] }
0x1443   :  { %v4696_v43 = vadd.f32 %v5280_v41, %v4688_v40 }
0x1445   :  { %v4697_v44 = vpack.c.bf16 %v4696_v43, %v4695_v42 }
0x1447   :  { %5712 = vmatmul.mubr.msk.bf16.vlgmr.msra.gmra.mrb[108].mxu1 %vm229_vm1, %v4697_v44 }
0x1448   :  { %5739 = vmatprep.mubr.msk.f32.mxu1 %vm5948_vm3, %v5947_v5 }
0x151a   :  { %v4753_v57 = vpop.f32.mrb[108].mxu1 }
0x151b   :  { %v4754_v3 = vadd.f32 %v5281_v55, %v4753_v57  ;;  %v5713_v8 = vpop.f32.mrb[109].mxu1 }
0x151c   :  { %v4756_v58 = vpop.f32.mrb[110].mxu1 }
0x151d   :  { %v5285_v49 = vmul.f32 -1.702, %v4754_v3  ;;  %v4757_v22 = vadd.f32 %v5281_v55, %v4756_v58  ;;  %v5714_v30 = vpop.f32.mrb[111].mxu1  ;;  %v5129_v55 = vstv %s5760_s18 }
0x151f   :  { %v4764_v60 = vmul.f32 1.442695, %v5285_v49  ;;  %v5286_v59 = vmul.f32 -1.702, %v4757_v22 }
0x1521   :  { %5910 = vpow2.f32 %v4764_v60  ;;  %v4766_v61 = vmul.f32 1.442695, %v5286_v59 }
0x1523   :  { %5912 = vpow2.f32 %v4766_v61 }
0x152b   :  { %v5911_v18 = vpop.eup %5910 }
0x152c   :  { %v4768_v53 = vadd.f32 1.0, %v5911_v18 }
0x152d   :  { %v5913_v63 = vpop.eup %5912 }
0x152e   :  { %5914 = vrcp.f32 %v4768_v53  ;;  %v4769_v0 = vadd.f32 1.0, %v5913_v63 }
0x1530   :  { %5916 = vrcp.f32 %v4769_v0 }
0x1538   :  { %v5915_v2 = vpop.eup %5914 }
0x1539   :  { %v4774_v7 = vmul.f32 %v5915_v2, %v4754_v3 }
0x153a   :  { %v5917_v6 = vpop.eup %5916 }
0x153b   :  { %v4775_v9 = vmul.f32 %v5917_v6, %v4757_v22 }
0x153d   :  { %v4776_v4 = vpack.c.bf16 %v4775_v9, %v4774_v7 }
0x153f   :  { %5732 = vmatmul.mubr.bf16.vlgmr.msra.gmra.mrb[72].mxu0 %v4776_v4 }
0x1612   :  { %v4859_v11 = vpop.f32.mrb[72].mxu0 }
0x1613   :  { %v4866_v13 = vadd.f32 %v4859_v11, %v6985_v52  ;;  %v5733_v14 = vpop.f32.mrb[73].mxu0  ;;  %v4876_v52 = vld [vmem:[%s7117_s20] sm:$0x3] }
0x1614   :  { %v4862_v62 = vpop.f32.mrb[74].mxu0 }
0x1615   :  { %v4867_v16 = vadd.f32 %v4862_v62, %v6988_v56  ;;  %v5734_v17 = vpop.f32.mrb[75].mxu0  ;;  %v4874_v10 = vadd.f32 %v5295_v15, %v4866_v13 }
0x1617   :  { %v4875_v1 = vadd.f32 %v5295_v15, %v4867_v16 }
0x1619   :  { %v5756_v21 = vpack.c.bf16 %v4875_v1, %v4874_v10 }
0x161b   :  { %5758 = vmatpush3.bf16.msk.msra.mxu1 %vm5757_vm12, %v5756_v21 }
0x161c   :  { %5742 = vmatprep.subr.bf16.mxu1 %v5947_v5 }
0x161e   :  { %5740 = vmatmul.mubr.msk.f32.vlgmr.msra.gmra.mrb[112].mxu1 %vm4877_vm13, %v4876_v52 }
0x161f   :  { %5746 = vmatprep.mubr.msk.bf16.mxu1 %vm5948_vm3, %v5947_v5  ;;  %5743 = vmatpush3.bf16.msra.mxu1 %v5816_v31 }
0x1620   :  { %5744 = vmatprep.subr.bf16.mxu1 %v5947_v5 }
0x1623   :  { %5745 = vmatpush3.bf16.msra.mxu1 %v5817_v32 }
0x1624   :  { %5750 = vmatprep.subr.mxu1 %v5947_v5 }
0x16f1   :  { %v4950_v56 = vpop.f32.mrb[112].mxu1 }
0x16f2   :  { %v4956_v12 = vsel %vm233_vm2, %v4950_v56, 0.0  ;;  %v5741_v24 = vpop.f32.mrb[113].mxu1 }
0x16f3   :  { %4957 = vadd.xlane.f32.xlu0 %v4956_v12 }
0x1780   :  { %v4958_v25 = vpop.xlane.xlu0 %4957 }
0x1781   :  { %v4959_v26 = vmul.f32 0.03125, %v4958_v25 }
0x1783   :  { %v4960_v20 = vsub.f32 %v4950_v56, %v4959_v26 }
0x1785   :  { %v4961_v27 = vmul.f32 %v4960_v20, %v4960_v20 }
0x1787   :  { %v4962_v29 = vsel %vm233_vm2, %v4961_v27, 0.0 }
0x1788   :  { %4963 = vadd.xlane.f32.xlu1 %v4962_v29 }
0x1815   :  { %v4964_v33 = vpop.xlane.xlu1 %4963 }
0x1816   :  { %v4965_v34 = vmul.f32 0.03125, %v4964_v33 }
0x1818   :  { %v4966_v36 = vadd.f32 1e-05, %v4965_v34 }
0x181a   :  { %5918 = vrsqrt.f32 %v4966_v36 }
0x1824   :  { %v5919_v35 = vpop.eup %5918 }
0x1825   :  { %v4968_v28 = vmul.f32 %v5919_v35, %v4960_v20 }
0x1827   :  { %v4975_v39 = vmul.f32 %v5298_v37, %v4968_v28 }
0x1829   :  { %v4982_v41 = vadd.f32 %v5299_v38, %v4975_v39 }
0x182b   :  { %v4983_v40 = vpack.c.bf16 %v4982_v41, %v4982_v41 }
0x182d   :  { %5747 = vmatmul.mubr.msk.bf16.vlgmr.msra.gmra.mrb[116].mxu1 %vm229_vm1, %v4983_v40 }
0x182e   :  { %5752 = vmatprep.mubr.msk.f32.mxu1 %vm5948_vm3, %v5947_v5  ;;  %5751 = vmatpush3.xpose.msk.msra.mxu1 %vm229_vm1, %v5050_v47 }
0x1900   :  { %v5037_v42 = vpop.f32.mrb[116].mxu1 }
0x1901   :  { %v5043_v43 = vmul.f32 %v5037_v42, %v5037_v42  ;;  %v5748_v44 = vpop.f32.mrb[117].mxu1 }
0x1902   :  { %v5040_v19 = vpop.f32.mrb[118].mxu1 }
0x1903   :  { %v5749_v45 = vpop.f32.mrb[119].mxu1  ;;  %v5044_v46 = vsel %vm233_vm2, %v5043_v43, 0.0 }
0x1904   :  { %5045 = vadd.xlane.f32.xlu0 %v5044_v46 }
0x1991   :  { %v5046_v50 = vpop.xlane.xlu0 %5045 }
0x1992   :  { %v5047_v51 = vadd.f32 1e-12, %v5046_v50 }
0x1994   :  { %5920 = vrsqrt.f32 %v5047_v51 }
0x199e   :  { %v5921_v5 = vpop.eup %5920 }
0x199f   :  { %v5049_v54 = vmul.f32 %v5921_v5, %v5037_v42 }
0x19a1   :  { %5753 = vmatmul.mubr.msk.f32.vlgmr.msra.gmra.mrb[114].mxu1 %vm229_vm1, %v5049_v54 }
0x1a74   :  { %v5123_v57 = vpop.f32.mrb[114].mxu1 }
0x1a75   :  { %v5130_v3 = vmul.f32 %v5129_v55, %v5123_v57  ;;  %v5754_v8 = vpop.f32.mrb[115].mxu1 }
0x1a77   :  { %5132 = vst.msk [vmem:[#allocation4] sm:$0x3] %vm5131_vm14, %v5130_v3 }
0x1a78   :  { %5933 = shalt.err (!%p5930_p4)
}
0x1a79   :  { %s5934_s6 = scalar_lea.hbm %s7120_s23, 32 }
0x1a7a   :  { %p5935_p5 = scmp.ne.s32.totalorder %s7120_s23, %s5934_s6  ;;  %p5938_p6 = scmp.lt.u32.totalorder %s5934_s6, %s7120_s23 }
0x1a7c   :  { %p5940_p7 = pnand %p5938_p6, %p5935_p5 }
0x1a7e   :  { %5943 = shalt.err (!%p5940_p7)
}
0x1a7f   :  { %5142 = dma.vmem_to_hbm [thread:$0]  %s5140_s30, 32, %s7120_s23, [#allocation5]  }
0x1a80   :  { %5944 = dma.done.wait [#allocation5], 32  }
0x1a81   :  { %5945 = vsyncadd [#allocation5], 4294967264 }
0x1a82   :  { %5146 = vsyncpa [#allocation5], 1 }

</bundles_post_ra>
